<compile_context>
chip_gen: v7x
topology: tpu7x:2x2x1
jax: 0.10.0
libtpu: 0.0.40
codegen_flags: <defaults>
</compile_context>

<pallas_src>
import functools
import math

import jax
import jax.numpy as jnp
from jax.experimental import pallas as pl
from jax.experimental.pallas import tpu as pltpu


def _resblock_kernel(x_ref, w1_ref, b1_ref, w2_ref, b2_ref, o_ref,
                     pbuf_ref, col_ref, *, res_scale):
    # x_ref  : (1, H, W, Cp) f32   input block (also the identity branch)
    # w*_ref : (9*Cp, Cp)    bf16  im2col weights, tap-major (tap = 3*dy + dx)
    # b*_ref : (1, Cp)       f32
    # o_ref  : (1, H, W, Cp) f32
    # pbuf   : (H+2, W+2, Cp) bf16 zero-bordered padded activation buffer
    # col    : (H, W, 9*Cp)   bf16 im2col staging buffer
    _, H, W, Cp = x_ref.shape

    # Keep the 1-px border of the padded buffer at zero.  Border-only stores
    # (~2*(H+W)/(H*W) of a full clear).  Done every step (not under
    # pl.when(program_id==0)) so it stays correct when the "parallel" batch
    # axis is sharded across TensorCores on v7x (each core has its own scratch).
    zrow = jnp.zeros((1, W + 2, Cp), jnp.bfloat16)
    zcol = jnp.zeros((H + 2, 1, Cp), jnp.bfloat16)
    pbuf_ref[0:1, :, :] = zrow
    pbuf_ref[H + 1:H + 2, :, :] = zrow
    pbuf_ref[:, 0:1, :] = zcol
    pbuf_ref[:, W + 1:W + 2, :] = zcol

    def conv3x3(w_ref, b_ref):
        # Stage the 9 shifted taps into 128-lane-aligned slots of the im2col
        # buffer, then contract in a single MXU matmul with f32 accumulation.
        for dy in range(3):
            for dx in range(3):
                t = 3 * dy + dx
                col_ref[:, :, t * Cp:(t + 1) * Cp] = \
                    pbuf_ref[dy:dy + H, dx:dx + W, :]
        acc = jax.lax.dot_general(
            col_ref[...], w_ref[...], (((2,), (0,)), ((), ())),
            preferred_element_type=jnp.float32)          # (H, W, Cp) f32
        return acc + b_ref[0][None, None, :]

    # conv1 + ReLU: write x into the interior (in-kernel "same" padding),
    # conv, write the ReLU'd result back into the SAME padded buffer (reused
    # for conv2's padding -> no second padded scratch, no full clear).
    pbuf_ref[1:H + 1, 1:W + 1, :] = x_ref[0].astype(jnp.bfloat16)
    h1 = jnp.maximum(conv3x3(w1_ref, b1_ref), 0.0)
    pbuf_ref[1:H + 1, 1:W + 1, :] = h1.astype(jnp.bfloat16)

    # conv2 + residual (identity read in f32 from the single input block).
    h2 = conv3x3(w2_ref, b2_ref)
    o_ref[0] = (x_ref[0] + h2 * res_scale).astype(o_ref.dtype)


def residual_block_no_bn(x_nchw, w1, b1, w2, b2, res_scale=1.0):
    """x_nchw: (N, C, H, W) f32; w*: (C, C, 3, 3) OIHW; b*: (C,)."""
    N, C, H, W = x_nchw.shape
    Cp = 128 * pl.cdiv(C, 128)       # lane-dense channel padding

    # NCHW -> NHWC, zero-pad channels to Cp.  Kept f32 so the identity add is
    # exact; conv operands are cast to bf16 inside the kernel.
    # TODO(synk): if the surrounding model is NHWC end-to-end, drop these
    # transposes (each is an extra HBM pass outside the kernel).
    x = jnp.transpose(x_nchw, (0, 2, 3, 1))
    if Cp != C:
        x = jnp.pad(x, ((0, 0), (0, 0), (0, 0), (0, Cp - C)))

    def prep_w(w):
        # OIHW -> (kh, kw, Cin, Cout) -> pad channels -> (9*Cp, Cp) bf16
        wt = jnp.transpose(w, (2, 3, 1, 0))
        wt = jnp.pad(wt, ((0, 0), (0, 0), (0, Cp - C), (0, Cp - C)))
        return wt.reshape(9 * Cp, Cp).astype(jnp.bfloat16)

    def prep_b(b):
        return jnp.pad(b, (0, Cp - C)).reshape(1, Cp).astype(jnp.float32)

    w1m, w2m = prep_w(w1), prep_w(w2)
    b1m, b2m = prep_b(b1), prep_b(b2)

    # Explicit VMEM budget from the block sizes (double-buffered x/out blocks
    # + weights + the two scratch buffers), with headroom.
    blk_bytes = H * W * Cp * 4
    w_bytes = 2 * (9 * Cp * Cp * 2 + Cp * 4)
    scratch_bytes = (H + 2) * (W + 2) * Cp * 2 + H * W * 9 * Cp * 2
    vmem_limit = int(min(100 * 2**20,
                         max(2 * (2 * blk_bytes + w_bytes) + scratch_bytes,
                             16 * 2**20)))

    kernel = functools.partial(_resblock_kernel, res_scale=float(res_scale))
    out_nhwc = pl.pallas_call(
        kernel,
        out_shape=jax.ShapeDtypeStruct((N, H, W, Cp), x.dtype),
        grid_spec=pltpu.PrefetchScalarGridSpec(
            num_scalar_prefetch=0,
            grid=(N,),
            in_specs=[
                pl.BlockSpec((1, H, W, Cp), lambda n: (n, 0, 0, 0)),
                pl.BlockSpec((9 * Cp, Cp), lambda n: (0, 0)),
                pl.BlockSpec((1, Cp), lambda n: (0, 0)),
                pl.BlockSpec((9 * Cp, Cp), lambda n: (0, 0)),
                pl.BlockSpec((1, Cp), lambda n: (0, 0)),
            ],
            out_specs=pl.BlockSpec((1, H, W, Cp), lambda n: (n, 0, 0, 0)),
            scratch_shapes=[
                pltpu.VMEM((H + 2, W + 2, Cp), jnp.bfloat16),   # padded act
                pltpu.VMEM((H, W, 9 * Cp), jnp.bfloat16),       # im2col
            ],
        ),
        compiler_params=pltpu.CompilerParams(
            dimension_semantics=("parallel",),
            vmem_limit_bytes=vmem_limit),
    )(x, w1m, b1m, w2m, b2m)

    # TODO(synk): for large feature maps (e.g. 64x256x256 SR trunks) add
    # halo'd row tiling (grid=(N, H//TH), manual DMA of a TH+4 row slab) so
    # blocks fit v7x's 64 MiB VMEM; whole-image blocks are right at these
    # small shapes (per-step overhead amortization).
    out = out_nhwc[..., :C]
    return jnp.transpose(out, (0, 3, 1, 2))                     # back to NCHW


def _kaiming_conv_weight(key, cout, cin, k, scale):
    # kaiming_normal_ (fan_in, a=0 -> gain = sqrt(2)), then * scale
    fan_in = cin * k * k
    std = math.sqrt(2.0 / fan_in)
    return (scale * std) * jax.random.normal(key, (cout, cin, k, k), jnp.float32)


def _ref_forward(x, w1, b1, w2, b2, res_scale):
    dn = ("NCHW", "OIHW", "NCHW")
    y = jax.lax.conv_general_dilated(x, w1, (1, 1), ((1, 1), (1, 1)),
                                     dimension_numbers=dn)
    y = jnp.maximum(y + b1[None, :, None, None], 0.0)
    y = jax.lax.conv_general_dilated(y, w2, (1, 1), ((1, 1), (1, 1)),
                                     dimension_numbers=dn)
    y = y + b2[None, :, None, None]
    return x + y * res_scale


if __name__ == "__main__":
    N, C, H, W = 2, 16, 16, 16           # num_feat = 16 (small synthetic config)
    res_scale = 1.0

    key = jax.random.PRNGKey(0)
    kx, k1, k2 = jax.random.split(key, 3)

    x = jax.random.normal(kx, (N, C, H, W), jnp.float32)
    # default_init_weights([conv1, conv2], scale=0.1): kaiming_normal * 0.1, bias = 0
    w1 = _kaiming_conv_weight(k1, C, C, 3, scale=0.1)
    b1 = jnp.zeros((C,), jnp.float32)
    w2 = _kaiming_conv_weight(k2, C, C, 3, scale=0.1)
    b2 = jnp.zeros((C,), jnp.float32)

    out = residual_block_no_bn(x, w1, b1, w2, b2, res_scale)
    out = jax.block_until_ready(out)

    ref = jax.block_until_ready(_ref_forward(x, w1, b1, w2, b2, res_scale))
    assert out.shape == (N, C, H, W)
    err = float(jnp.max(jnp.abs(out - ref)))
    # bf16 MXU operands with f32 accumulation -> small deviation vs f32 XLA conv.
    assert err < 5e-3, f"mismatch vs XLA conv reference: {err}"

    print("KERNEL_OK")
</pallas_src>

<mosaic_0001>
module attributes {stable_mosaic.version = 11 : i64} {
  func.func @_resblock_kernel(%arg0: i32, %arg1: memref<1x16x16x128xf32, #tpu.memory_space<vmem>>, %arg2: memref<1152x128xbf16, #tpu.memory_space<vmem>>, %arg3: memref<1x128xf32, #tpu.memory_space<vmem>>, %arg4: memref<1152x128xbf16, #tpu.memory_space<vmem>>, %arg5: memref<1x128xf32, #tpu.memory_space<vmem>>, %arg6: memref<1x16x16x128xf32, #tpu.memory_space<vmem>>, %arg7: memref<18x18x128xbf16, #tpu.memory_space<vmem>>, %arg8: memref<16x16x1152xbf16, #tpu.memory_space<vmem>>) attributes {dimension_semantics = [#tpu.dimension_semantics<parallel>], iteration_bounds = array<i64: 2>, scalar_prefetch = 0 : i64, scratch_operands = 2 : i64, tpu.core_type = #tpu.core_type<tc>, window_params = [{transform_indices = @transform_0, window_bounds = array<i64: 1, 16, 16, 128>}, {pipeline_mode = #tpu.pipeline_mode<synchronous>, transform_indices = @transform_1, window_bounds = array<i64: 1152, 128>}, {pipeline_mode = #tpu.pipeline_mode<synchronous>, transform_indices = @transform_2, window_bounds = array<i64: 1, 128>}, {pipeline_mode = #tpu.pipeline_mode<synchronous>, transform_indices = @transform_3, window_bounds = array<i64: 1152, 128>}, {pipeline_mode = #tpu.pipeline_mode<synchronous>, transform_indices = @transform_4, window_bounds = array<i64: 1, 128>}, {transform_indices = @transform_5, window_bounds = array<i64: 1, 16, 16, 128>}]} {
    %cst = arith.constant 0.000000e+00 : bf16
    %0 = vector.broadcast %cst : bf16 to vector<1x18x128xbf16>
    %cst_0 = arith.constant 0.000000e+00 : bf16
    %1 = vector.broadcast %cst_0 : bf16 to vector<18x1x128xbf16>
    %c0 = arith.constant 0 : index
    %c0_1 = arith.constant 0 : index
    %c0_2 = arith.constant 0 : index
    %2 = vector.load %arg7[%c0, %c0_1, %c0_2] : memref<18x18x128xbf16, #tpu.memory_space<vmem>>, vector<1x18x128xbf16>
    tpu.vector_store %arg7[%c0, %c0_1, %c0_2], %0 {strides = array<i32>} : memref<18x18x128xbf16, #tpu.memory_space<vmem>>, vector<1x18x128xbf16>,
    %c17 = arith.constant 17 : index
    %c0_3 = arith.constant 0 : index
    %c0_4 = arith.constant 0 : index
    %3 = vector.load %arg7[%c17, %c0_3, %c0_4] : memref<18x18x128xbf16, #tpu.memory_space<vmem>>, vector<1x18x128xbf16>
    tpu.vector_store %arg7[%c17, %c0_3, %c0_4], %0 {strides = array<i32>} : memref<18x18x128xbf16, #tpu.memory_space<vmem>>, vector<1x18x128xbf16>,
    %c0_5 = arith.constant 0 : index
    %c0_6 = arith.constant 0 : index
    %c0_7 = arith.constant 0 : index
    %4 = vector.load %arg7[%c0_5, %c0_6, %c0_7] : memref<18x18x128xbf16, #tpu.memory_space<vmem>>, vector<18x1x128xbf16>
    tpu.vector_store %arg7[%c0_5, %c0_6, %c0_7], %1 {strides = array<i32>} : memref<18x18x128xbf16, #tpu.memory_space<vmem>>, vector<18x1x128xbf16>,
    %c0_8 = arith.constant 0 : index
    %c17_9 = arith.constant 17 : index
    %c0_10 = arith.constant 0 : index
    %5 = vector.load %arg7[%c0_8, %c17_9, %c0_10] : memref<18x18x128xbf16, #tpu.memory_space<vmem>>, vector<18x1x128xbf16>
    tpu.vector_store %arg7[%c0_8, %c17_9, %c0_10], %1 {strides = array<i32>} : memref<18x18x128xbf16, #tpu.memory_space<vmem>>, vector<18x1x128xbf16>,
    %c0_11 = arith.constant 0 : index
    %c0_12 = arith.constant 0 : index
    %c0_13 = arith.constant 0 : index
    %c0_14 = arith.constant 0 : index
    %6 = vector.load %arg1[%c0_11, %c0_12, %c0_13, %c0_14] : memref<1x16x16x128xf32, #tpu.memory_space<vmem>>, vector<1x16x16x128xf32>
    %7 = vector.shape_cast %6 : vector<1x16x16x128xf32> to vector<16x16x128xf32>
    %8 = arith.truncf %7 : vector<16x16x128xf32> to vector<16x16x128xbf16>
    %c1 = arith.constant 1 : index
    %c1_15 = arith.constant 1 : index
    %c0_16 = arith.constant 0 : index
    %9 = vector.load %arg7[%c1, %c1_15, %c0_16] : memref<18x18x128xbf16, #tpu.memory_space<vmem>>, vector<16x16x128xbf16>
    tpu.vector_store %arg7[%c1, %c1_15, %c0_16], %8 {strides = array<i32>} : memref<18x18x128xbf16, #tpu.memory_space<vmem>>, vector<16x16x128xbf16>,
    %c0_17 = arith.constant 0 : index
    %c0_18 = arith.constant 0 : index
    %c0_19 = arith.constant 0 : index
    %10 = vector.load %arg7[%c0_17, %c0_18, %c0_19] : memref<18x18x128xbf16, #tpu.memory_space<vmem>>, vector<16x16x128xbf16>
    %c0_20 = arith.constant 0 : index
    %c0_21 = arith.constant 0 : index
    %c0_22 = arith.constant 0 : index
    %11 = vector.load %arg8[%c0_20, %c0_21, %c0_22] : memref<16x16x1152xbf16, #tpu.memory_space<vmem>>, vector<16x16x128xbf16>
    tpu.vector_store %arg8[%c0_20, %c0_21, %c0_22], %10 {strides = array<i32>} : memref<16x16x1152xbf16, #tpu.memory_space<vmem>>, vector<16x16x128xbf16>,
    %c0_23 = arith.constant 0 : index
    %c1_24 = arith.constant 1 : index
    %c0_25 = arith.constant 0 : index
    %12 = vector.load %arg7[%c0_23, %c1_24, %c0_25] : memref<18x18x128xbf16, #tpu.memory_space<vmem>>, vector<16x16x128xbf16>
    %c0_26 = arith.constant 0 : index
    %c0_27 = arith.constant 0 : index
    %c128 = arith.constant 128 : index
    %13 = vector.load %arg8[%c0_26, %c0_27, %c128] : memref<16x16x1152xbf16, #tpu.memory_space<vmem>>, vector<16x16x128xbf16>
    tpu.vector_store %arg8[%c0_26, %c0_27, %c128], %12 {strides = array<i32>} : memref<16x16x1152xbf16, #tpu.memory_space<vmem>>, vector<16x16x128xbf16>,
    %c0_28 = arith.constant 0 : index
    %c2 = arith.constant 2 : index
    %c0_29 = arith.constant 0 : index
    %14 = vector.load %arg7[%c0_28, %c2, %c0_29] : memref<18x18x128xbf16, #tpu.memory_space<vmem>>, vector<16x16x128xbf16>
    %c0_30 = arith.constant 0 : index
    %c0_31 = arith.constant 0 : index
    %c256 = arith.constant 256 : index
    %15 = vector.load %arg8[%c0_30, %c0_31, %c256] : memref<16x16x1152xbf16, #tpu.memory_space<vmem>>, vector<16x16x128xbf16>
    tpu.vector_store %arg8[%c0_30, %c0_31, %c256], %14 {strides = array<i32>} : memref<16x16x1152xbf16, #tpu.memory_space<vmem>>, vector<16x16x128xbf16>,
    %c1_32 = arith.constant 1 : index
    %c0_33 = arith.constant 0 : index
    %c0_34 = arith.constant 0 : index
    %16 = vector.load %arg7[%c1_32, %c0_33, %c0_34] : memref<18x18x128xbf16, #tpu.memory_space<vmem>>, vector<16x16x128xbf16>
    %c0_35 = arith.constant 0 : index
    %c0_36 = arith.constant 0 : index
    %c384 = arith.constant 384 : index
    %17 = vector.load %arg8[%c0_35, %c0_36, %c384] : memref<16x16x1152xbf16, #tpu.memory_space<vmem>>, vector<16x16x128xbf16>
    tpu.vector_store %arg8[%c0_35, %c0_36, %c384], %16 {strides = array<i32>} : memref<16x16x1152xbf16, #tpu.memory_space<vmem>>, vector<16x16x128xbf16>,
    %c1_37 = arith.constant 1 : index
    %c1_38 = arith.constant 1 : index
    %c0_39 = arith.constant 0 : index
    %18 = vector.load %arg7[%c1_37, %c1_38, %c0_39] : memref<18x18x128xbf16, #tpu.memory_space<vmem>>, vector<16x16x128xbf16>
    %c0_40 = arith.constant 0 : index
    %c0_41 = arith.constant 0 : index
    %c512 = arith.constant 512 : index
    %19 = vector.load %arg8[%c0_40, %c0_41, %c512] : memref<16x16x1152xbf16, #tpu.memory_space<vmem>>, vector<16x16x128xbf16>
    tpu.vector_store %arg8[%c0_40, %c0_41, %c512], %18 {strides = array<i32>} : memref<16x16x1152xbf16, #tpu.memory_space<vmem>>, vector<16x16x128xbf16>,
    %c1_42 = arith.constant 1 : index
    %c2_43 = arith.constant 2 : index
    %c0_44 = arith.constant 0 : index
    %20 = vector.load %arg7[%c1_42, %c2_43, %c0_44] : memref<18x18x128xbf16, #tpu.memory_space<vmem>>, vector<16x16x128xbf16>
    %c0_45 = arith.constant 0 : index
    %c0_46 = arith.constant 0 : index
    %c640 = arith.constant 640 : index
    %21 = vector.load %arg8[%c0_45, %c0_46, %c640] : memref<16x16x1152xbf16, #tpu.memory_space<vmem>>, vector<16x16x128xbf16>
    tpu.vector_store %arg8[%c0_45, %c0_46, %c640], %20 {strides = array<i32>} : memref<16x16x1152xbf16, #tpu.memory_space<vmem>>, vector<16x16x128xbf16>,
    %c2_47 = arith.constant 2 : index
    %c0_48 = arith.constant 0 : index
    %c0_49 = arith.constant 0 : index
    %22 = vector.load %arg7[%c2_47, %c0_48, %c0_49] : memref<18x18x128xbf16, #tpu.memory_space<vmem>>, vector<16x16x128xbf16>
    %c0_50 = arith.constant 0 : index
    %c0_51 = arith.constant 0 : index
    %c768 = arith.constant 768 : index
    %23 = vector.load %arg8[%c0_50, %c0_51, %c768] : memref<16x16x1152xbf16, #tpu.memory_space<vmem>>, vector<16x16x128xbf16>
    tpu.vector_store %arg8[%c0_50, %c0_51, %c768], %22 {strides = array<i32>} : memref<16x16x1152xbf16, #tpu.memory_space<vmem>>, vector<16x16x128xbf16>,
    %c2_52 = arith.constant 2 : index
    %c1_53 = arith.constant 1 : index
    %c0_54 = arith.constant 0 : index
    %24 = vector.load %arg7[%c2_52, %c1_53, %c0_54] : memref<18x18x128xbf16, #tpu.memory_space<vmem>>, vector<16x16x128xbf16>
    %c0_55 = arith.constant 0 : index
    %c0_56 = arith.constant 0 : index
    %c896 = arith.constant 896 : index
    %25 = vector.load %arg8[%c0_55, %c0_56, %c896] : memref<16x16x1152xbf16, #tpu.memory_space<vmem>>, vector<16x16x128xbf16>
    tpu.vector_store %arg8[%c0_55, %c0_56, %c896], %24 {strides = array<i32>} : memref<16x16x1152xbf16, #tpu.memory_space<vmem>>, vector<16x16x128xbf16>,
    %c2_57 = arith.constant 2 : index
    %c2_58 = arith.constant 2 : index
    %c0_59 = arith.constant 0 : index
    %26 = vector.load %arg7[%c2_57, %c2_58, %c0_59] : memref<18x18x128xbf16, #tpu.memory_space<vmem>>, vector<16x16x128xbf16>
    %c0_60 = arith.constant 0 : index
    %c0_61 = arith.constant 0 : index
    %c1024 = arith.constant 1024 : index
    %27 = vector.load %arg8[%c0_60, %c0_61, %c1024] : memref<16x16x1152xbf16, #tpu.memory_space<vmem>>, vector<16x16x128xbf16>
    tpu.vector_store %arg8[%c0_60, %c0_61, %c1024], %26 {strides = array<i32>} : memref<16x16x1152xbf16, #tpu.memory_space<vmem>>, vector<16x16x128xbf16>,
    %c0_62 = arith.constant 0 : index
    %c0_63 = arith.constant 0 : index
    %c0_64 = arith.constant 0 : index
    %28 = vector.load %arg8[%c0_62, %c0_63, %c0_64] : memref<16x16x1152xbf16, #tpu.memory_space<vmem>>, vector<16x16x1152xbf16>
    %c0_65 = arith.constant 0 : index
    %c0_66 = arith.constant 0 : index
    %29 = vector.load %arg2[%c0_65, %c0_66] : memref<1152x128xbf16, #tpu.memory_space<vmem>>, vector<1152x128xbf16>
    %cst_67 = arith.constant dense<0.000000e+00> : vector<16x16x128xf32>
    %30 = tpu.matmul %28, %29, %cst_67 {dimension_numbers = #tpu.dot_dimension_numbers<[2], [0], [0, 1], [1], [0, 0, 0, 1, 1, 1], [], []>} : vector<16x16x1152xbf16>, vector<1152x128xbf16>, vector<16x16x128xf32> -> vector<16x16x128xf32>
    %c0_68 = arith.constant 0 : index
    %c0_69 = arith.constant 0 : index
    %31 = vector.load %arg3[%c0_68, %c0_69] : memref<1x128xf32, #tpu.memory_space<vmem>>, vector<1x128xf32>
    %32 = vector.shape_cast %31 : vector<1x128xf32> to vector<128xf32>
    %33 = vector.shape_cast %32 : vector<128xf32> to vector<1x1x128xf32>
    %34 = vector.broadcast %33 : vector<1x1x128xf32> to vector<16x16x128xf32>
    %35 = arith.addf %30, %34 : vector<16x16x128xf32>
    %cst_70 = arith.constant 0.000000e+00 : f32
    %36 = vector.broadcast %cst_70 : f32 to vector<16x16x128xf32>
    %37 = arith.maximumf %35, %36 : vector<16x16x128xf32>
    %38 = arith.truncf %37 : vector<16x16x128xf32> to vector<16x16x128xbf16>
    %c1_71 = arith.constant 1 : index
    %c1_72 = arith.constant 1 : index
    %c0_73 = arith.constant 0 : index
    %39 = vector.load %arg7[%c1_71, %c1_72, %c0_73] : memref<18x18x128xbf16, #tpu.memory_space<vmem>>, vector<16x16x128xbf16>
    tpu.vector_store %arg7[%c1_71, %c1_72, %c0_73], %38 {strides = array<i32>} : memref<18x18x128xbf16, #tpu.memory_space<vmem>>, vector<16x16x128xbf16>,
    %c0_74 = arith.constant 0 : index
    %c0_75 = arith.constant 0 : index
    %c0_76 = arith.constant 0 : index
    %40 = vector.load %arg7[%c0_74, %c0_75, %c0_76] : memref<18x18x128xbf16, #tpu.memory_space<vmem>>, vector<16x16x128xbf16>
    %c0_77 = arith.constant 0 : index
    %c0_78 = arith.constant 0 : index
    %c0_79 = arith.constant 0 : index
    %41 = vector.load %arg8[%c0_77, %c0_78, %c0_79] : memref<16x16x1152xbf16, #tpu.memory_space<vmem>>, vector<16x16x128xbf16>
    tpu.vector_store %arg8[%c0_77, %c0_78, %c0_79], %40 {strides = array<i32>} : memref<16x16x1152xbf16, #tpu.memory_space<vmem>>, vector<16x16x128xbf16>,
    %c0_80 = arith.constant 0 : index
    %c1_81 = arith.constant 1 : index
    %c0_82 = arith.constant 0 : index
    %42 = vector.load %arg7[%c0_80, %c1_81, %c0_82] : memref<18x18x128xbf16, #tpu.memory_space<vmem>>, vector<16x16x128xbf16>
    %c0_83 = arith.constant 0 : index
    %c0_84 = arith.constant 0 : index
    %c128_85 = arith.constant 128 : index
    %43 = vector.load %arg8[%c0_83, %c0_84, %c128_85] : memref<16x16x1152xbf16, #tpu.memory_space<vmem>>, vector<16x16x128xbf16>
    tpu.vector_store %arg8[%c0_83, %c0_84, %c128_85], %42 {strides = array<i32>} : memref<16x16x1152xbf16, #tpu.memory_space<vmem>>, vector<16x16x128xbf16>,
    %c0_86 = arith.constant 0 : index
    %c2_87 = arith.constant 2 : index
    %c0_88 = arith.constant 0 : index
    %44 = vector.load %arg7[%c0_86, %c2_87, %c0_88] : memref<18x18x128xbf16, #tpu.memory_space<vmem>>, vector<16x16x128xbf16>
    %c0_89 = arith.constant 0 : index
    %c0_90 = arith.constant 0 : index
    %c256_91 = arith.constant 256 : index
    %45 = vector.load %arg8[%c0_89, %c0_90, %c256_91] : memref<16x16x1152xbf16, #tpu.memory_space<vmem>>, vector<16x16x128xbf16>
    tpu.vector_store %arg8[%c0_89, %c0_90, %c256_91], %44 {strides = array<i32>} : memref<16x16x1152xbf16, #tpu.memory_space<vmem>>, vector<16x16x128xbf16>,
    %c1_92 = arith.constant 1 : index
    %c0_93 = arith.constant 0 : index
    %c0_94 = arith.constant 0 : index
    %46 = vector.load %arg7[%c1_92, %c0_93, %c0_94] : memref<18x18x128xbf16, #tpu.memory_space<vmem>>, vector<16x16x128xbf16>
    %c0_95 = arith.constant 0 : index
    %c0_96 = arith.constant 0 : index
    %c384_97 = arith.constant 384 : index
    %47 = vector.load %arg8[%c0_95, %c0_96, %c384_97] : memref<16x16x1152xbf16, #tpu.memory_space<vmem>>, vector<16x16x128xbf16>
    tpu.vector_store %arg8[%c0_95, %c0_96, %c384_97], %46 {strides = array<i32>} : memref<16x16x1152xbf16, #tpu.memory_space<vmem>>, vector<16x16x128xbf16>,
    %c1_98 = arith.constant 1 : index
    %c1_99 = arith.constant 1 : index
    %c0_100 = arith.constant 0 : index
    %48 = vector.load %arg7[%c1_98, %c1_99, %c0_100] : memref<18x18x128xbf16, #tpu.memory_space<vmem>>, vector<16x16x128xbf16>
    %c0_101 = arith.constant 0 : index
    %c0_102 = arith.constant 0 : index
    %c512_103 = arith.constant 512 : index
    %49 = vector.load %arg8[%c0_101, %c0_102, %c512_103] : memref<16x16x1152xbf16, #tpu.memory_space<vmem>>, vector<16x16x128xbf16>
    tpu.vector_store %arg8[%c0_101, %c0_102, %c512_103], %48 {strides = array<i32>} : memref<16x16x1152xbf16, #tpu.memory_space<vmem>>, vector<16x16x128xbf16>,
    %c1_104 = arith.constant 1 : index
    %c2_105 = arith.constant 2 : index
    %c0_106 = arith.constant 0 : index
    %50 = vector.load %arg7[%c1_104, %c2_105, %c0_106] : memref<18x18x128xbf16, #tpu.memory_space<vmem>>, vector<16x16x128xbf16>
    %c0_107 = arith.constant 0 : index
    %c0_108 = arith.constant 0 : index
    %c640_109 = arith.constant 640 : index
    %51 = vector.load %arg8[%c0_107, %c0_108, %c640_109] : memref<16x16x1152xbf16, #tpu.memory_space<vmem>>, vector<16x16x128xbf16>
    tpu.vector_store %arg8[%c0_107, %c0_108, %c640_109], %50 {strides = array<i32>} : memref<16x16x1152xbf16, #tpu.memory_space<vmem>>, vector<16x16x128xbf16>,
    %c2_110 = arith.constant 2 : index
    %c0_111 = arith.constant 0 : index
    %c0_112 = arith.constant 0 : index
    %52 = vector.load %arg7[%c2_110, %c0_111, %c0_112] : memref<18x18x128xbf16, #tpu.memory_space<vmem>>, vector<16x16x128xbf16>
    %c0_113 = arith.constant 0 : index
    %c0_114 = arith.constant 0 : index
    %c768_115 = arith.constant 768 : index
    %53 = vector.load %arg8[%c0_113, %c0_114, %c768_115] : memref<16x16x1152xbf16, #tpu.memory_space<vmem>>, vector<16x16x128xbf16>
    tpu.vector_store %arg8[%c0_113, %c0_114, %c768_115], %52 {strides = array<i32>} : memref<16x16x1152xbf16, #tpu.memory_space<vmem>>, vector<16x16x128xbf16>,
    %c2_116 = arith.constant 2 : index
    %c1_117 = arith.constant 1 : index
    %c0_118 = arith.constant 0 : index
    %54 = vector.load %arg7[%c2_116, %c1_117, %c0_118] : memref<18x18x128xbf16, #tpu.memory_space<vmem>>, vector<16x16x128xbf16>
    %c0_119 = arith.constant 0 : index
    %c0_120 = arith.constant 0 : index
    %c896_121 = arith.constant 896 : index
    %55 = vector.load %arg8[%c0_119, %c0_120, %c896_121] : memref<16x16x1152xbf16, #tpu.memory_space<vmem>>, vector<16x16x128xbf16>
    tpu.vector_store %arg8[%c0_119, %c0_120, %c896_121], %54 {strides = array<i32>} : memref<16x16x1152xbf16, #tpu.memory_space<vmem>>, vector<16x16x128xbf16>,
    %c2_122 = arith.constant 2 : index
    %c2_123 = arith.constant 2 : index
    %c0_124 = arith.constant 0 : index
    %56 = vector.load %arg7[%c2_122, %c2_123, %c0_124] : memref<18x18x128xbf16, #tpu.memory_space<vmem>>, vector<16x16x128xbf16>
    %c0_125 = arith.constant 0 : index
    %c0_126 = arith.constant 0 : index
    %c1024_127 = arith.constant 1024 : index
    %57 = vector.load %arg8[%c0_125, %c0_126, %c1024_127] : memref<16x16x1152xbf16, #tpu.memory_space<vmem>>, vector<16x16x128xbf16>
    tpu.vector_store %arg8[%c0_125, %c0_126, %c1024_127], %56 {strides = array<i32>} : memref<16x16x1152xbf16, #tpu.memory_space<vmem>>, vector<16x16x128xbf16>,
    %c0_128 = arith.constant 0 : index
    %c0_129 = arith.constant 0 : index
    %c0_130 = arith.constant 0 : index
    %58 = vector.load %arg8[%c0_128, %c0_129, %c0_130] : memref<16x16x1152xbf16, #tpu.memory_space<vmem>>, vector<16x16x1152xbf16>
    %c0_131 = arith.constant 0 : index
    %c0_132 = arith.constant 0 : index
    %59 = vector.load %arg4[%c0_131, %c0_132] : memref<1152x128xbf16, #tpu.memory_space<vmem>>, vector<1152x128xbf16>
    %cst_133 = arith.constant dense<0.000000e+00> : vector<16x16x128xf32>
    %60 = tpu.matmul %58, %59, %cst_133 {dimension_numbers = #tpu.dot_dimension_numbers<[2], [0], [0, 1], [1], [0, 0, 0, 1, 1, 1], [], []>} : vector<16x16x1152xbf16>, vector<1152x128xbf16>, vector<16x16x128xf32> -> vector<16x16x128xf32>
    %c0_134 = arith.constant 0 : index
    %c0_135 = arith.constant 0 : index
    %61 = vector.load %arg5[%c0_134, %c0_135] : memref<1x128xf32, #tpu.memory_space<vmem>>, vector<1x128xf32>
    %62 = vector.shape_cast %61 : vector<1x128xf32> to vector<128xf32>
    %63 = vector.shape_cast %62 : vector<128xf32> to vector<1x1x128xf32>
    %64 = vector.broadcast %63 : vector<1x1x128xf32> to vector<16x16x128xf32>
    %65 = arith.addf %60, %64 : vector<16x16x128xf32>
    %c0_136 = arith.constant 0 : index
    %c0_137 = arith.constant 0 : index
    %c0_138 = arith.constant 0 : index
    %c0_139 = arith.constant 0 : index
    %66 = vector.load %arg1[%c0_136, %c0_137, %c0_138, %c0_139] : memref<1x16x16x128xf32, #tpu.memory_space<vmem>>, vector<1x16x16x128xf32>
    %67 = vector.shape_cast %66 : vector<1x16x16x128xf32> to vector<16x16x128xf32>
    %cst_140 = arith.constant 1.000000e+00 : f32
    %68 = vector.broadcast %cst_140 : f32 to vector<16x16x128xf32>
    %69 = arith.mulf %65, %68 : vector<16x16x128xf32>
    %70 = arith.addf %67, %69 : vector<16x16x128xf32>
    %c0_141 = arith.constant 0 : index
    %c0_142 = arith.constant 0 : index
    %c0_143 = arith.constant 0 : index
    %c0_144 = arith.constant 0 : index
    %71 = vector.load %arg6[%c0_141, %c0_142, %c0_143, %c0_144] : memref<1x16x16x128xf32, #tpu.memory_space<vmem>>, vector<1x16x16x128xf32>
    %72 = vector.shape_cast %71 : vector<1x16x16x128xf32> to vector<16x16x128xf32>
    %73 = vector.shape_cast %70 : vector<16x16x128xf32> to vector<1x16x16x128xf32>
    tpu.vector_store %arg6[%c0_141, %c0_142, %c0_143, %c0_144], %73 {strides = array<i32>} : memref<1x16x16x128xf32, #tpu.memory_space<vmem>>, vector<1x16x16x128xf32>,
    return
  }
  func.func @transform_0(%arg0: i32) -> (i32, i32, i32, i32) {
    %c0_i32 = arith.constant 0 : i32
    %c0_i32_0 = arith.constant 0 : i32
    %c0_i32_1 = arith.constant 0 : i32
    %c0_i32_2 = arith.constant 0 : i32
    return %arg0, %c0_i32, %c0_i32_0, %c0_i32_1 : i32, i32, i32, i32
  }
  func.func @transform_1(%arg0: i32) -> (i32, i32) {
    %c0_i32 = arith.constant 0 : i32
    %c0_i32_0 = arith.constant 0 : i32
    %c0_i32_1 = arith.constant 0 : i32
    return %c0_i32, %c0_i32_0 : i32, i32
  }
  func.func @transform_2(%arg0: i32) -> (i32, i32) {
    %c0_i32 = arith.constant 0 : i32
    %c0_i32_0 = arith.constant 0 : i32
    %c0_i32_1 = arith.constant 0 : i32
    return %c0_i32, %c0_i32_0 : i32, i32
  }
  func.func @transform_3(%arg0: i32) -> (i32, i32) {
    %c0_i32 = arith.constant 0 : i32
    %c0_i32_0 = arith.constant 0 : i32
    %c0_i32_1 = arith.constant 0 : i32
    return %c0_i32, %c0_i32_0 : i32, i32
  }
  func.func @transform_4(%arg0: i32) -> (i32, i32) {
    %c0_i32 = arith.constant 0 : i32
    %c0_i32_0 = arith.constant 0 : i32
    %c0_i32_1 = arith.constant 0 : i32
    return %c0_i32, %c0_i32_0 : i32, i32
  }
  func.func @transform_5(%arg0: i32) -> (i32, i32, i32, i32) {
    %c0_i32 = arith.constant 0 : i32
    %c0_i32_0 = arith.constant 0 : i32
    %c0_i32_1 = arith.constant 0 : i32
    %c0_i32_2 = arith.constant 0 : i32
    return %arg0, %c0_i32, %c0_i32_0, %c0_i32_1 : i32, i32, i32, i32
  }
}

</mosaic_0001>

<bundles_post_ra>
// kernel: tpu_custom_call.1
= control target key start
LH: loop header
LB: loop body
LE: loop exit
PB: predicated region body
PF: predicated region fallthrough
CT: control target
= control target key end

     0   :  { %10 = vsyncpa [#allocation5], 0  ;;  %s13802_s0 = inlined_call_operand.hbm [shape: f32[2,16,16,128], index: 0, kind: input, shape index: {}]   ;;  %s13803_s1 = inlined_call_operand.hbm [shape: bf16[1152,128], index: 1, kind: input, shape index: {}]   ;;  %s13804_s2 = inlined_call_operand.vmem [shape: f32[1,128], index: 2, kind: input, shape index: {}]   ;;  %s13805_s3 = inlined_call_operand.hbm [shape: bf16[1152,128], index: 3, kind: input, shape index: {}]   ;;  %s13806_s4 = inlined_call_operand.vmem [shape: f32[1,128], index: 4, kind: input, shape index: {}]   ;;  %s13807_s5 = inlined_call_operand.hbm [shape: f32[2,16,16,128], index: 5, kind: output, shape index: {}]  }
   0x1   :  { %12 = vsyncpa [#allocation5 + $0x1], 0 }
   0x2   :  { %13 = vsyncpa [#allocation8], 0 }
   0x3   :  { %14 = vsyncpa [#allocation6], 0 }
   0x4   :  { %16 = vsyncpa [#allocation6 + $0x1], 0  ;;  %s12300_s18 = smov 0   ;;  %s12302_s19 = smov 0  }
   0x5   :  { %s12304_s20 = smov 0   ;;  %s12306_s21 = smov 0  }
   0x6 LB: > { %s12321_s22 = sadd.s32 4294967295, %s12257_s21   ;;  %s9587_s23 = sadd.s32 4294967294, %s12257_s21   ;;  %s12257_s21 = sphi %s12306_s21, %s13835_s21   ;;  %s12253_s20 = sphi %s12304_s20, %s13834_s20   ;;  %s12249_s19 = sphi %s12302_s19, %s13833_s19   ;;  %s12245_s18 = sphi %s12300_s18, %s13832_s18  }
   0x7   : > { %p42_p0 = scmp.ne.s32.totalorder %s12249_s19, %s12245_s18  ;;  %p13808_p1 = scmp.eq.s32.totalorder %s12321_s22, 0 }
   0x8   : > { %p156_p3 = scmp.eq.s32.totalorder %s9587_s23, 1  ;;  %p9588_p5 = scmp.ge.s32.totalorder %s12257_s21, 1 }
   0x9   : > { %p12330_p4 = por %p13808_p1, %p42_p0  ;;  %p163_p7 = scmp.lt.s32.totalorder %s12257_s21, 3 }
   0xa   : > { %p12335_p6 = por %p156_p3, %p42_p0  ;;  %s12259_s27 = smov [#allocation7]  }
   0xb   : > { %s13811_s24 = scalar_select %p12330_p4, 1, 0 }
   0xc   : > { %s13812_s25 = scalar_select %p12335_p6, 1, 0 }
   0xd   : > { %p12340_p8 = pnand %p9588_p5, %p163_p7  ;;  %s175_s28 = sshll.u32 %s12259_s27, 4  ;;  %s12344_s28 = int_to_ptr.vmem [resolvable:$true] %s175_s28 }
   0xe   : > { %s12260_s30 = smov [#allocation9]   ;;  %s12101_s9 = scalar_lea.hbm %s13803_s1, 9216 }
   0xf   : > { %p11413_p9 = pneg %p12340_p8  ;;  %s191_s6 = sshll.u32 %s12260_s30, 4  ;;  %s12355_s6 = int_to_ptr.vmem [resolvable:$true] %s191_s6 }
  0x10   : > { %p12102_p12 = scmp.ne.s32.totalorder %s13803_s1, %s12101_s9  ;;  %p12108_p5 = scmp.lt.u32.totalorder %s12101_s9, %s13803_s1 }
  0x11   : > { %p12351_p11 = pnand %p11413_p9, %p13808_p1 }
  0x13   : > { %p12103_p13 = pneg %p12351_p11 }
  0x15   : > { %p12104_p0 = pnand %p12103_p13, %p12102_p12 }
  0x17   : > { %p12105_p3 = pneg %p12104_p0 }
  0x19   : > { %p12110_p7 = pnand %p12108_p5, %p12105_p3 }
  0x1b   : > { %12113 = shalt.err (!%p12110_p7)
}
  0x1c   : > { %s12114_s14 = scalar_lea.vmem %s12344_s28, 9216  ;;  %p12122_p2 = scmp.lt.s32.totalorder %s12344_s28, %s12344_s28 }
  0x1d   : > { %p12115_p9 = scmp.ne.s32.totalorder %s12344_s28, %s12114_s14  ;;  %p12123_p12 = scmp.lt.s32.totalorder %s12114_s14, %s12114_s14 }
  0x1f   : > { %p12117_p10 = pnand %p12115_p9, %p12103_p13  ;;  %p12124_p0 = por %p12123_p12, %p12122_p2 }
  0x21   : > { %p12118_p1 = pneg %p12117_p10 }
  0x23   : > { %p12125_p6 = pnand %p12124_p0, %p12118_p1 }
  0x25   : > { %12128 = shalt.err (!%p12125_p6)
}
  0x26   : > { %s12261_s15 = smov 64   ;;  %s12262_s16 = smov 4  }
  0x27   : > { %11416 = dma.hbm_to_vmem [thread:$0]  (!%p12351_p11), %s13803_s1, 9216, %s12344_s28, [#allocation8], %s12261_s15, %s12261_s15, %s12262_s16  }
  0x28   : > { %s12129_s7 = scalar_lea.hbm %s13805_s3, 9216 }
  0x29   : > { %p12130_p2 = scmp.ne.s32.totalorder %s13805_s3, %s12129_s7  ;;  %p12136_p10 = scmp.lt.u32.totalorder %s12129_s7, %s13805_s3 }
  0x2b   : > { %p12132_p1 = pnand %p12130_p2, %p12103_p13 }
  0x2d   : > { %p12133_p6 = pneg %p12132_p1 }
  0x2f   : > { %p12138_p3 = pnand %p12136_p10, %p12133_p6 }
  0x31   : > { %12141 = shalt.err (!%p12138_p3)
}
  0x32   : > { %s12142_s28 = scalar_lea.vmem %s12355_s6, 9216  ;;  %p12150_p12 = scmp.lt.s32.totalorder %s12355_s6, %s12355_s6 }
  0x33   : > { %p12143_p5 = scmp.ne.s32.totalorder %s12355_s6, %s12142_s28  ;;  %p12151_p0 = scmp.lt.s32.totalorder %s12142_s28, %s12142_s28 }
  0x35   : > { %p12145_p7 = pnand %p12143_p5, %p12103_p13  ;;  %p12152_p2 = por %p12151_p0, %p12150_p12 }
  0x37   : > { %p12146_p9 = pneg %p12145_p7 }
  0x39   : > { %p12153_p1 = pnand %p12152_p2, %p12146_p9 }
  0x3b   : > { %12156 = shalt.err (!%p12153_p1)
}
  0x3c   : > { %11419 = dma.hbm_to_vmem [thread:$0]  (!%p12351_p11), %s13805_s3, 9216, %s12355_s6, [#allocation8], %s12261_s15, %s12261_s15, %s12262_s16  }
  0x3d   : > { %s12410_s14 = sadd.s32 1, %s12257_s21   ;;  %s29_s29 = sadd.s32 1, %s12253_s20 }
  0x3e   : > { %s26_s17 = ssub.s32 %s12257_s21, %s12410_s14  ;;  %p36_p13 = scmp.ne.s32.totalorder %s12253_s20, %s12249_s19 }
  0x3f   : > { %p27_p6 = scmp.eq.s32.totalorder %s26_s17, 0  ;;  %p37_p10 = scmp.eq.s32.totalorder %s12257_s21, 0 }
  0x40   : > { %p13815_p3 = scmp.eq.s32.totalorder %s12321_s22, 1  ;;  %p11430_p7 = scmp.lt.s32.totalorder %s12257_s21, 2 }
  0x41   : > { %s12426_s27 = scalar_select %p27_p6, %s12253_s20, %s29_s29  }
  0x42   : > { %p12420_p5 = por %p13815_p3, %p36_p13  ;;  %p38_p9 = por %p37_p10, %p36_p13 }
  0x43   : > { %s208_s30 = sand.u32 1, %s12253_s20   ;;  %s10295_s6 = sshll.u32 %s12257_s21, 12 }
  0x44   : > { %s13816_s23 = scalar_select %p12420_p5, 1, 0 }
  0x45   : > { %s9592_s7 = sshll.u32 %s208_s30, 8  ;;  %s12433_s8 = scalar_lea.hbm %s13802_s0, %s10295_s6 }
  0x46   : > { %s212_s9 = scalar_lea.vmem [#allocation4], %s9592_s7  ;;  %p12437_p11 = pnand %p11430_p7, %p38_p9 }
  0x47   : > { %s219_s10 = sshll.u32 %s212_s9, 4  ;;  %s12441_s28 = scalar_lea.sflag [#allocation5], %s208_s30  ;;  %s12435_s10 = int_to_ptr.vmem [resolvable:$true] %s219_s10 }
  0x48   : > { %s12157_s12 = scalar_lea.hbm %s12433_s8, 4096  ;;  %p12159_p0 = pneg %p12437_p11 }
  0x49   : > { %p12158_p12 = scmp.ne.s32.totalorder %s12433_s8, %s12157_s12  ;;  %s12162_s17 = scalar_lea.hbm %s13802_s0, 8192 }
  0x4a   : > { %p12163_p13 = scmp.lt.u32.totalorder %s12433_s8, %s13802_s0  ;;  %p12164_p6 = scmp.lt.u32.totalorder %s12162_s17, %s12157_s12 }
  0x4b   : > { %p12160_p2 = pnand %p12159_p0, %p12158_p12  ;;  %p12166_p3 = scmp.lt.u32.totalorder %s12157_s12, %s12433_s8 }
  0x4c   : > { %p12165_p10 = por %p12164_p6, %p12163_p13 }
  0x4d   : > { %p12161_p1 = pneg %p12160_p2 }
  0x4e   : > { %p12167_p7 = por %p12166_p3, %p12165_p10 }
  0x50   : > { %p12168_p9 = pnand %p12167_p7, %p12161_p1 }
  0x52   : > { %12171 = shalt.err (!%p12168_p9)
}
  0x53   : > { %s12172_s30 = scalar_lea.vmem %s12435_s10, 4096  ;;  %s12263_s15 = smov [#allocation4]  }
  0x54   : > { %p12173_p12 = scmp.ne.s32.totalorder %s12435_s10, %s12172_s30  ;;  %s12177_s16 = sshll.u32 %s12263_s15, 4  ;;  %s12178_s16 = int_to_ptr.vmem [resolvable:$false] %s12177_s16 }
  0x55   : > { %s12179_s9 = scalar_lea.vmem %s12178_s16, 8192  ;;  %p12180_p4 = scmp.lt.s32.totalorder %s12435_s10, %s12178_s16 }
  0x56   : > { %p12175_p2 = pnand %p12173_p12, %p12159_p0  ;;  %p12181_p13 = scmp.lt.s32.totalorder %s12179_s9, %s12172_s30 }
  0x58   : > { %p12176_p5 = pneg %p12175_p2  ;;  %p12182_p6 = por %p12181_p13, %p12180_p4 }
  0x5a   : > { %p12183_p10 = pnand %p12182_p6, %p12176_p5 }
  0x5c   : > { %12186 = shalt.err (!%p12183_p10)
}
  0x5d   : > { %s12264_s12 = smov 128   ;;  %s12265_s13 = smov 8  }
  0x5e   : > { %11423 = dma.hbm_to_vmem [thread:$0]  (!%p12437_p11), %s12433_s8, 4096, %s12435_s10, %s12441_s28, %s12264_s12, %s12264_s12, %s12265_s13  }
  0x5f   : > { %231 = sbr.rel (%p12340_p8) target bundleno = 1225 (0x4c9), region = 40  ;;  %s12472_s29 = sand.u32 (!%p12340_p8), 1, %s12249_s19  }
  0x60   : > { %s9596_s17 = sshll.u32 (!%p12340_p8), %s12472_s29, 8  ;;  %s234_s7 = scalar_lea.sflag (!%p12340_p8), [#allocation5], %s12472_s29 }
  0x61   : > { %s12478_s6 = scalar_lea.vmem (!%p12340_p8), [#allocation4], %s9596_s17  ;;  %p13818_p4 = scmp.ne.s32.totalorder (!%p12340_p8), %s13811_s24, 0 }
  0x66   : > { %12232 = dma.done.wait (%p13818_p4), %s234_s7, 4096  }
  0x67   : > { %12234 = vsyncadd (%p13818_p4), %s234_s7, 4294963200  ;;  %p13819_p5 = scmp.eq.s32.totalorder %s12321_s22, 0 }
  0x69   : > { %12236 = dma.done.wait (%p13819_p5), [#allocation8], 18432   ;;  %p13820_p8 = pmov %p13819_p5 }
  0x6a   : > { %v12266_v0 = vmov 0   ;;  %v11475_v1 = vld [vmem:[#allocation7 + $0x40] sm:$0xff]   ;;  %v11479_v5 = vld [vmem:[#allocation7 + $0x48] sm:$0xff]   ;;  %v11483_v9 = vld [vmem:[#allocation7 + $0x50] sm:$0xff]   ;;  %vm281_vm0 = vsmask.f32 256 }
  0x6b   : > { %12238 = vsyncadd (%p13820_p8), [#allocation8], 4294948864  ;;  %273 = vst [vmem:[#allocation2] sm:$0xf] %v12266_v0  ;;  %v11476_v2 = vld [vmem:[#allocation7] sm:$0xff]   ;;  %10361 = vmatprep.subr.bf16.mxu0 %v11475_v1  ;;  %v11480_v6 = vld [vmem:[#allocation7 + $0x8] sm:$0xff]  }
  0x6c   : > { %274 = vst [vmem:[#allocation2 + $0x4] sm:$0xf] %v12266_v0  ;;  %275 = vst [vmem:[#allocation2 + $0x8] sm:$0x1] %v12266_v0  ;;  %v11477_v3 = vld [vmem:[#allocation7 + $0xc0] sm:$0xff]   ;;  %10362 = vmatpush3.bf16.msra.mxu0 %v11476_v2  ;;  %v11481_v7 = vld [vmem:[#allocation7 + $0xc8] sm:$0xff]  }
  0x6d   : > { %277 = vst [vmem:[#allocation2 + $0xcc] sm:$0xf] %v12266_v0  ;;  %278 = vst [vmem:[#allocation2 + $0xd0] sm:$0xf] %v12266_v0  ;;  %v11478_v4 = vld [vmem:[#allocation7 + $0x80] sm:$0xff]   ;;  %10473 = vmatprep.subr.bf16.mxu1 %v11477_v3  ;;  %10363 = vmatprep.subr.bf16.mxu0 %v11479_v5  ;;  %v11482_v8 = vld [vmem:[#allocation7 + $0x88] sm:$0xff]  }
  0x6e   : > { %279 = vst [vmem:[#allocation2 + $0xd4] sm:$0x1] %v12266_v0  ;;  %10474 = vmatpush3.bf16.msra.mxu1 %v11478_v4  ;;  %v11484_v10 = vld [vmem:[#allocation7 + $0x10] sm:$0xff]   ;;  %vm337_vm1 = vsmask.f32 7938  ;;  %v11487_v13 = vld [vmem:[#allocation7 + $0x58] sm:$0xff]  }
  0x6f   : > { %10475 = vmatprep.subr.bf16.mxu1 %v11481_v7  ;;  %v11485_v11 = vld [vmem:[#allocation7 + $0xd0] sm:$0xff]   ;;  %v11488_v14 = vld [vmem:[#allocation7 + $0x18] sm:$0xff]   ;;  %v11491_v17 = vld [vmem:[#allocation7 + $0x60] sm:$0xff]   ;;  %vm280_vm2 = vcmask 1040384   ;;  %vm844_vm5 = vcmask 1043456   ;;  %vm1679_vm10 = vcmask 1046528  }
  0x70   : > { %10364 = vmatpush3.bf16.msra.mxu0 %v11480_v6  ;;  %v11486_v12 = vld [vmem:[#allocation7 + $0x90] sm:$0xff]   ;;  %v11489_v15 = vld [vmem:[#allocation7 + $0xd8] sm:$0xff]   ;;  %v11492_v18 = vld [vmem:[#allocation7 + $0x20] sm:$0xff]   ;;  %vm1278_vm6 = vsmask.f32 7424  ;;  %s13659_s16 = scalar_lea.vmem [#allocation10], %s9596_s17 }
  0x71   : > { %10365 = vmatprep.subr.bf16.mxu0 %v11483_v9  ;;  %v11490_v16 = vld [vmem:[#allocation7 + $0x98] sm:$0xff]   ;;  %v11493_v19 = vld [vmem:[#allocation7 + $0xe0] sm:$0xff]   ;;  %v11495_v21 = vld [vmem:[#allocation7 + $0x68] sm:$0xff]   ;;  %vm521_vm7 = vsmask.f32 4368  ;;  %s10360_s9 = sshll.u32 %s12321_s22, 12 }
  0x72   : > { %10476 = vmatpush3.bf16.msra.mxu1 %v11482_v8  ;;  %v11494_v20 = vld [vmem:[#allocation7 + $0xa0] sm:$0xff]   ;;  %v11496_v22 = vld [vmem:[#allocation7 + $0x28] sm:$0xff]   ;;  %vm12489_vm3 = vmand %vm280_vm2, %vm281_vm0  ;;  %s9495_s12 = sshll.u32 %s13659_s16, 4  ;;  %s13753_s7 = scalar_lea.hbm %s13807_s5, %s10360_s9  ;;  %s13755_s12 = int_to_ptr.vmem [resolvable:$true] %s9495_s12 }
  0x73   : > { %10477 = vmatprep.subr.bf16.mxu1 %v11485_v11  ;;  %vm12494_vm4 = vmand %vm280_vm2, %vm337_vm1  ;;  %v11497_v25 = vld [vmem:[#allocation7 + $0xe8] sm:$0xff]   ;;  %v11499_v27 = vld [vmem:[#allocation7 + $0x70] sm:$0xff]   ;;  %s9482_s22 = scalar_lea.sflag [#allocation6], %s12472_s29  ;;  %p13829_p0 = scmp.ne.s32.totalorder %s13816_s23, 0 }
  0x74   : > { %10366 = vmatpush3.bf16.msra.mxu0 %v11484_v10  ;;  %v11498_v26 = vld [vmem:[#allocation7 + $0xa8] sm:$0xff]   ;;  %v11500_v28 = vld [vmem:[#allocation7 + $0x30] sm:$0xff]   ;;  %v11503_v31 = vld [vmem:[#allocation7 + $0x78] sm:$0xff]   ;;  %s12267_s24 = smov [#allocation10]  }
  0x75   : > { %10367 = vmatprep.subr.bf16.mxu0 %v11487_v13  ;;  %v11501_v29 = vld [vmem:[#allocation7 + $0xf0] sm:$0xff]   ;;  %v11504_v32 = vld [vmem:[#allocation7 + $0x38] sm:$0xff]   ;;  %v283_v34 = vld [vmem:[#allocation2] sm:$0x1]  ;;  %s12191_s26 = sshll.u32 %s12267_s24, 4  ;;  %s12192_s26 = int_to_ptr.vmem [resolvable:$false] %s12191_s26 }
  0x76   : > { %10478 = vmatpush3.bf16.msra.mxu1 %v11486_v12  ;;  %v11502_v30 = vld [vmem:[#allocation7 + $0xb0] sm:$0xff]   ;;  %v11505_v33 = vld [vmem:[#allocation7 + $0xf8] sm:$0xff]   ;;  %v284_v36 = vsel %vm12489_vm3, 0, %v283_v34  ;;  %v11510_v39 = vld [vmem:[#allocation7 + $0x140] sm:$0xff]   ;;  %s12193_s8 = scalar_lea.vmem %s12192_s26, 8192  ;;  %p12194_p7 = scmp.lt.s32.totalorder %s13755_s12, %s12192_s26 }
  0x77   : > { %10479 = vmatprep.subr.bf16.mxu1 %v11489_v15  ;;  %v339_v35 = vld [vmem:[#allocation2 + $0x8] sm:$0x1]  ;;  %285 = vst [vmem:[#allocation2] sm:$0x1] %v284_v36  ;;  %v11508_v38 = vld [vmem:[#allocation7 + $0xb8] sm:$0xff]   ;;  %v393_v42 = vld [vmem:[%s12478_s6] sm:$0xff] }
  0x78   : > { %10368 = vmatpush3.bf16.msra.mxu0 %v11488_v14  ;;  %v340_v37 = vsel %vm12494_vm4, 0, %v339_v35  ;;  %v286_v40 = vld [vmem:[#allocation2 + $0xc] sm:$0x1]  ;;  %v394_v43 = vld [vmem:[%s12478_s6 + $0x8] sm:$0xff]  ;;  %v10296_v44 = vpack.c.bf16 %v393_v42, %v393_v42  ;;  %v342_v47 = vld [vmem:[#allocation2 + $0x14] sm:$0x1] }
  0x79   : > { %10369 = vmatprep.subr.bf16.mxu0 %v11491_v17  ;;  %341 = vst [vmem:[#allocation2 + $0x8] sm:$0x1] %v340_v37  ;;  %v287_v41 = vsel %vm12489_vm3, 0, %v286_v40  ;;  %v10297_v45 = vpack.c.bf16 %v394_v43, %v394_v43  ;;  %v12506_v46 = vld [vmem:[#allocation2] sm:$0xfe]   ;;  %v343_v53 = vsel %vm12494_vm4, 0, %v342_v47  ;;  %vm12516_vm8 = vmand %vm844_vm5, %vm337_vm1 }
  0x7a   : > { %10480 = vmatpush3.bf16.msra.mxu1 %v11490_v16  ;;  %288 = vst [vmem:[#allocation2 + $0xc] sm:$0x1] %v287_v41  ;;  %v524_v48 = vshrl.u32 %v10296_v44, 16  ;;  %v527_v49 = vshll.u32 %v10296_v44, 16  ;;  %v289_v50 = vld [vmem:[#allocation2 + $0x18] sm:$0x1]  ;;  %vm12524_vm9 = vmor %vm281_vm0, %vm521_vm7 }
  0x7b   : > { %10481 = vmatprep.subr.bf16.mxu1 %v11493_v19  ;;  %v532_v51 = vshrl.u32 %v10297_v45, 16  ;;  %v535_v52 = vshll.u32 %v10297_v45, 16  ;;  %v290_v54 = vsel %vm12489_vm3, 0, %v289_v50  ;;  %v395_v55 = vld [vmem:[%s12478_s6 + $0x10] sm:$0xff]  ;;  %v396_v56 = vld [vmem:[%s12478_s6 + $0x18] sm:$0xff]  ;;  %v1680_v63 = vrot.slane %v12506_v46, 1 }
  0x7c   : > { %10370 = vmatpush3.bf16.msra.mxu0 %v11492_v18  ;;  %v526_v58 = vrot.slane %v524_v48, 7  ;;  %344 = vst [vmem:[#allocation2 + $0x14] sm:$0x1] %v343_v53  ;;  %291 = vst [vmem:[#allocation2 + $0x18] sm:$0x1] %v290_v54  ;;  %v10298_v59 = vpack.c.bf16 %v395_v55, %v395_v55  ;;  %v10299_v60 = vpack.c.bf16 %v396_v56, %v396_v56  ;;  %v397_v4 = vld [vmem:[%s12478_s6 + $0x20] sm:$0xff] }
  0x7d   : > { %10371 = vmatprep.subr.bf16.mxu0 %v11495_v21  ;;  %v534_v6 = vrot.slane %v532_v51, 7  ;;  %v12538_v36 = vpack.c.bf16 %v397_v4, %v397_v4  ;;  %v399_v37 = vld [vmem:[%s12478_s6 + $0x30] sm:$0xff]  ;;  %v292_v41 = vld [vmem:[#allocation2 + $0x24] sm:$0x1]  ;;  %v400_v53 = vld [vmem:[%s12478_s6 + $0x38] sm:$0xff] }
  0x7e   : > { %10482 = vmatpush3.bf16.msra.mxu1 %v11494_v20  ;;  %v11506_v57 = vld [vmem:[#allocation2] sm:$0xff]   ;;  %v529_v2 = vor.u32 %v527_v49, %v526_v58  ;;  %v530_v3 = vrot.slane %v526_v58, 4  ;;  %v541_v8 = vshrl.u32 %v10298_v59, 16  ;;  %v544_v9 = vshll.u32 %v10298_v59, 16  ;;  %v11512_v20 = vld [vmem:[#allocation7 + $0x100] sm:$0xff]   ;;  %v11538_v59 = vld [vmem:[#allocation7 + $0x150] sm:$0xff]  }
  0x7f   : > { %10483 = vmatprep.subr.bf16.mxu1 %v11497_v25  ;;  %v1280_v0 = vshrl.u32 %v11506_v57, 16  ;;  %v1282_v1 = vshll.u32 %v11506_v57, 16  ;;  %v549_v14 = vshrl.u32 %v10299_v60, 16  ;;  %v552_v15 = vshll.u32 %v10299_v60, 16  ;;  %v11509_v17 = vld [vmem:[#allocation2] sm:$0xff]  }
  0x80   : > { %10372 = vmatpush3.bf16.msra.mxu0 %v11496_v22  ;;  %v11507_v62 = vld [vmem:[#allocation2 + $0x8] ss:$0 sps:$4 sm:$0x11]   ;;  %v537_v18 = vor.u32 %v535_v52, %v534_v6  ;;  %v539_v19 = vrot.slane %v534_v6, 4  ;;  %v543_v21 = vrot.slane %v541_v8, 7  ;;  %v293_v43 = vsel %vm12489_vm3, 0, %v292_v41 }
  0x81   : > { %10373 = vmatprep.subr.bf16.mxu0 %v11499_v27  ;;  %v1287_v5 = vshll.u32 %v11507_v62, 16  ;;  %v846_v7 = vld [vmem:[#allocation2 + $0xc] sm:$0xf]  ;;  %v1284_v10 = vrot.slane %v1282_v1, 1  ;;  %v345_v22 = vld [vmem:[#allocation2 + $0x20] sm:$0x1]  ;;  %v12556_v57 = vpack.c.bf16 %v399_v37, %v399_v37 }
  0x82   : > { %10484 = vmatpush3.bf16.msra.mxu1 %v11498_v26  ;;  %v847_v12 = vsel %vm12516_vm8, %v529_v2, %v846_v7  ;;  %v12530_v13 = vld [vmem:[#allocation2 + $0x8] ss:$0 sps:$4 sm:$0x11]   ;;  %v551_v27 = vrot.slane %v549_v14, 7  ;;  %v547_v34 = vrot.slane %v543_v21, 4  ;;  %v11526_v45 = vld [vmem:[#allocation7 + $0x108] sm:$0xff]  }
  0x83   : > { %10485 = vmatprep.subr.bf16.mxu1 %v11501_v29  ;;  %v1289_v16 = vrot.slane %v1287_v5, 1  ;;  %848 = vst [vmem:[#allocation2 + $0xc] sm:$0xf] %v847_v12  ;;  %v1285_v25 = vor.u32 %v1284_v10, %v1280_v0  ;;  %v1681_v26 = vrot.slane %v12530_v13, 1  ;;  %v11524_v29 = vld [vmem:[#allocation7 + $0x148] sm:$0xff]   ;;  %v558_v50 = vshrl.u32 %v12538_v36, 16 }
  0x84   : > { %10374 = vmatpush3.bf16.msra.mxu0 %v11500_v28  ;;  %v346_v28 = vsel %vm12494_vm4, 0, %v345_v22  ;;  %v853_v35 = vld [vmem:[#allocation2 + $0x18] sm:$0xf]  ;;  %v554_v40 = vor.u32 %v552_v15, %v551_v27  ;;  %v348_v47 = vld [vmem:[#allocation2 + $0x2c] sm:$0x1]  ;;  %v556_v49 = vrot.slane %v551_v27, 4  ;;  %v10303_v0 = vpack.c.bf16 %v400_v53, %v400_v53 }
  0x85   : > { %10375 = vmatprep.subr.bf16.mxu0 %v11503_v31  ;;  %v538_v31 = vsel %vm12524_vm9, %v530_v3, %v537_v18  ;;  %347 = vst [vmem:[#allocation2 + $0x20] sm:$0x1] %v346_v28  ;;  %294 = vst [vmem:[#allocation2 + $0x24] sm:$0x1] %v293_v43  ;;  %v349_v51 = vsel %vm12494_vm4, 0, %v348_v47  ;;  %v560_v60 = vrot.slane %v558_v50, 7  ;;  %v1682_v7 = vsel %vm1679_vm10, %v1680_v63, %v1681_v26 }
  0x86   : > { %10486 = vmatpush3.bf16.msra.mxu1 %v11502_v30  ;;  %v398_v30 = vld [vmem:[%s12478_s6 + $0x28] sm:$0xff]  ;;  %849 = vst [vmem:[#allocation2 + $0x10] sm:$0xf] %v538_v31  ;;  %v555_v48 = vsel %vm12524_vm9, %v547_v34, %v554_v40  ;;  %v295_v52 = vld [vmem:[#allocation2 + $0x30] sm:$0x1]  ;;  %v561_v2 = vshll.u32 %v12538_v36, 16 }
  0x87   : > { %10487 = vmatprep.subr.bf16.mxu1 %v11505_v33  ;;  %v546_v33 = vor.u32 %v544_v9, %v543_v21  ;;  %v10301_v44 = vpack.c.bf16 %v398_v30, %v398_v30  ;;  %856 = vst [vmem:[#allocation2 + $0x1c] sm:$0xf] %v555_v48  ;;  %350 = vst [vmem:[#allocation2 + $0x2c] sm:$0x1] %v349_v51  ;;  %v296_v56 = vsel %vm12489_vm3, 0, %v295_v52  ;;  %v575_v3 = vshrl.u32 %v12556_v57, 16 }
  0x88   : > { %10376 = vmatpush3.bf16.msra.mxu0 %v11504_v32  ;;  %v850_v32 = vld [vmem:[#allocation2 + $0x14] sm:$0x1]  ;;  %v351_v58 = vld [vmem:[#allocation2 + $0x38] sm:$0x1]  ;;  %297 = vst [vmem:[#allocation2 + $0x30] sm:$0x1] %v296_v56 }
  0x89   : > { %10585 = vmatprep.subr.bf16.mxu0 %v11510_v39  ;;  %v851_v39 = vsel %vm12489_vm3, %v539_v19, %v850_v32  ;;  %v854_v42 = vsel %vm12516_vm8, %v546_v33, %v853_v35  ;;  %v566_v54 = vshrl.u32 %v10301_v44, 16  ;;  %v569_v55 = vshll.u32 %v10301_v44, 16  ;;  %v401_v27 = vld [vmem:[%s12478_s6 + $0x40] sm:$0xff]  ;;  %v402_v35 = vld [vmem:[%s12478_s6 + $0x48] sm:$0xff] }
  0x8a   : > { %10488 = vmatpush3.bf16.msra.mxu1 %v11508_v38  ;;  %v1290_v38 = vsel %vm1278_vm6, %v1285_v25, %v1289_v16  ;;  %852 = vst [vmem:[#allocation2 + $0x14] sm:$0x1] %v851_v39  ;;  %855 = vst [vmem:[#allocation2 + $0x18] sm:$0xf] %v854_v42  ;;  %v578_v4 = vshll.u32 %v12556_v57, 16  ;;  %v352_v5 = vsel %vm12494_vm4, 0, %v351_v58  ;;  %v10304_v47 = vpack.c.bf16 %v401_v27, %v401_v27 }
  0x8b   : > { %4120 = vmatprep.mubr.bf16.mxu0 %v1290_v38  ;;  %v12558_v62 = vrot.slane %v566_v54, 7  ;;  %v564_v9 = vrot.slane %v560_v60, 4  ;;  %353 = vst [vmem:[#allocation2 + $0x38] sm:$0x1] %v352_v5  ;;  %v583_v46 = vshrl.u32 %v10303_v0, 16  ;;  %v586_v15 = vshll.u32 %v10303_v0, 16 }
  0x8c   : > { %4121 = vmatmul.mubr.bf16.vlgmr.msra.gmra.mrb[0].mxu0 %v11509_v17  ;;  %v857_v1 = vld [vmem:[#allocation2 + $0x20] sm:$0x1]  ;;  %v577_v37 = vrot.slane %v575_v3, 7  ;;  %v860_v41 = vld [vmem:[#allocation2 + $0x24] sm:$0xf] }
  0x8d   : > { %10586 = vmatpush3.bf16.msra.mxu0 %v11512_v20  ;;  %v11511_v6 = vld [vmem:[#allocation2 + $0xc] sm:$0xff]   ;;  %v858_v8 = vsel %vm12489_vm3, %v556_v49, %v857_v1  ;;  %v571_v10 = vor.u32 %v569_v55, %v12558_v62  ;;  %v573_v30 = vrot.slane %v12558_v62, 4  ;;  %v585_v42 = vrot.slane %v583_v46, 7 }
  0x8e   : > { %10587 = vmatprep.subr.bf16.mxu0 %v11524_v29  ;;  %v11515_v12 = vld [vmem:[#allocation2 + $0xc] sm:$0xff]   ;;  %859 = vst [vmem:[#allocation2 + $0x20] sm:$0x1] %v858_v8  ;;  %4281 = vmatprep.mubr.bf16.mxu1 %v11511_v6  ;;  %v563_v29 = vor.u32 %v561_v2, %v560_v60  ;;  %v580_v50 = vor.u32 %v578_v4, %v577_v37  ;;  %v592_v2 = vshrl.u32 %v10304_v47, 16  ;;  %v298_v6 = vld [vmem:[#allocation2 + $0x3c] sm:$0x1] }
  0x8f   : > { %v572_v14 = vsel %vm12524_vm9, %v564_v9, %v571_v10  ;;  %4282 = vmatmul.mubr.bf16.vlgmr.msra.gmra.mrb[0].mxu1 %v1682_v7  ;;  %v1292_v63 = vshrl.u32 %v11515_v12, 16  ;;  %v1294_v16 = vshll.u32 %v11515_v12, 16  ;;  %v11519_v19 = vld [vmem:[#allocation2 + $0xc] sm:$0xfe]   ;;  %v588_v51 = vor.u32 %v586_v15, %v585_v42  ;;  %v864_v54 = vld [vmem:[#allocation2 + $0x2c] sm:$0x1] }
  0x90   : > { %863 = vst [vmem:[#allocation2 + $0x28] sm:$0xf] %v572_v14  ;;  %v11517_v22 = vld [vmem:[#allocation2 + $0xc] sm:$0xff]   ;;  %v1683_v28 = vrot.slane %v11519_v19, 1  ;;  %v861_v44 = vsel %vm12516_vm8, %v563_v29, %v860_v41  ;;  %v10305_v55 = vpack.c.bf16 %v402_v35, %v402_v35  ;;  %v865_v58 = vsel %vm12489_vm3, %v573_v30, %v864_v54  ;;  %v301_v54 = vld [vmem:[#allocation2 + $0x48] sm:$0x1] }
  0x91   : > { %10588 = vmatpush3.bf16.msra.mxu0 %v11526_v45  ;;  %v11516_v13 = vld [vmem:[#allocation2 + $0x14] ss:$0 sps:$4 sm:$0x11]   ;;  %v11518_v18 = vld [vmem:[#allocation2 + $0x18] sm:$0xff]   ;;  %v1296_v20 = vrot.slane %v1294_v16, 1  ;;  %v581_v45 = vrot.slane %v577_v37, 4 }
  0x92   : > { %10589 = vmatprep.subr.bf16.mxu0 %v11538_v59  ;;  %v1299_v17 = vshll.u32 %v11516_v13, 16  ;;  %4289 = vmatprep.mubr.bf16.mxu1 %v11518_v18  ;;  %v11520_v25 = vld [vmem:[#allocation2 + $0x14] ss:$0 sps:$4 sm:$0x11]   ;;  %v11521_v26 = vld [vmem:[#allocation2 + $0x18] sm:$0xff]   ;;  %v590_v60 = vrot.slane %v585_v42, 4 }
  0x93   : > { %v1297_v31 = vor.u32 %v1296_v20, %v1292_v63  ;;  %v1684_v32 = vrot.slane %v11520_v25, 1  ;;  %v1304_v33 = vshrl.u32 %v11521_v26, 16  ;;  %v1306_v34 = vshll.u32 %v11521_v26, 16  ;;  %862 = vst [vmem:[#allocation2 + $0x24] sm:$0xf] %v861_v44  ;;  %v11523_v56 = vld [vmem:[#allocation2 + $0x18] sm:$0xff]  }
  0x94   : > { %v1301_v21 = vrot.slane %v1299_v17, 1  ;;  %v11527_v49 = vld [vmem:[#allocation2 + $0x18] sm:$0xfe]   ;;  %v589_v59 = vsel %vm12524_vm9, %v581_v45, %v588_v51  ;;  %866 = vst [vmem:[#allocation2 + $0x2c] sm:$0x1] %v865_v58  ;;  %v594_v7 = vrot.slane %v592_v2, 7 }
  0x95   : > { %v11522_v36 = vld [vmem:[#allocation2 + $0x20] ss:$0 sps:$4 sm:$0x11]   ;;  %v1685_v39 = vsel %vm1679_vm10, %v1683_v28, %v1684_v32  ;;  %v1308_v40 = vrot.slane %v1306_v34, 1  ;;  %v1686_v57 = vrot.slane %v11527_v49, 1  ;;  %v299_v8 = vsel %vm12489_vm3, 0, %v298_v6 }
  0x96   : > { %v1302_v38 = vsel %vm1278_vm6, %v1297_v31, %v1301_v21  ;;  %v1311_v43 = vshll.u32 %v11522_v36, 16  ;;  %v11528_v53 = vld [vmem:[#allocation2 + $0x20] ss:$0 sps:$4 sm:$0x11]   ;;  %v867_v1 = vld [vmem:[#allocation2 + $0x30] sm:$0xf] }
  0x97   : > { %4128 = vmatprep.mubr.bf16.mxu0 %v1302_v38  ;;  %4290 = vmatmul.mubr.bf16.gmra.mrb[4].mxu1 %v1685_v39  ;;  %v1309_v48 = vor.u32 %v1308_v40, %v1304_v33  ;;  %v1687_v0 = vrot.slane %v11528_v53, 1  ;;  %870 = vst [vmem:[#allocation2 + $0x34] sm:$0xf] %v589_v59  ;;  %v868_v3 = vsel %vm12516_vm8, %v580_v50, %v867_v1  ;;  %v871_v4 = vld [vmem:[#allocation2 + $0x38] sm:$0x1]  ;;  %v600_v9 = vshrl.u32 %v10305_v55, 16 }
  0x98   : > { %4129 = vmatmul.mubr.bf16.gmra.mrb[4].mxu0 %v11517_v22  ;;  %v1313_v52 = vrot.slane %v1311_v43, 1  ;;  %869 = vst [vmem:[#allocation2 + $0x30] sm:$0xf] %v868_v3  ;;  %v872_v5 = vsel %vm12489_vm3, %v590_v60, %v871_v4  ;;  %v603_v10 = vshll.u32 %v10305_v55, 16  ;;  %v11540_v12 = vld [vmem:[#allocation7 + $0x110] sm:$0xff]   ;;  %v598_v15 = vrot.slane %v594_v7, 4 }
  0x99   : > { %873 = vst [vmem:[#allocation2 + $0x38] sm:$0x1] %v872_v5  ;;  %v1688_v14 = vsel %vm1679_vm10, %v1686_v57, %v1687_v0  ;;  %300 = vst [vmem:[#allocation2 + $0x3c] sm:$0x1] %v299_v8  ;;  %v12592_v63 = vrot.slane %v600_v9, 7  ;;  %v595_v17 = vshll.u32 %v10304_v47, 16  ;;  %10590 = vmatpush3.bf16.msra.mxu0 %v11540_v12 }
  0x9a   : > { %v1314_v62 = vsel %vm1278_vm6, %v1309_v48, %v1313_v52  ;;  %v11525_v13 = vld [vmem:[#allocation2 + $0x24] sm:$0xff]   ;;  %v302_v57 = vsel %vm12489_vm3, 0, %v301_v54  ;;  %v404_v60 = vld [vmem:[%s12478_s6 + $0x58] sm:$0xff] }
  0x9b   : > { %4136 = vmatprep.mubr.bf16.mxu0 %v1314_v62  ;;  %v11529_v46 = vld [vmem:[#allocation2 + $0x24] sm:$0xff]   ;;  %4297 = vmatprep.mubr.bf16.mxu1 %v11525_v13  ;;  %v11530_v18 = vld [vmem:[#allocation2 + $0x2c] ss:$0 sps:$4 sm:$0x11]   ;;  %v605_v20 = vor.u32 %v603_v10, %v12592_v63  ;;  %v597_v31 = vor.u32 %v595_v17, %v594_v7  ;;  %v607_v40 = vrot.slane %v12592_v63, 4  ;;  %v10307_v2 = vpack.c.bf16 %v404_v60, %v404_v60  ;;  %v11552_v6 = vld [vmem:[#allocation7 + $0x158] sm:$0xff]  }
  0x9c   : > { %v11533_v16 = vld [vmem:[#allocation2 + $0x24] sm:$0xfe]   ;;  %v1316_v19 = vshrl.u32 %v11529_v46, 16  ;;  %v1318_v21 = vshll.u32 %v11529_v46, 16  ;;  %v1323_v25 = vshll.u32 %v11530_v18, 16  ;;  %v405_v7 = vld [vmem:[%s12478_s6 + $0x60] sm:$0xff]  ;;  %10591 = vmatprep.subr.bf16.mxu0 %v11552_v6 }
  0x9d   : > { %v1689_v22 = vrot.slane %v11533_v16, 1  ;;  %v606_v27 = vsel %vm12524_vm9, %v598_v15, %v605_v20  ;;  %v11531_v29 = vld [vmem:[#allocation2 + $0x24] sm:$0xff]   ;;  %v11534_v30 = vld [vmem:[#allocation2 + $0x2c] ss:$0 sps:$4 sm:$0x11]   ;;  %v617_v8 = vshrl.u32 %v10307_v2, 16  ;;  %v12614_v16 = vpack.c.bf16 %v405_v7, %v405_v7 }
  0x9e   : > { %v1320_v28 = vrot.slane %v1318_v21, 1  ;;  %877 = vst [vmem:[#allocation2 + $0x40] sm:$0xf] %v606_v27  ;;  %v354_v32 = vld [vmem:[#allocation2 + $0x44] sm:$0x1]  ;;  %v1325_v33 = vrot.slane %v1323_v25, 1 }
  0x9f   : > { %4298 = vmatmul.mubr.bf16.gmra.mrb[8].mxu1 %v1688_v14  ;;  %v11532_v26 = vld [vmem:[#allocation2 + $0x30] sm:$0xff]   ;;  %v1690_v36 = vrot.slane %v11534_v30, 1  ;;  %v403_v47 = vld [vmem:[%s12478_s6 + $0x50] sm:$0xff]  ;;  %v355_v50 = vsel %vm12494_vm4, 0, %v354_v32  ;;  %303 = vst [vmem:[#allocation2 + $0x48] sm:$0x1] %v302_v57 }
  0xa0   : > { %4137 = vmatmul.mubr.bf16.gmra.mrb[8].mxu0 %v11523_v56  ;;  %4305 = vmatprep.mubr.bf16.mxu1 %v11532_v26  ;;  %v11535_v34 = vld [vmem:[#allocation2 + $0x30] sm:$0xff]   ;;  %v1321_v35 = vor.u32 %v1320_v28, %v1316_v19  ;;  %v11536_v37 = vld [vmem:[#allocation2 + $0x38] ss:$0 sps:$4 sm:$0x11]   ;;  %v874_v41 = vld [vmem:[#allocation2 + $0x3c] sm:$0xf]  ;;  %v10306_v51 = vpack.c.bf16 %v403_v47, %v403_v47 }
  0xa1   : > { %v1328_v38 = vshrl.u32 %v11535_v34, 16  ;;  %v1330_v39 = vshll.u32 %v11535_v34, 16  ;;  %v1691_v43 = vsel %vm1679_vm10, %v1689_v22, %v1690_v36  ;;  %v1335_v44 = vshll.u32 %v11536_v37, 16  ;;  %v11541_v49 = vld [vmem:[#allocation2 + $0x30] sm:$0xfe]   ;;  %v406_v12 = vld [vmem:[%s12478_s6 + $0x68] sm:$0xff] }
  0xa2   : > { %v1326_v42 = vsel %vm1278_vm6, %v1321_v35, %v1325_v33  ;;  %v875_v45 = vsel %vm12516_vm8, %v597_v31, %v874_v41  ;;  %v11542_v53 = vld [vmem:[#allocation2 + $0x38] ss:$0 sps:$4 sm:$0x11]   ;;  %356 = vst [vmem:[#allocation2 + $0x44] sm:$0x1] %v355_v50  ;;  %v1692_v56 = vrot.slane %v11541_v49, 1  ;;  %v10309_v20 = vpack.c.bf16 %v406_v12, %v406_v12 }
  0xa3   : > { %4144 = vmatprep.mubr.bf16.mxu0 %v1326_v42  ;;  %v1332_v48 = vrot.slane %v1330_v39, 1  ;;  %876 = vst [vmem:[#allocation2 + $0x3c] sm:$0xf] %v875_v45  ;;  %v1337_v52 = vrot.slane %v1335_v44, 1  ;;  %v11537_v58 = vld [vmem:[#allocation2 + $0x30] sm:$0xff]   ;;  %v1693_v59 = vrot.slane %v11542_v53, 1 }
  0xa4   : > { %v609_v62 = vshrl.u32 %v10306_v51, 16  ;;  %v612_v0 = vshll.u32 %v10306_v51, 16  ;;  %v357_v3 = vld [vmem:[#allocation2 + $0x50] sm:$0x1]  ;;  %v620_v9 = vshll.u32 %v10307_v2, 16  ;;  %v619_v19 = vrot.slane %v617_v8, 7 }
  0xa5   : > { %v1333_v55 = vor.u32 %v1332_v48, %v1328_v38  ;;  %v358_v5 = vsel %vm12494_vm4, 0, %v357_v3  ;;  %v304_v10 = vld [vmem:[#allocation2 + $0x54] sm:$0x1]  ;;  %v1694_v46 = vsel %vm1679_vm10, %v1692_v56, %v1693_v59  ;;  %v626_v32 = vshrl.u32 %v12614_v16, 16  ;;  %v11566_v37 = vld [vmem:[#allocation7 + $0x160] sm:$0xff]  }
  0xa6   : > { %v611_v4 = vrot.slane %v609_v62, 7  ;;  %359 = vst [vmem:[#allocation2 + $0x50] sm:$0x1] %v358_v5  ;;  %v11554_v13 = vld [vmem:[#allocation7 + $0x118] sm:$0xff]   ;;  %v305_v22 = vsel %vm12489_vm3, 0, %v304_v10  ;;  %v622_v25 = vor.u32 %v620_v9, %v619_v19  ;;  %v624_v26 = vrot.slane %v619_v19, 4 }
  0xa7   : > { %4306 = vmatmul.mubr.bf16.gmra.mrb[12].mxu1 %v1691_v43  ;;  %v1338_v1 = vsel %vm1278_vm6, %v1333_v55, %v1337_v52  ;;  %10592 = vmatpush3.bf16.msra.mxu0 %v11554_v13  ;;  %v881_v27 = vld [vmem:[#allocation2 + $0x48] sm:$0xf]  ;;  %306 = vst [vmem:[#allocation2 + $0x54] sm:$0x1] %v305_v22  ;;  %v408_v33 = vld [vmem:[%s12478_s6 + $0x78] sm:$0xff]  ;;  %v634_v35 = vshrl.u32 %v10309_v20, 16 }
  0xa8   : > { %4145 = vmatmul.mubr.bf16.gmra.mrb[12].mxu0 %v11531_v29  ;;  %v614_v15 = vor.u32 %v612_v0, %v611_v4  ;;  %v615_v63 = vrot.slane %v611_v4, 4  ;;  %v407_v29 = vld [vmem:[%s12478_s6 + $0x70] sm:$0xff]  ;;  %v637_v36 = vshll.u32 %v10309_v20, 16  ;;  %v360_v41 = vld [vmem:[#allocation2 + $0x5c] sm:$0x1]  ;;  %v10311_v43 = vpack.c.bf16 %v408_v33, %v408_v33  ;;  %10593 = vmatprep.subr.bf16.mxu0 %v11566_v37  ;;  %v410_v13 = vld [vmem:[%s12478_s6 + $0x88] sm:$0xff] }
  0xa9   : > { %4152 = vmatprep.mubr.bf16.mxu0 %v1338_v1  ;;  %v878_v17 = vld [vmem:[#allocation2 + $0x44] sm:$0x1]  ;;  %v10310_v42 = vpack.c.bf16 %v407_v29, %v407_v29  ;;  %v12629_v47 = vrot.slane %v634_v35, 7  ;;  %v361_v48 = vsel %vm12494_vm4, 0, %v360_v41  ;;  %v307_v49 = vld [vmem:[#allocation2 + $0x60] sm:$0x1]  ;;  %v10313_v33 = vpack.c.bf16 %v410_v13, %v410_v13 }
  0xaa   : > { %v11539_v14 = vld [vmem:[#allocation2 + $0x3c] sm:$0xff]   ;;  %v879_v21 = vsel %vm12489_vm3, %v607_v40, %v878_v17  ;;  %v882_v31 = vsel %vm12516_vm8, %v614_v15, %v881_v27  ;;  %v623_v34 = vsel %vm12524_vm9, %v615_v63, %v622_v25  ;;  %v628_v40 = vrot.slane %v626_v32, 7  ;;  %362 = vst [vmem:[#allocation2 + $0x5c] sm:$0x1] %v361_v48  ;;  %v363_v19 = vld [vmem:[#allocation2 + $0x68] sm:$0x1] }
  0xab   : > { %v11543_v18 = vld [vmem:[#allocation2 + $0x3c] sm:$0xff]   ;;  %4313 = vmatprep.mubr.bf16.mxu1 %v11539_v14  ;;  %880 = vst [vmem:[#allocation2 + $0x44] sm:$0x1] %v879_v21  ;;  %883 = vst [vmem:[#allocation2 + $0x48] sm:$0xf] %v882_v31  ;;  %v308_v52 = vsel %vm12489_vm3, 0, %v307_v49  ;;  %v639_v55 = vor.u32 %v637_v36, %v12629_v47 }
  0xac   : > { %v11547_v28 = vld [vmem:[#allocation2 + $0x3c] sm:$0xfe]   ;;  %v1342_v30 = vshll.u32 %v11543_v18, 16  ;;  %v1340_v38 = vshrl.u32 %v11543_v18, 16  ;;  %884 = vst [vmem:[#allocation2 + $0x4c] sm:$0xf] %v623_v34 }
  0xad   : > { %v885_v39 = vld [vmem:[#allocation2 + $0x50] sm:$0x1]  ;;  %v1695_v44 = vrot.slane %v11547_v28, 1  ;;  %v632_v51 = vrot.slane %v628_v40, 4  ;;  %v643_v53 = vshrl.u32 %v10310_v42, 16  ;;  %v629_v54 = vshll.u32 %v12614_v16, 16 }
  0xae   : > { %v886_v45 = vsel %vm12489_vm3, %v624_v26, %v885_v39  ;;  %v1344_v50 = vrot.slane %v1342_v30, 1  ;;  %v641_v56 = vrot.slane %v12629_v47, 4  ;;  %309 = vst [vmem:[#allocation2 + $0x60] sm:$0x1] %v308_v52  ;;  %v651_v57 = vshrl.u32 %v10311_v43, 16  ;;  %v11545_v4 = vld [vmem:[#allocation2 + $0x3c] sm:$0xff]  }
  0xaf   : > { %4314 = vmatmul.mubr.bf16.gmra.mrb[16].mxu1 %v1694_v46  ;;  %887 = vst [vmem:[#allocation2 + $0x50] sm:$0x1] %v886_v45  ;;  %v646_v60 = vshll.u32 %v10310_v42, 16  ;;  %v640_v0 = vsel %vm12524_vm9, %v632_v51, %v639_v55  ;;  %v645_v1 = vrot.slane %v643_v53, 7  ;;  %v409_v6 = vld [vmem:[%s12478_s6 + $0x80] sm:$0xff]  ;;  %v631_v9 = vor.u32 %v629_v54, %v628_v40  ;;  %v411_v47 = vld [vmem:[%s12478_s6 + $0x90] sm:$0xff] }
  0xb0   : > { %4153 = vmatmul.mubr.bf16.gmra.mrb[16].mxu0 %v11537_v58  ;;  %v11568_v58 = vld [vmem:[#allocation7 + $0x120] sm:$0xff]   ;;  %v1345_v2 = vor.u32 %v1344_v50, %v1340_v38  ;;  %891 = vst [vmem:[#allocation2 + $0x58] sm:$0xf] %v640_v0  ;;  %v12640_v5 = vrot.slane %v651_v57, 7  ;;  %v888_v18 = vld [vmem:[#allocation2 + $0x54] sm:$0xf]  ;;  %v12648_v25 = vpack.c.bf16 %v409_v6, %v409_v6  ;;  %v12665_v55 = vpack.c.bf16 %v411_v47, %v411_v47 }
  0xb1   : > { %10594 = vmatpush3.bf16.msra.mxu0 %v11568_v58  ;;  %v649_v15 = vrot.slane %v645_v1, 4  ;;  %v889_v21 = vsel %vm12516_vm8, %v631_v9, %v888_v18  ;;  %v654_v22 = vshll.u32 %v10311_v43, 16  ;;  %v648_v29 = vor.u32 %v646_v60, %v645_v1  ;;  %v892_v31 = vld [vmem:[#allocation2 + $0x5c] sm:$0x1]  ;;  %v310_v45 = vld [vmem:[#allocation2 + $0x6c] sm:$0x1] }
  0xb2   : > { %v11544_v59 = vld [vmem:[#allocation2 + $0x44] ss:$0 sps:$4 sm:$0x11]   ;;  %890 = vst [vmem:[#allocation2 + $0x54] sm:$0xf] %v889_v21  ;;  %v893_v38 = vsel %vm12489_vm3, %v641_v56, %v892_v31  ;;  %v364_v41 = vsel %vm12494_vm4, 0, %v363_v19 }
  0xb3   : > { %v11548_v62 = vld [vmem:[#allocation2 + $0x44] ss:$0 sps:$4 sm:$0x11]   ;;  %v1347_v3 = vshll.u32 %v11544_v59, 16  ;;  %v11546_v7 = vld [vmem:[#allocation2 + $0x48] sm:$0xff]   ;;  %v656_v32 = vor.u32 %v654_v22, %v12640_v5  ;;  %v660_v42 = vshrl.u32 %v12648_v25, 16 }
  0xb4   : > { %v1696_v8 = vrot.slane %v11548_v62, 1  ;;  %v11549_v12 = vld [vmem:[#allocation2 + $0x48] sm:$0xff]   ;;  %4321 = vmatprep.mubr.bf16.mxu1 %v11546_v7  ;;  %894 = vst [vmem:[#allocation2 + $0x5c] sm:$0x1] %v893_v38  ;;  %365 = vst [vmem:[#allocation2 + $0x68] sm:$0x1] %v364_v41 }
  0xb5   : > { %v1349_v10 = vrot.slane %v1347_v3, 1  ;;  %v1352_v16 = vshrl.u32 %v11549_v12, 16  ;;  %v1354_v17 = vshll.u32 %v11549_v12, 16  ;;  %v11555_v27 = vld [vmem:[#allocation2 + $0x48] sm:$0xfe]   ;;  %v657_v39 = vsel %vm12524_vm9, %v649_v15, %v656_v32  ;;  %v412_v3 = vld [vmem:[%s12478_s6 + $0x98] sm:$0xff] }
  0xb6   : > { %v1697_v14 = vsel %vm1679_vm10, %v1695_v44, %v1696_v8  ;;  %v11550_v46 = vld [vmem:[#allocation2 + $0x50] ss:$0 sps:$4 sm:$0x11]   ;;  %v11551_v35 = vld [vmem:[#allocation2 + $0x48] sm:$0xff]   ;;  %v1698_v36 = vrot.slane %v11555_v27, 1  ;;  %v311_v48 = vsel %vm12489_vm3, 0, %v310_v45  ;;  %v10315_v19 = vpack.c.bf16 %v412_v3, %v412_v3 }
  0xb7   : > { %v1350_v63 = vsel %vm1278_vm6, %v1345_v2, %v1349_v10  ;;  %4322 = vmatmul.mubr.bf16.gmra.mrb[20].mxu1 %v1697_v14  ;;  %v1359_v20 = vshll.u32 %v11550_v46, 16  ;;  %v1356_v26 = vrot.slane %v1354_v17, 1  ;;  %v11556_v28 = vld [vmem:[#allocation2 + $0x50] ss:$0 sps:$4 sm:$0x11]   ;;  %v662_v49 = vrot.slane %v660_v42, 7 }
  0xb8   : > { %4160 = vmatprep.mubr.bf16.mxu0 %v1350_v63  ;;  %v1699_v37 = vrot.slane %v11556_v28, 1  ;;  %v895_v40 = vld [vmem:[#allocation2 + $0x60] sm:$0xf]  ;;  %898 = vst [vmem:[#allocation2 + $0x64] sm:$0xf] %v657_v39  ;;  %v668_v50 = vshrl.u32 %v10313_v33, 16 }
  0xb9   : > { %4161 = vmatmul.mubr.bf16.gmra.mrb[20].mxu0 %v11545_v4  ;;  %v1361_v30 = vrot.slane %v1359_v20, 1  ;;  %v1357_v34 = vor.u32 %v1356_v26, %v1352_v16  ;;  %v896_v44 = vsel %vm12516_vm8, %v648_v29, %v895_v40  ;;  %v658_v51 = vrot.slane %v12640_v5, 4  ;;  %312 = vst [vmem:[#allocation2 + $0x6c] sm:$0x1] %v311_v48  ;;  %v366_v53 = vld [vmem:[#allocation2 + $0x74] sm:$0x1] }
  0xba   : > { %897 = vst [vmem:[#allocation2 + $0x60] sm:$0xf] %v896_v44  ;;  %v671_v52 = vshll.u32 %v10313_v33, 16  ;;  %v313_v54 = vld [vmem:[#allocation2 + $0x78] sm:$0x1]  ;;  %v1700_v57 = vsel %vm1679_vm10, %v1698_v36, %v1699_v37  ;;  %v663_v58 = vshll.u32 %v12648_v25, 16 }
  0xbb   : > { %v1362_v43 = vsel %vm1278_vm6, %v1357_v34, %v1361_v30  ;;  %v11553_v56 = vld [vmem:[#allocation2 + $0x54] sm:$0xff]   ;;  %v666_v60 = vrot.slane %v662_v49, 4  ;;  %v670_v62 = vrot.slane %v668_v50, 7  ;;  %v367_v0 = vsel %vm12494_vm4, 0, %v366_v53  ;;  %v899_v13 = vld [vmem:[#allocation2 + $0x68] sm:$0x1] }
  0xbc   : > { %4168 = vmatprep.mubr.bf16.mxu0 %v1362_v43  ;;  %v11557_v59 = vld [vmem:[#allocation2 + $0x54] sm:$0xff]   ;;  %4329 = vmatprep.mubr.bf16.mxu1 %v11553_v56  ;;  %368 = vst [vmem:[#allocation2 + $0x74] sm:$0x1] %v367_v0  ;;  %v314_v2 = vsel %vm12489_vm3, 0, %v313_v54  ;;  %v677_v4 = vshrl.u32 %v12665_v55, 16  ;;  %v900_v63 = vsel %vm12489_vm3, %v658_v51, %v899_v13  ;;  %v665_v16 = vor.u32 %v663_v58, %v662_v49  ;;  %v11580_v40 = vld [vmem:[#allocation7 + $0x168] sm:$0xff]  }
  0xbd   : > { %v11561_v1 = vld [vmem:[#allocation2 + $0x54] sm:$0xfe]   ;;  %v11558_v5 = vld [vmem:[#allocation2 + $0x5c] ss:$0 sps:$4 sm:$0x11]   ;;  %v1364_v6 = vshrl.u32 %v11557_v59, 16  ;;  %v673_v7 = vor.u32 %v671_v52, %v670_v62  ;;  %10595 = vmatprep.subr.bf16.mxu0 %v11580_v40 }
  0xbe   : > { %315 = vst [vmem:[#allocation2 + $0x78] sm:$0x1] %v314_v2  ;;  %v1366_v8 = vshll.u32 %v11557_v59, 16  ;;  %v1701_v9 = vrot.slane %v11561_v1, 1  ;;  %v1371_v10 = vshll.u32 %v11558_v5, 16  ;;  %v11559_v21 = vld [vmem:[#allocation2 + $0x54] sm:$0xff]  }
  0xbf   : > { %4330 = vmatmul.mubr.bf16.gmra.mrb[24].mxu1 %v1700_v57  ;;  %v674_v14 = vsel %vm12524_vm9, %v666_v60, %v673_v7  ;;  %v11562_v15 = vld [vmem:[#allocation2 + $0x5c] ss:$0 sps:$4 sm:$0x11]   ;;  %901 = vst [vmem:[#allocation2 + $0x68] sm:$0x1] %v900_v63  ;;  %v675_v25 = vrot.slane %v670_v62, 4 }
  0xc0   : > { %v1368_v46 = vrot.slane %v1366_v8, 1  ;;  %905 = vst [vmem:[#allocation2 + $0x70] sm:$0xf] %v674_v14  ;;  %v1373_v17 = vrot.slane %v1371_v10, 1  ;;  %v1702_v22 = vrot.slane %v11562_v15, 1  ;;  %v679_v26 = vrot.slane %v677_v4, 7 }
  0xc1   : > { %4169 = vmatmul.mubr.bf16.gmra.mrb[24].mxu0 %v11551_v35  ;;  %v11560_v12 = vld [vmem:[#allocation2 + $0x60] sm:$0xff]   ;;  %v902_v29 = vld [vmem:[#allocation2 + $0x6c] sm:$0xf]  ;;  %v680_v37 = vshll.u32 %v12665_v55, 16  ;;  %v685_v42 = vshrl.u32 %v10315_v19, 16  ;;  %v688_v43 = vshll.u32 %v10315_v19, 16 }
  0xc2   : > { %4337 = vmatprep.mubr.bf16.mxu1 %v11560_v12  ;;  %v11563_v18 = vld [vmem:[#allocation2 + $0x60] sm:$0xff]   ;;  %v1369_v20 = vor.u32 %v1368_v46, %v1364_v6  ;;  %v1703_v31 = vsel %vm1679_vm10, %v1701_v9, %v1702_v22  ;;  %v903_v32 = vsel %vm12516_vm8, %v665_v16, %v902_v29  ;;  %v683_v38 = vrot.slane %v679_v26, 4  ;;  %v413_v45 = vld [vmem:[%s12478_s6 + $0xa0] sm:$0xff] }
  0xc3   : > { %v1376_v27 = vshrl.u32 %v11563_v18, 16  ;;  %v1378_v28 = vshll.u32 %v11563_v18, 16  ;;  %v11569_v33 = vld [vmem:[#allocation2 + $0x60] sm:$0xfe]   ;;  %v906_v34 = vld [vmem:[#allocation2 + $0x74] sm:$0x1]  ;;  %v682_v47 = vor.u32 %v680_v37, %v679_v26  ;;  %v10316_v60 = vpack.c.bf16 %v413_v45, %v413_v45 }
  0xc4   : > { %v1374_v30 = vsel %vm1278_vm6, %v1369_v20, %v1373_v17  ;;  %904 = vst [vmem:[#allocation2 + $0x6c] sm:$0xf] %v903_v32  ;;  %v907_v36 = vsel %vm12489_vm3, %v675_v25, %v906_v34  ;;  %v1704_v41 = vrot.slane %v11569_v33, 1  ;;  %v369_v44 = vld [vmem:[#allocation2 + $0x80] sm:$0x1]  ;;  %v687_v49 = vrot.slane %v685_v42, 7 }
  0xc5   : > { %4176 = vmatprep.mubr.bf16.mxu0 %v1374_v30  ;;  %v1380_v35 = vrot.slane %v1378_v28, 1  ;;  %v909_v39 = vld [vmem:[#allocation2 + $0x78] sm:$0xf]  ;;  %908 = vst [vmem:[#allocation2 + $0x74] sm:$0x1] %v907_v36  ;;  %v370_v52 = vsel %vm12494_vm4, 0, %v369_v44 }
  0xc6   : > { %v11564_v48 = vld [vmem:[#allocation2 + $0x68] ss:$0 sps:$4 sm:$0x11]   ;;  %v910_v51 = vsel %vm12516_vm8, %v682_v47, %v909_v39  ;;  %v11565_v55 = vld [vmem:[#allocation2 + $0x60] sm:$0xff]   ;;  %v690_v56 = vor.u32 %v688_v43, %v687_v49  ;;  %371 = vst [vmem:[#allocation2 + $0x80] sm:$0x1] %v370_v52 }
  0xc7   : > { %4338 = vmatmul.mubr.bf16.gmra.mrb[28].mxu1 %v1703_v31  ;;  %v11570_v50 = vld [vmem:[#allocation2 + $0x68] ss:$0 sps:$4 sm:$0x11]   ;;  %v1381_v53 = vor.u32 %v1380_v35, %v1376_v27  ;;  %v1383_v54 = vshll.u32 %v11564_v48, 16  ;;  %911 = vst [vmem:[#allocation2 + $0x78] sm:$0xf] %v910_v51 }
  0xc8   : > { %v1705_v57 = vrot.slane %v11570_v50, 1  ;;  %v316_v58 = vld [vmem:[#allocation2 + $0x84] sm:$0x1]  ;;  %v691_v1 = vsel %vm12524_vm9, %v683_v38, %v690_v56  ;;  %v692_v6 = vrot.slane %v687_v49, 4  ;;  %v694_v13 = vshrl.u32 %v10316_v60, 16  ;;  %v416_v52 = vld [vmem:[%s12478_s6 + $0xb8] sm:$0xff] }
  0xc9   : > { %4177 = vmatmul.mubr.bf16.gmra.mrb[28].mxu0 %v11559_v21  ;;  %v414_v59 = vld [vmem:[%s12478_s6 + $0xa8] sm:$0xff]  ;;  %v1385_v62 = vrot.slane %v1383_v54, 1  ;;  %912 = vst [vmem:[#allocation2 + $0x7c] sm:$0xf] %v691_v1  ;;  %v317_v7 = vsel %vm12489_vm3, 0, %v316_v58  ;;  %v697_v15 = vshll.u32 %v10316_v60, 16  ;;  %v10319_v56 = vpack.c.bf16 %v416_v52, %v416_v52 }
  0xca   : > { %v1706_v2 = vsel %vm1679_vm10, %v1704_v41, %v1705_v57  ;;  %v10317_v8 = vpack.c.bf16 %v414_v59, %v414_v59  ;;  %318 = vst [vmem:[#allocation2 + $0x84] sm:$0x1] %v317_v7  ;;  %v696_v25 = vrot.slane %v694_v13, 7  ;;  %v11582_v28 = vld [vmem:[#allocation7 + $0x128] sm:$0xff]   ;;  %v415_v41 = vld [vmem:[%s12478_s6 + $0xb0] sm:$0xff] }
  0xcb   : > { %v11567_v0 = vld [vmem:[#allocation2 + $0x6c] sm:$0xff]   ;;  %v1386_v5 = vsel %vm1278_vm6, %v1381_v53, %v1385_v62  ;;  %10596 = vmatpush3.bf16.msra.mxu0 %v11582_v28  ;;  %v10318_v47 = vpack.c.bf16 %v415_v41, %v415_v41  ;;  %v375_v53 = vld [vmem:[#allocation2 + $0x98] sm:$0x1]  ;;  %v719_v1 = vshrl.u32 %v10319_v56, 16  ;;  %v378_v52 = vld [vmem:[#allocation2 + $0xa4] sm:$0x1] }
  0xcc   : > { %v11571_v3 = vld [vmem:[#allocation2 + $0x6c] sm:$0xff]   ;;  %v11572_v4 = vld [vmem:[#allocation2 + $0x74] ss:$0 sps:$4 sm:$0x11]   ;;  %4345 = vmatprep.mubr.bf16.mxu1 %v11567_v0  ;;  %4184 = vmatprep.mubr.bf16.mxu0 %v1386_v5  ;;  %v702_v26 = vshrl.u32 %v10317_v8, 16  ;;  %v705_v27 = vshll.u32 %v10317_v8, 16  ;;  %v699_v33 = vor.u32 %v697_v15, %v696_v25 }
  0xcd   : > { %v1388_v9 = vshrl.u32 %v11571_v3, 16  ;;  %v1390_v10 = vshll.u32 %v11571_v3, 16  ;;  %v1395_v12 = vshll.u32 %v11572_v4, 16  ;;  %v11575_v14 = vld [vmem:[#allocation2 + $0x6c] sm:$0xfe]   ;;  %v700_v34 = vrot.slane %v696_v25, 4 }
  0xce   : > { %v11576_v46 = vld [vmem:[#allocation2 + $0x74] ss:$0 sps:$4 sm:$0x11]   ;;  %v913_v17 = vld [vmem:[#allocation2 + $0x80] sm:$0x1]  ;;  %v11573_v18 = vld [vmem:[#allocation2 + $0x6c] sm:$0xff]  }
  0xcf   : > { %4346 = vmatmul.mubr.bf16.gmra.mrb[32].mxu1 %v1706_v2  ;;  %v1392_v63 = vrot.slane %v1390_v10, 1  ;;  %v1397_v16 = vrot.slane %v1395_v12, 1  ;;  %v1707_v19 = vrot.slane %v11575_v14, 1  ;;  %v1708_v20 = vrot.slane %v11576_v46, 1  ;;  %v372_v44 = vld [vmem:[#allocation2 + $0x8c] sm:$0x1] }
  0xd0   : > { %v914_v21 = vsel %vm12489_vm3, %v692_v6, %v913_v17  ;;  %v11574_v29 = vld [vmem:[#allocation2 + $0x78] sm:$0xff]   ;;  %v12702_v35 = vrot.slane %v702_v26, 7  ;;  %v319_v45 = vld [vmem:[#allocation2 + $0x90] sm:$0x1]  ;;  %v373_v50 = vsel %vm12494_vm4, 0, %v372_v44  ;;  %v711_v59 = vshrl.u32 %v10318_v47, 16 }
  0xd1   : > { %4185 = vmatmul.mubr.bf16.gmra.mrb[32].mxu0 %v11565_v55  ;;  %v1393_v22 = vor.u32 %v1392_v63, %v1388_v9  ;;  %915 = vst [vmem:[#allocation2 + $0x80] sm:$0x1] %v914_v21  ;;  %v1709_v30 = vsel %vm1679_vm10, %v1707_v19, %v1708_v20  ;;  %v11577_v32 = vld [vmem:[#allocation2 + $0x78] sm:$0xff]   ;;  %4353 = vmatprep.mubr.bf16.mxu1 %v11574_v29  ;;  %v916_v36 = vld [vmem:[#allocation2 + $0x84] sm:$0xf]  ;;  %v320_v51 = vsel %vm12489_vm3, 0, %v319_v45 }
  0xd2   : > { %v1400_v37 = vshrl.u32 %v11577_v32, 16  ;;  %v1402_v38 = vshll.u32 %v11577_v32, 16  ;;  %v707_v39 = vor.u32 %v705_v27, %v12702_v35  ;;  %v709_v40 = vrot.slane %v12702_v35, 4  ;;  %v11583_v43 = vld [vmem:[#allocation2 + $0x78] sm:$0xfe]   ;;  %v11594_v6 = vld [vmem:[#allocation7 + $0x170] sm:$0xff]  }
  0xd3   : > { %v1398_v31 = vsel %vm1278_vm6, %v1393_v22, %v1397_v16  ;;  %v917_v42 = vsel %vm12516_vm8, %v699_v33, %v916_v36  ;;  %v1710_v55 = vrot.slane %v11583_v43, 1  ;;  %374 = vst [vmem:[#allocation2 + $0x8c] sm:$0x1] %v373_v50  ;;  %321 = vst [vmem:[#allocation2 + $0x90] sm:$0x1] %v320_v51  ;;  %v11579_v62 = vld [vmem:[#allocation2 + $0x78] sm:$0xff]   ;;  %10597 = vmatprep.subr.bf16.mxu0 %v11594_v6 }
  0xd4   : > { %4192 = vmatprep.mubr.bf16.mxu0 %v1398_v31  ;;  %v1404_v48 = vrot.slane %v1402_v38, 1  ;;  %v708_v49 = vsel %vm12524_vm9, %v700_v34, %v707_v39  ;;  %918 = vst [vmem:[#allocation2 + $0x84] sm:$0xf] %v917_v42  ;;  %v714_v0 = vshll.u32 %v10318_v47, 16  ;;  %v722_v2 = vshll.u32 %v10319_v56, 16  ;;  %v417_v10 = vld [vmem:[%s12478_s6 + $0xc0] sm:$0xff] }
  0xd5   : > { %919 = vst [vmem:[#allocation2 + $0x88] sm:$0xf] %v708_v49  ;;  %v713_v4 = vrot.slane %v711_v59, 7  ;;  %v376_v5 = vsel %vm12494_vm4, 0, %v375_v53  ;;  %v721_v8 = vrot.slane %v719_v1, 7  ;;  %v418_v12 = vld [vmem:[%s12478_s6 + $0xc8] sm:$0xff]  ;;  %v10320_v16 = vpack.c.bf16 %v417_v10, %v417_v10 }
  0xd6   : > { %v1405_v57 = vor.u32 %v1404_v48, %v1400_v37  ;;  %377 = vst [vmem:[#allocation2 + $0x98] sm:$0x1] %v376_v5  ;;  %v322_v9 = vld [vmem:[#allocation2 + $0x9c] sm:$0x1]  ;;  %v10321_v21 = vpack.c.bf16 %v418_v12, %v418_v12  ;;  %v11596_v37 = vld [vmem:[#allocation7 + $0x130] sm:$0xff]   ;;  %v11601_v51 = vld [vmem:[#allocation7 + $0x1c8] sm:$0xff]  }
  0xd7   : > { %4354 = vmatmul.mubr.bf16.gmra.mrb[36].mxu1 %v1709_v30  ;;  %v717_v13 = vrot.slane %v713_v4, 4  ;;  %v323_v14 = vsel %vm12489_vm3, 0, %v322_v9  ;;  %v716_v15 = vor.u32 %v714_v0, %v713_v4  ;;  %v724_v63 = vor.u32 %v722_v2, %v721_v8  ;;  %10598 = vmatpush3.bf16.msra.mxu0 %v11596_v37  ;;  %v11599_v45 = vld [vmem:[#allocation7 + $0x1c0] sm:$0xff]   ;;  %v419_v12 = vld [vmem:[%s12478_s6 + $0xd0] sm:$0xff] }
  0xd8   : > { %v11578_v54 = vld [vmem:[#allocation2 + $0x80] ss:$0 sps:$4 sm:$0x11]   ;;  %324 = vst [vmem:[#allocation2 + $0x9c] sm:$0x1] %v323_v14  ;;  %v726_v20 = vrot.slane %v721_v8, 4  ;;  %10697 = vmatprep.subr.bf16.mxu1 %v11599_v45 }
  0xd9   : > { %4193 = vmatmul.mubr.bf16.gmra.mrb[36].mxu0 %v11573_v18  ;;  %v11584_v58 = vld [vmem:[#allocation2 + $0x80] ss:$0 sps:$4 sm:$0x11]   ;;  %v1407_v60 = vshll.u32 %v11578_v54, 16  ;;  %v725_v26 = vsel %vm12524_vm9, %v717_v13, %v724_v63  ;;  %v728_v27 = vshrl.u32 %v10320_v16, 16  ;;  %v731_v29 = vshll.u32 %v10320_v16, 16 }
  0xda   : > { %v1711_v3 = vrot.slane %v11584_v58, 1  ;;  %v920_v19 = vld [vmem:[#allocation2 + $0x8c] sm:$0x1]  ;;  %v923_v28 = vld [vmem:[#allocation2 + $0x90] sm:$0xf]  ;;  %v736_v35 = vshrl.u32 %v10321_v21, 16 }
  0xdb   : > { %v1409_v7 = vrot.slane %v1407_v60, 1  ;;  %v921_v22 = vsel %vm12489_vm3, %v709_v40, %v920_v19  ;;  %926 = vst [vmem:[#allocation2 + $0x94] sm:$0xf] %v725_v26  ;;  %v924_v31 = vsel %vm12516_vm8, %v716_v15, %v923_v28  ;;  %v730_v34 = vrot.slane %v728_v27, 7  ;;  %v11600_v47 = vld [vmem:[#allocation7 + $0x180] sm:$0xff]   ;;  %v11604_v8 = vld [vmem:[#allocation7 + $0x188] sm:$0xff]  }
  0xdc   : > { %v11581_v17 = vld [vmem:[#allocation2 + $0x84] sm:$0xff]   ;;  %v1712_v18 = vsel %vm1679_vm10, %v1710_v55, %v1711_v3  ;;  %922 = vst [vmem:[#allocation2 + $0x8c] sm:$0x1] %v921_v22  ;;  %925 = vst [vmem:[#allocation2 + $0x90] sm:$0xf] %v924_v31  ;;  %v739_v36 = vshll.u32 %v10321_v21, 16  ;;  %10698 = vmatpush3.bf16.msra.mxu1 %v11600_v47  ;;  %v10322_v15 = vpack.c.bf16 %v419_v12, %v419_v12 }
  0xdd   : > { %v1410_v46 = vsel %vm1278_vm6, %v1405_v57, %v1409_v7  ;;  %v11585_v25 = vld [vmem:[#allocation2 + $0x84] sm:$0xff]   ;;  %4361 = vmatprep.mubr.bf16.mxu1 %v11581_v17  ;;  %v927_v33 = vld [vmem:[#allocation2 + $0x98] sm:$0x1]  ;;  %v733_v41 = vor.u32 %v731_v29, %v730_v34  ;;  %v734_v42 = vrot.slane %v730_v34, 4  ;;  %v738_v43 = vrot.slane %v736_v35, 7  ;;  %10699 = vmatprep.subr.bf16.mxu1 %v11601_v51  ;;  %v11611_v47 = vld [vmem:[#allocation7 + $0x1d8] sm:$0xff]  }
  0xde   : > { %4200 = vmatprep.mubr.bf16.mxu0 %v1410_v46  ;;  %v1414_v30 = vshll.u32 %v11585_v25, 16  ;;  %v11589_v32 = vld [vmem:[#allocation2 + $0x84] sm:$0xfe]   ;;  %v1412_v38 = vshrl.u32 %v11585_v25, 16  ;;  %v928_v40 = vsel %vm12489_vm3, %v726_v20, %v927_v33  ;;  %v379_v54 = vsel %vm12494_vm4, 0, %v378_v52 }
  0xdf   : > { %4362 = vmatmul.mubr.bf16.gmra.mrb[40].mxu1 %v1712_v18  ;;  %929 = vst [vmem:[#allocation2 + $0x98] sm:$0x1] %v928_v40  ;;  %v930_v44 = vld [vmem:[#allocation2 + $0x9c] sm:$0xf]  ;;  %v1713_v48 = vrot.slane %v11589_v32, 1  ;;  %v741_v49 = vor.u32 %v739_v36, %v738_v43  ;;  %v11587_v58 = vld [vmem:[#allocation2 + $0x84] sm:$0xff]  }
  0xe0   : > { %v1416_v39 = vrot.slane %v1414_v30, 1  ;;  %v931_v50 = vsel %vm12516_vm8, %v733_v41, %v930_v44  ;;  %380 = vst [vmem:[#allocation2 + $0xa4] sm:$0x1] %v379_v54  ;;  %v743_v5 = vrot.slane %v738_v43, 4  ;;  %10700 = vmatpush3.bf16.msra.mxu1 %v11604_v8  ;;  %v745_v25 = vshrl.u32 %v10322_v15, 16  ;;  %v420_v30 = vld [vmem:[%s12478_s6 + $0xd8] sm:$0xff] }
  0xe1   : > { %4201 = vmatmul.mubr.bf16.gmra.mrb[40].mxu0 %v11579_v62  ;;  %932 = vst [vmem:[#allocation2 + $0x9c] sm:$0xf] %v931_v50  ;;  %v742_v55 = vsel %vm12524_vm9, %v734_v42, %v741_v49  ;;  %v325_v29 = vld [vmem:[#allocation2 + $0xa8] sm:$0x1]  ;;  %v10323_v33 = vpack.c.bf16 %v420_v30, %v420_v30  ;;  %v748_v37 = vshll.u32 %v10322_v15, 16  ;;  %v11618_v8 = vld [vmem:[#allocation7 + $0x138] sm:$0xff]  }
  0xe2   : > { %v1417_v56 = vor.u32 %v1416_v39, %v1412_v38  ;;  %933 = vst [vmem:[#allocation2 + $0xa0] sm:$0xf] %v742_v55  ;;  %v747_v31 = vrot.slane %v745_v25, 7  ;;  %v326_v32 = vsel %vm12489_vm3, 0, %v325_v29  ;;  %v11609_v34 = vld [vmem:[#allocation7 + $0x1d0] sm:$0xff]   ;;  %v11622_v15 = vld [vmem:[#allocation7 + $0x1a0] sm:$0xff]  }
  0xe3   : > { %v11586_v53 = vld [vmem:[#allocation2 + $0x8c] ss:$0 sps:$4 sm:$0x11]   ;;  %v11588_v59 = vld [vmem:[#allocation2 + $0x90] sm:$0xff]   ;;  %327 = vst [vmem:[#allocation2 + $0xa8] sm:$0x1] %v326_v32  ;;  %10701 = vmatprep.subr.bf16.mxu1 %v11609_v34 }
  0xe4   : > { %v1419_v57 = vshll.u32 %v11586_v53, 16  ;;  %v11590_v60 = vld [vmem:[#allocation2 + $0x8c] ss:$0 sps:$4 sm:$0x11]   ;;  %v11591_v62 = vld [vmem:[#allocation2 + $0x90] sm:$0xff]   ;;  %4369 = vmatprep.mubr.bf16.mxu1 %v11588_v59  ;;  %v753_v38 = vshrl.u32 %v10323_v33, 16  ;;  %v750_v44 = vor.u32 %v748_v37, %v747_v31 }
  0xe5   : > { %v1714_v2 = vrot.slane %v11590_v60, 1  ;;  %v1424_v3 = vshrl.u32 %v11591_v62, 16  ;;  %v1426_v4 = vshll.u32 %v11591_v62, 16  ;;  %v11597_v14 = vld [vmem:[#allocation2 + $0x90] sm:$0xfe]   ;;  %v756_v39 = vshll.u32 %v10323_v33, 16 }
  0xe6   : > { %v1421_v0 = vrot.slane %v1419_v57, 1  ;;  %v11592_v1 = vld [vmem:[#allocation2 + $0x98] ss:$0 sps:$4 sm:$0x11]   ;;  %v1716_v18 = vrot.slane %v11597_v14, 1  ;;  %v11593_v26 = vld [vmem:[#allocation2 + $0x90] sm:$0xff]  }
  0xe7   : > { %v1431_v7 = vshll.u32 %v11592_v1, 16  ;;  %v1715_v9 = vsel %vm1679_vm10, %v1713_v48, %v1714_v2  ;;  %v1428_v10 = vrot.slane %v1426_v4, 1  ;;  %v11598_v46 = vld [vmem:[#allocation2 + $0x98] ss:$0 sps:$4 sm:$0x11]   ;;  %v751_v40 = vrot.slane %v747_v31, 4 }
  0xe8   : > { %v1422_v6 = vsel %vm1278_vm6, %v1417_v56, %v1421_v0  ;;  %4370 = vmatmul.mubr.bf16.gmra.mrb[44].mxu1 %v1715_v9  ;;  %v934_v17 = vld [vmem:[#allocation2 + $0xa4] sm:$0x1]  ;;  %v1717_v19 = vrot.slane %v11598_v46, 1  ;;  %v11610_v41 = vld [vmem:[#allocation7 + $0x190] sm:$0xff]   ;;  %v755_v43 = vrot.slane %v753_v38, 7  ;;  %v11616_v60 = vld [vmem:[#allocation7 + $0x178] sm:$0xff]  }
  0xe9   : > { %4208 = vmatprep.mubr.bf16.mxu0 %v1422_v6  ;;  %v1433_v13 = vrot.slane %v1431_v7, 1  ;;  %v1429_v63 = vor.u32 %v1428_v10, %v1424_v3  ;;  %v11595_v16 = vld [vmem:[#allocation2 + $0x9c] sm:$0xff]   ;;  %v935_v20 = vsel %vm12489_vm3, %v743_v5, %v934_v17  ;;  %10702 = vmatpush3.bf16.msra.mxu1 %v11610_v41  ;;  %v381_v52 = vld [vmem:[#allocation2 + $0xb0] sm:$0x1]  ;;  %v328_v62 = vld [vmem:[#allocation2 + $0xb4] sm:$0x1] }
  0xea   : > { %4209 = vmatmul.mubr.bf16.gmra.mrb[44].mxu0 %v11587_v58  ;;  %4377 = vmatprep.mubr.bf16.mxu1 %v11595_v16  ;;  %936 = vst [vmem:[#allocation2 + $0xa4] sm:$0x1] %v935_v20  ;;  %v11602_v22 = vld [vmem:[#allocation2 + $0x9c] sm:$0xff]   ;;  %v1718_v27 = vsel %vm1679_vm10, %v1716_v18, %v1717_v19  ;;  %v758_v50 = vor.u32 %v756_v39, %v755_v43  ;;  %v382_v54 = vsel %vm12494_vm4, 0, %v381_v52  ;;  %v937_v57 = vld [vmem:[#allocation2 + $0xa8] sm:$0xf] }
  0xeb   : > { %v1434_v21 = vsel %vm1278_vm6, %v1429_v63, %v1433_v13  ;;  %v1438_v28 = vshll.u32 %v11602_v22, 16  ;;  %v1436_v35 = vshrl.u32 %v11602_v22, 16  ;;  %v11607_v45 = vld [vmem:[#allocation2 + $0x9c] sm:$0xfe]   ;;  %10703 = vmatprep.subr.bf16.mxu1 %v11611_v47  ;;  %383 = vst [vmem:[#allocation2 + $0xb0] sm:$0x1] %v382_v54  ;;  %v938_v59 = vsel %vm12516_vm8, %v750_v44, %v937_v57  ;;  %10599 = vmatprep.subr.bf16.mxu0 %v11616_v60 }
  0xec   : > { %4216 = vmatprep.mubr.bf16.mxu0 %v1434_v21  ;;  %v11605_v53 = vld [vmem:[#allocation2 + $0x9c] sm:$0xff]   ;;  %v759_v56 = vsel %vm12524_vm9, %v751_v40, %v758_v50  ;;  %v11614_v58 = vld [vmem:[#allocation7 + $0x198] sm:$0xff]   ;;  %939 = vst [vmem:[#allocation2 + $0xa8] sm:$0xf] %v938_v59  ;;  %v1719_v1 = vrot.slane %v11607_v45, 1  ;;  %v329_v2 = vsel %vm12489_vm3, 0, %v328_v62  ;;  %10600 = vmatpush3.bf16.msra.mxu0 %v11618_v8 }
  0xed   : > { %v1440_v36 = vrot.slane %v1438_v28, 1  ;;  %940 = vst [vmem:[#allocation2 + $0xac] sm:$0xf] %v759_v56  ;;  %10704 = vmatpush3.bf16.msra.mxu1 %v11614_v58  ;;  %v421_v3 = vld [vmem:[%s12478_s6 + $0xe0] sm:$0xff]  ;;  %v422_v4 = vld [vmem:[%s12478_s6 + $0xe8] sm:$0xff]  ;;  %v760_v5 = vrot.slane %v755_v43, 4 }
  0xee   : > { %330 = vst [vmem:[#allocation2 + $0xb4] sm:$0x1] %v329_v2  ;;  %v10324_v6 = vpack.c.bf16 %v421_v3, %v421_v3  ;;  %v10325_v7 = vpack.c.bf16 %v422_v4, %v422_v4  ;;  %v11621_v10 = vld [vmem:[#allocation7 + $0x1e0] sm:$0xff]   ;;  %v11623_v18 = vld [vmem:[#allocation7 + $0x1e8] sm:$0xff]   ;;  %v423_v38 = vld [vmem:[%s12478_s6 + $0xf0] sm:$0xff] }
  0xef   : > { %v1441_v48 = vor.u32 %v1440_v36, %v1436_v35  ;;  %10705 = vmatprep.subr.bf16.mxu1 %v11621_v10  ;;  %v11626_v19 = vld [vmem:[#allocation7 + $0x1a8] sm:$0xff]   ;;  %v384_v36 = vld [vmem:[#allocation2 + $0xbc] sm:$0x1]  ;;  %v10326_v43 = vpack.c.bf16 %v423_v38, %v423_v38  ;;  %v11631_v44 = vld [vmem:[#allocation7 + $0x1f0] sm:$0xff]  }
  0xf0   : > { %4378 = vmatmul.mubr.bf16.gmra.mrb[48].mxu1 %v1718_v27  ;;  %v762_v12 = vshrl.u32 %v10324_v6, 16  ;;  %v765_v13 = vshll.u32 %v10324_v6, 16  ;;  %v770_v14 = vshrl.u32 %v10325_v7, 16  ;;  %v773_v46 = vshll.u32 %v10325_v7, 16  ;;  %v331_v41 = vld [vmem:[#allocation2 + $0xc0] sm:$0x1] }
  0xf1   : > { %v11603_v42 = vld [vmem:[#allocation2 + $0xa4] ss:$0 sps:$4 sm:$0x11]   ;;  %10706 = vmatpush3.bf16.msra.mxu1 %v11622_v15  ;;  %v385_v37 = vsel %vm12494_vm4, 0, %v384_v36  ;;  %v332_v45 = vsel %vm12489_vm3, 0, %v331_v41  ;;  %v779_v50 = vshrl.u32 %v10326_v43, 16 }
  0xf2   : > { %4217 = vmatmul.mubr.bf16.gmra.mrb[48].mxu0 %v11593_v26  ;;  %v1443_v49 = vshll.u32 %v11603_v42, 16  ;;  %v11608_v51 = vld [vmem:[#allocation2 + $0xa4] ss:$0 sps:$4 sm:$0x11]   ;;  %v941_v63 = vld [vmem:[#allocation2 + $0xb0] sm:$0x1]  ;;  %10707 = vmatprep.subr.bf16.mxu1 %v11623_v18 }
  0xf3   : > { %v1720_v9 = vrot.slane %v11608_v51, 1  ;;  %v764_v16 = vrot.slane %v762_v12, 7  ;;  %v12759_v17 = vrot.slane %v770_v14, 7  ;;  %v942_v20 = vsel %vm12489_vm3, %v760_v5, %v941_v63  ;;  %386 = vst [vmem:[#allocation2 + $0xbc] sm:$0x1] %v385_v37  ;;  %v424_v42 = vld [vmem:[%s12478_s6 + $0xf8] sm:$0xff] }
  0xf4   : > { %v1445_v55 = vrot.slane %v1443_v49, 1  ;;  %v11606_v21 = vld [vmem:[#allocation2 + $0xa8] sm:$0xff]   ;;  %943 = vst [vmem:[#allocation2 + $0xb0] sm:$0x1] %v942_v20  ;;  %v10327_v47 = vpack.c.bf16 %v424_v42, %v424_v42  ;;  %333 = vst [vmem:[#allocation2 + $0xc0] sm:$0x1] %v332_v45 }
  0xf5   : > { %v1721_v22 = vsel %vm1679_vm10, %v1719_v1, %v1720_v9  ;;  %v767_v25 = vor.u32 %v765_v13, %v764_v16  ;;  %v768_v26 = vrot.slane %v764_v16, 4  ;;  %v775_v27 = vor.u32 %v773_v46, %v12759_v17  ;;  %v11612_v28 = vld [vmem:[#allocation2 + $0xa8] sm:$0xff]   ;;  %4385 = vmatprep.mubr.bf16.mxu1 %v11606_v21  ;;  %v944_v31 = vld [vmem:[#allocation2 + $0xb4] sm:$0xf]  ;;  %10708 = vmatpush3.bf16.msra.mxu1 %v11626_v19  ;;  %v11639_v19 = vld [vmem:[#allocation7 + $0x200] sm:$0xff]  }
  0xf6   : > { %v1446_v0 = vsel %vm1278_vm6, %v1441_v48, %v1445_v55  ;;  %v777_v29 = vrot.slane %v12759_v17, 4  ;;  %v1448_v32 = vshrl.u32 %v11612_v28, 16  ;;  %v1450_v33 = vshll.u32 %v11612_v28, 16  ;;  %v11619_v35 = vld [vmem:[#allocation2 + $0xa8] sm:$0xfe]   ;;  %10709 = vmatprep.subr.bf16.mxu1 %v11631_v44  ;;  %v11633_v60 = vld [vmem:[#allocation7 + $0x1f8] sm:$0xff]   ;;  %11305 = vmatprep.subr.bf16.mxu0 %v11639_v19 }
  0xf7   : > { %4224 = vmatprep.mubr.bf16.mxu0 %v1446_v0  ;;  %v776_v30 = vsel %vm12524_vm9, %v768_v26, %v775_v27  ;;  %v945_v34 = vsel %vm12516_vm8, %v767_v25, %v944_v31  ;;  %v1722_v40 = vrot.slane %v11619_v35, 1  ;;  %v11632_v48 = vld [vmem:[#allocation7 + $0x1b0] sm:$0xff]   ;;  %v781_v56 = vrot.slane %v779_v50, 7  ;;  %v11636_v15 = vld [vmem:[#allocation7 + $0x1b8] sm:$0xff]  }
  0xf8   : > { %4386 = vmatmul.mubr.bf16.gmra.mrb[52].mxu1 %v1721_v22  ;;  %947 = vst [vmem:[#allocation2 + $0xb8] sm:$0xf] %v776_v30  ;;  %946 = vst [vmem:[#allocation2 + $0xb4] sm:$0xf] %v945_v34  ;;  %v1452_v39 = vrot.slane %v1450_v33, 1  ;;  %v11615_v55 = vld [vmem:[#allocation2 + $0xa8] sm:$0xff]  }
  0xf9   : > { %10710 = vmatpush3.bf16.msra.mxu1 %v11632_v48  ;;  %v787_v57 = vshrl.u32 %v10327_v47, 16  ;;  %v790_v58 = vshll.u32 %v10327_v47, 16  ;;  %v785_v7 = vrot.slane %v781_v56, 4  ;;  %v11637_v16 = vld [vmem:[#allocation2 + $0xc] sm:$0xff]   ;;  %v11640_v34 = vld [vmem:[#allocation2 + $0x18] sm:$0xff]  }
  0xfa   : > { %4225 = vmatmul.mubr.bf16.gmra.mrb[52].mxu0 %v11605_v53  ;;  %v1453_v51 = vor.u32 %v1452_v39, %v1448_v32  ;;  %v782_v53 = vshll.u32 %v10326_v43, 16  ;;  %v948_v3 = vld [vmem:[#allocation2 + $0xbc] sm:$0x1]  ;;  %10711 = vmatprep.subr.bf16.mxu1 %v11633_v60  ;;  %v11634_v20 = vld [vmem:[#allocation2 + $0xc] sm:$0xfe]   ;;  %v2081_v22 = vshrl.u32 %v11637_v16, 16 }
  0xfb   : > { %v11613_v49 = vld [vmem:[#allocation2 + $0xb0] ss:$0 sps:$4 sm:$0x11]   ;;  %v949_v6 = vsel %vm12489_vm3, %v777_v29, %v948_v3  ;;  %v12780_v8 = vrot.slane %v787_v57, 7  ;;  %v951_v10 = vld [vmem:[#allocation2 + $0xc0] sm:$0xf] }
  0xfc   : > { %v11620_v52 = vld [vmem:[#allocation2 + $0xb0] ss:$0 sps:$4 sm:$0x11]   ;;  %v1455_v54 = vshll.u32 %v11613_v49, 16  ;;  %v784_v1 = vor.u32 %v782_v53, %v781_v56  ;;  %950 = vst [vmem:[#allocation2 + $0xbc] sm:$0x1] %v949_v6 }
  0xfd   : > { %v1723_v59 = vrot.slane %v11620_v52, 1  ;;  %v792_v13 = vor.u32 %v790_v58, %v12780_v8  ;;  %10712 = vmatpush3.bf16.msra.mxu1 %v11636_v15  ;;  %v11635_v21 = vld [vmem:[#allocation2 + $0x14] ss:$0 sps:$4 sm:$0x11]   ;;  %v2480_v25 = vrot.slane %v11634_v20, 1  ;;  %v2083_v26 = vshll.u32 %v11637_v16, 16 }
  0xfe   : > { %v1457_v62 = vrot.slane %v1455_v54, 1  ;;  %v952_v14 = vsel %vm12516_vm8, %v784_v1, %v951_v10  ;;  %v2481_v28 = vrot.slane %v11635_v21, 1  ;;  %v11638_v36 = vld [vmem:[#allocation2 + $0x14] ss:$0 sps:$4 sm:$0x11]   ;;  %v2882_v41 = vshrl.u32 %v11640_v34, 16 }
  0xff   : > { %v11617_v0 = vld [vmem:[#allocation2 + $0xb4] sm:$0xff]   ;;  %v1724_v2 = vsel %vm1679_vm10, %v1722_v40, %v1723_v59  ;;  %953 = vst [vmem:[#allocation2 + $0xc0] sm:$0xf] %v952_v14  ;;  %v793_v17 = vsel %vm12524_vm9, %v785_v7, %v792_v13  ;;  %v2085_v30 = vrot.slane %v2083_v26, 1  ;;  %v2088_v40 = vshll.u32 %v11638_v36, 16  ;;  %v11652_v10 = vld [vmem:[#allocation2 + $0x24] sm:$0xff]  }
 0x100   : > { %v11624_v4 = vld [vmem:[#allocation2 + $0xb4] sm:$0xff]   ;;  %v1458_v5 = vsel %vm1278_vm6, %v1453_v51, %v1457_v62  ;;  %4393 = vmatprep.mubr.bf16.mxu1 %v11617_v0  ;;  %954 = vst [vmem:[#allocation2 + $0xc4] sm:$0xf] %v793_v17  ;;  %v2482_v43 = vsel %vm1679_vm10, %v2480_v25, %v2481_v28  ;;  %v11641_v44 = vld [vmem:[#allocation2 + $0x20] ss:$0 sps:$4 sm:$0x11]  }
 0x101   : > { %4232 = vmatprep.mubr.bf16.mxu0 %v1458_v5  ;;  %4394 = vmatmul.mubr.bf16.gmra.mrb[56].mxu1 %v1724_v2  ;;  %v1462_v9 = vshll.u32 %v11624_v4, 16  ;;  %v1460_v12 = vshrl.u32 %v11624_v4, 16  ;;  %v11629_v46 = vld [vmem:[#allocation2 + $0xb4] sm:$0xfe]   ;;  %v2884_v45 = vshll.u32 %v11640_v34, 16  ;;  %v2090_v47 = vrot.slane %v2088_v40, 1 }
 0x102   : > { %4233 = vmatmul.mubr.bf16.gmra.mrb[56].mxu0 %v11615_v55  ;;  %v1725_v18 = vrot.slane %v11629_v46, 1  ;;  %v11627_v33 = vld [vmem:[#allocation2 + $0xb4] sm:$0xff]   ;;  %v2889_v49 = vshll.u32 %v11641_v44, 16  ;;  %v2086_v50 = vor.u32 %v2085_v30, %v2081_v22  ;;  %v11644_v55 = vld [vmem:[#allocation2 + $0x20] ss:$0 sps:$4 sm:$0x11]  }
 0x103   : > { %v1464_v63 = vrot.slane %v1462_v9, 1  ;;  %v11625_v27 = vld [vmem:[#allocation2 + $0xbc] ss:$0 sps:$4 sm:$0x11]   ;;  %v2886_v48 = vrot.slane %v2884_v45, 1  ;;  %v2484_v59 = vrot.slane %v11644_v55, 1 }
 0x104   : > { %v11630_v29 = vld [vmem:[#allocation2 + $0xbc] ss:$0 sps:$4 sm:$0x11]   ;;  %v1467_v32 = vshll.u32 %v11625_v27, 16  ;;  %v2891_v54 = vrot.slane %v2889_v49, 1  ;;  %v2091_v62 = vsel %vm1278_vm6, %v2086_v50, %v2090_v47  ;;  %v11647_v2 = vld [vmem:[#allocation2 + $0x24] sm:$0xff]  }
 0x105   : > { %v1465_v31 = vor.u32 %v1464_v63, %v1460_v12  ;;  %v1726_v35 = vrot.slane %v11630_v29, 1  ;;  %v11642_v51 = vld [vmem:[#allocation2 + $0x18] sm:$0xff]   ;;  %v2887_v53 = vor.u32 %v2886_v48, %v2882_v41  ;;  %v11646_v60 = vld [vmem:[#allocation2 + $0x20] ss:$0 sps:$4 sm:$0x11]   ;;  %v2894_v7 = vshrl.u32 %v11647_v2, 16 }
 0x106   : > { %v1469_v37 = vrot.slane %v1467_v32, 1  ;;  %v11643_v52 = vld [vmem:[#allocation2 + $0x18] sm:$0xfe]   ;;  %v2100_v4 = vshll.u32 %v11646_v60, 16  ;;  %v2896_v9 = vshll.u32 %v11647_v2, 16  ;;  %v11649_v15 = vld [vmem:[#allocation2 + $0x24] sm:$0xff]  }
 0x107   : > { %v11628_v38 = vld [vmem:[#allocation2 + $0xc0] sm:$0xff]   ;;  %v1727_v39 = vsel %vm1679_vm10, %v1725_v18, %v1726_v35  ;;  %v2483_v56 = vrot.slane %v11643_v52, 1  ;;  %v11645_v57 = vld [vmem:[#allocation2 + $0x18] sm:$0xff]   ;;  %v2892_v58 = vsel %vm1278_vm6, %v2887_v53, %v2891_v54  ;;  %v11648_v5 = vld [vmem:[#allocation2 + $0x2c] ss:$0 sps:$4 sm:$0x11]  }
 0x108   : > { %v1470_v42 = vsel %vm1278_vm6, %v1465_v31, %v1469_v37  ;;  %4401 = vmatprep.mubr.bf16.mxu1 %v11628_v38  ;;  %v2093_v0 = vshrl.u32 %v11645_v57, 16  ;;  %v2095_v1 = vshll.u32 %v11645_v57, 16  ;;  %v2102_v12 = vrot.slane %v2100_v4, 1  ;;  %v11650_v63 = vld [vmem:[#allocation2 + $0x24] sm:$0xfe]   ;;  %v11655_v32 = vld [vmem:[#allocation2 + $0x30] sm:$0xff]  }
 0x109   : > { %4240 = vmatprep.mubr.bf16.mxu0 %v1470_v42  ;;  %4402 = vmatmul.mubr.bf16.gmra.mrb[60].mxu1 %v1727_v39  ;;  %v2485_v3 = vsel %vm1679_vm10, %v2483_v56, %v2484_v59  ;;  %v2901_v13 = vshll.u32 %v11648_v5, 16  ;;  %v2898_v46 = vrot.slane %v2896_v9, 1  ;;  %v2105_v16 = vshrl.u32 %v11652_v10, 16  ;;  %v11651_v18 = vld [vmem:[#allocation2 + $0x2c] ss:$0 sps:$4 sm:$0x11]  }
 0x10a   : > { %4241 = vmatmul.mubr.bf16.gmra.mrb[60].mxu0 %v11627_v33  ;;  %4603 = vmatprep.mubr.bf16.mxu1 %v2892_v58  ;;  %v2097_v6 = vrot.slane %v2095_v1, 1  ;;  %v2486_v21 = vrot.slane %v11650_v63, 1  ;;  %v2107_v22 = vshll.u32 %v11652_v10, 16  ;;  %v2487_v25 = vrot.slane %v11651_v18, 1  ;;  %v11654_v30 = vld [vmem:[#allocation7 + $0x208] sm:$0xff]   ;;  %v11660_v37 = vld [vmem:[#allocation2 + $0x30] sm:$0xff]  }
 0x10b   : > { %4442 = vmatprep.mubr.bf16.mxu0 %v2482_v43  ;;  %v2903_v17 = vrot.slane %v2901_v13, 1  ;;  %v2899_v20 = vor.u32 %v2898_v46, %v2894_v7  ;;  %v11653_v26 = vld [vmem:[#allocation2 + $0x2c] ss:$0 sps:$4 sm:$0x11]   ;;  %v2906_v35 = vshrl.u32 %v11655_v32, 16  ;;  %v2908_v36 = vshll.u32 %v11655_v32, 16 }
 0x10c   : > { %v2098_v14 = vor.u32 %v2097_v6, %v2093_v0  ;;  %v2109_v29 = vrot.slane %v2107_v22, 1  ;;  %v2112_v31 = vshll.u32 %v11653_v26, 16  ;;  %v11656_v33 = vld [vmem:[#allocation2 + $0x38] ss:$0 sps:$4 sm:$0x11]   ;;  %v11662_v40 = vld [vmem:[#allocation2 + $0x3c] sm:$0xff]  }
 0x10d   : > { %v2904_v28 = vsel %vm1278_vm6, %v2899_v20, %v2903_v17  ;;  %v2913_v39 = vshll.u32 %v11656_v33, 16  ;;  %v2910_v41 = vrot.slane %v2908_v36, 1  ;;  %v11657_v42 = vld [vmem:[#allocation2 + $0x30] sm:$0xff]   ;;  %v2117_v44 = vshrl.u32 %v11660_v37, 16  ;;  %v11664_v4 = vld [vmem:[#allocation2 + $0x3c] sm:$0xff]   ;;  %v11670_v18 = vld [vmem:[#allocation2 + $0x48] sm:$0xff]  }
 0x10e   : > { %v2103_v27 = vsel %vm1278_vm6, %v2098_v14, %v2102_v12  ;;  %v2114_v34 = vrot.slane %v2112_v31, 1  ;;  %v2110_v38 = vor.u32 %v2109_v29, %v2105_v16  ;;  %v11658_v43 = vld [vmem:[#allocation2 + $0x30] sm:$0xfe]   ;;  %v11659_v47 = vld [vmem:[#allocation2 + $0x38] ss:$0 sps:$4 sm:$0x11]  }
 0x10f   : > { %v2915_v45 = vrot.slane %v2913_v39, 1  ;;  %v2911_v48 = vor.u32 %v2910_v41, %v2906_v35  ;;  %v2489_v49 = vrot.slane %v11658_v43, 1  ;;  %v2119_v50 = vshll.u32 %v11660_v37, 16  ;;  %v11661_v53 = vld [vmem:[#allocation2 + $0x38] ss:$0 sps:$4 sm:$0x11]  }
 0x110   : > { %v2490_v52 = vrot.slane %v11659_v47, 1  ;;  %v2124_v57 = vshll.u32 %v11661_v53, 16  ;;  %v11663_v58 = vld [vmem:[#allocation2 + $0x44] ss:$0 sps:$4 sm:$0x11]   ;;  %v2918_v59 = vshrl.u32 %v11662_v40, 16 }
 0x111   : > { %4604 = vmatmul.mubr.bf16.vlgmr.msra.gmra.mrb[64].mxu1 %v11642_v51  ;;  %v2115_v51 = vsel %vm1278_vm6, %v2110_v38, %v2114_v34  ;;  %v2916_v54 = vsel %vm1278_vm6, %v2911_v48, %v2915_v45  ;;  %v2121_v55 = vrot.slane %v2119_v50, 1  ;;  %v2920_v60 = vshll.u32 %v11662_v40, 16  ;;  %v11665_v5 = vld [vmem:[#allocation2 + $0x3c] sm:$0xfe]   ;;  %v11669_v16 = vld [vmem:[#allocation7 + $0x210] sm:$0xff]   ;;  %v11677_v37 = vld [vmem:[#allocation2 + $0x54] sm:$0xff]  }
 0x112   : > { %4443 = vmatmul.mubr.bf16.vlgmr.msra.gmra.mrb[64].mxu0 %v2091_v62  ;;  %4611 = vmatprep.mubr.bf16.mxu1 %v2904_v28  ;;  %v2491_v56 = vsel %vm1679_vm10, %v2489_v49, %v2490_v52  ;;  %v2126_v0 = vrot.slane %v2124_v57, 1  ;;  %v2925_v2 = vshll.u32 %v11663_v58, 16  ;;  %v11666_v9 = vld [vmem:[#allocation2 + $0x44] ss:$0 sps:$4 sm:$0x11]   ;;  %v2492_v12 = vrot.slane %v11665_v5, 1 }
 0x113   : > { %11306 = vmatpush3.bf16.msra.mxu0 %v11639_v19  ;;  %4450 = vmatprep.mubr.bf16.mxu0 %v2485_v3  ;;  %v2488_v19 = vsel %vm1679_vm10, %v2486_v21, %v2487_v25  ;;  %v2122_v62 = vor.u32 %v2121_v55, %v2117_v44  ;;  %v2922_v1 = vrot.slane %v2920_v60, 1  ;;  %v11667_v3 = vld [vmem:[#allocation2 + $0x3c] sm:$0xff]   ;;  %v11668_v13 = vld [vmem:[#allocation2 + $0x44] ss:$0 sps:$4 sm:$0x11]   ;;  %v2493_v46 = vrot.slane %v11666_v9, 1 }
 0x114   : > { %11307 = vmatprep.subr.bf16.mxu0 %v11654_v30  ;;  %v2927_v7 = vrot.slane %v2925_v2, 1  ;;  %v2131_v63 = vshll.u32 %v11667_v3, 16  ;;  %v2136_v17 = vshll.u32 %v11668_v13, 16  ;;  %v11671_v25 = vld [vmem:[#allocation2 + $0x50] ss:$0 sps:$4 sm:$0x11]  }
 0x115   : > { %v2923_v6 = vor.u32 %v2922_v1, %v2918_v59  ;;  %v2127_v10 = vsel %vm1278_vm6, %v2122_v62, %v2126_v0  ;;  %v2494_v20 = vsel %vm1679_vm10, %v2492_v12, %v2493_v46  ;;  %v2930_v26 = vshrl.u32 %v11670_v18, 16  ;;  %v11673_v31 = vld [vmem:[#allocation2 + $0x48] sm:$0xfe]   ;;  %v11674_v32 = vld [vmem:[#allocation2 + $0x50] ss:$0 sps:$4 sm:$0x11]  }
 0x116   : > { %v2133_v21 = vrot.slane %v2131_v63, 1  ;;  %v2138_v22 = vrot.slane %v2136_v17, 1  ;;  %v11675_v33 = vld [vmem:[#allocation2 + $0x48] sm:$0xff]   ;;  %v2495_v38 = vrot.slane %v11673_v31, 1  ;;  %v2496_v39 = vrot.slane %v11674_v32, 1  ;;  %v11679_v55 = vld [vmem:[#allocation2 + $0x54] sm:$0xff]  }
 0x117   : > { %11308 = vmatpush3.bf16.msra.mxu0 %v11654_v30  ;;  %v2928_v14 = vsel %vm1278_vm6, %v2923_v6, %v2927_v7  ;;  %v2937_v30 = vshll.u32 %v11671_v25, 16  ;;  %v2141_v40 = vshrl.u32 %v11675_v33, 16  ;;  %v2143_v41 = vshll.u32 %v11675_v33, 16  ;;  %v11676_v43 = vld [vmem:[#allocation2 + $0x50] ss:$0 sps:$4 sm:$0x11]  }
 0x118   : > { %11309 = vmatprep.subr.bf16.mxu0 %v11669_v16  ;;  %v2942_v44 = vshrl.u32 %v11677_v37, 16  ;;  %v2497_v45 = vsel %vm1679_vm10, %v2495_v38, %v2496_v39  ;;  %v2944_v48 = vshll.u32 %v11677_v37, 16  ;;  %v2148_v49 = vshll.u32 %v11676_v43, 16  ;;  %v11678_v50 = vld [vmem:[#allocation2 + $0x5c] ss:$0 sps:$4 sm:$0x11]  }
 0x119   : > { %4612 = vmatmul.mubr.bf16.gmra.mrb[68].mxu1 %v11649_v15  ;;  %v2129_v15 = vshrl.u32 %v11667_v3, 16  ;;  %v2939_v36 = vrot.slane %v2937_v30, 1  ;;  %v2145_v47 = vrot.slane %v2143_v41, 1  ;;  %v11680_v57 = vld [vmem:[#allocation2 + $0x54] sm:$0xfe]   ;;  %v11685_v7 = vld [vmem:[#allocation2 + $0x60] sm:$0xff]  }
 0x11a   : > { %4451 = vmatmul.mubr.bf16.gmra.mrb[68].mxu0 %v2103_v27  ;;  %4619 = vmatprep.mubr.bf16.mxu1 %v2916_v54  ;;  %v2932_v27 = vshll.u32 %v11670_v18, 16  ;;  %v2946_v52 = vrot.slane %v2944_v48, 1  ;;  %v2150_v53 = vrot.slane %v2148_v49, 1  ;;  %v2949_v54 = vshll.u32 %v11678_v50, 16  ;;  %v11682_v59 = vld [vmem:[#allocation2 + $0x54] sm:$0xff]   ;;  %v11694_v48 = vld [vmem:[#allocation2 + $0x6c] sm:$0xff]  }
 0x11b   : > { %4458 = vmatprep.mubr.bf16.mxu0 %v2488_v19  ;;  %v2134_v28 = vor.u32 %v2133_v21, %v2129_v15  ;;  %11310 = vmatpush3.bf16.msra.mxu0 %v11669_v16  ;;  %v11672_v19 = vld [vmem:[#allocation2 + $0x48] sm:$0xff]   ;;  %v11681_v58 = vld [vmem:[#allocation2 + $0x5c] ss:$0 sps:$4 sm:$0x11]   ;;  %v11684_v0 = vld [vmem:[#allocation7 + $0x218] sm:$0xff]   ;;  %v2498_v1 = vrot.slane %v11680_v57, 1 }
 0x11c   : > { %v2934_v29 = vrot.slane %v2932_v27, 1  ;;  %v2951_v62 = vrot.slane %v2949_v54, 1  ;;  %v2499_v2 = vrot.slane %v11681_v58, 1  ;;  %v2153_v3 = vshrl.u32 %v11682_v59, 16  ;;  %11311 = vmatprep.subr.bf16.mxu0 %v11684_v0  ;;  %v11690_v16 = vld [vmem:[#allocation2 + $0x60] sm:$0xff]  }
 0x11d   : > { %v2139_v34 = vsel %vm1278_vm6, %v2134_v28, %v2138_v22  ;;  %v11683_v6 = vld [vmem:[#allocation2 + $0x5c] ss:$0 sps:$4 sm:$0x11]   ;;  %v2954_v13 = vshrl.u32 %v11685_v7, 16  ;;  %v2956_v15 = vshll.u32 %v11685_v7, 16  ;;  %v2165_v25 = vshrl.u32 %v11690_v16, 16 }
 0x11e   : > { %v2935_v35 = vor.u32 %v2934_v29, %v2930_v26  ;;  %v2500_v9 = vsel %vm1679_vm10, %v2498_v1, %v2499_v2  ;;  %v2160_v12 = vshll.u32 %v11683_v6, 16  ;;  %v11686_v46 = vld [vmem:[#allocation2 + $0x68] ss:$0 sps:$4 sm:$0x11]   ;;  %v11688_v21 = vld [vmem:[#allocation2 + $0x60] sm:$0xfe]  }
 0x11f   : > { %11312 = vmatpush3.bf16.msra.mxu0 %v11684_v0  ;;  %v2958_v17 = vrot.slane %v2956_v15, 1  ;;  %v2961_v18 = vshll.u32 %v11686_v46, 16  ;;  %v11689_v22 = vld [vmem:[#allocation2 + $0x68] ss:$0 sps:$4 sm:$0x11]   ;;  %v2167_v29 = vshll.u32 %v11690_v16, 16 }
 0x120   : > { %v2162_v63 = vrot.slane %v2160_v12, 1  ;;  %v2501_v30 = vrot.slane %v11688_v21, 1  ;;  %v11691_v32 = vld [vmem:[#allocation2 + $0x68] ss:$0 sps:$4 sm:$0x11]   ;;  %v11705_v7 = vld [vmem:[#allocation2 + $0x78] sm:$0xff]  }
 0x121   : > { %4620 = vmatmul.mubr.bf16.gmra.mrb[72].mxu1 %v11657_v42  ;;  %v2940_v42 = vsel %vm1278_vm6, %v2935_v35, %v2939_v36  ;;  %v2959_v27 = vor.u32 %v2958_v17, %v2954_v13  ;;  %v2963_v28 = vrot.slane %v2961_v18, 1  ;;  %v2169_v33 = vrot.slane %v2167_v29, 1  ;;  %v11692_v35 = vld [vmem:[#allocation2 + $0x6c] sm:$0xff]   ;;  %v11693_v36 = vld [vmem:[#allocation2 + $0x74] ss:$0 sps:$4 sm:$0x11]  }
 0x122   : > { %4459 = vmatmul.mubr.bf16.gmra.mrb[72].mxu0 %v2115_v51  ;;  %4627 = vmatprep.mubr.bf16.mxu1 %v2928_v14  ;;  %v2146_v51 = vor.u32 %v2145_v47, %v2141_v40  ;;  %v2172_v38 = vshll.u32 %v11691_v32, 16  ;;  %v2966_v39 = vshrl.u32 %v11692_v35, 16  ;;  %v2968_v40 = vshll.u32 %v11692_v35, 16  ;;  %v11695_v49 = vld [vmem:[#allocation2 + $0x6c] sm:$0xfe]   ;;  %v11707_v12 = vld [vmem:[#allocation2 + $0x84] sm:$0xff]  }
 0x123   : > { %4466 = vmatprep.mubr.bf16.mxu0 %v2491_v56  ;;  %v2947_v56 = vor.u32 %v2946_v52, %v2942_v44  ;;  %v2964_v31 = vsel %vm1278_vm6, %v2959_v27, %v2963_v28  ;;  %v2170_v37 = vor.u32 %v2169_v33, %v2165_v25  ;;  %v2973_v41 = vshll.u32 %v11693_v36, 16  ;;  %v11699_v44 = vld [vmem:[#allocation7 + $0x220] sm:$0xff]   ;;  %v11701_v1 = vld [vmem:[#allocation2 + $0x80] ss:$0 sps:$4 sm:$0x11]   ;;  %v11712_v32 = vld [vmem:[#allocation2 + $0x84] sm:$0xff]  }
 0x124   : > { %v2151_v60 = vsel %vm1278_vm6, %v2146_v51, %v2150_v53  ;;  %v2174_v43 = vrot.slane %v2172_v38, 1  ;;  %v11696_v51 = vld [vmem:[#allocation2 + $0x74] ss:$0 sps:$4 sm:$0x11]   ;;  %11313 = vmatprep.subr.bf16.mxu0 %v11699_v44  ;;  %v2504_v54 = vrot.slane %v11695_v49, 1  ;;  %v2985_v6 = vshll.u32 %v11701_v1, 16 }
 0x125   : > { %v2952_v5 = vsel %vm1278_vm6, %v2947_v56, %v2951_v62  ;;  %v2975_v47 = vrot.slane %v2973_v41, 1  ;;  %11314 = vmatpush3.bf16.msra.mxu0 %v11699_v44  ;;  %v2505_v56 = vrot.slane %v11696_v51, 1  ;;  %v11703_v46 = vld [vmem:[#allocation2 + $0x78] sm:$0xfe]   ;;  %v2990_v25 = vshrl.u32 %v11707_v12, 16  ;;  %v11709_v35 = vld [vmem:[#allocation2 + $0x84] sm:$0xff]  }
 0x126   : > { %v2175_v50 = vsel %vm1278_vm6, %v2170_v37, %v2174_v43  ;;  %v11704_v15 = vld [vmem:[#allocation2 + $0x80] ss:$0 sps:$4 sm:$0x11]   ;;  %v2507_v16 = vrot.slane %v11703_v46, 1  ;;  %v11710_v38 = vld [vmem:[#allocation2 + $0x84] sm:$0xfe]  }
 0x127   : > { %v2506_v62 = vsel %vm1679_vm10, %v2504_v54, %v2505_v56  ;;  %v2508_v17 = vrot.slane %v11704_v15, 1  ;;  %v11706_v18 = vld [vmem:[#allocation2 + $0x80] ss:$0 sps:$4 sm:$0x11]   ;;  %v11715_v49 = vld [vmem:[#allocation2 + $0x90] sm:$0xff]  }
 0x128   : > { %v2196_v27 = vshll.u32 %v11706_v18, 16  ;;  %v11708_v28 = vld [vmem:[#allocation2 + $0x8c] ss:$0 sps:$4 sm:$0x11]   ;;  %v11714_v36 = vld [vmem:[#allocation7 + $0x228] sm:$0xff]   ;;  %v3004_v56 = vshll.u32 %v11715_v49, 16 }
 0x129   : > { %4628 = vmatmul.mubr.bf16.gmra.mrb[76].mxu1 %v11664_v4  ;;  %v2155_v4 = vshll.u32 %v11682_v59, 16  ;;  %11315 = vmatprep.subr.bf16.mxu0 %v11714_v36  ;;  %v11713_v44 = vld [vmem:[#allocation2 + $0x8c] ss:$0 sps:$4 sm:$0x11]   ;;  %v11717_v1 = vld [vmem:[#allocation2 + $0x90] sm:$0xff]  }
 0x12a   : > { %4467 = vmatmul.mubr.bf16.gmra.mrb[76].mxu0 %v2127_v10  ;;  %4635 = vmatprep.mubr.bf16.mxu1 %v2940_v42  ;;  %v11697_v42 = vld [vmem:[#allocation2 + $0x6c] sm:$0xff]   ;;  %v2208_v51 = vshll.u32 %v11713_v44, 16 }
 0x12b   : > { %4474 = vmatprep.mubr.bf16.mxu0 %v2494_v20  ;;  %v2157_v10 = vrot.slane %v2155_v4, 1  ;;  %v11687_v20 = vld [vmem:[#allocation2 + $0x60] sm:$0xff]   ;;  %v2177_v52 = vshrl.u32 %v11697_v42, 16  ;;  %v2179_v57 = vshll.u32 %v11697_v42, 16  ;;  %v2510_v42 = vrot.slane %v11710_v38, 1  ;;  %11316 = vmatpush3.bf16.msra.mxu0 %v11714_v36 }
 0x12c   : > { %v2210_v54 = vrot.slane %v2208_v51, 1 }
 0x12d   : > { %v2158_v14 = vor.u32 %v2157_v10, %v2153_v3  ;;  %v2181_v0 = vrot.slane %v2179_v57, 1  ;;  %v11702_v10 = vld [vmem:[#allocation2 + $0x78] sm:$0xff]  }
 0x12f   : > { %v2163_v26 = vsel %vm1278_vm6, %v2158_v14, %v2162_v63  ;;  %v2987_v14 = vrot.slane %v2985_v6, 1 }
 0x131   : > { %4636 = vmatmul.mubr.bf16.gmra.mrb[80].mxu1 %v11672_v19  ;;  %v2502_v19 = vrot.slane %v11689_v22, 1  ;;  %v2191_v22 = vshll.u32 %v11705_v7, 16 }
 0x132   : > { %4475 = vmatmul.mubr.bf16.gmra.mrb[80].mxu0 %v2139_v34  ;;  %4643 = vmatprep.mubr.bf16.mxu1 %v2952_v5  ;;  %v2182_v5 = vor.u32 %v2181_v0, %v2177_v52  ;;  %v3006_v0 = vrot.slane %v3004_v56, 1  ;;  %v11725_v56 = vld [vmem:[#allocation2 + $0x9c] sm:$0xfe]  }
 0x133   : > { %4482 = vmatprep.mubr.bf16.mxu0 %v2497_v45  ;;  %v2503_v34 = vsel %vm1679_vm10, %v2501_v30, %v2502_v19  ;;  %v2970_v45 = vrot.slane %v2968_v40, 1  ;;  %v2193_v29 = vrot.slane %v2191_v22, 1  ;;  %v2992_v30 = vshll.u32 %v11707_v12, 16 }
 0x134   : > { %v2198_v19 = vrot.slane %v2196_v27, 1 }
 0x135   : > { %v2971_v53 = vor.u32 %v2970_v45, %v2966_v39  ;;  %v11711_v39 = vld [vmem:[#allocation2 + $0x8c] ss:$0 sps:$4 sm:$0x11]   ;;  %v2201_v45 = vshrl.u32 %v11712_v32, 16 }
 0x136   : > { %v2511_v43 = vrot.slane %v11711_v39, 1 }
 0x137   : > { %v2976_v58 = vsel %vm1278_vm6, %v2971_v53, %v2975_v47  ;;  %v11716_v53 = vld [vmem:[#allocation2 + $0x98] ss:$0 sps:$4 sm:$0x11]  }
 0x139   : > { %4644 = vmatmul.mubr.bf16.gmra.mrb[84].mxu1 %v11679_v55  ;;  %v11698_v55 = vld [vmem:[#allocation2 + $0x74] ss:$0 sps:$4 sm:$0x11]  }
 0x13a   : > { %4483 = vmatmul.mubr.bf16.gmra.mrb[84].mxu0 %v2151_v60  ;;  %4651 = vmatprep.mubr.bf16.mxu1 %v2964_v31  ;;  %v2184_v59 = vshll.u32 %v11698_v55, 16  ;;  %v11700_v60 = vld [vmem:[#allocation2 + $0x78] sm:$0xff]   ;;  %v2997_v31 = vshll.u32 %v11708_v28, 16  ;;  %v3002_v55 = vshrl.u32 %v11715_v49, 16 }
 0x13b   : > { %4490 = vmatprep.mubr.bf16.mxu0 %v2500_v9  ;;  %v2978_v3 = vshrl.u32 %v11700_v60, 16  ;;  %v2980_v4 = vshll.u32 %v11700_v60, 16  ;;  %v12823_v60 = vld [vmem:[%s13804_s2] ss:$0 sm:$0xff] }
 0x13c   : > { %v2186_v2 = vrot.slane %v2184_v59, 1  ;;  %v2999_v37 = vrot.slane %v2997_v31, 1  ;;  %v3009_v59 = vshll.u32 %v11716_v53, 16  ;;  %v3007_v12 = vor.u32 %v3006_v0, %v3002_v55  ;;  %v11721_v28 = vld [vmem:[#allocation2 + $0x98] ss:$0 sps:$4 sm:$0x11]  }
 0x13d   : > { %v2982_v9 = vrot.slane %v2980_v4, 1 }
 0x13e   : > { %v2187_v13 = vsel %vm1278_vm6, %v2182_v5, %v2186_v2  ;;  %v3011_v6 = vrot.slane %v3009_v59, 1  ;;  %v11726_v59 = vld [vmem:[#allocation2 + $0xa4] ss:$0 sps:$4 sm:$0x11]  }
 0x13f   : > { %v2983_v63 = vor.u32 %v2982_v9, %v2978_v3 }
 0x141   : > { %4652 = vmatmul.mubr.bf16.gmra.mrb[88].mxu1 %v11687_v20  ;;  %v2189_v20 = vshrl.u32 %v11705_v7, 16  ;;  %v2988_v21 = vsel %vm1278_vm6, %v2983_v63, %v2987_v14  ;;  %v11718_v63 = vld [vmem:[#allocation2 + $0x90] sm:$0xfe]  }
 0x142   : > { %4491 = vmatmul.mubr.bf16.gmra.mrb[88].mxu0 %v2163_v26  ;;  %4659 = vmatprep.mubr.bf16.mxu1 %v2976_v58  ;;  %v2509_v26 = vsel %vm1679_vm10, %v2507_v16, %v2508_v17  ;;  %v11722_v16 = vld [vmem:[#allocation2 + $0x9c] sm:$0xff]   ;;  %v11719_v17 = vld [vmem:[#allocation2 + $0x98] ss:$0 sps:$4 sm:$0x11]   ;;  %v2513_v22 = vrot.slane %v11718_v63, 1 }
 0x143   : > { %4498 = vmatprep.mubr.bf16.mxu0 %v2503_v34  ;;  %v2194_v33 = vor.u32 %v2193_v29, %v2189_v20  ;;  %v2994_v34 = vrot.slane %v2992_v30, 1  ;;  %v3012_v20 = vsel %vm1278_vm6, %v3007_v12, %v3011_v6  ;;  %v2514_v27 = vrot.slane %v11719_v17, 1  ;;  %v11728_v6 = vld [vmem:[#allocation2 + $0xa4] ss:$0 sps:$4 sm:$0x11]  }
 0x144   : > { %v3014_v36 = vshrl.u32 %v11722_v16, 16  ;;  %v11731_v63 = vld [vmem:[#allocation2 + $0xb0] ss:$0 sps:$4 sm:$0x11]  }
 0x145   : > { %v2199_v40 = vsel %vm1278_vm6, %v2194_v33, %v2198_v19  ;;  %v2995_v41 = vor.u32 %v2994_v34, %v2990_v25  ;;  %v2220_v34 = vshll.u32 %v11721_v28, 16  ;;  %v11735_v28 = vld [vmem:[#allocation2 + $0xa8] sm:$0xff]  }
 0x147   : > { %v3000_v47 = vsel %vm1278_vm6, %v2995_v41, %v2999_v37  ;;  %v3016_v37 = vshll.u32 %v11722_v16, 16 }
 0x149   : > { %4660 = vmatmul.mubr.bf16.gmra.mrb[92].mxu1 %v11694_v48  ;;  %v2203_v48 = vshll.u32 %v11712_v32, 16  ;;  %v2515_v32 = vsel %vm1679_vm10, %v2513_v22, %v2514_v27 }
 0x14a   : > { %4499 = vmatmul.mubr.bf16.gmra.mrb[92].mxu0 %v2175_v50  ;;  %4667 = vmatprep.mubr.bf16.mxu1 %v2988_v21  ;;  %v2512_v50 = vsel %vm1679_vm10, %v2510_v42, %v2511_v43 }
 0x14b   : > { %4506 = vmatprep.mubr.bf16.mxu0 %v2506_v62  ;;  %v2205_v52 = vrot.slane %v2203_v48, 1 }
 0x14d   : > { %v2206_v58 = vor.u32 %v2205_v52, %v2201_v45  ;;  %v3018_v45 = vrot.slane %v3016_v37, 1  ;;  %v11732_v37 = vld [vmem:[#allocation2 + $0xa8] sm:$0xff]  }
 0x14f   : > { %v2211_v5 = vsel %vm1278_vm6, %v2206_v58, %v2210_v54 }
 0x151   : > { %4668 = vmatmul.mubr.bf16.gmra.mrb[96].mxu1 %v11702_v10  ;;  %v11720_v10 = vld [vmem:[#allocation2 + $0x90] sm:$0xff]  }
 0x152   : > { %4507 = vmatmul.mubr.bf16.gmra.mrb[96].mxu0 %v2187_v13  ;;  %4675 = vmatprep.mubr.bf16.mxu1 %v3000_v47  ;;  %v2213_v29 = vshrl.u32 %v11720_v10, 16  ;;  %v2215_v30 = vshll.u32 %v11720_v10, 16  ;;  %v11724_v47 = vld [vmem:[#allocation2 + $0x9c] sm:$0xff]  }
 0x153   : > { %4514 = vmatprep.mubr.bf16.mxu0 %v2509_v26 }
 0x154   : > { %v2217_v33 = vrot.slane %v2215_v30, 1 }
 0x156   : > { %v2218_v39 = vor.u32 %v2217_v33, %v2213_v29 }
 0x159   : > { %4676 = vmatmul.mubr.bf16.gmra.mrb[100].mxu1 %v11709_v35  ;;  %v11723_v35 = vld [vmem:[#allocation2 + $0xa4] ss:$0 sps:$4 sm:$0x11]  }
 0x15a   : > { %4515 = vmatmul.mubr.bf16.gmra.mrb[100].mxu0 %v2199_v40  ;;  %4683 = vmatprep.mubr.bf16.mxu1 %v3012_v20  ;;  %v2222_v40 = vrot.slane %v2220_v34, 1  ;;  %v3021_v41 = vshll.u32 %v11723_v35, 16 }
 0x15b   : > { %4522 = vmatprep.mubr.bf16.mxu0 %v2512_v50  ;;  %v11727_v50 = vld [vmem:[#allocation2 + $0x9c] sm:$0xff]  }
 0x15c   : > { %v2223_v51 = vsel %vm1278_vm6, %v2218_v39, %v2222_v40  ;;  %v3023_v52 = vrot.slane %v3021_v41, 1 }
 0x15f   : > { %v10377_v57 = vpop.f32.mrb[0].mxu0 }
 0x160   : > { %v10378_v62 = vpop.f32.mrb[1].mxu0 }
 0x161   : > { %v10379_v2 = vadd.f32 %v10378_v62, %v10377_v57  ;;  %v10380_v3 = vpop.f32.mrb[2].mxu0  ;;  %4684 = vmatmul.mubr.bf16.gmra.mrb[104].mxu1 %v11717_v1  ;;  %v3019_v57 = vor.u32 %v3018_v45, %v3014_v36  ;;  %v2516_v1 = vrot.slane %v11725_v56, 1  ;;  %v2237_v45 = vshrl.u32 %v11735_v28, 16 }
 0x162   : > { %v10489_v4 = vpop.f32.mrb[0].mxu1  ;;  %v10381_v7 = vpop.f32.mrb[3].mxu0  ;;  %4523 = vmatmul.mubr.bf16.gmra.mrb[104].mxu0 %v2211_v5  ;;  %v2517_v5 = vrot.slane %v11726_v59, 1  ;;  %v11738_v59 = vld [vmem:[#allocation2 + $0xbc] ss:$0 sps:$4 sm:$0x11]  }
 0x163   : > { %v10490_v9 = vpop.f32.mrb[1].mxu1  ;;  %v4123_v13 = vadd.f32 %v10379_v2, %v12823_v60  ;;  %v10382_v14 = vadd.f32 %v10381_v7, %v10380_v3  ;;  %4530 = vmatprep.mubr.bf16.mxu0 %v2515_v32  ;;  %v2225_v3 = vshrl.u32 %v11727_v50, 16  ;;  %v2227_v7 = vshll.u32 %v11727_v50, 16 }
 0x164   : > { %v10491_v46 = vadd.f32 %v10490_v9, %v10489_v4  ;;  %v10492_v15 = vpop.f32.mrb[2].mxu1  ;;  %v3024_v4 = vsel %vm1278_vm6, %v3019_v57, %v3023_v52  ;;  %v11729_v9 = vld [vmem:[#allocation7 + $0x230] sm:$0xff]   ;;  %v2239_v52 = vshll.u32 %v11735_v28, 16  ;;  %v11740_v28 = vld [vmem:[#allocation2 + $0xb4] sm:$0xfe]  }
 0x165   : > { %v10493_v18 = vpop.f32.mrb[3].mxu1  ;;  %v4126_v21 = vadd.f32 %v10382_v14, %v12823_v60  ;;  %4691 = vmatprep.mubr.bf16.mxu1 %v3024_v4  ;;  %v2229_v14 = vrot.slane %v2227_v7, 1  ;;  %11317 = vmatprep.subr.bf16.mxu0 %v11729_v9  ;;  %v11742_v7 = vld [vmem:[#allocation2 + $0xb4] sm:$0xff]  }
 0x166   : > { %v10494_v25 = vadd.f32 %v10493_v18, %v10492_v15  ;;  %v12829_v19 = vadd.f32 %v10491_v46, %v4123_v13  ;;  %v2518_v13 = vsel %vm1679_vm10, %v2516_v1, %v2517_v5  ;;  %v2232_v46 = vshll.u32 %v11728_v6, 16  ;;  %v11730_v15 = vld [vmem:[#allocation2 + $0xa8] sm:$0xff]   ;;  %11318 = vmatpush3.bf16.msra.mxu0 %v11729_v9 }
 0x167   : > { %v2230_v16 = vor.u32 %v2229_v14, %v2225_v3  ;;  %v3028_v22 = vshll.u32 %v11730_v15, 16  ;;  %v2241_v56 = vrot.slane %v2239_v52, 1  ;;  %v3045_v9 = vshll.u32 %v11738_v59, 16 }
 0x168   : > { %v12831_v31 = vadd.f32 %v10494_v25, %v4126_v21  ;;  %v2234_v17 = vrot.slane %v2232_v46, 1  ;;  %v3026_v21 = vshrl.u32 %v11730_v15, 16  ;;  %v3033_v25 = vshll.u32 %v11731_v63, 16  ;;  %v11744_v15 = vld [vmem:[#allocation7 + $0x238] sm:$0xff]  }
 0x169   : > { %4692 = vmatmul.mubr.bf16.gmra.mrb[108].mxu1 %v11724_v47  ;;  %v3030_v35 = vrot.slane %v3028_v22, 1  ;;  %v2242_v1 = vor.u32 %v2241_v56, %v2237_v45  ;;  %v2249_v22 = vshrl.u32 %v11742_v7, 16  ;;  %11319 = vmatprep.subr.bf16.mxu0 %v11744_v15  ;;  %v11787_v56 = vld [vmem:[#allocation9 + $0x40] sm:$0xff]  }
 0x16a   : > { %v10495_v44 = vpop.f32.mrb[4].mxu1  ;;  %4531 = vmatmul.mubr.bf16.gmra.mrb[108].mxu0 %v2223_v51  ;;  %v2235_v29 = vsel %vm1278_vm6, %v2230_v16, %v2234_v17  ;;  %v3035_v36 = vrot.slane %v3033_v25, 1  ;;  %v11736_v51 = vld [vmem:[#allocation2 + $0xb0] ss:$0 sps:$4 sm:$0x11]   ;;  %v11739_v17 = vld [vmem:[#allocation2 + $0xb4] sm:$0xff]   ;;  %10833 = vmatprep.subr.bf16.mxu1 %v11787_v56 }
 0x16b   : > { %v10383_v26 = vpop.f32.mrb[4].mxu0  ;;  %v10496_v49 = vpop.f32.mrb[5].mxu1  ;;  %4538 = vmatprep.mubr.bf16.mxu0 %v2518_v13  ;;  %v3031_v47 = vor.u32 %v3030_v35, %v3026_v21  ;;  %v2244_v57 = vshll.u32 %v11736_v51, 16  ;;  %v3047_v25 = vrot.slane %v3045_v9, 1  ;;  %11320 = vmatpush3.bf16.msra.mxu0 %v11744_v15  ;;  %v12869_v15 = vld [vmem:[#allocation2 + $0xc0] sm:$0xfe]  }
 0x16c   : > { %v10384_v38 = vpop.f32.mrb[5].mxu0  ;;  %v10498_v55 = vpop.f32.mrb[6].mxu1  ;;  %v10497_v58 = vadd.f32 %v10496_v49, %v10495_v44 }
 0x16d   : > { %v10385_v42 = vadd.f32 %v10384_v38, %v10383_v26  ;;  %v10386_v43 = vpop.f32.mrb[6].mxu0  ;;  %v10499_v62 = vpop.f32.mrb[7].mxu1 }
 0x16e   : > { %v10387_v48 = vpop.f32.mrb[7].mxu0  ;;  %v10500_v2 = vadd.f32 %v10499_v62, %v10498_v55 }
 0x16f   : > { %v4131_v53 = vadd.f32 %v10385_v42, %v12823_v60  ;;  %v10388_v54 = vadd.f32 %v10387_v48, %v10386_v43  ;;  %v11733_v42 = vld [vmem:[#allocation2 + $0xa8] sm:$0xfe]   ;;  %v11734_v43 = vld [vmem:[#allocation2 + $0xb0] ss:$0 sps:$4 sm:$0x11]  }
 0x170   : > { %v2519_v49 = vrot.slane %v11733_v42, 1  ;;  %v2520_v50 = vrot.slane %v11734_v43, 1  ;;  %v387_v42 = vld [vmem:[#allocation2 + $0xc8] sm:$0x1] }
 0x171   : > { %v4134_v0 = vadd.f32 %v10388_v54, %v12823_v60  ;;  %v12838_v10 = vadd.f32 %v10497_v58, %v4131_v53  ;;  %v3036_v53 = vsel %vm1278_vm6, %v3031_v47, %v3035_v36  ;;  %v11737_v58 = vld [vmem:[#allocation2 + $0xb4] sm:$0xff]   ;;  %v2522_v36 = vrot.slane %v11740_v28, 1 }
 0x172   : > { %v10501_v20 = vpop.f32.mrb[8].mxu1  ;;  %4539 = vmatmul.mubr.bf16.gmra.mrb[112].mxu0 %v2235_v29  ;;  %4699 = vmatprep.mubr.bf16.mxu1 %v3036_v53  ;;  %v2521_v55 = vsel %vm1679_vm10, %v2519_v49, %v2520_v50  ;;  %v3038_v3 = vshrl.u32 %v11737_v58, 16  ;;  %v3040_v4 = vshll.u32 %v11737_v58, 16  ;;  %v12863_v50 = vld [vmem:[#allocation2 + $0xc0] sm:$0xff]  }
 0x173   : > { %v12840_v12 = vadd.f32 %v10500_v2, %v4134_v0  ;;  %v10389_v18 = vpop.f32.mrb[8].mxu0  ;;  %v10502_v27 = vpop.f32.mrb[9].mxu1  ;;  %4700 = vmatmul.mubr.bf16.gmra.mrb[112].mxu1 %v11732_v37  ;;  %4546 = vmatprep.mubr.bf16.mxu0 %v2521_v55  ;;  %v2246_v2 = vrot.slane %v2244_v57, 1 }
 0x174   : > { %v10390_v26 = vpop.f32.mrb[9].mxu0  ;;  %v10503_v33 = vadd.f32 %v10502_v27, %v10501_v20  ;;  %v10504_v34 = vpop.f32.mrb[10].mxu1  ;;  %v3042_v16 = vrot.slane %v3040_v4, 1 }
 0x175   : > { %v10391_v30 = vadd.f32 %v10390_v26, %v10389_v18  ;;  %v10392_v32 = vpop.f32.mrb[10].mxu0  ;;  %v10505_v39 = vpop.f32.mrb[11].mxu1  ;;  %v2247_v63 = vsel %vm1278_vm6, %v2242_v1, %v2246_v2  ;;  %v794_v2 = vrot.slane %v12780_v8, 4 }
 0x176   : > { %v10393_v38 = vpop.f32.mrb[11].mxu0  ;;  %v10506_v44 = vadd.f32 %v10505_v39, %v10504_v34  ;;  %v2251_v34 = vshll.u32 %v11742_v7, 16 }
 0x177   : > { %v4139_v40 = vadd.f32 %v10391_v30, %v12823_v60  ;;  %v10394_v41 = vadd.f32 %v10393_v38, %v10392_v32  ;;  %v3043_v30 = vor.u32 %v3042_v16, %v3038_v3  ;;  %v11741_v32 = vld [vmem:[#allocation2 + $0xbc] ss:$0 sps:$4 sm:$0x11]  }
 0x178   : > { %v2523_v39 = vrot.slane %v11741_v32, 1 }
 0x179   : > { %v4142_v48 = vadd.f32 %v10394_v41, %v12823_v60  ;;  %v12847_v54 = vadd.f32 %v10503_v33, %v4139_v40  ;;  %v3048_v38 = vsel %vm1278_vm6, %v3043_v30, %v3047_v25  ;;  %v11743_v40 = vld [vmem:[#allocation2 + $0xbc] ss:$0 sps:$4 sm:$0x11]   ;;  %v2253_v41 = vrot.slane %v2251_v34, 1 }
 0x17a   : > { %v10507_v6 = vpop.f32.mrb[12].mxu1  ;;  %4547 = vmatmul.mubr.bf16.gmra.mrb[116].mxu0 %v2247_v63  ;;  %4707 = vmatprep.mubr.bf16.mxu1 %v3048_v38  ;;  %v2256_v47 = vshll.u32 %v11743_v40, 16  ;;  %v11750_v63 = vld [vmem:[#allocation2 + $0xc0] sm:$0xff]   ;;  %v11755_v38 = vld [vmem:[#allocation2 + $0x18] sm:$0xfe]   ;;  %v3050_v40 = vshrl.u32 %v12863_v50, 16 }
 0x17b   : > { %v12850_v62 = vadd.f32 %v10506_v44, %v4142_v48  ;;  %v10395_v0 = vpop.f32.mrb[12].mxu0  ;;  %v10508_v46 = vpop.f32.mrb[13].mxu1  ;;  %4708 = vmatmul.mubr.bf16.gmra.mrb[116].mxu1 %v11739_v17  ;;  %v2524_v44 = vsel %vm1679_vm10, %v2522_v36, %v2523_v39  ;;  %v2254_v45 = vor.u32 %v2253_v41, %v2249_v22  ;;  %v388_v48 = vsel %vm12494_vm4, 0, %v387_v42 }
 0x17c   : > { %v10396_v5 = vpop.f32.mrb[13].mxu0  ;;  %v10509_v20 = vadd.f32 %v10508_v46, %v10507_v6  ;;  %v10510_v21 = vpop.f32.mrb[14].mxu1  ;;  %4554 = vmatprep.mubr.bf16.mxu0 %v2524_v44  ;;  %389 = vst [vmem:[#allocation2 + $0xc8] sm:$0x1] %v388_v48  ;;  %v2258_v49 = vrot.slane %v2256_v47, 1  ;;  %v2263_v36 = vshll.u32 %v11750_v63, 16 }
 0x17d   : > { %v10397_v13 = vadd.f32 %v10396_v5, %v10395_v0  ;;  %v10398_v14 = vpop.f32.mrb[14].mxu0  ;;  %v10511_v29 = vpop.f32.mrb[15].mxu1  ;;  %v3052_v5 = vshll.u32 %v12863_v50, 16  ;;  %v2525_v48 = vrot.slane %v12869_v15, 1  ;;  %v3281_v50 = vrot.slane %v11755_v38, 1 }
 0x17e   : > { %v10399_v18 = vpop.f32.mrb[15].mxu0  ;;  %v10512_v33 = vadd.f32 %v10511_v29, %v10510_v21  ;;  %v2259_v57 = vsel %vm1278_vm6, %v2254_v45, %v2258_v49  ;;  %v2261_v49 = vshrl.u32 %v11750_v63, 16 }
 0x17f   : > { %v4147_v26 = vadd.f32 %v10397_v13, %v12823_v60  ;;  %v10400_v27 = vadd.f32 %v10399_v18, %v10398_v14  ;;  %v334_v13 = vld [vmem:[#allocation2 + $0xcc] sm:$0x1]  ;;  %v390_v14 = vld [vmem:[#allocation2 + $0xd4] sm:$0x1]  ;;  %v3054_v47 = vrot.slane %v3052_v5, 1  ;;  %v11747_v5 = vld [vmem:[#allocation2 + $0xc0] sm:$0xff]  }
 0x180   : > { %v335_v16 = vsel %vm12489_vm3, 0, %v334_v13  ;;  %v391_v8 = vsel %vm12494_vm4, 0, %v390_v14  ;;  %v12890_v13 = vld [vmem:[#allocation2 + $0x24] sm:$0xfe]  }
 0x181   : > { %v4150_v35 = vadd.f32 %v10400_v27, %v12823_v60  ;;  %v12855_v37 = vadd.f32 %v10509_v20, %v4147_v26  ;;  %336 = vst [vmem:[#allocation2 + $0xcc] sm:$0x1] %v335_v16  ;;  %392 = vst [vmem:[#allocation2 + $0xd4] sm:$0x1] %v391_v8 }
 0x182   : > { %v10513_v52 = vpop.f32.mrb[16].mxu1  ;;  %4555 = vmatmul.mubr.bf16.gmra.mrb[120].mxu0 %v2259_v57  ;;  %v2265_v57 = vrot.slane %v2263_v36, 1  ;;  %v12892_v14 = vld [vmem:[#allocation2 + $0x2c] ss:$0 sps:$4 sm:$0x11]  }
 0x183   : > { %v12858_v43 = vadd.f32 %v10512_v33, %v4150_v35  ;;  %v10401_v51 = vpop.f32.mrb[16].mxu0  ;;  %v10514_v55 = vpop.f32.mrb[17].mxu1  ;;  %v955_v18 = vld [vmem:[#allocation2 + $0xc8] sm:$0x1] }
 0x184   : > { %v10402_v53 = vpop.f32.mrb[17].mxu0  ;;  %v10515_v0 = vadd.f32 %v10514_v55, %v10513_v52  ;;  %v10516_v1 = vpop.f32.mrb[18].mxu1  ;;  %v956_v27 = vsel %vm12489_vm3, %v794_v2, %v955_v18  ;;  %v11756_v52 = vld [vmem:[#allocation2 + $0x20] ss:$0 sps:$4 sm:$0x11]  }
 0x185   : > { %v10403_v58 = vadd.f32 %v10402_v53, %v10401_v51  ;;  %v10404_v59 = vpop.f32.mrb[18].mxu0  ;;  %v10517_v4 = vpop.f32.mrb[19].mxu1  ;;  %957 = vst [vmem:[#allocation2 + $0xc8] sm:$0x1] %v956_v27  ;;  %v3282_v8 = vrot.slane %v11756_v52, 1 }
 0x186   : > { %v10405_v3 = vpop.f32.mrb[19].mxu0  ;;  %v10518_v9 = vadd.f32 %v10517_v4, %v10516_v1  ;;  %v3055_v4 = vor.u32 %v3054_v47, %v3050_v40 }
 0x187   : > { %v4155_v6 = vadd.f32 %v10403_v58, %v12823_v60  ;;  %v10406_v7 = vadd.f32 %v10405_v3, %v10404_v59 }
 0x188   : > { %v11752_v58 = vld [vmem:[#allocation2 + $0xcc] sm:$0xff]   ;;  %v11753_v59 = vld [vmem:[#allocation2 + $0xd4] ss:$0 sps:$4 sm:$0x11]  }
 0x189   : > { %v4158_v20 = vadd.f32 %v10406_v7, %v12823_v60  ;;  %v12876_v26 = vadd.f32 %v10515_v0, %v4155_v6  ;;  %v3062_v1 = vshrl.u32 %v11752_v58, 16  ;;  %v3064_v3 = vshll.u32 %v11752_v58, 16 }
 0x18a   : > { %v10519_v25 = vpop.f32.mrb[20].mxu1  ;;  %v3069_v16 = vshll.u32 %v11753_v59, 16 }
 0x18b   : > { %v10520_v29 = vpop.f32.mrb[21].mxu1  ;;  %v12881_v35 = vadd.f32 %v10518_v9, %v4158_v20  ;;  %v2266_v9 = vor.u32 %v2265_v57, %v2261_v49  ;;  %v3066_v63 = vrot.slane %v3064_v3, 1  ;;  %v3285_v49 = vrot.slane %v12892_v14, 1  ;;  %v11761_v3 = vld [vmem:[#allocation2 + $0x3c] sm:$0xfe]  }
 0x18c   : > { %v10407_v46 = vpop.f32.mrb[20].mxu0  ;;  %v10521_v32 = vadd.f32 %v10520_v29, %v10519_v25  ;;  %v10522_v33 = vpop.f32.mrb[22].mxu1  ;;  %v11746_v0 = vld [vmem:[#allocation2 + $0xc8] ss:$0 sps:$4 sm:$0x11]  }
 0x18d   : > { %v10408_v17 = vpop.f32.mrb[21].mxu0  ;;  %v10523_v39 = vpop.f32.mrb[23].mxu1  ;;  %v11749_v2 = vld [vmem:[#allocation2 + $0xc8] ss:$0 sps:$4 sm:$0x11]   ;;  %v3057_v6 = vshll.u32 %v11746_v0, 16 }
 0x18e   : > { %v10409_v21 = vadd.f32 %v10408_v17, %v10407_v46  ;;  %v10410_v22 = vpop.f32.mrb[22].mxu0  ;;  %v10524_v42 = vadd.f32 %v10523_v39, %v10522_v33  ;;  %v11751_v7 = vld [vmem:[#allocation2 + $0xc8] ss:$0 sps:$4 sm:$0x11]   ;;  %v2526_v15 = vrot.slane %v11749_v2, 1  ;;  %v11789_v0 = vld [vmem:[#allocation9 + $0x48] sm:$0xff]  }
 0x18f   : > { %v10411_v28 = vpop.f32.mrb[23].mxu0  ;;  %v3059_v20 = vrot.slane %v3057_v6, 1  ;;  %v11760_v33 = vld [vmem:[#allocation2 + $0x38] ss:$0 sps:$4 sm:$0x11]  }
 0x190   : > { %v4163_v24 = vadd.f32 %v10409_v21, %v12823_v60  ;;  %v10412_v30 = vadd.f32 %v10411_v28, %v10410_v22  ;;  %v2268_v21 = vshll.u32 %v11751_v7, 16  ;;  %v2527_v29 = vsel %vm1679_vm10, %v2525_v48, %v2526_v15  ;;  %v11790_v7 = vld [vmem:[#allocation9 + $0x8] sm:$0xff]  }
 0x191   : > { %4562 = vmatprep.mubr.bf16.mxu0 %v2527_v29  ;;  %v3284_v48 = vrot.slane %v12890_v13, 1  ;;  %v3288_v2 = vrot.slane %v11760_v33, 1 }
 0x192   : > { %v4166_v41 = vadd.f32 %v10412_v30, %v12823_v60  ;;  %v12885_v45 = vadd.f32 %v10521_v32, %v4163_v24  ;;  %v10525_v55 = vpop.f32.mrb[24].mxu1  ;;  %v3067_v24 = vor.u32 %v3066_v63, %v3062_v1  ;;  %v3071_v30 = vrot.slane %v3069_v16, 1  ;;  %v11759_v32 = vld [vmem:[#allocation2 + $0x30] sm:$0xfe]  }
 0x193   : > { %v10526_v18 = vpop.f32.mrb[25].mxu1  ;;  %v2270_v36 = vrot.slane %v2268_v21, 1  ;;  %v11764_v16 = vld [vmem:[#allocation2 + $0x50] ss:$0 sps:$4 sm:$0x11]  }
 0x194   : > { %v10413_v34 = vpop.f32.mrb[24].mxu0  ;;  %v12888_v56 = vadd.f32 %v10524_v42, %v4166_v41  ;;  %v10527_v25 = vadd.f32 %v10526_v18, %v10525_v55  ;;  %v10528_v27 = vpop.f32.mrb[26].mxu1  ;;  %v3072_v41 = vsel %vm1278_vm6, %v3067_v24, %v3071_v30  ;;  %v3283_v42 = vsel %vm1679_vm10, %v3281_v50, %v3282_v8  ;;  %v11754_v50 = vld [vmem:[#allocation2 + $0xcc] sm:$0xff]  }
 0x195   : > { %v10414_v44 = vpop.f32.mrb[25].mxu0  ;;  %v10529_v39 = vpop.f32.mrb[27].mxu1  ;;  %v2271_v47 = vsel %vm1278_vm6, %v2266_v9, %v2270_v36  ;;  %v3287_v55 = vrot.slane %v11759_v32, 1  ;;  %v11762_v9 = vld [vmem:[#allocation2 + $0x44] ss:$0 sps:$4 sm:$0x11]  }
 0x196   : > { %v10415_v51 = vadd.f32 %v10414_v44, %v10413_v34  ;;  %v10416_v53 = vpop.f32.mrb[26].mxu0  ;;  %v3060_v34 = vsel %vm1278_vm6, %v3055_v4, %v3059_v20  ;;  %v10530_v44 = vadd.f32 %v10529_v39, %v10528_v27  ;;  %4563 = vmatmul.mubr.bf16.gmra.mrb[124].mxu0 %v2271_v47  ;;  %v3290_v32 = vrot.slane %v11761_v3, 1 }
 0x197   : > { %v10417_v17 = vpop.f32.mrb[27].mxu0  ;;  %4715 = vmatprep.mubr.bf16.mxu1 %v3060_v34  ;;  %11321 = vmatprep.mubr.bf16.mxu0 %v3283_v42  ;;  %v3289_v27 = vsel %vm1679_vm10, %v3287_v55, %v3288_v2  ;;  %v11767_v55 = vld [vmem:[#allocation2 + $0x60] sm:$0xfe]   ;;  %v11791_v2 = vld [vmem:[#allocation9 + $0x50] sm:$0xff]  }
 0x198   : > { %v4171_v46 = vadd.f32 %v10415_v51, %v12823_v60  ;;  %v10418_v22 = vadd.f32 %v10417_v17, %v10416_v53  ;;  %4716 = vmatmul.mubr.bf16.gmra.mrb[120].mxu1 %v11747_v5  ;;  %v11788_v53 = vld [vmem:[#allocation9] sm:$0xff]  }
 0x199   : > { %4723 = vmatprep.mubr.bf16.mxu1 %v3072_v41  ;;  %10834 = vmatpush3.bf16.msra.mxu1 %v11788_v53  ;;  %v3294_v41 = vrot.slane %v11764_v16, 1 }
 0x19a   : > { %v4174_v38 = vadd.f32 %v10418_v22, %v12823_v60  ;;  %v12898_v40 = vadd.f32 %v10527_v25, %v4171_v46  ;;  %v10531_v52 = vpop.f32.mrb[28].mxu1  ;;  %v11763_v46 = vld [vmem:[#allocation2 + $0x48] sm:$0xfe]   ;;  %10835 = vmatprep.subr.bf16.mxu1 %v11789_v0  ;;  %v3286_v25 = vsel %vm1679_vm10, %v3284_v48, %v3285_v49 }
 0x19b   : > { %v10532_v59 = vpop.f32.mrb[29].mxu1  ;;  %v3293_v39 = vrot.slane %v11763_v46, 1 }
 0x19c   : > { %v10419_v28 = vpop.f32.mrb[28].mxu0  ;;  %v12905_v1 = vadd.f32 %v10530_v44, %v4174_v38  ;;  %v10533_v6 = vadd.f32 %v10532_v59, %v10531_v52  ;;  %v10534_v5 = vpop.f32.mrb[30].mxu1  ;;  %v3291_v38 = vrot.slane %v11762_v9, 1  ;;  %v11766_v52 = vld [vmem:[#allocation2 + $0x5c] ss:$0 sps:$4 sm:$0x11]  }
 0x19d   : > { %v10420_v51 = vpop.f32.mrb[29].mxu0  ;;  %v10535_v15 = vpop.f32.mrb[31].mxu1  ;;  %10836 = vmatpush3.bf16.msra.mxu1 %v11790_v7 }
 0x19e   : > { %v10421_v57 = vadd.f32 %v10420_v51, %v10419_v28  ;;  %v10422_v58 = vpop.f32.mrb[30].mxu0  ;;  %v10536_v8 = vadd.f32 %v10535_v15, %v10534_v5  ;;  %11322 = vmatmul.mubr.bf16.vlgmr.msra.gmra.mrb[128].mxu0 %v3286_v25  ;;  %v11765_v51 = vld [vmem:[#allocation2 + $0x54] sm:$0xfe]   ;;  %v11792_v5 = vld [vmem:[#allocation9 + $0x10] sm:$0xff]   ;;  %v3292_v7 = vsel %vm1679_vm10, %v3290_v32, %v3291_v38  ;;  %10837 = vmatprep.subr.bf16.mxu1 %v11791_v2 }
 0x19f   : > { %v10423_v4 = vpop.f32.mrb[31].mxu0  ;;  %11325 = vmatprep.mubr.bf16.mxu0 %v3289_v27  ;;  %v3295_v15 = vsel %vm1679_vm10, %v3293_v39, %v3294_v41  ;;  %v12927_v25 = vld [vmem:[#allocation2 + $0x6c] sm:$0xfe]  }
 0x1a0   : > { %v4179_v13 = vadd.f32 %v10421_v57, %v12823_v60  ;;  %v10424_v14 = vadd.f32 %v10423_v4, %v10422_v58  ;;  %4724 = vmatmul.mubr.bf16.gmra.mrb[124].mxu1 %v11754_v50  ;;  %v11768_v58 = vld [vmem:[#allocation2 + $0x68] ss:$0 sps:$4 sm:$0x11]  }
 0x1a1   : > { %10838 = vmatpush3.bf16.msra.mxu1 %v11792_v5 }
 0x1a2   : > { %v4182_v18 = vadd.f32 %v10424_v14, %v12823_v60  ;;  %v12909_v22 = vadd.f32 %v10533_v6, %v4179_v13  ;;  %v10537_v29 = vpop.f32.mrb[32].mxu1 }
 0x1a3   : > { %v10538_v34 = vpop.f32.mrb[33].mxu1 }
 0x1a4   : > { %v10425_v63 = vpop.f32.mrb[32].mxu0  ;;  %v12914_v30 = vadd.f32 %v10536_v8, %v4182_v18  ;;  %v10539_v42 = vadd.f32 %v10538_v34, %v10537_v29  ;;  %v10540_v44 = vpop.f32.mrb[34].mxu1  ;;  %v3300_v29 = vrot.slane %v11768_v58, 1 }
 0x1a5   : > { %v10426_v17 = vpop.f32.mrb[33].mxu0  ;;  %v10541_v48 = vpop.f32.mrb[35].mxu1 }
 0x1a6   : > { %v10427_v20 = vadd.f32 %v10426_v17, %v10425_v63  ;;  %v10428_v21 = vpop.f32.mrb[34].mxu0  ;;  %v10542_v57 = vadd.f32 %v10541_v48, %v10540_v44  ;;  %v3296_v63 = vrot.slane %v11765_v51, 1  ;;  %11326 = vmatmul.mubr.bf16.gmra.mrb[132].mxu0 %v3292_v7  ;;  %v11772_v44 = vld [vmem:[#allocation2 + $0x80] ss:$0 sps:$4 sm:$0x11]  }
 0x1a7   : > { %v10429_v24 = vpop.f32.mrb[35].mxu0  ;;  %11329 = vmatprep.mubr.bf16.mxu0 %v3295_v15  ;;  %v12931_v48 = vld [vmem:[#allocation2 + $0x84] sm:$0xfe]   ;;  %v11793_v15 = vld [vmem:[#allocation9 + $0x58] sm:$0xff]  }
 0x1a8   : > { %v4187_v28 = vadd.f32 %v10427_v20, %v12823_v60  ;;  %v10430_v33 = vadd.f32 %v10429_v24, %v10428_v21  ;;  %v3297_v20 = vrot.slane %v11766_v52, 1  ;;  %v3299_v21 = vrot.slane %v11767_v55, 1  ;;  %v11770_v24 = vld [vmem:[#allocation2 + $0x74] ss:$0 sps:$4 sm:$0x11]   ;;  %10839 = vmatprep.subr.bf16.mxu1 %v11793_v15 }
 0x1aa   : > { %v4190_v47 = vadd.f32 %v10430_v33, %v12823_v60  ;;  %v12917_v53 = vadd.f32 %v10539_v42, %v4187_v28  ;;  %v10543_v50 = vpop.f32.mrb[36].mxu1 }
 0x1ab   : > { %v10544_v6 = vpop.f32.mrb[37].mxu1 }
 0x1ac   : > { %v10431_v36 = vpop.f32.mrb[36].mxu0  ;;  %v12919_v3 = vadd.f32 %v10542_v57, %v4190_v47  ;;  %v10545_v14 = vadd.f32 %v10544_v6, %v10543_v50  ;;  %v10546_v46 = vpop.f32.mrb[38].mxu1  ;;  %v3298_v57 = vsel %vm1679_vm10, %v3296_v63, %v3297_v20  ;;  %v12944_v6 = vld [vmem:[#allocation2 + $0x98] ss:$0 sps:$4 sm:$0x11]   ;;  %v11794_v20 = vld [vmem:[#allocation9 + $0x18] sm:$0xff]  }
 0x1ad   : > { %v10432_v49 = vpop.f32.mrb[37].mxu0  ;;  %v10547_v16 = vpop.f32.mrb[39].mxu1  ;;  %10840 = vmatpush3.bf16.msra.mxu1 %v11794_v20 }
 0x1ae   : > { %v10433_v59 = vadd.f32 %v10432_v49, %v10431_v36  ;;  %v10434_v0 = vpop.f32.mrb[38].mxu0  ;;  %v10548_v18 = vadd.f32 %v10547_v16, %v10546_v46  ;;  %v11771_v36 = vld [vmem:[#allocation2 + $0x78] sm:$0xfe]   ;;  %v12933_v49 = vld [vmem:[#allocation2 + $0x8c] ss:$0 sps:$4 sm:$0x11]   ;;  %11330 = vmatmul.mubr.bf16.gmra.mrb[136].mxu0 %v3298_v57 }
 0x1af   : > { %v10435_v4 = vpop.f32.mrb[39].mxu0  ;;  %v3305_v63 = vrot.slane %v11771_v36, 1 }
 0x1b0   : > { %v4195_v9 = vadd.f32 %v10433_v59, %v12823_v60  ;;  %v10436_v13 = vadd.f32 %v10435_v4, %v10434_v0  ;;  %v3301_v59 = vsel %vm1679_vm10, %v3299_v21, %v3300_v29  ;;  %v3302_v0 = vrot.slane %v12927_v25, 1  ;;  %v12942_v4 = vld [vmem:[#allocation2 + $0x90] sm:$0xfe]  }
 0x1b1   : > { %11333 = vmatprep.mubr.bf16.mxu0 %v3301_v59  ;;  %v3306_v21 = vrot.slane %v11772_v44, 1  ;;  %v3309_v29 = vrot.slane %v12933_v49, 1 }
 0x1b2   : > { %v4198_v8 = vadd.f32 %v10436_v13, %v12823_v60  ;;  %v12925_v17 = vadd.f32 %v10545_v14, %v4195_v9  ;;  %v10549_v28 = vpop.f32.mrb[40].mxu1  ;;  %v3303_v9 = vrot.slane %v11770_v24, 1  ;;  %v12946_v13 = vld [vmem:[#allocation2 + $0x9c] sm:$0xfe]  }
 0x1b3   : > { %v10550_v34 = vpop.f32.mrb[41].mxu1  ;;  %v12952_v24 = vld [vmem:[#allocation2 + $0xa4] ss:$0 sps:$4 sm:$0x11]   ;;  %v3307_v59 = vsel %vm1679_vm10, %v3305_v63, %v3306_v21 }
 0x1b4   : > { %v10437_v27 = vpop.f32.mrb[40].mxu0  ;;  %v12929_v32 = vadd.f32 %v10548_v18, %v4198_v8  ;;  %v10551_v41 = vadd.f32 %v10550_v34, %v10549_v28  ;;  %v10552_v42 = vpop.f32.mrb[42].mxu1  ;;  %v3308_v28 = vrot.slane %v12931_v48, 1 }
 0x1b5   : > { %v10438_v33 = vpop.f32.mrb[41].mxu0  ;;  %v10553_v55 = vpop.f32.mrb[43].mxu1 }
 0x1b6   : > { %v10439_v38 = vadd.f32 %v10438_v33, %v10437_v27  ;;  %v10440_v39 = vpop.f32.mrb[42].mxu0  ;;  %v10554_v58 = vadd.f32 %v10553_v55, %v10552_v42  ;;  %v12957_v33 = vld [vmem:[%s13804_s2] ss:$0 sm:$0xff]  ;;  %v3312_v42 = vrot.slane %v12944_v6, 1 }
 0x1b7   : > { %v10441_v47 = vpop.f32.mrb[43].mxu0  ;;  %v11780_v55 = vld [vmem:[#allocation2 + $0xb0] ss:$0 sps:$4 sm:$0x11]  }
 0x1b8   : > { %v4203_v51 = vadd.f32 %v10439_v38, %v12823_v60  ;;  %v10442_v52 = vadd.f32 %v10441_v47, %v10440_v39  ;;  %v3318_v20 = vrot.slane %v11780_v55, 1 }
 0x1ba   : > { %v4206_v50 = vadd.f32 %v10442_v52, %v12823_v60  ;;  %v12940_v2 = vadd.f32 %v10551_v41, %v4203_v51  ;;  %v3311_v41 = vrot.slane %v12942_v4, 1  ;;  %v3304_v51 = vsel %vm1679_vm10, %v3302_v0, %v3303_v9  ;;  %v11782_v0 = vld [vmem:[#allocation2 + $0xbc] ss:$0 sps:$4 sm:$0x11]  }
 0x1bb   : > { %v10555_v7 = vpop.f32.mrb[44].mxu1  ;;  %v3314_v52 = vrot.slane %v12946_v13, 1  ;;  %11334 = vmatmul.mubr.bf16.gmra.mrb[140].mxu0 %v3304_v51  ;;  %v3321_v51 = vrot.slane %v11782_v0, 1 }
 0x1bc   : > { %v10556_v46 = vpop.f32.mrb[45].mxu1  ;;  %v12948_v16 = vadd.f32 %v10554_v58, %v4206_v50  ;;  %v11779_v50 = vld [vmem:[#allocation2 + $0xa8] sm:$0xfe]   ;;  %11337 = vmatprep.mubr.bf16.mxu0 %v3307_v59 }
 0x1bd   : > { %v10443_v5 = vpop.f32.mrb[44].mxu0  ;;  %v10558_v18 = vpop.f32.mrb[46].mxu1  ;;  %v10557_v27 = vadd.f32 %v10556_v46, %v10555_v7  ;;  %v3317_v63 = vrot.slane %v11779_v50, 1 }
 0x1be   : > { %v10444_v14 = vpop.f32.mrb[45].mxu0  ;;  %v10559_v38 = vpop.f32.mrb[47].mxu1 }
 0x1bf   : > { %v10445_v8 = vadd.f32 %v10444_v14, %v10443_v5  ;;  %v10446_v60 = vpop.f32.mrb[46].mxu0  ;;  %v10560_v39 = vadd.f32 %v10559_v38, %v10558_v18  ;;  %v3315_v14 = vrot.slane %v12952_v24, 1  ;;  %v11784_v24 = vld [vmem:[#allocation2 + $0xc8] ss:$0 sps:$4 sm:$0x11]  }
 0x1c0   : > { %v10447_v25 = vpop.f32.mrb[47].mxu0 }
 0x1c1   : > { %v4211_v34 = vadd.f32 %v12957_v33, %v10445_v8  ;;  %v10448_v36 = vadd.f32 %v10447_v25, %v10446_v60  ;;  %v11781_v8 = vld [vmem:[#allocation2 + $0xb4] sm:$0xfe]  }
 0x1c2   : > { %v3320_v38 = vrot.slane %v11781_v8, 1 }
 0x1c3   : > { %v4214_v44 = vadd.f32 %v12957_v33, %v10448_v36  ;;  %v12963_v47 = vadd.f32 %v10557_v27, %v4211_v34  ;;  %v10561_v49 = vpop.f32.mrb[48].mxu1  ;;  %v11783_v27 = vld [vmem:[#allocation2 + $0xc0] sm:$0xfe]  }
 0x1c4   : > { %v10562_v58 = vpop.f32.mrb[49].mxu1  ;;  %v3323_v55 = vrot.slane %v11783_v27, 1 }
 0x1c5   : > { %v10449_v48 = vpop.f32.mrb[48].mxu0  ;;  %v12968_v5 = vadd.f32 %v10560_v39, %v4214_v44  ;;  %v10564_v7 = vpop.f32.mrb[50].mxu1  ;;  %v10563_v15 = vadd.f32 %v10562_v58, %v10561_v49  ;;  %v3310_v49 = vsel %vm1679_vm10, %v3308_v28, %v3309_v29  ;;  %v3313_v58 = vsel %vm1679_vm10, %v3311_v41, %v3312_v42  ;;  %v11785_v42 = vld [vmem:[#allocation2 + $0xcc] sm:$0xfe]  }
 0x1c6   : > { %v10450_v57 = vpop.f32.mrb[49].mxu0  ;;  %v10565_v60 = vpop.f32.mrb[51].mxu1  ;;  %11338 = vmatmul.mubr.bf16.gmra.mrb[144].mxu0 %v3310_v49  ;;  %v3326_v27 = vrot.slane %v11785_v42, 1 }
 0x1c7   : > { %v10451_v4 = vadd.f32 %v10450_v57, %v10449_v48  ;;  %v10452_v6 = vpop.f32.mrb[50].mxu0  ;;  %v10566_v18 = vadd.f32 %v10565_v60, %v10564_v7  ;;  %v11795_v7 = vld [vmem:[#allocation9 + $0x60] sm:$0xff]   ;;  %11341 = vmatprep.mubr.bf16.mxu0 %v3313_v58  ;;  %v3316_v60 = vsel %vm1679_vm10, %v3314_v52, %v3315_v14 }
 0x1c8   : > { %v10453_v46 = vpop.f32.mrb[51].mxu0  ;;  %10841 = vmatprep.subr.bf16.mxu1 %v11795_v7 }
 0x1c9   : > { %v4219_v9 = vadd.f32 %v12957_v33, %v10451_v4  ;;  %v10454_v13 = vadd.f32 %v10453_v46, %v10452_v6 }
 0x1cb   : > { %v4222_v21 = vadd.f32 %v12957_v33, %v10454_v13  ;;  %v12973_v25 = vadd.f32 %v10563_v15, %v4219_v9  ;;  %v10567_v50 = vpop.f32.mrb[52].mxu1  ;;  %v11796_v9 = vld [vmem:[#allocation9 + $0x20] sm:$0xff]   ;;  %v3324_v13 = vrot.slane %v11784_v24, 1 }
 0x1cc   : > { %v10568_v6 = vpop.f32.mrb[53].mxu1  ;;  %10842 = vmatpush3.bf16.msra.mxu1 %v11796_v9  ;;  %v11798_v9 = vld [vmem:[#allocation9 + $0x28] sm:$0xff]  }
 0x1cd   : > { %v10455_v34 = vpop.f32.mrb[52].mxu0  ;;  %v12975_v39 = vadd.f32 %v10566_v18, %v4222_v21  ;;  %v10569_v15 = vadd.f32 %v10568_v6, %v10567_v50  ;;  %v10570_v8 = vpop.f32.mrb[54].mxu1  ;;  %v3319_v18 = vsel %vm1679_vm10, %v3317_v63, %v3318_v20  ;;  %v11786_v21 = vld [vmem:[#allocation2 + $0xd4] ss:$0 sps:$4 sm:$0x11]   ;;  %v3322_v50 = vsel %vm1679_vm10, %v3320_v38, %v3321_v51 }
 0x1ce   : > { %v10456_v36 = vpop.f32.mrb[53].mxu0  ;;  %v10571_v28 = vpop.f32.mrb[55].mxu1  ;;  %11342 = vmatmul.mubr.bf16.gmra.mrb[148].mxu0 %v3316_v60  ;;  %v3325_v14 = vsel %vm1679_vm10, %v3323_v55, %v3324_v13 }
 0x1cf   : > { %v10457_v44 = vadd.f32 %v10456_v36, %v10455_v34  ;;  %v10458_v48 = vpop.f32.mrb[54].mxu0  ;;  %v10572_v41 = vadd.f32 %v10571_v28, %v10570_v8  ;;  %11345 = vmatprep.mubr.bf16.mxu0 %v3319_v18  ;;  %v11797_v8 = vld [vmem:[#allocation9 + $0x68] sm:$0xff]  }
 0x1d0   : > { %v10459_v57 = vpop.f32.mrb[55].mxu0  ;;  %10843 = vmatprep.subr.bf16.mxu1 %v11797_v8 }
 0x1d1   : > { %v4227_v59 = vadd.f32 %v12957_v33, %v10457_v44  ;;  %v10460_v4 = vadd.f32 %v10459_v57, %v10458_v48  ;;  %10844 = vmatpush3.bf16.msra.mxu1 %v11798_v9 }
 0x1d3   : > { %v4230_v46 = vadd.f32 %v12957_v33, %v10460_v4  ;;  %v12981_v29 = vadd.f32 %v10569_v15, %v4227_v59  ;;  %v3327_v4 = vrot.slane %v11786_v21, 1 }
 0x1d4   : > { %v10573_v34 = vpop.f32.mrb[56].mxu1 }
 0x1d5   : > { %v12983_v0 = vadd.f32 %v10572_v41, %v4230_v46  ;;  %v10461_v36 = vpop.f32.mrb[56].mxu0  ;;  %v10574_v24 = vpop.f32.mrb[57].mxu1  ;;  %v3328_v38 = vsel %vm1679_vm10, %v3326_v27, %v3327_v4 }
 0x1d6   : > { %v10462_v44 = vpop.f32.mrb[57].mxu0  ;;  %v10575_v48 = vadd.f32 %v10574_v24, %v10573_v34  ;;  %v10576_v49 = vpop.f32.mrb[58].mxu1  ;;  %11346 = vmatmul.mubr.bf16.gmra.mrb[152].mxu0 %v3322_v50 }
 0x1d7   : > { %v10463_v57 = vadd.f32 %v10462_v44, %v10461_v36  ;;  %v10464_v58 = vpop.f32.mrb[58].mxu0  ;;  %v10577_v59 = vpop.f32.mrb[59].mxu1  ;;  %11349 = vmatprep.mubr.bf16.mxu0 %v3325_v14 }
 0x1d8   : > { %v10465_v6 = vpop.f32.mrb[59].mxu0  ;;  %v10578_v52 = vadd.f32 %v10577_v59, %v10576_v49 }
 0x1d9   : > { %v4235_v63 = vadd.f32 %v12957_v33, %v10463_v57  ;;  %v10466_v20 = vadd.f32 %v10465_v6, %v10464_v58 }
 0x1db   : > { %v4238_v7 = vadd.f32 %v12957_v33, %v10466_v20  ;;  %v12991_v46 = vadd.f32 %v10575_v48, %v4235_v63 }
 0x1dc   : > { %v10579_v51 = vpop.f32.mrb[60].mxu1 }
 0x1dd   : > { %v12993_v15 = vadd.f32 %v10578_v52, %v4238_v7  ;;  %v10467_v55 = vpop.f32.mrb[60].mxu0  ;;  %v10580_v13 = vpop.f32.mrb[61].mxu1 }
 0x1de   : > { %11350 = vmatmul.mubr.bf16.gmra.mrb[156].mxu0 %v3328_v38  ;;  %v10468_v28 = vpop.f32.mrb[61].mxu0  ;;  %v10581_v41 = vadd.f32 %v10580_v13, %v10579_v51  ;;  %v10582_v42 = vpop.f32.mrb[62].mxu1 }
 0x1df   : > { %v10469_v60 = vadd.f32 %v10468_v28, %v10467_v55  ;;  %v10470_v18 = vpop.f32.mrb[62].mxu0  ;;  %v10583_v21 = vpop.f32.mrb[63].mxu1 }
 0x1e0   : > { %v10471_v34 = vpop.f32.mrb[63].mxu0  ;;  %v10584_v36 = vadd.f32 %v10583_v21, %v10582_v42 }
 0x1e1   : > { %v4243_v24 = vadd.f32 %v12957_v33, %v10469_v60  ;;  %v10472_v44 = vadd.f32 %v10471_v34, %v10470_v18 }
 0x1e3   : > { %v4246_v48 = vadd.f32 %v12957_v33, %v10472_v44  ;;  %v12998_v27 = vadd.f32 %v10581_v41, %v4243_v24 }
 0x1e4   : > { %v10713_v49 = vpop.f32.mrb[64].mxu1 }
 0x1e5   : > { %v13000_v57 = vadd.f32 %v10584_v36, %v4246_v48  ;;  %v10601_v58 = vpop.f32.mrb[64].mxu0  ;;  %v10714_v59 = vpop.f32.mrb[65].mxu1 }
 0x1e6   : > { %v10602_v50 = vpop.f32.mrb[65].mxu0  ;;  %v10715_v4 = vadd.f32 %v10714_v59, %v10713_v49  ;;  %v10716_v6 = vpop.f32.mrb[66].mxu1 }
 0x1e7   : > { %v10603_v52 = vadd.f32 %v10602_v50, %v10601_v58  ;;  %v10604_v14 = vpop.f32.mrb[66].mxu0  ;;  %v10717_v63 = vpop.f32.mrb[67].mxu1 }
 0x1e8   : > { %v10605_v20 = vpop.f32.mrb[67].mxu0  ;;  %v10718_v7 = vadd.f32 %v10717_v63, %v10716_v6  ;;  %v11801_v6 = vld [vmem:[#allocation9 + $0xc0] sm:$0xff]  }
 0x1e9   : > { %v4445_v8 = vadd.f32 %v10603_v52, %v12829_v19  ;;  %v10606_v9 = vadd.f32 %v10605_v20, %v10604_v14  ;;  %10945 = vmatprep.subr.bf16.mxu0 %v11801_v6 }
 0x1eb   : > { %v4448_v33 = vadd.f32 %v10606_v9, %v12831_v31  ;;  %v13004_v38 = vadd.f32 %v10715_v4, %v4445_v8 }
 0x1ec   : > { %v10719_v51 = vpop.f32.mrb[68].mxu1 }
 0x1ed   : > { %v10607_v55 = vpop.f32.mrb[68].mxu0  ;;  %v10720_v13 = vpop.f32.mrb[69].mxu1  ;;  %v13006_v28 = vadd.f32 %v10718_v7, %v4448_v33  ;;  %v11802_v7 = vld [vmem:[#allocation9 + $0x80] sm:$0xff]  }
 0x1ee   : > { %v10608_v41 = vpop.f32.mrb[69].mxu0  ;;  %v10721_v42 = vadd.f32 %v10720_v13, %v10719_v51  ;;  %v10722_v60 = vpop.f32.mrb[70].mxu1  ;;  %v11799_v51 = vld [vmem:[#allocation9 + $0x70] sm:$0xff]   ;;  %10946 = vmatpush3.bf16.msra.mxu0 %v11802_v7  ;;  %v11803_v13 = vld [vmem:[#allocation9 + $0xc8] sm:$0xff]   ;;  %v11808_v7 = vld [vmem:[#allocation9 + $0x98] sm:$0xff]  }
 0x1ef   : > { %v10609_v18 = vadd.f32 %v10608_v41, %v10607_v55  ;;  %v10610_v21 = vpop.f32.mrb[70].mxu0  ;;  %v10723_v34 = vpop.f32.mrb[71].mxu1  ;;  %v11800_v55 = vld [vmem:[#allocation9 + $0x30] sm:$0xff]   ;;  %10845 = vmatprep.subr.bf16.mxu1 %v11799_v51  ;;  %10947 = vmatprep.subr.bf16.mxu0 %v11803_v13 }
 0x1f0   : > { %v10611_v36 = vpop.f32.mrb[71].mxu0  ;;  %v10724_v24 = vadd.f32 %v10723_v34, %v10722_v60  ;;  %10846 = vmatpush3.bf16.msra.mxu1 %v11800_v55 }
 0x1f1   : > { %v4453_v19 = vadd.f32 %v10609_v18, %v12838_v10  ;;  %v10612_v44 = vadd.f32 %v10611_v36, %v10610_v21 }
 0x1f3   : > { %v4456_v31 = vadd.f32 %v10612_v44, %v12840_v12  ;;  %v13010_v48 = vadd.f32 %v10721_v42, %v4453_v19  ;;  %v11804_v42 = vld [vmem:[#allocation9 + $0x88] sm:$0xff]  }
 0x1f4   : > { %v10725_v58 = vpop.f32.mrb[72].mxu1  ;;  %10948 = vmatpush3.bf16.msra.mxu0 %v11804_v42 }
 0x1f5   : > { %v10613_v49 = vpop.f32.mrb[72].mxu0  ;;  %v13012_v59 = vadd.f32 %v10724_v24, %v4456_v31  ;;  %v10726_v4 = vpop.f32.mrb[73].mxu1  ;;  %v11805_v24 = vld [vmem:[#allocation9 + $0xd0] sm:$0xff]  }
 0x1f6   : > { %v10614_v50 = vpop.f32.mrb[73].mxu0  ;;  %v10727_v63 = vadd.f32 %v10726_v4, %v10725_v58  ;;  %v10728_v20 = vpop.f32.mrb[74].mxu1  ;;  %v11806_v58 = vld [vmem:[#allocation9 + $0x90] sm:$0xff]   ;;  %10949 = vmatprep.subr.bf16.mxu0 %v11805_v24 }
 0x1f7   : > { %v10615_v52 = vadd.f32 %v10614_v50, %v10613_v49  ;;  %v10616_v14 = vpop.f32.mrb[74].mxu0  ;;  %v10729_v9 = vpop.f32.mrb[75].mxu1 }
 0x1f8   : > { %v10617_v8 = vpop.f32.mrb[75].mxu0  ;;  %v10730_v33 = vadd.f32 %v10729_v9, %v10728_v20  ;;  %10950 = vmatpush3.bf16.msra.mxu0 %v11806_v58 }
 0x1f9   : > { %v4461_v10 = vadd.f32 %v10615_v52, %v12847_v54  ;;  %v10618_v12 = vadd.f32 %v10617_v8, %v10616_v14  ;;  %v11807_v14 = vld [vmem:[#allocation9 + $0xd8] sm:$0xff]  }
 0x1fa   : > { %10951 = vmatprep.subr.bf16.mxu0 %v11807_v14 }
 0x1fb   : > { %v4464_v41 = vadd.f32 %v10618_v12, %v12850_v62  ;;  %v13016_v60 = vadd.f32 %v10727_v63, %v4461_v10 }
 0x1fc   : > { %v10731_v21 = vpop.f32.mrb[76].mxu1  ;;  %10952 = vmatpush3.bf16.msra.mxu0 %v11808_v7 }
 0x1fd   : > { %v10619_v18 = vpop.f32.mrb[76].mxu0  ;;  %v13018_v34 = vadd.f32 %v10730_v33, %v4464_v41  ;;  %v10732_v36 = vpop.f32.mrb[77].mxu1  ;;  %v11811_v41 = vld [vmem:[#allocation9 + $0xe0] sm:$0xff]  }
 0x1fe   : > { %v10620_v54 = vpop.f32.mrb[77].mxu0  ;;  %v10733_v31 = vadd.f32 %v10732_v36, %v10731_v21  ;;  %v10734_v49 = vpop.f32.mrb[78].mxu1  ;;  %v11812_v21 = vld [vmem:[#allocation9 + $0xa0] sm:$0xff]   ;;  %10953 = vmatprep.subr.bf16.mxu0 %v11811_v41 }
 0x1ff   : > { %v10621_v19 = vadd.f32 %v10620_v54, %v10619_v18  ;;  %v10622_v44 = vpop.f32.mrb[78].mxu0  ;;  %v10735_v50 = vpop.f32.mrb[79].mxu1 }
 0x200   : > { %v10623_v62 = vpop.f32.mrb[79].mxu0  ;;  %v10736_v52 = vadd.f32 %v10735_v50, %v10734_v49  ;;  %10954 = vmatpush3.bf16.msra.mxu0 %v11812_v21  ;;  %v11817_v49 = vld [vmem:[#allocation2] sm:$0xff]  }
 0x201   : > { %v4469_v4 = vadd.f32 %v10621_v19, %v12855_v37  ;;  %v10624_v6 = vadd.f32 %v10623_v62, %v10622_v44  ;;  %v11813_v19 = vld [vmem:[#allocation9 + $0xe8] sm:$0xff]  }
 0x202   : > { %10955 = vmatprep.subr.bf16.mxu0 %v11813_v19  ;;  %v11819_v19 = vld [vmem:[#allocation9 + $0xf8] sm:$0xff]  }
 0x203   : > { %v4472_v63 = vadd.f32 %v10624_v6, %v12858_v43  ;;  %v13022_v20 = vadd.f32 %v10733_v31, %v4469_v4  ;;  %v11814_v31 = vld [vmem:[#allocation9 + $0xa8] sm:$0xff]  }
 0x204   : > { %v10737_v9 = vpop.f32.mrb[80].mxu1  ;;  %10956 = vmatpush3.bf16.msra.mxu0 %v11814_v31  ;;  %v11820_v31 = vld [vmem:[#allocation2] sm:$0xff]  }
 0x205   : > { %v10625_v8 = vpop.f32.mrb[80].mxu0  ;;  %v13024_v10 = vadd.f32 %v10736_v52, %v4472_v63  ;;  %v10738_v33 = vpop.f32.mrb[81].mxu1 }
 0x206   : > { %v10626_v12 = vpop.f32.mrb[81].mxu0  ;;  %v10739_v37 = vadd.f32 %v10738_v33, %v10737_v9  ;;  %v10740_v13 = vpop.f32.mrb[82].mxu1  ;;  %v11810_v33 = vld [vmem:[#allocation9 + $0x38] sm:$0xff]  }
 0x207   : > { %v10627_v51 = vadd.f32 %v10626_v12, %v10625_v8  ;;  %v10628_v55 = vpop.f32.mrb[82].mxu0  ;;  %v10741_v18 = vpop.f32.mrb[83].mxu1  ;;  %v11809_v8 = vld [vmem:[#allocation9 + $0x78] sm:$0xff]  }
 0x208   : > { %v10629_v42 = vpop.f32.mrb[83].mxu0  ;;  %v10742_v36 = vadd.f32 %v10741_v18, %v10740_v13  ;;  %10847 = vmatprep.subr.bf16.mxu1 %v11809_v8  ;;  %v11816_v18 = vld [vmem:[#allocation9 + $0xb0] sm:$0xff]  }
 0x209   : > { %v4477_v43 = vadd.f32 %v10627_v51, %v12876_v26  ;;  %v10630_v54 = vadd.f32 %v10629_v42, %v10628_v55  ;;  %v5776_v26 = vshll.u32 %v11817_v49, 16  ;;  %v11815_v51 = vld [vmem:[#allocation9 + $0xf0] sm:$0xff]   ;;  %v5774_v55 = vshrl.u32 %v11817_v49, 16  ;;  %10848 = vmatpush3.bf16.msra.mxu1 %v11810_v33 }
 0x20a   : > { %10957 = vmatprep.subr.bf16.mxu0 %v11815_v51 }
 0x20b   : > { %v4480_v24 = vadd.f32 %v10630_v54, %v12881_v35  ;;  %v13028_v44 = vadd.f32 %v10739_v37, %v4477_v43  ;;  %v11818_v35 = vld [vmem:[#allocation2 + $0x8] ss:$0 sps:$4 sm:$0x11]   ;;  %v5778_v37 = vrot.slane %v5776_v26, 1  ;;  %10958 = vmatpush3.bf16.msra.mxu0 %v11816_v18 }
 0x20c   : > { %v10743_v62 = vpop.f32.mrb[84].mxu1  ;;  %v5781_v21 = vshll.u32 %v11818_v35, 16  ;;  %10959 = vmatprep.subr.bf16.mxu0 %v11819_v19 }
 0x20d   : > { %v10631_v58 = vpop.f32.mrb[84].mxu0  ;;  %v13030_v50 = vadd.f32 %v10742_v36, %v4480_v24  ;;  %v10744_v6 = vpop.f32.mrb[85].mxu1  ;;  %v5779_v43 = vor.u32 %v5778_v37, %v5774_v55 }
 0x20e   : > { %v10632_v4 = vpop.f32.mrb[85].mxu0  ;;  %v10745_v63 = vadd.f32 %v10744_v6, %v10743_v62  ;;  %v10746_v7 = vpop.f32.mrb[86].mxu1  ;;  %v5783_v24 = vrot.slane %v5781_v21, 1  ;;  %v11821_v62 = vld [vmem:[#allocation9 + $0xb8] sm:$0xff]  }
 0x20f   : > { %v10633_v52 = vadd.f32 %v10632_v4, %v10631_v58  ;;  %v10634_v14 = vpop.f32.mrb[86].mxu0  ;;  %v10747_v12 = vpop.f32.mrb[87].mxu1  ;;  %10960 = vmatpush3.bf16.msra.mxu0 %v11821_v62 }
 0x210   : > { %v10635_v9 = vpop.f32.mrb[87].mxu0  ;;  %v10748_v42 = vadd.f32 %v10747_v12, %v10746_v7 }
 0x211   : > { %v4485_v13 = vadd.f32 %v10633_v52, %v12885_v45  ;;  %v10636_v41 = vadd.f32 %v10635_v9, %v10634_v14  ;;  %v5784_v45 = vsel %vm1278_vm6, %v5779_v43, %v5783_v24 }
 0x212   : > { %8612 = vmatprep.mubr.bf16.mxu1 %v5784_v45 }
 0x213   : > { %v4488_v54 = vadd.f32 %v10636_v41, %v12888_v56  ;;  %v13034_v36 = vadd.f32 %v10745_v63, %v4485_v13  ;;  %8613 = vmatmul.mubr.bf16.vlgmr.msra.gmra.mrb[128].mxu1 %v11820_v31 }
 0x214   : > { %v10749_v6 = vpop.f32.mrb[88].mxu1 }
 0x215   : > { %v10637_v49 = vpop.f32.mrb[88].mxu0  ;;  %v13036_v58 = vadd.f32 %v10748_v42, %v4488_v54  ;;  %v10750_v14 = vpop.f32.mrb[89].mxu1 }
 0x216   : > { %v10638_v4 = vpop.f32.mrb[89].mxu0  ;;  %v10751_v63 = vadd.f32 %v10750_v14, %v10749_v6  ;;  %v10752_v7 = vpop.f32.mrb[90].mxu1 }
 0x217   : > { %v10639_v26 = vadd.f32 %v10638_v4, %v10637_v49  ;;  %v10640_v52 = vpop.f32.mrb[90].mxu0  ;;  %v10753_v9 = vpop.f32.mrb[91].mxu1 }
 0x218   : > { %v10641_v56 = vpop.f32.mrb[91].mxu0  ;;  %v10754_v12 = vadd.f32 %v10753_v9, %v10752_v7 }
 0x219   : > { %v4493_v8 = vadd.f32 %v10639_v26, %v12898_v40  ;;  %v10642_v35 = vadd.f32 %v10641_v56, %v10640_v52  ;;  %v11823_v56 = vld [vmem:[#allocation9 + $0x140] sm:$0xff]  }
 0x21a   : > { %11057 = vmatprep.subr.bf16.mxu1 %v11823_v56 }
 0x21b   : > { %v4496_v33 = vadd.f32 %v10642_v35, %v12905_v1  ;;  %v13041_v51 = vadd.f32 %v10751_v63, %v4493_v8  ;;  %v11826_v63 = vld [vmem:[#allocation9 + $0x100] sm:$0xff]  }
 0x21c   : > { %v10755_v18 = vpop.f32.mrb[92].mxu1  ;;  %11058 = vmatpush3.bf16.msra.mxu1 %v11826_v63 }
 0x21d   : > { %v10643_v55 = vpop.f32.mrb[92].mxu0  ;;  %v13043_v37 = vadd.f32 %v10754_v12, %v4496_v33  ;;  %v10756_v43 = vpop.f32.mrb[93].mxu1 }
 0x21e   : > { %v10644_v13 = vpop.f32.mrb[93].mxu0  ;;  %v10757_v40 = vadd.f32 %v10756_v43, %v10755_v18  ;;  %v10758_v19 = vpop.f32.mrb[94].mxu1 }
 0x21f   : > { %v10645_v41 = vadd.f32 %v10644_v13, %v10643_v55  ;;  %v10646_v42 = vpop.f32.mrb[94].mxu0  ;;  %v10759_v31 = vpop.f32.mrb[95].mxu1 }
 0x220   : > { %v10647_v21 = vpop.f32.mrb[95].mxu0  ;;  %v10760_v1 = vadd.f32 %v10759_v31, %v10758_v19 }
 0x221   : > { %v4501_v54 = vadd.f32 %v10645_v41, %v12909_v22  ;;  %v10648_v24 = vadd.f32 %v10647_v21, %v10646_v42 }
 0x223   : > { %v4504_v49 = vadd.f32 %v10648_v24, %v12914_v30  ;;  %v13047_v45 = vadd.f32 %v10757_v40, %v4501_v54 }
 0x224   : > { %v10761_v14 = vpop.f32.mrb[96].mxu1 }
 0x225   : > { %v10649_v62 = vpop.f32.mrb[96].mxu0  ;;  %v13049_v4 = vadd.f32 %v10760_v1, %v4504_v49  ;;  %v10762_v22 = vpop.f32.mrb[97].mxu1 }
 0x226   : > { %v10650_v6 = vpop.f32.mrb[97].mxu0  ;;  %v10763_v9 = vadd.f32 %v10762_v22, %v10761_v14  ;;  %v10764_v12 = vpop.f32.mrb[98].mxu1 }
 0x227   : > { %v10651_v26 = vadd.f32 %v10650_v6, %v10649_v62  ;;  %v10652_v52 = vpop.f32.mrb[98].mxu0  ;;  %v10765_v30 = vpop.f32.mrb[99].mxu1 }
 0x228   : > { %v10653_v7 = vpop.f32.mrb[99].mxu0  ;;  %v10766_v55 = vadd.f32 %v10765_v30, %v10764_v12 }
 0x229   : > { %v4509_v8 = vadd.f32 %v10651_v26, %v12917_v53  ;;  %v10654_v35 = vadd.f32 %v10653_v7, %v10652_v52 }
 0x22b   : > { %v4512_v33 = vadd.f32 %v10654_v35, %v12919_v3  ;;  %v13053_v13 = vadd.f32 %v10763_v9, %v4509_v8 }
 0x22c   : > { %v10767_v54 = vpop.f32.mrb[100].mxu1 }
 0x22d   : > { %v10655_v41 = vpop.f32.mrb[100].mxu0  ;;  %v13055_v42 = vadd.f32 %v10766_v55, %v4512_v33  ;;  %v10768_v53 = vpop.f32.mrb[101].mxu1 }
 0x22e   : > { %v10656_v18 = vpop.f32.mrb[101].mxu0  ;;  %v10769_v31 = vadd.f32 %v10768_v53, %v10767_v54  ;;  %v10770_v49 = vpop.f32.mrb[102].mxu1  ;;  %v11842_v54 = vld [vmem:[#allocation9 + $0x108] sm:$0xff]  }
 0x22f   : > { %v10657_v21 = vadd.f32 %v10656_v18, %v10655_v41  ;;  %v10658_v43 = vpop.f32.mrb[102].mxu0  ;;  %v10771_v1 = vpop.f32.mrb[103].mxu1 }
 0x230   : > { %v10659_v24 = vpop.f32.mrb[103].mxu0  ;;  %v10772_v62 = vadd.f32 %v10771_v1, %v10770_v49 }
 0x231   : > { %v4517_v40 = vadd.f32 %v10657_v21, %v12925_v17  ;;  %v10660_v19 = vadd.f32 %v10659_v24, %v10658_v43  ;;  %v11837_v43 = vld [vmem:[#allocation9 + $0x148] sm:$0xff]  }
 0x232   : > { %11059 = vmatprep.subr.bf16.mxu1 %v11837_v43 }
 0x233   : > { %v4520_v3 = vadd.f32 %v10660_v19, %v12929_v32  ;;  %v13059_v6 = vadd.f32 %v10769_v31, %v4517_v40  ;;  %11060 = vmatpush3.bf16.msra.mxu1 %v11842_v54 }
 0x234   : > { %v10773_v7 = vpop.f32.mrb[104].mxu1 }
 0x235   : > { %v10661_v26 = vpop.f32.mrb[104].mxu0  ;;  %v13061_v52 = vadd.f32 %v10772_v62, %v4520_v3  ;;  %v10774_v35 = vpop.f32.mrb[105].mxu1 }
 0x236   : > { %v10662_v14 = vpop.f32.mrb[105].mxu0  ;;  %v10775_v9 = vadd.f32 %v10774_v35, %v10773_v7  ;;  %v10776_v12 = vpop.f32.mrb[106].mxu1 }
 0x237   : > { %v10663_v56 = vadd.f32 %v10662_v14, %v10661_v26  ;;  %v10664_v63 = vpop.f32.mrb[106].mxu0  ;;  %v10777_v32 = vpop.f32.mrb[107].mxu1 }
 0x238   : > { %v10665_v22 = vpop.f32.mrb[107].mxu0  ;;  %v10778_v33 = vadd.f32 %v10777_v32, %v10776_v12 }
 0x239   : > { %v4525_v8 = vadd.f32 %v10663_v56, %v12940_v2  ;;  %v10666_v17 = vadd.f32 %v10665_v22, %v10664_v63 }
 0x23b   : > { %v4528_v30 = vadd.f32 %v10666_v17, %v12948_v16  ;;  %v13065_v55 = vadd.f32 %v10775_v9, %v4525_v8 }
 0x23c   : > { %v10779_v19 = vpop.f32.mrb[108].mxu1 }
 0x23d   : > { %v10667_v41 = vpop.f32.mrb[108].mxu0  ;;  %v13067_v18 = vadd.f32 %v10778_v33, %v4528_v30  ;;  %v10780_v16 = vpop.f32.mrb[109].mxu1 }
 0x23e   : > { %v10668_v21 = vpop.f32.mrb[109].mxu0  ;;  %v10781_v1 = vadd.f32 %v10780_v16, %v10779_v19  ;;  %v10782_v3 = vpop.f32.mrb[110].mxu1 }
 0x23f   : > { %v10669_v24 = vadd.f32 %v10668_v21, %v10667_v41  ;;  %v10670_v53 = vpop.f32.mrb[110].mxu0  ;;  %v10783_v62 = vpop.f32.mrb[111].mxu1 }
 0x240   : > { %v10671_v40 = vpop.f32.mrb[111].mxu0  ;;  %v10784_v26 = vadd.f32 %v10783_v62, %v10782_v3 }
 0x241   : > { %v4533_v2 = vadd.f32 %v10669_v24, %v12963_v47  ;;  %v10672_v31 = vadd.f32 %v10671_v40, %v10670_v53 }
 0x243   : > { %v4536_v49 = vadd.f32 %v10672_v31, %v12968_v5  ;;  %v13071_v14 = vadd.f32 %v10781_v1, %v4533_v2  ;;  %v11856_v1 = vld [vmem:[#allocation9 + $0x110] sm:$0xff]  }
 0x245   : > { %v10673_v56 = vpop.f32.mrb[112].mxu0  ;;  %v13073_v7 = vadd.f32 %v10784_v26, %v4536_v49  ;;  %v11851_v49 = vld [vmem:[#allocation9 + $0x150] sm:$0xff]  }
 0x246   : > { %v10674_v63 = vpop.f32.mrb[113].mxu0  ;;  %v10785_v9 = vpop.f32.mrb[112].mxu1  ;;  %11061 = vmatprep.subr.bf16.mxu1 %v11851_v49 }
 0x247   : > { %v10675_v22 = vadd.f32 %v10674_v63, %v10673_v56  ;;  %v10676_v8 = vpop.f32.mrb[114].mxu0  ;;  %v10786_v5 = vpop.f32.mrb[113].mxu1  ;;  %11062 = vmatpush3.bf16.msra.mxu1 %v11856_v1 }
 0x248   : > { %v10677_v17 = vpop.f32.mrb[115].mxu0  ;;  %v10787_v30 = vadd.f32 %v10786_v5, %v10785_v9  ;;  %v10788_v32 = vpop.f32.mrb[114].mxu1 }
 0x249   : > { %v4541_v47 = vadd.f32 %v10675_v22, %v12973_v25  ;;  %v10678_v35 = vadd.f32 %v10677_v17, %v10676_v8  ;;  %v10789_v33 = vpop.f32.mrb[115].mxu1  ;;  %v11865_v8 = vld [vmem:[#allocation9 + $0x158] sm:$0xff]  }
 0x24a   : > { %v10790_v41 = vadd.f32 %v10789_v33, %v10788_v32  ;;  %11063 = vmatprep.subr.bf16.mxu1 %v11865_v8  ;;  %v11878_v32 = vld [vmem:[#allocation9 + $0x1c0] sm:$0xff]  }
 0x24b   : > { %v4544_v12 = vadd.f32 %v10678_v35, %v12975_v39  ;;  %v13077_v43 = vadd.f32 %v10787_v30, %v4541_v47  ;;  %v11870_v30 = vld [vmem:[#allocation9 + $0x118] sm:$0xff]   ;;  %v11881_v33 = vld [vmem:[#allocation9 + $0x160] sm:$0xff]   ;;  %11169 = vmatprep.subr.bf16.mxu0 %v11878_v32 }
 0x24c   : > { %11064 = vmatpush3.bf16.msra.mxu1 %v11870_v30  ;;  %v13097_v30 = vld [vmem:[#allocation2] sm:$0xfe]  }
 0x24d   : > { %v10679_v21 = vpop.f32.mrb[116].mxu0  ;;  %v13079_v40 = vadd.f32 %v10790_v41, %v4544_v12  ;;  %11065 = vmatprep.subr.bf16.mxu1 %v11881_v33 }
 0x24e   : > { %v10680_v54 = vpop.f32.mrb[117].mxu0  ;;  %v10791_v31 = vpop.f32.mrb[116].mxu1 }
 0x24f   : > { %v10681_v24 = vadd.f32 %v10680_v54, %v10679_v21  ;;  %v10682_v53 = vpop.f32.mrb[118].mxu0  ;;  %v10792_v16 = vpop.f32.mrb[117].mxu1 }
 0x250   : > { %v10683_v2 = vpop.f32.mrb[119].mxu0  ;;  %v10793_v3 = vadd.f32 %v10792_v16, %v10791_v31  ;;  %v10794_v62 = vpop.f32.mrb[118].mxu1 }
 0x251   : > { %v4549_v25 = vadd.f32 %v10681_v24, %v12981_v29  ;;  %v10684_v19 = vadd.f32 %v10683_v2, %v10682_v53  ;;  %v10795_v26 = vpop.f32.mrb[119].mxu1 }
 0x252   : > { %v10796_v56 = vadd.f32 %v10795_v26, %v10794_v62 }
 0x253   : > { %v4552_v39 = vadd.f32 %v10684_v19, %v12983_v0  ;;  %v13083_v63 = vadd.f32 %v10793_v3, %v4549_v25 }
 0x255   : > { %v10685_v22 = vpop.f32.mrb[120].mxu0  ;;  %v13085_v47 = vadd.f32 %v10796_v56, %v4552_v39  ;;  %v11886_v39 = vld [vmem:[#allocation9 + $0x120] sm:$0xff]  }
 0x256   : > { %v10686_v17 = vpop.f32.mrb[121].mxu0  ;;  %11066 = vmatpush3.bf16.msra.mxu1 %v11886_v39 }
 0x257   : > { %v10687_v29 = vadd.f32 %v10686_v17, %v10685_v22  ;;  %v10688_v35 = vpop.f32.mrb[122].mxu0 }
 0x258   : > { %v10689_v0 = vpop.f32.mrb[123].mxu0 }
 0x259   : > { %v4557_v9 = vadd.f32 %v10687_v29, %v12991_v46  ;;  %v10690_v12 = vadd.f32 %v10689_v0, %v10688_v35 }
 0x25b   : > { %v4560_v5 = vadd.f32 %v10690_v12, %v12993_v15 }
 0x269   : > { %v10691_v54 = vpop.f32.mrb[124].mxu0 }
 0x26a   : > { %v10692_v2 = vpop.f32.mrb[125].mxu0 }
 0x26b   : > { %v10797_v41 = vpop.f32.mrb[120].mxu1  ;;  %v10693_v19 = vadd.f32 %v10692_v2, %v10691_v54  ;;  %v10694_v31 = vpop.f32.mrb[126].mxu0 }
 0x26c   : > { %v10798_v21 = vpop.f32.mrb[121].mxu1  ;;  %v10695_v16 = vpop.f32.mrb[127].mxu0 }
 0x26d   : > { %v10799_v24 = vadd.f32 %v10798_v21, %v10797_v41  ;;  %v10800_v53 = vpop.f32.mrb[122].mxu1  ;;  %v4565_v15 = vadd.f32 %v10693_v19, %v12998_v27  ;;  %v10696_v1 = vadd.f32 %v10695_v16, %v10694_v31  ;;  %v11897_v21 = vld [vmem:[#allocation9 + $0x168] sm:$0xff]  }
 0x26e   : > { %v10801_v25 = vpop.f32.mrb[123].mxu1  ;;  %11067 = vmatprep.subr.bf16.mxu1 %v11897_v21 }
 0x26f   : > { %v10802_v46 = vadd.f32 %v10801_v25, %v10800_v53  ;;  %v13089_v49 = vadd.f32 %v10799_v24, %v4557_v9  ;;  %v4568_v62 = vadd.f32 %v10696_v1, %v13000_v57  ;;  %v13100_v57 = vld [vmem:[#allocation2 + $0x8] ss:$0 sps:$4 sm:$0x11]  }
 0x270   : > { %v6174_v39 = vrot.slane %v13100_v57, 1 }
 0x271   : > { %v13092_v3 = vadd.f32 %v10802_v46, %v4560_v5  ;;  %v11323_v22 = vpop.f32.mrb[128].mxu0 }
 0x272   : > { %v4775_v29 = vadd.f32 %v11323_v22, %v13010_v48  ;;  %v4766_v35 = vpop.f32.mrb[129].mxu0 }
 0x273   : > { %v10803_v26 = vpop.f32.mrb[124].mxu1  ;;  %v4767_v9 = vadd.f32 %v4766_v35, %v13004_v38  ;;  %v11324_v12 = vpop.f32.mrb[130].mxu0 }
 0x274   : > { %v10804_v56 = vpop.f32.mrb[125].mxu1  ;;  %v4895_v32 = vmax.f32 %v4775_v29, 0.0  ;;  %v4778_v5 = vadd.f32 %v11324_v12, %v13012_v59  ;;  %v4769_v33 = vpop.f32.mrb[131].mxu0  ;;  %v6173_v59 = vrot.slane %v13097_v30, 1 }
 0x275   : > { %v10805_v8 = vadd.f32 %v10804_v56, %v10803_v26  ;;  %v10806_v17 = vpop.f32.mrb[126].mxu1  ;;  %v4893_v54 = vmax.f32 %v4767_v9, 0.0  ;;  %v4770_v48 = vadd.f32 %v4769_v33, %v13006_v28  ;;  %v5348_v28 = vld [vmem:[#allocation2 + $0x18] sm:$0xf]  ;;  %v5341_v33 = vld [vmem:[#allocation2 + $0xc] sm:$0xf] }
 0x276   : > { %v10807_v0 = vpop.f32.mrb[127].mxu1  ;;  %v10330_v24 = vpack.c.bf16 %v4895_v32, %v4895_v32  ;;  %v4896_v53 = vmax.f32 %v4778_v5, 0.0 }
 0x277   : > { %v10808_v27 = vadd.f32 %v10807_v0, %v10806_v17  ;;  %v13102_v41 = vadd.f32 %v10805_v8, %v4565_v15  ;;  %v10328_v38 = vpack.c.bf16 %v4893_v54, %v4893_v54  ;;  %v4894_v25 = vmax.f32 %v4770_v48, 0.0 }
 0x278   : > { %v5039_v19 = vshrl.u32 %v10330_v24, 16  ;;  %v10331_v31 = vpack.c.bf16 %v4896_v53, %v4896_v53  ;;  %v5042_v46 = vshll.u32 %v10330_v24, 16 }
 0x279   : > { %v13105_v2 = vadd.f32 %v10808_v27, %v4568_v62  ;;  %v5022_v16 = vshrl.u32 %v10328_v38, 16  ;;  %v5025_v15 = vshll.u32 %v10328_v38, 16  ;;  %v10329_v1 = vpack.c.bf16 %v4894_v25, %v4894_v25  ;;  %v11327_v26 = vpop.f32.mrb[132].mxu0  ;;  %v11902_v27 = vld [vmem:[#allocation9 + $0x128] sm:$0xff]  }
 0x27a   : > { %v5041_v56 = vrot.slane %v5039_v19, 7  ;;  %v5047_v22 = vshrl.u32 %v10331_v31, 16  ;;  %v5050_v8 = vshll.u32 %v10331_v31, 16  ;;  %v4791_v62 = vadd.f32 %v11327_v26, %v13022_v20  ;;  %v4782_v17 = vpop.f32.mrb[133].mxu0  ;;  %v5352_v38 = vld [vmem:[#allocation2 + $0x20] sm:$0x1]  ;;  %11068 = vmatpush3.bf16.msra.mxu1 %v11902_v27 }
 0x27b   : > { %v5024_v29 = vrot.slane %v5022_v16, 7  ;;  %v5030_v35 = vshrl.u32 %v10329_v1, 16  ;;  %v5033_v0 = vshll.u32 %v10329_v1, 16  ;;  %v4783_v9 = vadd.f32 %v4782_v17, %v13016_v60  ;;  %v11328_v12 = vpop.f32.mrb[134].mxu0  ;;  %v5345_v60 = vld [vmem:[#allocation2 + $0x14] sm:$0x1] }
 0x27c   : > { %v5044_v32 = vor.u32 %v5042_v46, %v5041_v56  ;;  %v5045_v5 = vrot.slane %v5041_v56, 4  ;;  %v5049_v21 = vrot.slane %v5047_v22, 7  ;;  %v4899_v54 = vmax.f32 %v4791_v62, 0.0  ;;  %v4785_v48 = vpop.f32.mrb[135].mxu0 }
 0x27d   : > { %v5027_v24 = vor.u32 %v5025_v15, %v5024_v29  ;;  %v5028_v53 = vrot.slane %v5024_v29, 4  ;;  %v5032_v25 = vrot.slane %v5030_v35, 7  ;;  %v4897_v19 = vmax.f32 %v4783_v9, 0.0 }
 0x27e   : > { %v5349_v20 = vsel %vm12516_vm8, %v5044_v32, %v5348_v28  ;;  %v5052_v31 = vor.u32 %v5050_v8, %v5049_v21  ;;  %v5054_v16 = vrot.slane %v5049_v21, 4  ;;  %v10334_v1 = vpack.c.bf16 %v4899_v54, %v4899_v54  ;;  %v5362_v21 = vld [vmem:[#allocation2 + $0x30] sm:$0xf] }
 0x27f   : > { %5350 = vst [vmem:[#allocation2 + $0x18] sm:$0xf] %v5349_v20  ;;  %v5342_v46 = vsel %vm12516_vm8, %v5027_v24, %v5341_v33  ;;  %v5035_v26 = vor.u32 %v5033_v0, %v5032_v25  ;;  %v5037_v56 = vrot.slane %v5032_v25, 4  ;;  %v10332_v22 = vpack.c.bf16 %v4897_v19, %v4897_v19 }
 0x280   : > { %5343 = vst [vmem:[#allocation2 + $0xc] sm:$0xf] %v5342_v46  ;;  %v5053_v15 = vsel %vm12524_vm9, %v5045_v5, %v5052_v31  ;;  %v5353_v62 = vsel %vm12489_vm3, %v5054_v16, %v5352_v38  ;;  %v5073_v17 = vshrl.u32 %v10334_v1, 16  ;;  %v5076_v29 = vshll.u32 %v10334_v1, 16 }
 0x281   : > { %5351 = vst [vmem:[#allocation2 + $0x1c] sm:$0xf] %v5053_v15  ;;  %5354 = vst [vmem:[#allocation2 + $0x20] sm:$0x1] %v5353_v62  ;;  %v5036_v28 = vsel %vm12524_vm9, %v5028_v53, %v5035_v26  ;;  %v5346_v8 = vsel %vm12489_vm3, %v5037_v56, %v5345_v60  ;;  %v5056_v35 = vshrl.u32 %v10332_v22, 16  ;;  %v11331_v0 = vpop.f32.mrb[136].mxu0  ;;  %v4794_v27 = vadd.f32 %v11328_v12, %v13024_v10 }
 0x282   : > { %5344 = vst [vmem:[#allocation2 + $0x10] sm:$0xf] %v5036_v28  ;;  %5347 = vst [vmem:[#allocation2 + $0x14] sm:$0x1] %v5346_v8  ;;  %v13123_v9 = vrot.slane %v5073_v17, 7  ;;  %v4786_v32 = vadd.f32 %v4785_v48, %v13018_v34  ;;  %v4807_v5 = vadd.f32 %v11331_v0, %v13034_v36  ;;  %v4798_v33 = vpop.f32.mrb[137].mxu0  ;;  %v6175_v25 = vsel %vm1679_vm10, %v6173_v59, %v6174_v39 }
 0x283   : > { %v13128_v54 = vrot.slane %v5056_v35, 7  ;;  %v5059_v24 = vshll.u32 %v10332_v22, 16  ;;  %v4799_v53 = vadd.f32 %v4798_v33, %v13028_v44  ;;  %v11332_v38 = vpop.f32.mrb[138].mxu0  ;;  %v5355_v12 = vld [vmem:[#allocation2 + $0x24] sm:$0xf]  ;;  %v4900_v36 = vmax.f32 %v4794_v27, 0.0 }
 0x284   : > { %v5078_v10 = vor.u32 %v5076_v29, %v13123_v9  ;;  %v5079_v34 = vrot.slane %v13123_v9, 4  ;;  %v4898_v48 = vmax.f32 %v4786_v32, 0.0  ;;  %v4801_v19 = vpop.f32.mrb[139].mxu0  ;;  %v4903_v44 = vmax.f32 %v4807_v5, 0.0  ;;  %v11913_v60 = vld [vmem:[#allocation9 + $0x170] sm:$0xff]   ;;  %v11879_v22 = vld [vmem:[#allocation9 + $0x180] sm:$0xff]  }
 0x285   : > { %v5061_v20 = vor.u32 %v5059_v24, %v13128_v54  ;;  %v5062_v31 = vrot.slane %v13128_v54, 4  ;;  %v4901_v16 = vmax.f32 %v4799_v53, 0.0  ;;  %v10335_v57 = vpack.c.bf16 %v4900_v36, %v4900_v36  ;;  %11069 = vmatprep.subr.bf16.mxu1 %v11913_v60  ;;  %v5366_v8 = vld [vmem:[#allocation2 + $0x38] sm:$0x1]  ;;  %v5359_v29 = vld [vmem:[#allocation2 + $0x2c] sm:$0x1] }
 0x286   : > { %v5363_v30 = vsel %vm12516_vm8, %v5078_v10, %v5362_v21  ;;  %v10333_v59 = vpack.c.bf16 %v4898_v48, %v4898_v48  ;;  %v4810_v39 = vadd.f32 %v11332_v38, %v13036_v58  ;;  %v10338_v46 = vpack.c.bf16 %v4903_v44, %v4903_v44  ;;  %v5376_v54 = vld [vmem:[#allocation2 + $0x48] sm:$0xf]  ;;  %v5369_v24 = vld [vmem:[#allocation2 + $0x3c] sm:$0xf]  ;;  %v11894_v10 = vld [vmem:[#allocation9 + $0x1c8] sm:$0xff]  }
 0x287   : > { %5364 = vst [vmem:[#allocation2 + $0x30] sm:$0xf] %v5363_v30  ;;  %v5356_v1 = vsel %vm12516_vm8, %v5061_v20, %v5355_v12  ;;  %v10336_v26 = vpack.c.bf16 %v4901_v16, %v4901_v16  ;;  %v4802_v56 = vadd.f32 %v4801_v19, %v13030_v50  ;;  %v5081_v15 = vshrl.u32 %v10335_v57, 16 }
 0x288   : > { %5357 = vst [vmem:[#allocation2 + $0x24] sm:$0xf] %v5356_v1  ;;  %v5084_v62 = vshll.u32 %v10335_v57, 16  ;;  %v5064_v17 = vshrl.u32 %v10333_v59, 16  ;;  %v5067_v28 = vshll.u32 %v10333_v59, 16  ;;  %v5107_v35 = vshrl.u32 %v10338_v46, 16 }
 0x289   : > { %v5110_v0 = vshll.u32 %v10338_v46, 16  ;;  %v5090_v58 = vshrl.u32 %v10336_v26, 16  ;;  %v5093_v27 = vshll.u32 %v10336_v26, 16  ;;  %v11822_v5 = vld [vmem:[#allocation2 + $0xc] sm:$0xff]   ;;  %v5083_v33 = vrot.slane %v5081_v15, 7  ;;  %v11827_v44 = vld [vmem:[#allocation2 + $0x18] sm:$0xff]  }
 0x28a   : > { %v5066_v21 = vrot.slane %v5064_v17, 7  ;;  %v4904_v50 = vmax.f32 %v4810_v39, 0.0  ;;  %v4902_v53 = vmax.f32 %v4802_v56, 0.0  ;;  %v13146_v12 = vrot.slane %v5107_v35, 7  ;;  %8773 = vmatprep.mubr.bf16.mxu0 %v11822_v5  ;;  %v11895_v39 = vld [vmem:[#allocation9 + $0x188] sm:$0xff]  }
 0x28b   : > { %v13148_v36 = vrot.slane %v5090_v58, 7  ;;  %v5086_v16 = vor.u32 %v5084_v62, %v5083_v33  ;;  %v5088_v60 = vrot.slane %v5083_v33, 4  ;;  %8774 = vmatmul.mubr.bf16.vlgmr.msra.gmra.mrb[160].mxu0 %v6175_v25  ;;  %v11910_v62 = vld [vmem:[#allocation9 + $0x1d0] sm:$0xff]  }
 0x28c   : > { %v5069_v30 = vor.u32 %v5067_v28, %v5066_v21  ;;  %v5071_v57 = vrot.slane %v5066_v21, 4  ;;  %v5112_v1 = vor.u32 %v5110_v0, %v13146_v12  ;;  %v5113_v46 = vrot.slane %v13146_v12, 4  ;;  %8781 = vmatprep.mubr.bf16.mxu0 %v11827_v44  ;;  %11170 = vmatpush3.bf16.msra.mxu0 %v11879_v22  ;;  %v11911_v28 = vld [vmem:[#allocation9 + $0x190] sm:$0xff]   ;;  %v5380_v21 = vld [vmem:[#allocation2 + $0x50] sm:$0x1] }
 0x28d   : > { %v5095_v26 = vor.u32 %v5093_v27, %v13148_v36  ;;  %v5367_v56 = vsel %vm12489_vm3, %v5088_v60, %v5366_v8  ;;  %11171 = vmatprep.subr.bf16.mxu0 %v11894_v10  ;;  %v10339_v22 = vpack.c.bf16 %v4904_v50, %v4904_v50  ;;  %v10337_v17 = vpack.c.bf16 %v4902_v53, %v4902_v53  ;;  %v11918_v33 = vld [vmem:[#allocation9 + $0x130] sm:$0xff]  }
 0x28e   : > { %v11335_v32 = vpop.f32.mrb[140].mxu0  ;;  %v5070_v25 = vsel %vm12524_vm9, %v5062_v31, %v5069_v30  ;;  %v5360_v15 = vsel %vm12489_vm3, %v5071_v57, %v5359_v29  ;;  %5368 = vst [vmem:[#allocation2 + $0x38] sm:$0x1] %v5367_v56  ;;  %v5377_v9 = vsel %vm12516_vm8, %v5112_v1, %v5376_v54  ;;  %11070 = vmatpush3.bf16.msra.mxu1 %v11918_v33  ;;  %v5390_v56 = vld [vmem:[#allocation2 + $0x60] sm:$0xf] }
 0x28f   : > { %v4814_v38 = vpop.f32.mrb[141].mxu0  ;;  %v4823_v48 = vadd.f32 %v11335_v32, %v13047_v45  ;;  %v5096_v45 = vrot.slane %v13148_v36, 4  ;;  %5358 = vst [vmem:[#allocation2 + $0x28] sm:$0xf] %v5070_v25  ;;  %5361 = vst [vmem:[#allocation2 + $0x2c] sm:$0x1] %v5360_v15 }
 0x290   : > { %v4815_v19 = vadd.f32 %v4814_v38, %v13041_v51  ;;  %v11336_v20 = vpop.f32.mrb[142].mxu0  ;;  %v5087_v51 = vsel %vm12524_vm9, %v5079_v34, %v5086_v16  ;;  %v5370_v34 = vsel %vm12516_vm8, %v5095_v26, %v5369_v24  ;;  %5378 = vst [vmem:[#allocation2 + $0x48] sm:$0xf] %v5377_v9  ;;  %v5115_v0 = vshrl.u32 %v10339_v22, 16  ;;  %11172 = vmatpush3.bf16.msra.mxu0 %v11895_v39  ;;  %v5383_v25 = vld [vmem:[#allocation2 + $0x54] sm:$0xf] }
 0x291   : > { %v4817_v59 = vpop.f32.mrb[143].mxu0  ;;  %5365 = vst [vmem:[#allocation2 + $0x34] sm:$0xf] %v5087_v51  ;;  %5371 = vst [vmem:[#allocation2 + $0x3c] sm:$0xf] %v5370_v34  ;;  %v4907_v31 = vmax.f32 %v4823_v48, 0.0  ;;  %v4826_v29 = vadd.f32 %v11336_v20, %v13049_v4  ;;  %11173 = vmatprep.subr.bf16.mxu0 %v11910_v62 }
 0x292   : > { %v4905_v8 = vmax.f32 %v4815_v19, 0.0  ;;  %v4818_v35 = vadd.f32 %v4817_v59, %v13043_v37  ;;  %v5118_v58 = vshll.u32 %v10339_v22, 16  ;;  %v5098_v27 = vshrl.u32 %v10337_v17, 16  ;;  %v5373_v19 = vld [vmem:[#allocation2 + $0x44] sm:$0x1]  ;;  %v11926_v59 = vld [vmem:[#allocation9 + $0x1d8] sm:$0xff]  }
 0x293   : > { %v5101_v32 = vshll.u32 %v10337_v17, 16  ;;  %v10342_v54 = vpack.c.bf16 %v4907_v31, %v4907_v31  ;;  %v4908_v50 = vmax.f32 %v4826_v29, 0.0  ;;  %v5117_v10 = vrot.slane %v5115_v0, 7  ;;  %v11927_v15 = vld [vmem:[#allocation9 + $0x198] sm:$0xff]   ;;  %v5394_v33 = vld [vmem:[#allocation2 + $0x68] sm:$0x1] }
 0x294   : > { %v10340_v24 = vpack.c.bf16 %v4905_v8, %v4905_v8  ;;  %v4906_v53 = vmax.f32 %v4818_v35, 0.0  ;;  %v5100_v48 = vrot.slane %v5098_v27, 7  ;;  %11174 = vmatpush3.bf16.msra.mxu0 %v11911_v28  ;;  %v13176_v34 = vld [vmem:[#allocation2 + $0x14] ss:$0 sps:$4 sm:$0x11]   ;;  %v13190_v8 = vld [vmem:[#allocation2 + $0xc] sm:$0xff]  }
 0x295   : > { %v5141_v44 = vshrl.u32 %v10342_v54, 16  ;;  %v5144_v16 = vshll.u32 %v10342_v54, 16  ;;  %v5120_v39 = vor.u32 %v5118_v58, %v5117_v10  ;;  %v5122_v1 = vrot.slane %v5117_v10, 4  ;;  %11175 = vmatprep.subr.bf16.mxu0 %v11926_v59 }
 0x296   : > { %v5124_v60 = vshrl.u32 %v10340_v24, 16  ;;  %v5127_v30 = vshll.u32 %v10340_v24, 16  ;;  %v5103_v26 = vor.u32 %v5101_v32, %v5100_v48  ;;  %v5105_v51 = vrot.slane %v5100_v48, 4 }
 0x297   : > { %v10341_v9 = vpack.c.bf16 %v4906_v53, %v4906_v53  ;;  %v5121_v22 = vsel %vm12524_vm9, %v5113_v46, %v5120_v39  ;;  %v5381_v17 = vsel %vm12489_vm3, %v5122_v1, %v5380_v21  ;;  %v5387_v21 = vld [vmem:[#allocation2 + $0x5c] sm:$0x1]  ;;  %v5786_v48 = vshrl.u32 %v13190_v8, 16 }
 0x298   : > { %v5126_v62 = vrot.slane %v5124_v60, 7  ;;  %v5104_v28 = vsel %vm12524_vm9, %v5096_v45, %v5103_v26  ;;  %v5374_v31 = vsel %vm12489_vm3, %v5105_v51, %v5373_v19  ;;  %5379 = vst [vmem:[#allocation2 + $0x4c] sm:$0xf] %v5121_v22  ;;  %5382 = vst [vmem:[#allocation2 + $0x50] sm:$0x1] %v5381_v17  ;;  %11176 = vmatpush3.bf16.msra.mxu0 %v11927_v15  ;;  %v5788_v60 = vshll.u32 %v13190_v8, 16 }
 0x299   : > { %v11339_v5 = vpop.f32.mrb[144].mxu0  ;;  %5372 = vst [vmem:[#allocation2 + $0x40] sm:$0xf] %v5104_v28  ;;  %5375 = vst [vmem:[#allocation2 + $0x44] sm:$0x1] %v5374_v31  ;;  %v5132_v27 = vshrl.u32 %v10341_v9, 16 }
 0x29a   : > { %v4830_v38 = vpop.f32.mrb[145].mxu0  ;;  %v4839_v4 = vadd.f32 %v11339_v5, %v13059_v6  ;;  %v5143_v6 = vrot.slane %v5141_v44, 7  ;;  %v5129_v46 = vor.u32 %v5127_v30, %v5126_v62  ;;  %v5130_v35 = vrot.slane %v5126_v62, 4  ;;  %v11831_v26 = vld [vmem:[#allocation2 + $0x18] sm:$0xff]   ;;  %v11833_v22 = vld [vmem:[#allocation2 + $0xc] sm:$0xfe]  }
 0x29b   : > { %v4831_v37 = vadd.f32 %v4830_v38, %v13053_v13  ;;  %v11340_v20 = vpop.f32.mrb[146].mxu0  ;;  %v10343_v13 = vpack.c.bf16 %v4908_v50, %v4908_v50  ;;  %v5135_v36 = vshll.u32 %v10341_v9, 16  ;;  %v5134_v38 = vrot.slane %v5132_v27, 7  ;;  %v5404_v9 = vld [vmem:[#allocation2 + $0x78] sm:$0xf] }
 0x29c   : > { %v13174_v57 = vpop.f32.mrb[147].mxu0  ;;  %v5146_v12 = vor.u32 %v5144_v16, %v5143_v6  ;;  %v5147_v29 = vrot.slane %v5143_v6, 4  ;;  %v5384_v5 = vsel %vm12516_vm8, %v5129_v46, %v5383_v25  ;;  %v4911_v54 = vmax.f32 %v4839_v4, 0.0  ;;  %v11832_v25 = vld [vmem:[#allocation2 + $0x20] ss:$0 sps:$4 sm:$0x11]  }
 0x29d   : > { %v5149_v0 = vshrl.u32 %v10343_v13, 16  ;;  %v5152_v58 = vshll.u32 %v10343_v13, 16  ;;  %v4909_v24 = vmax.f32 %v4831_v37, 0.0  ;;  %5385 = vst [vmem:[#allocation2 + $0x54] sm:$0xf] %v5384_v5  ;;  %v4842_v10 = vadd.f32 %v11340_v20, %v13061_v52 }
 0x29e   : > { %v5391_v45 = vsel %vm12516_vm8, %v5146_v12, %v5390_v56  ;;  %v10346_v44 = vpack.c.bf16 %v4911_v54, %v4911_v54  ;;  %v5793_v30 = vshll.u32 %v13176_v34, 16  ;;  %v5137_v39 = vor.u32 %v5135_v36, %v5134_v38  ;;  %v5397_v34 = vld [vmem:[#allocation2 + $0x6c] sm:$0xf]  ;;  %v11834_v12 = vld [vmem:[#allocation2 + $0x14] ss:$0 sps:$4 sm:$0x11]  }
 0x29f   : > { %5392 = vst [vmem:[#allocation2 + $0x60] sm:$0xf] %v5391_v45  ;;  %v5151_v53 = vrot.slane %v5149_v0, 7  ;;  %v10344_v16 = vpack.c.bf16 %v4909_v24, %v4909_v24  ;;  %v5139_v1 = vrot.slane %v5134_v38, 4  ;;  %v4912_v31 = vmax.f32 %v4842_v10, 0.0 }
 0x2a0   : > { %v5175_v51 = vshrl.u32 %v10346_v44, 16  ;;  %v5178_v56 = vshll.u32 %v10346_v44, 16  ;;  %v5138_v62 = vsel %vm12524_vm9, %v5130_v35, %v5137_v39  ;;  %v5790_v8 = vrot.slane %v5788_v60, 1  ;;  %v13239_v39 = vld [vmem:[#allocation2 + $0x24] sm:$0xff]  }
 0x2a1   : > { %v13192_v32 = vpop.f32.mrb[148].mxu0  ;;  %v5154_v37 = vor.u32 %v5152_v58, %v5151_v53  ;;  %v5156_v59 = vrot.slane %v5151_v53, 4  ;;  %v5158_v52 = vshrl.u32 %v10344_v16, 16  ;;  %v5161_v20 = vshll.u32 %v10344_v16, 16  ;;  %5386 = vst [vmem:[#allocation2 + $0x58] sm:$0xf] %v5138_v62 }
 0x2a2   : > { %v13198_v50 = vpop.f32.mrb[149].mxu0  ;;  %v5388_v13 = vsel %vm12489_vm3, %v5139_v1, %v5387_v21  ;;  %v13216_v17 = vrot.slane %v5175_v51, 7  ;;  %v4834_v46 = vadd.f32 %v13174_v57, %v13055_v42  ;;  %v5798_v35 = vshrl.u32 %v11831_v26, 16  ;;  %v5401_v62 = vld [vmem:[#allocation2 + $0x74] sm:$0x1] }
 0x2a3   : > { %v13202_v19 = vpop.f32.mrb[150].mxu0  ;;  %v5155_v15 = vsel %vm12524_vm9, %v5147_v29, %v5154_v37  ;;  %v5395_v6 = vsel %vm12489_vm3, %v5156_v59, %v5394_v33  ;;  %5389 = vst [vmem:[#allocation2 + $0x5c] sm:$0x1] %v5388_v13  ;;  %v13218_v28 = vrot.slane %v5158_v52, 7  ;;  %v5795_v29 = vrot.slane %v5793_v30, 1  ;;  %v11830_v59 = vld [vmem:[#allocation2 + $0xc] sm:$0xff]  }
 0x2a4   : > { %v13206_v4 = vpop.f32.mrb[151].mxu0  ;;  %5393 = vst [vmem:[#allocation2 + $0x64] sm:$0xf] %v5155_v15  ;;  %5396 = vst [vmem:[#allocation2 + $0x68] sm:$0x1] %v5395_v6  ;;  %v5800_v0 = vshll.u32 %v11831_v26, 16  ;;  %v5180_v27 = vor.u32 %v5178_v56, %v13216_v17  ;;  %v10347_v21 = vpack.c.bf16 %v4912_v31, %v4912_v31  ;;  %v5791_v54 = vor.u32 %v5790_v8, %v5786_v48 }
 0x2a5   : > { %v5181_v36 = vrot.slane %v13216_v17, 4  ;;  %v5163_v45 = vor.u32 %v5161_v20, %v13218_v28  ;;  %v5164_v5 = vrot.slane %v13218_v28, 4  ;;  %v4910_v24 = vmax.f32 %v4834_v46, 0.0  ;;  %v5408_v6 = vld [vmem:[#allocation2 + $0x80] sm:$0x1] }
 0x2a6   : > { %v5802_v53 = vrot.slane %v5800_v0, 1  ;;  %v5405_v42 = vsel %vm12516_vm8, %v5180_v27, %v5404_v9  ;;  %v5805_v10 = vshll.u32 %v11832_v25, 16  ;;  %v6176_v44 = vrot.slane %v11833_v22, 1 }
 0x2a7   : > { %v5398_v57 = vsel %vm12516_vm8, %v5163_v45, %v5397_v34  ;;  %5406 = vst [vmem:[#allocation2 + $0x78] sm:$0xf] %v5405_v42  ;;  %v5183_v60 = vshrl.u32 %v10347_v21, 16  ;;  %v5186_v30 = vshll.u32 %v10347_v21, 16  ;;  %v5796_v48 = vsel %vm1278_vm6, %v5791_v54, %v5795_v29  ;;  %v11835_v34 = vld [vmem:[#allocation2 + $0x24] sm:$0xff]  }
 0x2a8   : > { %5399 = vst [vmem:[#allocation2 + $0x6c] sm:$0xf] %v5398_v57  ;;  %v10345_v37 = vpack.c.bf16 %v4910_v24, %v4910_v24  ;;  %8620 = vmatprep.mubr.bf16.mxu1 %v5796_v48  ;;  %v5803_v1 = vor.u32 %v5802_v53, %v5798_v35  ;;  %v5807_v26 = vrot.slane %v5805_v10, 1  ;;  %v6177_v51 = vrot.slane %v11834_v12, 1  ;;  %v5418_v10 = vld [vmem:[#allocation2 + $0x90] sm:$0xf] }
 0x2a9   : > { %v13222_v58 = vpop.f32.mrb[152].mxu0  ;;  %v4855_v56 = vadd.f32 %v13192_v32, %v13071_v14  ;;  %v5185_v52 = vrot.slane %v5183_v60, 7  ;;  %8621 = vmatmul.mubr.bf16.gmra.mrb[132].mxu1 %v11830_v59  ;;  %v4847_v15 = vadd.f32 %v13198_v50, %v13065_v55  ;;  %v4858_v17 = vadd.f32 %v13202_v19, %v13073_v7  ;;  %v11839_v12 = vld [vmem:[#allocation2 + $0x2c] ss:$0 sps:$4 sm:$0x11]   ;;  %v11863_v11 = vld [vmem:[#allocation2 + $0x54] sm:$0xff]  }
 0x2aa   : > { %v13228_v33 = vpop.f32.mrb[153].mxu0  ;;  %v5166_v20 = vshrl.u32 %v10345_v37, 16  ;;  %v5169_v25 = vshll.u32 %v10345_v37, 16  ;;  %v5808_v13 = vsel %vm1278_vm6, %v5803_v1, %v5807_v26  ;;  %v6178_v9 = vsel %vm1679_vm10, %v6176_v44, %v6177_v51  ;;  %v5411_v26 = vld [vmem:[#allocation2 + $0x84] sm:$0xf] }
 0x2ab   : > { %v13230_v38 = vpop.f32.mrb[154].mxu0  ;;  %v4915_v22 = vmax.f32 %v4855_v56, 0.0  ;;  %v5188_v31 = vor.u32 %v5186_v30, %v5185_v52  ;;  %v5190_v14 = vrot.slane %v5185_v52, 4  ;;  %8628 = vmatprep.mubr.bf16.mxu1 %v5808_v13  ;;  %8782 = vmatmul.mubr.bf16.gmra.mrb[164].mxu0 %v6178_v9  ;;  %v4913_v8 = vmax.f32 %v4847_v15, 0.0  ;;  %v11840_v30 = vld [vmem:[#allocation2 + $0x18] sm:$0xfe]  }
 0x2ac   : > { %v13236_v16 = vpop.f32.mrb[155].mxu0  ;;  %v5168_v32 = vrot.slane %v5166_v20, 7  ;;  %8789 = vmatprep.mubr.bf16.mxu0 %v11835_v34  ;;  %v4916_v50 = vmax.f32 %v4858_v17, 0.0  ;;  %v4850_v46 = vadd.f32 %v13206_v4, %v13067_v18  ;;  %v5810_v35 = vshrl.u32 %v13239_v39, 16  ;;  %v11836_v4 = vld [vmem:[#allocation2 + $0x18] sm:$0xff]  }
 0x2ad   : > { %v10350_v55 = vpack.c.bf16 %v4915_v22, %v4915_v22  ;;  %v5189_v7 = vsel %vm12524_vm9, %v5181_v36, %v5188_v31  ;;  %v5409_v19 = vsel %vm12489_vm3, %v5190_v14, %v5408_v6  ;;  %v10348_v53 = vpack.c.bf16 %v4913_v8, %v4913_v8  ;;  %v11841_v52 = vld [vmem:[#allocation2 + $0x20] ss:$0 sps:$4 sm:$0x11]   ;;  %v5422_v14 = vld [vmem:[#allocation2 + $0x98] sm:$0x1] }
 0x2ae   : > { %v5171_v27 = vor.u32 %v5169_v25, %v5168_v32  ;;  %v5173_v45 = vrot.slane %v5168_v32, 4  ;;  %5407 = vst [vmem:[#allocation2 + $0x7c] sm:$0xf] %v5189_v7  ;;  %5410 = vst [vmem:[#allocation2 + $0x80] sm:$0x1] %v5409_v19  ;;  %v10351_v18 = vpack.c.bf16 %v4916_v50, %v4916_v50  ;;  %v4914_v44 = vmax.f32 %v4850_v46, 0.0 }
 0x2af   : > { %v5209_v54 = vshrl.u32 %v10350_v55, 16  ;;  %v5212_v24 = vshll.u32 %v10350_v55, 16  ;;  %v5812_v60 = vshll.u32 %v13239_v39, 16  ;;  %v5192_v37 = vshrl.u32 %v10348_v53, 16  ;;  %v5415_v32 = vld [vmem:[#allocation2 + $0x8c] sm:$0x1] }
 0x2b0   : > { %v5172_v36 = vsel %vm12524_vm9, %v5164_v5, %v5171_v27  ;;  %v5402_v57 = vsel %vm12489_vm3, %v5173_v45, %v5401_v62  ;;  %v5195_v59 = vshll.u32 %v10348_v53, 16  ;;  %v5217_v1 = vshrl.u32 %v10351_v18, 16  ;;  %v11845_v46 = vld [vmem:[#allocation2 + $0x30] sm:$0xff]   ;;  %v11846_v7 = vld [vmem:[#allocation2 + $0x38] ss:$0 sps:$4 sm:$0x11]  }
 0x2b1   : > { %v13249_v29 = vpop.f32.mrb[156].mxu0  ;;  %5400 = vst [vmem:[#allocation2 + $0x70] sm:$0xf] %v5172_v36  ;;  %5403 = vst [vmem:[#allocation2 + $0x74] sm:$0x1] %v5402_v57  ;;  %v5211_v48 = vrot.slane %v5209_v54, 7  ;;  %v10349_v28 = vpack.c.bf16 %v4914_v44, %v4914_v44  ;;  %8629 = vmatmul.mubr.bf16.gmra.mrb[136].mxu1 %v11836_v4  ;;  %v4863_v36 = vadd.f32 %v13228_v33, %v13077_v43 }
 0x2b2   : > { %v13254_v0 = vpop.f32.mrb[157].mxu0  ;;  %v5220_v51 = vshll.u32 %v10351_v18, 16  ;;  %v5814_v56 = vrot.slane %v5812_v60, 1  ;;  %v5817_v5 = vshll.u32 %v11839_v12, 16  ;;  %v5194_v15 = vrot.slane %v5192_v37, 7  ;;  %v11844_v57 = vld [vmem:[#allocation2 + $0x24] sm:$0xff]  }
 0x2b3   : > { %v13260_v21 = vpop.f32.mrb[158].mxu0  ;;  %v5214_v20 = vor.u32 %v5212_v24, %v5211_v48  ;;  %v5215_v25 = vrot.slane %v5211_v48, 4  ;;  %v5219_v6 = vrot.slane %v5217_v1, 7  ;;  %v5200_v62 = vshrl.u32 %v10349_v28, 16  ;;  %v11847_v19 = vld [vmem:[#allocation2 + $0x24] sm:$0xfe]  }
 0x2b4   : > { %v13262_v42 = vpop.f32.mrb[159].mxu0  ;;  %v5203_v39 = vshll.u32 %v10349_v28, 16  ;;  %v5815_v13 = vor.u32 %v5814_v56, %v5810_v35  ;;  %v5819_v9 = vrot.slane %v5817_v5, 1  ;;  %v5197_v22 = vor.u32 %v5195_v59, %v5194_v15  ;;  %v11848_v27 = vld [vmem:[#allocation2 + $0x2c] ss:$0 sps:$4 sm:$0x11]  }
 0x2b5   : > { %v5419_v34 = vsel %vm12516_vm8, %v5214_v20, %v5418_v10  ;;  %v5198_v17 = vrot.slane %v5194_v15, 4  ;;  %v5222_v31 = vor.u32 %v5220_v51, %v5219_v6  ;;  %v5224_v8 = vrot.slane %v5219_v6, 4  ;;  %v11843_v44 = vld [vmem:[#allocation2 + $0x30] sm:$0xff]  }
 0x2b6   : > { %5420 = vst [vmem:[#allocation2 + $0x90] sm:$0xf] %v5419_v34  ;;  %v5202_v12 = vrot.slane %v5200_v62, 7  ;;  %v5820_v55 = vsel %vm1278_vm6, %v5815_v13, %v5819_v9  ;;  %v6179_v50 = vrot.slane %v11840_v30, 1  ;;  %v5412_v35 = vsel %vm12516_vm8, %v5197_v22, %v5411_v26  ;;  %v5425_v22 = vld [vmem:[#allocation2 + $0x9c] sm:$0xf] }
 0x2b7   : > { %v5223_v45 = vsel %vm12524_vm9, %v5215_v25, %v5222_v31  ;;  %8636 = vmatprep.mubr.bf16.mxu1 %v5820_v55  ;;  %v6180_v54 = vrot.slane %v11841_v52, 1  ;;  %v4871_v24 = vadd.f32 %v13222_v58, %v13083_v63  ;;  %5413 = vst [vmem:[#allocation2 + $0x84] sm:$0xf] %v5412_v35  ;;  %v5423_v53 = vsel %vm12489_vm3, %v5224_v8, %v5422_v14  ;;  %v5432_v52 = vld [vmem:[#allocation2 + $0xa8] sm:$0xf] }
 0x2b8   : > { %5421 = vst [vmem:[#allocation2 + $0x94] sm:$0xf] %v5223_v45  ;;  %v5205_v18 = vor.u32 %v5203_v39, %v5202_v12  ;;  %v5207_v4 = vrot.slane %v5202_v12, 4  ;;  %5424 = vst [vmem:[#allocation2 + $0x98] sm:$0x1] %v5423_v53  ;;  %v4874_v30 = vadd.f32 %v13230_v38, %v13085_v47  ;;  %v4866_v63 = vadd.f32 %v13236_v16, %v13079_v40 }
 0x2b9   : > { %v6181_v10 = vsel %vm1679_vm10, %v6179_v50, %v6180_v54  ;;  %v4919_v60 = vmax.f32 %v4871_v24, 0.0  ;;  %v4917_v43 = vmax.f32 %v4863_v36, 0.0  ;;  %8637 = vmatmul.mubr.bf16.gmra.mrb[140].mxu1 %v11844_v57  ;;  %v5822_v33 = vshrl.u32 %v11845_v46, 16  ;;  %v11850_v24 = vld [vmem:[#allocation2 + $0x30] sm:$0xff]   ;;  %v11852_v57 = vld [vmem:[#allocation2 + $0x3c] sm:$0xff]  }
 0x2ba   : > { %v5206_v58 = vsel %vm12524_vm9, %v5198_v17, %v5205_v18  ;;  %v5416_v48 = vsel %vm12489_vm3, %v5207_v4, %v5415_v32  ;;  %8790 = vmatmul.mubr.bf16.gmra.mrb[168].mxu0 %v6181_v10  ;;  %v4920_v59 = vmax.f32 %v4874_v30, 0.0  ;;  %v4918_v1 = vmax.f32 %v4866_v63, 0.0  ;;  %v5436_v17 = vld [vmem:[#allocation2 + $0xb0] sm:$0x1] }
 0x2bb   : > { %5414 = vst [vmem:[#allocation2 + $0x88] sm:$0xf] %v5206_v58  ;;  %5417 = vst [vmem:[#allocation2 + $0x8c] sm:$0x1] %v5416_v48  ;;  %8797 = vmatprep.mubr.bf16.mxu0 %v11843_v44  ;;  %v10354_v37 = vpack.c.bf16 %v4919_v60, %v4919_v60  ;;  %v5824_v47 = vshll.u32 %v11845_v46, 16  ;;  %v10352_v38 = vpack.c.bf16 %v4917_v43, %v4917_v43  ;;  %v5829_v26 = vshll.u32 %v11846_v7, 16 }
 0x2bc   : > { %v6182_v40 = vrot.slane %v11847_v19, 1  ;;  %v6183_v16 = vrot.slane %v11848_v27, 1  ;;  %v10355_v56 = vpack.c.bf16 %v4920_v59, %v4920_v59  ;;  %v10353_v5 = vpack.c.bf16 %v4918_v1, %v4918_v1  ;;  %v5429_v46 = vld [vmem:[#allocation2 + $0xa4] sm:$0x1]  ;;  %v11849_v7 = vld [vmem:[#allocation2 + $0x3c] sm:$0xff]  }
 0x2bd   : > { %v5243_v51 = vshrl.u32 %v10354_v37, 16  ;;  %v5246_v28 = vshll.u32 %v10354_v37, 16  ;;  %v5226_v20 = vshrl.u32 %v10352_v38, 16  ;;  %v5229_v25 = vshll.u32 %v10352_v38, 16 }
 0x2be   : > { %v5826_v15 = vrot.slane %v5824_v47, 1  ;;  %v5831_v6 = vrot.slane %v5829_v26, 1  ;;  %v5251_v39 = vshrl.u32 %v10355_v56, 16  ;;  %v5254_v13 = vshll.u32 %v10355_v56, 16 }
 0x2bf   : > { %v5245_v62 = vrot.slane %v5243_v51, 7  ;;  %v5234_v9 = vshrl.u32 %v10353_v5, 16  ;;  %v5228_v34 = vrot.slane %v5226_v20, 7  ;;  %v5237_v31 = vshll.u32 %v10353_v5, 16 }
 0x2c0   : > { %v5827_v14 = vor.u32 %v5826_v15, %v5822_v33  ;;  %v6184_v32 = vsel %vm1679_vm10, %v6182_v40, %v6183_v16  ;;  %v5253_v55 = vrot.slane %v5251_v39, 7  ;;  %v11853_v19 = vld [vmem:[#allocation2 + $0x44] ss:$0 sps:$4 sm:$0x11]   ;;  %v4887_v54 = vadd.f32 %v13249_v29, %v13102_v41  ;;  %v11854_v41 = vld [vmem:[#allocation2 + $0x30] sm:$0xfe]  }
 0x2c1   : > { %v5248_v8 = vor.u32 %v5246_v28, %v5245_v62  ;;  %v5249_v12 = vrot.slane %v5245_v62, 4  ;;  %v5236_v50 = vrot.slane %v5234_v9, 7  ;;  %v5231_v27 = vor.u32 %v5229_v25, %v5228_v34  ;;  %v11855_v37 = vld [vmem:[#allocation2 + $0x38] ss:$0 sps:$4 sm:$0x11]   ;;  %v11857_v9 = vld [vmem:[#allocation2 + $0x48] sm:$0xff]  }
 0x2c2   : > { %v5232_v35 = vrot.slane %v5228_v34, 4  ;;  %v5832_v45 = vsel %vm1278_vm6, %v5827_v14, %v5831_v6  ;;  %8798 = vmatmul.mubr.bf16.gmra.mrb[172].mxu0 %v6184_v32  ;;  %v5256_v18 = vor.u32 %v5254_v13, %v5253_v55  ;;  %v5258_v4 = vrot.slane %v5253_v55, 4  ;;  %v5446_v16 = vld [vmem:[#allocation2 + $0xc0] sm:$0xf]  ;;  %v11859_v34 = vld [vmem:[#allocation2 + $0x48] sm:$0xff]  }
 0x2c3   : > { %v5433_v53 = vsel %vm12516_vm8, %v5248_v8, %v5432_v52  ;;  %v5239_v36 = vor.u32 %v5237_v31, %v5236_v50  ;;  %8644 = vmatprep.mubr.bf16.mxu1 %v5832_v45  ;;  %8805 = vmatprep.mubr.bf16.mxu0 %v11849_v7  ;;  %v5426_v10 = vsel %vm12516_vm8, %v5231_v27, %v5425_v22  ;;  %v5241_v44 = vrot.slane %v5236_v50, 4  ;;  %v11861_v22 = vld [vmem:[#allocation2 + $0x3c] sm:$0xfe]   ;;  %v5450_v32 = vld [vmem:[#allocation2 + $0xc8] sm:$0x1] }
 0x2c4   : > { %5434 = vst [vmem:[#allocation2 + $0xa8] sm:$0xf] %v5433_v53  ;;  %v4923_v60 = vmax.f32 %v4887_v54, 0.0  ;;  %v4879_v30 = vadd.f32 %v13254_v0, %v13089_v49  ;;  %8645 = vmatmul.mubr.bf16.gmra.mrb[144].mxu1 %v11850_v24  ;;  %5427 = vst [vmem:[#allocation2 + $0x9c] sm:$0xf] %v5426_v10  ;;  %v5257_v29 = vsel %vm12524_vm9, %v5249_v12, %v5256_v18  ;;  %v5834_v1 = vshrl.u32 %v11852_v57, 16 }
 0x2c5   : > { %v5437_v63 = vsel %vm12489_vm3, %v5258_v4, %v5436_v17  ;;  %v5240_v58 = vsel %vm12524_vm9, %v5232_v35, %v5239_v36  ;;  %v4890_v48 = vadd.f32 %v13260_v21, %v13105_v2  ;;  %5435 = vst [vmem:[#allocation2 + $0xac] sm:$0xf] %v5257_v29  ;;  %v5430_v49 = vsel %vm12489_vm3, %v5241_v44, %v5429_v46  ;;  %v11858_v12 = vld [vmem:[#allocation2 + $0x3c] sm:$0xff]   ;;  %v11862_v55 = vld [vmem:[#allocation2 + $0x44] ss:$0 sps:$4 sm:$0x11]  }
 0x2c6   : > { %5438 = vst [vmem:[#allocation2 + $0xb0] sm:$0x1] %v5437_v63  ;;  %5428 = vst [vmem:[#allocation2 + $0xa0] sm:$0xf] %v5240_v58  ;;  %v10358_v0 = vpack.c.bf16 %v4923_v60, %v4923_v60  ;;  %v4921_v43 = vmax.f32 %v4879_v30, 0.0  ;;  %v4882_v33 = vadd.f32 %v13262_v42, %v13092_v3  ;;  %v5836_v47 = vshll.u32 %v11852_v57, 16 }
 0x2c7   : > { %5431 = vst [vmem:[#allocation2 + $0xa4] sm:$0x1] %v5430_v49  ;;  %v4924_v59 = vmax.f32 %v4890_v48, 0.0  ;;  %v5841_v38 = vshll.u32 %v11853_v19, 16  ;;  %v6185_v5 = vrot.slane %v11854_v41, 1  ;;  %v6186_v13 = vrot.slane %v11855_v37, 1 }
 0x2c8   : > { %v5277_v26 = vshrl.u32 %v10358_v0, 16  ;;  %v5280_v40 = vshll.u32 %v10358_v0, 16  ;;  %v10356_v2 = vpack.c.bf16 %v4921_v43, %v4921_v43  ;;  %v4922_v21 = vmax.f32 %v4882_v33, 0.0  ;;  %v11860_v3 = vld [vmem:[#allocation2 + $0x50] ss:$0 sps:$4 sm:$0x11]  }
 0x2c9   : > { %v10359_v51 = vpack.c.bf16 %v4924_v59, %v4924_v59  ;;  %v5838_v28 = vrot.slane %v5836_v47, 1  ;;  %v5843_v56 = vrot.slane %v5841_v38, 1  ;;  %v5439_v42 = vld [vmem:[#allocation2 + $0xb4] sm:$0xf]  ;;  %v5443_v7 = vld [vmem:[#allocation2 + $0xbc] sm:$0x1]  ;;  %v6187_v27 = vsel %vm1679_vm10, %v6185_v5, %v6186_v13 }
 0x2ca   : > { %v5279_v52 = vrot.slane %v5277_v26, 7  ;;  %v5260_v20 = vshrl.u32 %v10356_v2, 16  ;;  %v5263_v25 = vshll.u32 %v10356_v2, 16  ;;  %v10357_v15 = vpack.c.bf16 %v4922_v21, %v4922_v21  ;;  %8806 = vmatmul.mubr.bf16.gmra.mrb[176].mxu0 %v6187_v27  ;;  %v11867_v53 = vld [vmem:[#allocation2 + $0x5c] ss:$0 sps:$4 sm:$0x11]  }
 0x2cb   : > { %v5285_v6 = vshrl.u32 %v10359_v51, 16  ;;  %v5288_v62 = vshll.u32 %v10359_v51, 16  ;;  %v5839_v39 = vor.u32 %v5838_v28, %v5834_v1  ;;  %8813 = vmatprep.mubr.bf16.mxu0 %v11857_v9  ;;  %v5846_v36 = vshrl.u32 %v11859_v34, 16  ;;  %v11866_v10 = vld [vmem:[#allocation2 + $0x54] sm:$0xff]   ;;  %v11873_v49 = vld [vmem:[#allocation2 + $0x60] sm:$0xff]  }
 0x2cc   : > { %v5282_v17 = vor.u32 %v5280_v40, %v5279_v52  ;;  %v5283_v31 = vrot.slane %v5279_v52, 4  ;;  %v5262_v14 = vrot.slane %v5260_v20, 7  ;;  %v5268_v8 = vshrl.u32 %v10357_v15, 16  ;;  %v11868_v33 = vld [vmem:[#allocation2 + $0x48] sm:$0xfe]   ;;  %v11929_v28 = vld [vmem:[#allocation9 + $0x178] sm:$0xff]  }
 0x2cd   : > { %v5287_v50 = vrot.slane %v5285_v6, 7  ;;  %v5271_v46 = vshll.u32 %v10357_v15, 16  ;;  %v5844_v19 = vsel %vm1278_vm6, %v5839_v39, %v5843_v56  ;;  %v5848_v57 = vshll.u32 %v11859_v34, 16  ;;  %v11869_v38 = vld [vmem:[#allocation2 + $0x50] ss:$0 sps:$4 sm:$0x11]   ;;  %11071 = vmatprep.subr.bf16.mxu1 %v11929_v28 }
 0x2ce   : > { %v5447_v35 = vsel %vm12516_vm8, %v5282_v17, %v5446_v16  ;;  %v5265_v45 = vor.u32 %v5263_v25, %v5262_v14  ;;  %v5266_v54 = vrot.slane %v5262_v14, 4  ;;  %v5270_v24 = vrot.slane %v5268_v8, 7  ;;  %8652 = vmatprep.mubr.bf16.mxu1 %v5844_v19  ;;  %v11874_v40 = vld [vmem:[#allocation2 + $0x68] ss:$0 sps:$4 sm:$0x11]   ;;  %v11882_v20 = vld [vmem:[#allocation2 + $0x6c] sm:$0xff]  }
 0x2cf   : > { %5448 = vst [vmem:[#allocation2 + $0xc0] sm:$0xf] %v5447_v35  ;;  %v5290_v18 = vor.u32 %v5288_v62, %v5287_v50  ;;  %v5292_v4 = vrot.slane %v5287_v50, 4  ;;  %8653 = vmatmul.mubr.bf16.gmra.mrb[148].mxu1 %v11858_v12  ;;  %v5853_v41 = vshll.u32 %v11860_v3, 16  ;;  %v5850_v58 = vrot.slane %v5848_v57, 1  ;;  %v11864_v16 = vld [vmem:[#allocation2 + $0x48] sm:$0xff]  }
 0x2d0   : > { %v5440_v44 = vsel %vm12516_vm8, %v5265_v45, %v5439_v42  ;;  %v5273_v60 = vor.u32 %v5271_v46, %v5270_v24  ;;  %v5275_v30 = vrot.slane %v5270_v24, 4  ;;  %v6188_v48 = vrot.slane %v11861_v22, 1  ;;  %v11934_v3 = vld [vmem:[#allocation9 + $0x138] sm:$0xff]   ;;  %v11876_v13 = vld [vmem:[#allocation2 + $0x5c] ss:$0 sps:$4 sm:$0x11]  }
 0x2d1   : > { %5441 = vst [vmem:[#allocation2 + $0xb4] sm:$0xf] %v5440_v44  ;;  %v5291_v29 = vsel %vm12524_vm9, %v5283_v31, %v5290_v18  ;;  %v5451_v63 = vsel %vm12489_vm3, %v5292_v4, %v5450_v32  ;;  %v6189_v43 = vrot.slane %v11862_v55, 1  ;;  %v5851_v37 = vor.u32 %v5850_v58, %v5846_v36  ;;  %v11875_v39 = vld [vmem:[#allocation2 + $0x54] sm:$0xfe]   ;;  %11072 = vmatpush3.bf16.msra.mxu1 %v11934_v3  ;;  %v11871_v9 = vld [vmem:[#allocation2 + $0x60] sm:$0xff]  }
 0x2d2   : > { %5449 = vst [vmem:[#allocation2 + $0xc4] sm:$0xf] %v5291_v29  ;;  %5452 = vst [vmem:[#allocation2 + $0xc8] sm:$0x1] %v5451_v63  ;;  %v5274_v0 = vsel %vm12524_vm9, %v5266_v54, %v5273_v60  ;;  %v5444_v61 = vsel %vm12489_vm3, %v5275_v30, %v5443_v7  ;;  %v5855_v59 = vrot.slane %v5853_v41, 1  ;;  %v5860_v1 = vshll.u32 %v11866_v10, 16 }
 0x2d3   : > { %5442 = vst [vmem:[#allocation2 + $0xb8] sm:$0xf] %v5274_v0  ;;  %5445 = vst [vmem:[#allocation2 + $0xbc] sm:$0x1] %v5444_v61  ;;  %v5865_v47 = vshll.u32 %v11867_v53, 16  ;;  %v5858_v26 = vshrl.u32 %v11866_v10, 16  ;;  %v6190_v21 = vsel %vm1679_vm10, %v6188_v48, %v6189_v43 }
 0x2d4   : > { %v5856_v2 = vsel %vm1278_vm6, %v5851_v37, %v5855_v59  ;;  %v5862_v51 = vrot.slane %v5860_v1, 1  ;;  %v5872_v23 = vshll.u32 %v11873_v49, 16  ;;  %8814 = vmatmul.mubr.bf16.gmra.mrb[180].mxu0 %v6190_v21  ;;  %v6191_v25 = vrot.slane %v11868_v33, 1  ;;  %v11883_v22 = vld [vmem:[#allocation2 + $0x74] ss:$0 sps:$4 sm:$0x11]  }
 0x2d5   : > { %8660 = vmatprep.mubr.bf16.mxu1 %v5856_v2  ;;  %8821 = vmatprep.mubr.bf16.mxu0 %v11863_v11  ;;  %v5867_v5 = vrot.slane %v5865_v47, 1  ;;  %v5877_v15 = vshll.u32 %v11874_v40, 16  ;;  %v6192_v6 = vrot.slane %v11869_v38, 1  ;;  %v5870_v62 = vshrl.u32 %v11873_v49, 16  ;;  %v11872_v31 = vld [vmem:[#allocation2 + $0x54] sm:$0xff]   ;;  %v11877_v24 = vld [vmem:[#allocation2 + $0x6c] sm:$0xff]  }
 0x2d6   : > { %v5863_v56 = vor.u32 %v5862_v51, %v5858_v26  ;;  %v5874_v52 = vrot.slane %v5872_v23, 1  ;;  %v5884_v17 = vshll.u32 %v11882_v20, 16  ;;  %v11889_v8 = vld [vmem:[#allocation2 + $0x78] sm:$0xff]   ;;  %v6194_v50 = vrot.slane %v11875_v39, 1  ;;  %v11884_v54 = vld [vmem:[#allocation2 + $0x60] sm:$0xfe]  }
 0x2d7   : > { %8661 = vmatmul.mubr.bf16.gmra.mrb[152].mxu1 %v11864_v16  ;;  %v5879_v14 = vrot.slane %v5877_v15, 1  ;;  %v6193_v32 = vsel %vm1679_vm10, %v6191_v25, %v6192_v6  ;;  %v6195_v46 = vrot.slane %v11876_v13, 1  ;;  %v5882_v7 = vshrl.u32 %v11882_v20, 16  ;;  %v11885_v27 = vld [vmem:[#allocation2 + $0x68] ss:$0 sps:$4 sm:$0x11]  }
 0x2d8   : > { %v5868_v42 = vsel %vm1278_vm6, %v5863_v56, %v5867_v5  ;;  %v5875_v34 = vor.u32 %v5874_v52, %v5870_v62  ;;  %v5886_v55 = vrot.slane %v5884_v17, 1  ;;  %v5889_v19 = vshll.u32 %v11883_v22, 16  ;;  %v11890_v53 = vld [vmem:[#allocation2 + $0x80] ss:$0 sps:$4 sm:$0x11]   ;;  %v11898_v10 = vld [vmem:[#allocation2 + $0x84] sm:$0xff]  }
 0x2d9   : > { %8668 = vmatprep.mubr.bf16.mxu1 %v5868_v42  ;;  %v5896_v35 = vshll.u32 %v11889_v8, 16  ;;  %v6196_v18 = vsel %vm1679_vm10, %v6194_v50, %v6195_v46  ;;  %v11880_v4 = vld [vmem:[#allocation2 + $0x60] sm:$0xff]   ;;  %v6197_v60 = vrot.slane %v11884_v54, 1  ;;  %v6198_v30 = vrot.slane %v11885_v27, 1  ;;  %v11891_v48 = vld [vmem:[#allocation2 + $0x6c] sm:$0xfe]  }
 0x2da   : > { %v5880_v12 = vsel %vm1278_vm6, %v5875_v34, %v5879_v14  ;;  %v5887_v45 = vor.u32 %v5886_v55, %v5882_v7  ;;  %v5891_v36 = vrot.slane %v5889_v19, 1  ;;  %v5894_v41 = vshrl.u32 %v11889_v8, 16  ;;  %v11892_v49 = vld [vmem:[#allocation2 + $0x74] ss:$0 sps:$4 sm:$0x11]   ;;  %v11887_v0 = vld [vmem:[#allocation2 + $0x78] sm:$0xff]  }
 0x2db   : > { %v5898_v57 = vrot.slane %v5896_v35, 1  ;;  %v5901_v29 = vshll.u32 %v11890_v53, 16  ;;  %v5908_v63 = vshll.u32 %v11898_v10, 16  ;;  %v11899_v61 = vld [vmem:[#allocation2 + $0x8c] ss:$0 sps:$4 sm:$0x11]   ;;  %v6199_v43 = vsel %vm1679_vm10, %v6197_v60, %v6198_v30 }
 0x2dc   : > { %8822 = vmatmul.mubr.bf16.gmra.mrb[184].mxu0 %v6193_v32  ;;  %v5892_v44 = vsel %vm1278_vm6, %v5887_v45, %v5891_v36  ;;  %v11888_v33 = vld [vmem:[#allocation2 + $0x6c] sm:$0xff]   ;;  %v6200_v38 = vrot.slane %v11891_v48, 1  ;;  %v5906_v26 = vshrl.u32 %v11898_v10, 16  ;;  %v6201_v40 = vrot.slane %v11892_v49, 1  ;;  %v11893_v21 = vld [vmem:[#allocation2 + $0x84] sm:$0xff]   ;;  %v11896_v11 = vld [vmem:[#allocation2 + $0x78] sm:$0xff]  }
 0x2dd   : > { %8829 = vmatprep.mubr.bf16.mxu0 %v11871_v9  ;;  %v5899_v58 = vor.u32 %v5898_v57, %v5894_v41  ;;  %v5903_v37 = vrot.slane %v5901_v29, 1  ;;  %v5910_v59 = vrot.slane %v5908_v63, 1  ;;  %v11905_v1 = vld [vmem:[#allocation2 + $0x90] sm:$0xff]   ;;  %v5913_v2 = vshll.u32 %v11899_v61, 16  ;;  %v11900_v28 = vld [vmem:[#allocation2 + $0x78] sm:$0xfe]  }
 0x2de   : > { %v11901_v51 = vld [vmem:[#allocation2 + $0x80] ss:$0 sps:$4 sm:$0x11]   ;;  %v5920_v23 = vshll.u32 %v11905_v1, 16  ;;  %v6202_v56 = vsel %vm1679_vm10, %v6200_v38, %v6201_v40  ;;  %v6203_v3 = vrot.slane %v11900_v28, 1  ;;  %v5918_v6 = vshrl.u32 %v11905_v1, 16 }
 0x2df   : > { %8669 = vmatmul.mubr.bf16.gmra.mrb[156].mxu1 %v11872_v31  ;;  %v5904_v47 = vsel %vm1278_vm6, %v5899_v58, %v5903_v37  ;;  %v5911_v16 = vor.u32 %v5910_v59, %v5906_v26  ;;  %v5915_v5 = vrot.slane %v5913_v2, 1  ;;  %v11906_v52 = vld [vmem:[#allocation2 + $0x98] ss:$0 sps:$4 sm:$0x11]   ;;  %v11914_v15 = vld [vmem:[#allocation2 + $0x9c] sm:$0xff]   ;;  %v6204_v42 = vrot.slane %v11901_v51, 1 }
 0x2e0   : > { %8676 = vmatprep.mubr.bf16.mxu1 %v5880_v12  ;;  %v5922_v25 = vrot.slane %v5920_v23, 1  ;;  %v5925_v62 = vshll.u32 %v11906_v52, 16  ;;  %v11907_v39 = vld [vmem:[#allocation2 + $0x84] sm:$0xfe]   ;;  %v11903_v13 = vld [vmem:[#allocation2 + $0x90] sm:$0xff]   ;;  %v5932_v17 = vshll.u32 %v11914_v15, 16 }
 0x2e1   : > { %v5916_v20 = vsel %vm1278_vm6, %v5911_v16, %v5915_v5  ;;  %v11904_v9 = vld [vmem:[#allocation2 + $0x84] sm:$0xff]   ;;  %v11935_v31 = vld [vmem:[#allocation9 + $0x1e0] sm:$0xff]   ;;  %v6205_v14 = vsel %vm1679_vm10, %v6203_v3, %v6204_v42  ;;  %v11908_v8 = vld [vmem:[#allocation2 + $0x8c] ss:$0 sps:$4 sm:$0x11]   ;;  %v5930_v50 = vshrl.u32 %v11914_v15, 16 }
 0x2e2   : > { %v5923_v34 = vor.u32 %v5922_v25, %v5918_v6  ;;  %v11915_v22 = vld [vmem:[#allocation2 + $0xa4] ss:$0 sps:$4 sm:$0x11]   ;;  %v5927_v32 = vrot.slane %v5925_v62, 1  ;;  %v11921_v12 = vld [vmem:[#allocation2 + $0xa8] sm:$0xff]   ;;  %11177 = vmatprep.subr.bf16.mxu0 %v11935_v31  ;;  %v5934_v46 = vrot.slane %v5932_v17, 1 }
 0x2e3   : > { %v11937_v7 = vld [vmem:[#allocation9 + $0x1a0] sm:$0xff]   ;;  %v11938_v19 = vld [vmem:[#allocation9 + $0x1e8] sm:$0xff]   ;;  %v6206_v27 = vrot.slane %v11907_v39, 1  ;;  %v5937_v35 = vshll.u32 %v11915_v22, 16  ;;  %v6207_v45 = vrot.slane %v11908_v8, 1  ;;  %v11912_v53 = vld [vmem:[#allocation2 + $0x90] sm:$0xff]  }
 0x2e4   : > { %8830 = vmatmul.mubr.bf16.gmra.mrb[188].mxu0 %v6196_v18  ;;  %v5928_v55 = vsel %vm1278_vm6, %v5923_v34, %v5927_v32  ;;  %v11939_v54 = vld [vmem:[#allocation9 + $0x1a8] sm:$0xff]   ;;  %v5935_v18 = vor.u32 %v5934_v46, %v5930_v50  ;;  %v5944_v36 = vshll.u32 %v11921_v12, 16  ;;  %v11945_v57 = vld [vmem:[#allocation9 + $0x1f0] sm:$0xff]   ;;  %v11922_v30 = vld [vmem:[#allocation2 + $0xb0] ss:$0 sps:$4 sm:$0x11]  }
 0x2e5   : > { %8837 = vmatprep.mubr.bf16.mxu0 %v11877_v24  ;;  %11178 = vmatpush3.bf16.msra.mxu0 %v11937_v7  ;;  %v11909_v24 = vld [vmem:[#allocation2 + $0x9c] sm:$0xff]   ;;  %v5939_v10 = vrot.slane %v5937_v35, 1  ;;  %v6208_v60 = vsel %vm1679_vm10, %v6206_v27, %v6207_v45  ;;  %v11946_v41 = vld [vmem:[#allocation9 + $0x1b0] sm:$0xff]   ;;  %v11930_v58 = vld [vmem:[#allocation2 + $0xb4] sm:$0xff]   ;;  %v5942_v61 = vshrl.u32 %v11921_v12, 16 }
 0x2e6   : > { %11179 = vmatprep.subr.bf16.mxu0 %v11938_v19  ;;  %v5946_v63 = vrot.slane %v5944_v36, 1  ;;  %v11949_v48 = vld [vmem:[#allocation9 + $0x1f8] sm:$0xff]   ;;  %v13344_v37 = vld [vmem:[#allocation9 + $0x200] sm:$0xff]   ;;  %v13346_v59 = vpop.f32.mrb[128].mxu1  ;;  %v11919_v1 = vld [vmem:[#allocation2 + $0xa8] sm:$0xff]   ;;  %v5956_v26 = vshll.u32 %v11930_v58, 16 }
 0x2e7   : > { %8677 = vmatmul.mubr.bf16.gmra.mrb[160].mxu1 %v11880_v4  ;;  %v11916_v4 = vld [vmem:[#allocation2 + $0x90] sm:$0xfe]   ;;  %v5940_v29 = vsel %vm1278_vm6, %v5935_v18, %v5939_v10  ;;  %v11923_v38 = vld [vmem:[#allocation2 + $0x9c] sm:$0xfe]   ;;  %11353 = vmatprep.subr.bf16.mxu1 %v13344_v37  ;;  %v5954_v5 = vshrl.u32 %v11930_v58, 16  ;;  %v11928_v25 = vld [vmem:[#allocation2 + $0xa8] sm:$0xff]  }
 0x2e8   : > { %8684 = vmatprep.mubr.bf16.mxu1 %v5892_v44  ;;  %v11917_v44 = vld [vmem:[#allocation2 + $0x98] ss:$0 sps:$4 sm:$0x11]   ;;  %v6209_v49 = vrot.slane %v11916_v4, 1  ;;  %v5958_v23 = vrot.slane %v5956_v26, 1  ;;  %v6212_v28 = vrot.slane %v11923_v38, 1 }
 0x2e9   : > { %11180 = vmatpush3.bf16.msra.mxu0 %v11939_v54  ;;  %v11924_v40 = vld [vmem:[#allocation2 + $0xa4] ss:$0 sps:$4 sm:$0x11]   ;;  %v11931_v2 = vld [vmem:[#allocation2 + $0xbc] ss:$0 sps:$4 sm:$0x11]  }
 0x2ea   : > { %11181 = vmatprep.subr.bf16.mxu0 %v11945_v57  ;;  %v5961_v52 = vshll.u32 %v11931_v2, 16  ;;  %v5959_v15 = vor.u32 %v5958_v23, %v5954_v5  ;;  %v11932_v3 = vld [vmem:[#allocation2 + $0xa8] sm:$0xfe]   ;;  %v11925_v42 = vld [vmem:[#allocation2 + $0xb4] sm:$0xff]   ;;  %v11936_v50 = vld [vmem:[#allocation2 + $0xc0] sm:$0xff]  }
 0x2eb   : > { %v11933_v6 = vld [vmem:[#allocation2 + $0xb0] ss:$0 sps:$4 sm:$0x11]   ;;  %v11948_v17 = vld [vmem:[#allocation2 + $0x20] ss:$0 sps:$4 sm:$0x11]  }
 0x2ec   : > { %8838 = vmatmul.mubr.bf16.gmra.mrb[192].mxu0 %v6199_v43  ;;  %v5949_v43 = vshll.u32 %v11922_v30, 16  ;;  %v11951_v62 = vld [vmem:[#allocation2 + $0xc] sm:$0xff]   ;;  %v6215_v31 = vrot.slane %v11932_v3, 1  ;;  %v6216_v32 = vrot.slane %v11933_v6, 1  ;;  %v11941_v12 = vld [vmem:[#allocation2 + $0xb4] sm:$0xfe]  }
 0x2ed   : > { %8845 = vmatprep.mubr.bf16.mxu0 %v11887_v0  ;;  %v6210_v0 = vrot.slane %v11917_v44, 1  ;;  %11182 = vmatpush3.bf16.msra.mxu0 %v11946_v41  ;;  %v11943_v34 = vld [vmem:[#allocation2 + $0xc] sm:$0xfe]   ;;  %v11952_v8 = vld [vmem:[#allocation2 + $0x14] ss:$0 sps:$4 sm:$0x11]  }
 0x2ee   : > { %11183 = vmatprep.subr.bf16.mxu0 %v11949_v48  ;;  %v5951_v16 = vrot.slane %v5949_v43, 1  ;;  %v6973_v46 = vrot.slane %v11943_v34, 1  ;;  %v11940_v19 = vld [vmem:[#allocation2 + $0xb4] sm:$0xff]   ;;  %v11942_v27 = vld [vmem:[#allocation2 + $0xbc] ss:$0 sps:$4 sm:$0x11]   ;;  %v6217_v54 = vsel %vm1679_vm10, %v6215_v31, %v6216_v32 }
 0x2ef   : > { %8685 = vmatmul.mubr.bf16.gmra.mrb[164].mxu1 %v11888_v33  ;;  %v11950_v33 = vld [vmem:[#allocation9 + $0x1b8] sm:$0xff]   ;;  %v7381_v45 = vshll.u32 %v11948_v17, 16  ;;  %v11955_v18 = vld [vmem:[#allocation2 + $0x20] ss:$0 sps:$4 sm:$0x11]   ;;  %v11957_v4 = vld [vmem:[#allocation2 + $0x24] sm:$0xff]  }
 0x2f0   : > { %8692 = vmatprep.mubr.bf16.mxu1 %v5904_v47  ;;  %v5947_v47 = vor.u32 %v5946_v63, %v5942_v61  ;;  %v11959_v57 = vld [vmem:[#allocation2 + $0x18] sm:$0xff]   ;;  %v6218_v30 = vrot.slane %v11941_v12, 1  ;;  %v6574_v41 = vshrl.u32 %v11951_v62, 16  ;;  %v7388_v48 = vshll.u32 %v11957_v4, 16  ;;  %v11961_v38 = vld [vmem:[#allocation2 + $0x24] sm:$0xfe]  }
 0x2f1   : > { %11184 = vmatpush3.bf16.msra.mxu0 %v11950_v33  ;;  %v7383_v63 = vrot.slane %v7381_v45, 1  ;;  %v11960_v61 = vld [vmem:[#allocation2 + $0x20] ss:$0 sps:$4 sm:$0x11]   ;;  %v6588_v43 = vshll.u32 %v11959_v57, 16  ;;  %v11966_v2 = vld [vmem:[#allocation2 + $0x24] sm:$0xff]  }
 0x2f2   : > { %v5952_v51 = vsel %vm1278_vm6, %v5947_v47, %v5951_v16  ;;  %v11962_v26 = vld [vmem:[#allocation2 + $0x2c] ss:$0 sps:$4 sm:$0x11]   ;;  %v11968_v16 = vld [vmem:[#allocation9 + $0x208] sm:$0xff]   ;;  %v6598_v12 = vshrl.u32 %v11966_v2, 16 }
 0x2f3   : > { %v11965_v5 = vld [vmem:[#allocation2 + $0x38] ss:$0 sps:$4 sm:$0x11]   ;;  %v6980_v34 = vrot.slane %v11962_v26, 1  ;;  %v11972_v31 = vld [vmem:[#allocation2 + $0x3c] sm:$0xff]  }
 0x2f4   : > { %8846 = vmatmul.mubr.bf16.gmra.mrb[196].mxu0 %v6202_v56  ;;  %v6213_v56 = vrot.slane %v11924_v40, 1  ;;  %v11964_v40 = vld [vmem:[#allocation2 + $0x30] sm:$0xff]  }
 0x2f5   : > { %8853 = vmatprep.mubr.bf16.mxu0 %v11893_v21  ;;  %v6211_v21 = vsel %vm1679_vm10, %v6209_v49, %v6210_v0  ;;  %v7400_v3 = vshll.u32 %v11964_v40, 16  ;;  %v7398_v17 = vshrl.u32 %v11964_v40, 16 }
 0x2f6   : > { %v6214_v39 = vsel %vm1679_vm10, %v6212_v28, %v6213_v56  ;;  %v6590_v28 = vrot.slane %v6588_v43, 1  ;;  %v6593_v56 = vshll.u32 %v11960_v61, 16  ;;  %v11981_v61 = vld [vmem:[#allocation2 + $0x3c] sm:$0xff]  }
 0x2f7   : > { %8693 = vmatmul.mubr.bf16.gmra.mrb[168].mxu1 %v11896_v11  ;;  %v11920_v11 = vld [vmem:[#allocation2 + $0x9c] sm:$0xff]   ;;  %v7402_v32 = vrot.slane %v7400_v3, 1  ;;  %v11984_v3 = vld [vmem:[#allocation2 + $0x48] sm:$0xfe]  }
 0x2f8   : > { %8700 = vmatprep.mubr.bf16.mxu1 %v5916_v20  ;;  %v11947_v20 = vld [vmem:[#allocation2 + $0x18] sm:$0xff]  }
 0x2f9   : > { %v7374_v44 = vshrl.u32 %v11947_v20, 16 }
 0x2fc   : > { %8854 = vmatmul.mubr.bf16.gmra.mrb[200].mxu0 %v6205_v14  ;;  %v7376_v14 = vshll.u32 %v11947_v20, 16  ;;  %v7386_v20 = vshrl.u32 %v11957_v4, 16  ;;  %v11963_v4 = vld [vmem:[#allocation2 + $0x24] sm:$0xff]  }
 0x2fd   : > { %8861 = vmatprep.mubr.bf16.mxu0 %v11903_v13  ;;  %v5963_v13 = vrot.slane %v5961_v52, 1 }
 0x2fe   : > { %v7378_v35 = vrot.slane %v7376_v14, 1  ;;  %v11956_v14 = vld [vmem:[#allocation2 + $0x18] sm:$0xff]  }
 0x2ff   : > { %8701 = vmatmul.mubr.bf16.gmra.mrb[172].mxu1 %v11904_v9  ;;  %v11944_v9 = vld [vmem:[#allocation2 + $0x14] ss:$0 sps:$4 sm:$0x11]   ;;  %v5964_v22 = vsel %vm1278_vm6, %v5959_v15, %v5963_v13  ;;  %v6586_v15 = vshrl.u32 %v11959_v57, 16  ;;  %v6595_v13 = vrot.slane %v6593_v56, 1 }
 0x300   : > { %8708 = vmatprep.mubr.bf16.mxu1 %v5928_v55  ;;  %v6576_v55 = vshll.u32 %v11951_v62, 16  ;;  %v6974_v7 = vrot.slane %v11944_v9, 1  ;;  %v7379_v49 = vor.u32 %v7378_v35, %v7374_v44  ;;  %v6600_v62 = vshll.u32 %v11966_v2, 16  ;;  %v11969_v35 = vld [vmem:[#allocation2 + $0x30] sm:$0xfe]  }
 0x301   : > { %v6979_v9 = vrot.slane %v11961_v38, 1  ;;  %v6982_v44 = vrot.slane %v11969_v35, 1 }
 0x302   : > { %v6578_v36 = vrot.slane %v6576_v55, 1  ;;  %v6975_v10 = vsel %vm1679_vm10, %v6973_v46, %v6974_v7  ;;  %v11973_v46 = vld [vmem:[#allocation2 + $0x44] ss:$0 sps:$4 sm:$0x11]   ;;  %v11974_v7 = vld [vmem:[#allocation2 + $0x30] sm:$0xff]  }
 0x303   : > { %v6981_v45 = vsel %vm1679_vm10, %v6979_v9, %v6980_v34  ;;  %v6610_v40 = vshrl.u32 %v11974_v7, 16 }
 0x304   : > { %8862 = vmatmul.mubr.bf16.gmra.mrb[204].mxu0 %v6208_v60  ;;  %v11958_v60 = vld [vmem:[#allocation2 + $0x2c] ss:$0 sps:$4 sm:$0x11]   ;;  %v6579_v0 = vor.u32 %v6578_v36, %v6574_v41  ;;  %v7403_v36 = vor.u32 %v7402_v32, %v7398_v17  ;;  %v7410_v41 = vshrl.u32 %v11972_v31, 16 }
 0x305   : > { %8869 = vmatprep.mubr.bf16.mxu0 %v11909_v24  ;;  %v6581_v24 = vshll.u32 %v11952_v8, 16  ;;  %v7393_v47 = vshll.u32 %v11958_v60, 16  ;;  %v7405_v8 = vshll.u32 %v11965_v5, 16  ;;  %v11979_v60 = vld [vmem:[#allocation2 + $0x48] sm:$0xff]  }
 0x306   : > { %v7422_v5 = vshrl.u32 %v11979_v60, 16 }
 0x307   : > { %8709 = vmatmul.mubr.bf16.gmra.mrb[176].mxu1 %v11912_v53  ;;  %v11954_v53 = vld [vmem:[#allocation2 + $0x18] sm:$0xfe]   ;;  %v6583_v58 = vrot.slane %v6581_v24, 1  ;;  %v7395_v6 = vrot.slane %v7393_v47, 1  ;;  %v7424_v47 = vshll.u32 %v11979_v60, 16 }
 0x308   : > { %8716 = vmatprep.mubr.bf16.mxu1 %v5940_v29  ;;  %v6219_v29 = vrot.slane %v11942_v27, 1  ;;  %v6976_v33 = vrot.slane %v11954_v53, 1  ;;  %v11975_v24 = vld [vmem:[#allocation2 + $0x38] ss:$0 sps:$4 sm:$0x11]   ;;  %v7407_v53 = vrot.slane %v7405_v8, 1 }
 0x309   : > { %v6584_v23 = vsel %vm1278_vm6, %v6579_v0, %v6583_v58  ;;  %v6617_v58 = vshll.u32 %v11975_v24, 16  ;;  %v11990_v8 = vld [vmem:[#allocation2 + $0x50] ss:$0 sps:$4 sm:$0x11]  }
 0x30a   : > { %v7408_v43 = vsel %vm1278_vm6, %v7403_v36, %v7407_v53  ;;  %v6641_v24 = vshll.u32 %v11990_v8, 16  ;;  %v11991_v53 = vld [vmem:[#allocation2 + $0x54] sm:$0xfe]   ;;  %v11995_v36 = vld [vmem:[#allocation2 + $0x68] ss:$0 sps:$4 sm:$0x11]  }
 0x30b   : > { %v6619_v2 = vrot.slane %v6617_v58, 1  ;;  %v11997_v58 = vld [vmem:[#allocation2 + $0x5c] ss:$0 sps:$4 sm:$0x11]  }
 0x30c   : > { %8870 = vmatmul.mubr.bf16.gmra.mrb[208].mxu0 %v6211_v21  ;;  %v6220_v21 = vsel %vm1679_vm10, %v6218_v30, %v6219_v29  ;;  %v12007_v8 = vld [vmem:[#allocation2 + $0x74] ss:$0 sps:$4 sm:$0x11]  }
 0x30d   : > { %8877 = vmatprep.mubr.bf16.mxu0 %v11919_v1  ;;  %v6977_v1 = vrot.slane %v11955_v18, 1  ;;  %v6612_v18 = vshll.u32 %v11974_v7, 16 }
 0x30f   : > { %8717 = vmatmul.mubr.bf16.gmra.mrb[180].mxu1 %v11920_v11  ;;  %v7390_v11 = vrot.slane %v7388_v48, 1  ;;  %v6978_v52 = vsel %vm1679_vm10, %v6976_v33, %v6977_v1  ;;  %v11976_v48 = vld [vmem:[#allocation2 + $0x3c] sm:$0xfe]   ;;  %v6614_v0 = vrot.slane %v6612_v18, 1 }
 0x310   : > { %8724 = vmatprep.mubr.bf16.mxu1 %v5952_v51  ;;  %v7384_v51 = vsel %vm1278_vm6, %v7379_v49, %v7383_v63  ;;  %v7417_v63 = vshll.u32 %v11973_v46, 16  ;;  %v11977_v49 = vld [vmem:[#allocation2 + $0x44] ss:$0 sps:$4 sm:$0x11]   ;;  %v11978_v46 = vld [vmem:[#allocation2 + $0x3c] sm:$0xff]  }
 0x311   : > { %v11980_v1 = vld [vmem:[#allocation2 + $0x50] ss:$0 sps:$4 sm:$0x11]   ;;  %v6986_v56 = vrot.slane %v11977_v49, 1  ;;  %v6991_v49 = vrot.slane %v11991_v53, 1 }
 0x312   : > { %v7419_v26 = vrot.slane %v7417_v63, 1  ;;  %v11992_v18 = vld [vmem:[#allocation2 + $0x5c] ss:$0 sps:$4 sm:$0x11]   ;;  %v6643_v63 = vrot.slane %v6641_v24, 1 }
 0x314   : > { %8878 = vmatmul.mubr.bf16.gmra.mrb[212].mxu0 %v6214_v39  ;;  %v6591_v39 = vor.u32 %v6590_v28, %v6586_v15  ;;  %v11971_v28 = vld [vmem:[#allocation2 + $0x30] sm:$0xff]  }
 0x315   : > { %8885 = vmatprep.mubr.bf16.mxu0 %v11925_v42  ;;  %v7391_v42 = vor.u32 %v7390_v11, %v7386_v20  ;;  %v7429_v20 = vshll.u32 %v11980_v1, 16  ;;  %v11998_v15 = vld [vmem:[#allocation9 + $0x218] sm:$0xff]  }
 0x316   : > { %v6596_v27 = vsel %vm1278_vm6, %v6591_v39, %v6595_v13  ;;  %v11988_v39 = vld [vmem:[#allocation2 + $0x5c] ss:$0 sps:$4 sm:$0x11]  }
 0x317   : > { %8725 = vmatmul.mubr.bf16.gmra.mrb[184].mxu1 %v11928_v25  ;;  %v11967_v25 = vld [vmem:[#allocation2 + $0x2c] ss:$0 sps:$4 sm:$0x11]  }
 0x318   : > { %8732 = vmatprep.mubr.bf16.mxu1 %v5964_v22  ;;  %v11983_v22 = vld [vmem:[#allocation9 + $0x210] sm:$0xff]   ;;  %v6605_v55 = vshll.u32 %v11967_v25, 16  ;;  %v11987_v25 = vld [vmem:[#allocation2 + $0x54] sm:$0xff]  }
 0x319   : > { %v7436_v34 = vshll.u32 %v11987_v25, 16 }
 0x31c   : > { %8886 = vmatmul.mubr.bf16.gmra.mrb[216].mxu0 %v6217_v54  ;;  %v7412_v54 = vshll.u32 %v11972_v31, 16  ;;  %v7431_v31 = vrot.slane %v7429_v20, 1  ;;  %v12005_v20 = vld [vmem:[#allocation2 + $0x68] ss:$0 sps:$4 sm:$0x11]  }
 0x31d   : > { %8893 = vmatprep.mubr.bf16.mxu0 %v11936_v50  ;;  %v11970_v50 = vld [vmem:[#allocation2 + $0x38] ss:$0 sps:$4 sm:$0x11]  }
 0x31e   : > { %v6983_v30 = vrot.slane %v11970_v50, 1  ;;  %v7414_v29 = vrot.slane %v7412_v54, 1  ;;  %v7441_v50 = vshll.u32 %v11988_v39, 16  ;;  %v11996_v54 = vld [vmem:[#allocation2 + $0x54] sm:$0xff]  }
 0x31f   : > { %8733 = vmatmul.mubr.bf16.gmra.mrb[188].mxu1 %v11940_v19  ;;  %v7396_v19 = vsel %vm1278_vm6, %v7391_v42, %v7395_v6  ;;  %v11985_v6 = vld [vmem:[#allocation2 + $0x50] ss:$0 sps:$4 sm:$0x11]  }
 0x320   : > { %8934 = vmatprep.mubr.bf16.mxu1 %v6975_v10  ;;  %v6607_v10 = vrot.slane %v6605_v55, 1  ;;  %v6984_v38 = vsel %vm1679_vm10, %v6982_v44, %v6983_v30  ;;  %v7415_v11 = vor.u32 %v7414_v29, %v7410_v41  ;;  %v6989_v7 = vrot.slane %v11985_v6, 1  ;;  %v10850_v6 = vpop.f32.mrb[129].mxu1 }
 0x321   : > { %v6648_v29 = vshll.u32 %v11996_v54, 16 }
 0x322   : > { %v7420_v13 = vsel %vm1278_vm6, %v7415_v11, %v7419_v26  ;;  %v6653_v11 = vshll.u32 %v11997_v58, 16  ;;  %v12018_v58 = vld [vmem:[#allocation2 + $0x8c] ss:$0 sps:$4 sm:$0x11]  }
 0x323   : > { %v6650_v26 = vrot.slane %v6648_v29, 1  ;;  %v12015_v29 = vld [vmem:[#allocation2 + $0x80] ss:$0 sps:$4 sm:$0x11]  }
 0x324   : > { %8894 = vmatmul.mubr.bf16.gmra.mrb[220].mxu0 %v6220_v21  ;;  %v11982_v21 = vld [vmem:[#allocation2 + $0x44] ss:$0 sps:$4 sm:$0x11]   ;;  %v6655_v39 = vrot.slane %v6653_v11, 1 }
 0x325   : > { %9095 = vmatprep.mubr.bf16.mxu0 %v7384_v51  ;;  %v6985_v51 = vrot.slane %v11976_v48, 1  ;;  %v6629_v42 = vshll.u32 %v11982_v21, 16  ;;  %v12004_v21 = vld [vmem:[#allocation2 + $0x60] sm:$0xff]  }
 0x327   : > { %8935 = vmatmul.mubr.bf16.vlgmr.msra.gmra.mrb[192].mxu1 %v6584_v23  ;;  %v6624_v23 = vshll.u32 %v11981_v61, 16  ;;  %v6987_v17 = vsel %vm1679_vm10, %v6985_v51, %v6986_v56  ;;  %v6631_v32 = vrot.slane %v6629_v42, 1 }
 0x328   : > { %8942 = vmatprep.mubr.bf16.mxu1 %v6978_v52  ;;  %11354 = vmatpush3.bf16.msra.mxu1 %v13344_v37  ;;  %v6602_v37 = vrot.slane %v6600_v62, 1  ;;  %v7426_v52 = vrot.slane %v7424_v47, 1  ;;  %v7453_v47 = vshll.u32 %v11995_v36, 16  ;;  %v6998_v36 = vrot.slane %v12007_v8, 1 }
 0x329   : > { %11355 = vmatprep.subr.bf16.mxu1 %v11968_v16  ;;  %v6626_v62 = vrot.slane %v6624_v23, 1 }
 0x32a   : > { %v6603_v57 = vor.u32 %v6602_v37, %v6598_v12  ;;  %v7427_v12 = vor.u32 %v7426_v52, %v7422_v5  ;;  %v6988_v37 = vrot.slane %v11984_v3, 1  ;;  %v6646_v5 = vshrl.u32 %v11996_v54, 16 }
 0x32b   : > { %v7455_v3 = vrot.slane %v7453_v47, 1 }
 0x32c   : > { %11356 = vmatpush3.bf16.msra.mxu1 %v11968_v16  ;;  %9096 = vmatmul.mubr.bf16.vlgmr.msra.gmra.mrb[224].mxu0 %v11956_v14  ;;  %v6608_v33 = vsel %vm1278_vm6, %v6603_v57, %v6607_v10  ;;  %v6615_v16 = vor.u32 %v6614_v0, %v6610_v40  ;;  %v6622_v14 = vshrl.u32 %v11981_v61, 16  ;;  %v7432_v57 = vsel %vm1278_vm6, %v7427_v12, %v7431_v31  ;;  %v11986_v61 = vld [vmem:[#allocation2 + $0x48] sm:$0xff]  }
 0x32d   : > { %11357 = vmatprep.subr.bf16.mxu1 %v11983_v22  ;;  %9103 = vmatprep.mubr.bf16.mxu0 %v7396_v19  ;;  %v7434_v19 = vshrl.u32 %v11987_v25, 16  ;;  %v6990_v30 = vsel %vm1679_vm10, %v6988_v37, %v6989_v7  ;;  %v6992_v0 = vrot.slane %v11992_v18, 1  ;;  %v12002_v40 = vld [vmem:[#allocation2 + $0x6c] sm:$0xff]   ;;  %v6660_v25 = vshll.u32 %v12004_v21, 16  ;;  %v12001_v18 = vld [vmem:[#allocation2 + $0x60] sm:$0xff]  }
 0x32e   : > { %v6620_v9 = vsel %vm1278_vm6, %v6615_v16, %v6619_v2  ;;  %v6627_v55 = vor.u32 %v6626_v62, %v6622_v14  ;;  %v12000_v2 = vld [vmem:[#allocation2 + $0x68] ss:$0 sps:$4 sm:$0x11]   ;;  %v12003_v16 = vld [vmem:[#allocation2 + $0x74] ss:$0 sps:$4 sm:$0x11]   ;;  %v6651_v42 = vor.u32 %v6650_v26, %v6646_v5 }
 0x32f   : > { %8943 = vmatmul.mubr.bf16.gmra.mrb[196].mxu1 %v6596_v27  ;;  %v7438_v27 = vrot.slane %v7436_v34, 1  ;;  %v6993_v56 = vsel %vm1679_vm10, %v6991_v49, %v6992_v0  ;;  %v7460_v52 = vshll.u32 %v12002_v40, 16  ;;  %v11993_v62 = vld [vmem:[#allocation2 + $0x54] sm:$0xff]   ;;  %v7465_v31 = vshll.u32 %v12003_v16, 16  ;;  %v12011_v7 = vld [vmem:[#allocation2 + $0x6c] sm:$0xff]  }
 0x330   : > { %8950 = vmatprep.mubr.bf16.mxu1 %v6981_v45  ;;  %11358 = vmatpush3.bf16.msra.mxu1 %v11983_v22  ;;  %v11989_v22 = vld [vmem:[#allocation2 + $0x48] sm:$0xff]   ;;  %v11994_v45 = vld [vmem:[#allocation2 + $0x60] sm:$0xff]   ;;  %v6632_v10 = vsel %vm1278_vm6, %v6627_v55, %v6631_v32  ;;  %v12009_v34 = vld [vmem:[#allocation2 + $0x78] sm:$0xff]   ;;  %v6662_v14 = vrot.slane %v6660_v25, 1  ;;  %v6665_v12 = vshll.u32 %v12005_v20, 16  ;;  %v7001_v5 = vrot.slane %v12015_v29, 1 }
 0x331   : > { %11359 = vmatprep.subr.bf16.mxu1 %v11998_v15  ;;  %v6636_v35 = vshll.u32 %v11989_v22, 16  ;;  %v7448_v60 = vshll.u32 %v11994_v45, 16  ;;  %v6634_v41 = vshrl.u32 %v11989_v22, 16  ;;  %v7439_v48 = vor.u32 %v7438_v27, %v7434_v19  ;;  %v12006_v32 = vld [vmem:[#allocation2 + $0x6c] sm:$0xfe]  }
 0x332   : > { %v10851_v22 = vadd.f32 %v10850_v6, %v13346_v59  ;;  %v12010_v55 = vld [vmem:[#allocation2 + $0x80] ss:$0 sps:$4 sm:$0x11]   ;;  %v7458_v27 = vshrl.u32 %v12002_v40, 16  ;;  %v6658_v59 = vshrl.u32 %v12004_v21, 16  ;;  %v7467_v54 = vrot.slane %v7465_v31, 1 }
 0x333   : > { %v6638_v44 = vrot.slane %v6636_v35, 1  ;;  %v7450_v1 = vrot.slane %v7448_v60, 1  ;;  %v12012_v35 = vld [vmem:[#allocation2 + $0x74] ss:$0 sps:$4 sm:$0x11]   ;;  %v6667_v53 = vrot.slane %v6665_v12, 1 }
 0x334   : > { %9104 = vmatmul.mubr.bf16.gmra.mrb[228].mxu0 %v11963_v4  ;;  %11360 = vmatpush3.bf16.msra.mxu1 %v11998_v15  ;;  %v7443_v4 = vrot.slane %v7441_v50, 1  ;;  %v6656_v50 = vsel %vm1278_vm6, %v6651_v42, %v6655_v39  ;;  %v6663_v24 = vor.u32 %v6662_v14, %v6658_v59  ;;  %v7477_v60 = vshll.u32 %v12010_v55, 16  ;;  %v13388_v26 = vld [vmem:[%s13806_s4] ss:$0 sm:$0xff]  ;;  %v12021_v42 = vld [vmem:[#allocation2 + $0x84] sm:$0xfe]  }
 0x335   : > { %9111 = vmatprep.mubr.bf16.mxu0 %v7408_v43  ;;  %v6639_v43 = vor.u32 %v6638_v44, %v6634_v41  ;;  %v13379_v44 = vld [vmem:[#allocation2 + $0x84] sm:$0xff]   ;;  %v6677_v41 = vshll.u32 %v12012_v35, 16  ;;  %v12024_v6 = vld [vmem:[#allocation2 + $0x90] sm:$0xff]   ;;  %v12022_v39 = vld [vmem:[#allocation2 + $0x8c] ss:$0 sps:$4 sm:$0x11]  }
 0x336   : > { %v7444_v51 = vsel %vm1278_vm6, %v7439_v48, %v7443_v4  ;;  %v6997_v4 = vrot.slane %v12006_v32, 1  ;;  %v12019_v48 = vld [vmem:[#allocation2 + $0x78] sm:$0xff]   ;;  %v6668_v0 = vsel %vm1278_vm6, %v6663_v24, %v6667_v53  ;;  %v7484_v47 = vshll.u32 %v13379_v44, 16 }
 0x337   : > { %8951 = vmatmul.mubr.bf16.gmra.mrb[200].mxu1 %v6608_v33  ;;  %v7446_v33 = vshrl.u32 %v11994_v45, 16  ;;  %v6644_v23 = vsel %vm1278_vm6, %v6639_v43, %v6643_v63  ;;  %v12014_v63 = vld [vmem:[#allocation2 + $0x78] sm:$0xfe]   ;;  %v10852_v43 = vpop.f32.mrb[130].mxu1  ;;  %v7479_v40 = vrot.slane %v7477_v60, 1  ;;  %v6679_v11 = vrot.slane %v6677_v41, 1 }
 0x338   : > { %8958 = vmatprep.mubr.bf16.mxu1 %v6984_v38  ;;  %v12013_v38 = vld [vmem:[#allocation9 + $0x220] sm:$0xff]   ;;  %v7000_v16 = vrot.slane %v12014_v63, 1 }
 0x339   : > { %11361 = vmatprep.subr.bf16.mxu1 %v12013_v38  ;;  %v7451_v15 = vor.u32 %v7450_v1, %v7446_v33  ;;  %v6999_v33 = vsel %vm1679_vm10, %v6997_v4, %v6998_v36  ;;  %v7470_v1 = vshrl.u32 %v12009_v34, 16  ;;  %v12025_v32 = vld [vmem:[#allocation2 + $0x98] ss:$0 sps:$4 sm:$0x11]   ;;  %v7004_v36 = vrot.slane %v12022_v39, 1  ;;  %v12032_v41 = vld [vmem:[#allocation2 + $0x9c] sm:$0xff]  }
 0x33a   : > { %11362 = vmatpush3.bf16.msra.mxu1 %v12013_v38  ;;  %v12020_v38 = vld [vmem:[#allocation2 + $0x80] ss:$0 sps:$4 sm:$0x11]   ;;  %v12016_v4 = vld [vmem:[#allocation2 + $0x78] sm:$0xff]  }
 0x33b   : > { %v7456_v37 = vsel %vm1278_vm6, %v7451_v15, %v7455_v3  ;;  %v7486_v15 = vrot.slane %v7484_v47, 1  ;;  %v7489_v3 = vshll.u32 %v12018_v58, 16  ;;  %v6689_v14 = vshll.u32 %v12020_v38, 16  ;;  %v12030_v63 = vld [vmem:[#allocation2 + $0x98] ss:$0 sps:$4 sm:$0x11]  }
 0x33c   : > { %9112 = vmatmul.mubr.bf16.gmra.mrb[232].mxu0 %v11971_v28  ;;  %v11999_v28 = vld [vmem:[#allocation2 + $0x60] sm:$0xfe]   ;;  %v12043_v58 = vld [vmem:[#allocation9 + $0x230] sm:$0xff]   ;;  %v12035_v47 = vld [vmem:[#allocation2 + $0x98] ss:$0 sps:$4 sm:$0x11]  }
 0x33d   : > { %9119 = vmatprep.mubr.bf16.mxu0 %v7420_v13  ;;  %v6994_v13 = vrot.slane %v11999_v28, 1  ;;  %v12008_v28 = vld [vmem:[#allocation2 + $0x6c] sm:$0xff]   ;;  %v7491_v59 = vrot.slane %v7489_v3, 1  ;;  %v6691_v53 = vrot.slane %v6689_v14, 1  ;;  %v12041_v3 = vld [vmem:[#allocation2 + $0x9c] sm:$0xff]  }
 0x33f   : > { %8959 = vmatmul.mubr.bf16.gmra.mrb[204].mxu1 %v6620_v9  ;;  %v6995_v9 = vrot.slane %v12000_v2, 1  ;;  %v6670_v2 = vshrl.u32 %v12011_v7, 16 }
 0x340   : > { %8966 = vmatprep.mubr.bf16.mxu1 %v6987_v17  ;;  %v7462_v17 = vrot.slane %v7460_v52, 1  ;;  %v8615_v52 = vadd.f32 %v10851_v22, %v13388_v26 }
 0x341   : > { %v6996_v19 = vsel %vm1679_vm10, %v6994_v13, %v6995_v9  ;;  %v12026_v13 = vld [vmem:[#allocation2 + $0x84] sm:$0xff]  }
 0x342   : > { %v7463_v45 = vor.u32 %v7462_v17, %v7458_v27  ;;  %v12027_v27 = vld [vmem:[#allocation2 + $0x8c] ss:$0 sps:$4 sm:$0x11]   ;;  %v6696_v35 = vshll.u32 %v12026_v13, 16  ;;  %v6694_v60 = vshrl.u32 %v12026_v13, 16 }
 0x343   : > { %v6701_v29 = vshll.u32 %v12027_v27, 16  ;;  %v12037_v13 = vld [vmem:[#allocation2 + $0xa4] ss:$0 sps:$4 sm:$0x11]   ;;  %v6718_v27 = vshrl.u32 %v12041_v3, 16 }
 0x344   : > { %9120 = vmatmul.mubr.bf16.gmra.mrb[236].mxu0 %v11978_v46  ;;  %v7472_v46 = vshll.u32 %v12009_v34, 16  ;;  %v7468_v49 = vsel %vm1278_vm6, %v7463_v45, %v7467_v54 }
 0x345   : > { %9127 = vmatprep.mubr.bf16.mxu0 %v7432_v57 }
 0x346   : > { %v7474_v57 = vrot.slane %v7472_v46, 1  ;;  %v7482_v46 = vshrl.u32 %v13379_v44, 16  ;;  %v6698_v44 = vrot.slane %v6696_v35, 1 }
 0x347   : > { %8967 = vmatmul.mubr.bf16.gmra.mrb[208].mxu1 %v6632_v10  ;;  %v6672_v10 = vshll.u32 %v12011_v7, 16  ;;  %v6682_v7 = vshrl.u32 %v12019_v48, 16 }
 0x348   : > { %8974 = vmatprep.mubr.bf16.mxu1 %v6990_v30  ;;  %v12028_v30 = vld [vmem:[#allocation9 + $0x228] sm:$0xff]   ;;  %v7475_v21 = vor.u32 %v7474_v57, %v7470_v1  ;;  %v7487_v54 = vor.u32 %v7486_v15, %v7482_v46  ;;  %v7494_v57 = vshrl.u32 %v12024_v6, 16  ;;  %v7508_v1 = vshll.u32 %v12032_v41, 16  ;;  %v12040_v15 = vld [vmem:[#allocation2 + $0xb0] ss:$0 sps:$4 sm:$0x11]  }
 0x349   : > { %11363 = vmatprep.subr.bf16.mxu1 %v12028_v30  ;;  %v7525_v14 = vshll.u32 %v12040_v15, 16 }
 0x34a   : > { %11364 = vmatpush3.bf16.msra.mxu1 %v12028_v30  ;;  %v7480_v17 = vsel %vm1278_vm6, %v7475_v21, %v7479_v40  ;;  %v6703_v40 = vrot.slane %v6701_v29, 1 }
 0x34b   : > { %11365 = vmatprep.subr.bf16.mxu1 %v12043_v58  ;;  %v7527_v35 = vrot.slane %v7525_v14, 1 }
 0x34c   : > { %9128 = vmatmul.mubr.bf16.gmra.mrb[240].mxu0 %v11986_v61  ;;  %v6674_v61 = vrot.slane %v6672_v10, 1  ;;  %v7501_v10 = vshll.u32 %v12025_v32, 16  ;;  %v6720_v32 = vshll.u32 %v12041_v3, 16 }
 0x34d   : > { %9135 = vmatprep.mubr.bf16.mxu0 %v7444_v51  ;;  %v6684_v51 = vshll.u32 %v12019_v48, 16  ;;  %v12029_v48 = vld [vmem:[#allocation2 + $0x90] sm:$0xfe]  }
 0x34e   : > { %v7503_v38 = vrot.slane %v7501_v10, 1  ;;  %11366 = vmatpush3.bf16.msra.mxu1 %v12043_v58  ;;  %v7006_v21 = vrot.slane %v12029_v48, 1 }
 0x34f   : > { %8975 = vmatmul.mubr.bf16.gmra.mrb[212].mxu1 %v6644_v23  ;;  %v10853_v23 = vpop.f32.mrb[131].mxu1  ;;  %v6686_v31 = vrot.slane %v6684_v51, 1  ;;  %v6699_v51 = vor.u32 %v6698_v44, %v6694_v60 }
 0x350   : > { %8982 = vmatprep.mubr.bf16.mxu1 %v6993_v56  ;;  %v6675_v56 = vor.u32 %v6674_v61, %v6670_v2  ;;  %v10854_v20 = vadd.f32 %v10853_v23, %v10852_v43  ;;  %v12033_v61 = vld [vmem:[#allocation2 + $0xa4] ss:$0 sps:$4 sm:$0x11]   ;;  %v12034_v43 = vld [vmem:[#allocation2 + $0x90] sm:$0xff]   ;;  %v7506_v23 = vshrl.u32 %v12032_v41, 16 }
 0x351   : > { %v6687_v24 = vor.u32 %v6686_v31, %v6682_v7  ;;  %v12042_v31 = vld [vmem:[#allocation2 + $0xa4] ss:$0 sps:$4 sm:$0x11]   ;;  %v7010_v7 = vrot.slane %v12037_v13, 1  ;;  %v13428_v13 = vld [vmem:[#allocation2 + $0xb4] sm:$0xff]  }
 0x352   : > { %v6680_v22 = vsel %vm1278_vm6, %v6675_v56, %v6679_v11  ;;  %v8618_v12 = vadd.f32 %v10854_v20, %v13388_v26  ;;  %v7007_v11 = vrot.slane %v12030_v63, 1  ;;  %v6708_v56 = vshll.u32 %v12034_v43, 16  ;;  %v12048_v41 = vld [vmem:[#allocation2 + $0xbc] ss:$0 sps:$4 sm:$0x11]  }
 0x353   : > { %v6713_v20 = vshll.u32 %v12035_v47, 16  ;;  %v7537_v15 = vshll.u32 %v12048_v41, 16 }
 0x354   : > { %9136 = vmatmul.mubr.bf16.gmra.mrb[244].mxu0 %v11993_v62  ;;  %v6710_v39 = vrot.slane %v6708_v56, 1 }
 0x355   : > { %9143 = vmatprep.mubr.bf16.mxu0 %v7456_v37 }
 0x357   : > { %8983 = vmatmul.mubr.bf16.gmra.mrb[216].mxu1 %v6656_v50  ;;  %v7002_v50 = vsel %vm1679_vm10, %v7000_v16, %v7001_v5  ;;  %v12023_v16 = vld [vmem:[#allocation2 + $0x84] sm:$0xff]  }
 0x358   : > { %8990 = vmatprep.mubr.bf16.mxu1 %v6996_v19  ;;  %v7496_v19 = vshll.u32 %v12024_v6, 16  ;;  %v13403_v5 = vld [vmem:[#allocation2 + $0xa8] sm:$0xff]   ;;  %v6704_v6 = vsel %vm1278_vm6, %v6699_v51, %v6703_v40 }
 0x35a   : > { %v7498_v30 = vrot.slane %v7496_v19, 1 }
 0x35c   : > { %9144 = vmatmul.mubr.bf16.gmra.mrb[248].mxu0 %v12001_v18  ;;  %v7003_v18 = vrot.slane %v12021_v42, 1  ;;  %v7499_v2 = vor.u32 %v7498_v30, %v7494_v57  ;;  %v12045_v57 = vld [vmem:[#allocation2 + $0xb0] ss:$0 sps:$4 sm:$0x11]  }
 0x35d   : > { %9151 = vmatprep.mubr.bf16.mxu0 %v7468_v49  ;;  %v7492_v49 = vsel %vm1278_vm6, %v7487_v54, %v7491_v59  ;;  %v13410_v59 = vld [vmem:[#allocation2 + $0xb4] sm:$0xff]   ;;  %v6722_v54 = vrot.slane %v6720_v32, 1 }
 0x35e   : > { %v10961_v25 = vpop.f32.mrb[160].mxu0  ;;  %v7504_v42 = vsel %vm1278_vm6, %v7499_v2, %v7503_v38  ;;  %v7530_v48 = vshrl.u32 %v13410_v59, 16 }
 0x35f   : > { %8991 = vmatmul.mubr.bf16.gmra.mrb[220].mxu1 %v6668_v0  ;;  %v10962_v62 = vpop.f32.mrb[161].mxu0  ;;  %v6692_v0 = vsel %vm1278_vm6, %v6687_v24, %v6691_v53  ;;  %v12044_v24 = vld [vmem:[#allocation2 + $0xa8] sm:$0xfe]  }
 0x360   : > { %8998 = vmatprep.mubr.bf16.mxu1 %v6999_v33  ;;  %v10963_v9 = vadd.f32 %v10962_v62, %v10961_v25  ;;  %v10964_v34 = vpop.f32.mrb[162].mxu0  ;;  %v7005_v33 = vsel %vm1679_vm10, %v7003_v18, %v7004_v36  ;;  %v12036_v25 = vld [vmem:[#allocation2 + $0x9c] sm:$0xfe]   ;;  %v13412_v53 = vld [vmem:[#allocation2 + $0xa8] sm:$0xff]   ;;  %v12058_v18 = vld [vmem:[#allocation9 + $0x238] sm:$0xff]   ;;  %v6725_v36 = vshll.u32 %v12042_v31, 16 }
 0x361   : > { %v10965_v8 = vpop.f32.mrb[163].mxu0  ;;  %v7009_v46 = vrot.slane %v12036_v25, 1  ;;  %11367 = vmatprep.subr.bf16.mxu1 %v12058_v18  ;;  %v7012_v51 = vrot.slane %v12044_v24, 1  ;;  %v12052_v31 = vld [vmem:[#allocation2 + $0xbc] ss:$0 sps:$4 sm:$0x11]  }
 0x362   : > { %v13394_v55 = vadd.f32 %v10963_v9, %v8615_v52  ;;  %v10966_v37 = vadd.f32 %v10965_v8, %v10964_v34  ;;  %v7510_v52 = vrot.slane %v7508_v1, 1  ;;  %v7520_v9 = vshll.u32 %v13403_v5, 16  ;;  %11368 = vmatpush3.bf16.msra.mxu1 %v12058_v18 }
 0x363   : > { %v7008_v34 = vsel %vm1679_vm10, %v7006_v21, %v7007_v11  ;;  %v7011_v44 = vsel %vm1679_vm10, %v7009_v46, %v7010_v7  ;;  %v6727_v2 = vrot.slane %v6725_v36, 1  ;;  %v12055_v46 = vld [vmem:[#allocation2 + $0xc8] ss:$0 sps:$4 sm:$0x11]   ;;  %v7539_v7 = vrot.slane %v7537_v15, 1 }
 0x364   : > { %9152 = vmatmul.mubr.bf16.gmra.mrb[252].mxu0 %v12008_v28  ;;  %v13398_v45 = vadd.f32 %v10966_v37, %v8618_v12  ;;  %v7513_v28 = vshll.u32 %v12033_v61, 16  ;;  %v7511_v8 = vor.u32 %v7510_v52, %v7506_v23  ;;  %v7518_v12 = vshrl.u32 %v13403_v5, 16  ;;  %v12031_v37 = vld [vmem:[#allocation2 + $0x90] sm:$0xff]   ;;  %v12038_v23 = vld [vmem:[#allocation2 + $0x9c] sm:$0xff]  }
 0x365   : > { %9159 = vmatprep.mubr.bf16.mxu0 %v7480_v17  ;;  %v6706_v17 = vshrl.u32 %v12034_v43, 16  ;;  %v7522_v19 = vrot.slane %v7520_v9, 1  ;;  %v12050_v43 = vld [vmem:[#allocation2 + $0xb0] ss:$0 sps:$4 sm:$0x11]   ;;  %v7013_v52 = vrot.slane %v12045_v57, 1 }
 0x366   : > { %v7515_v62 = vrot.slane %v7513_v28, 1  ;;  %v7016_v18 = vrot.slane %v12052_v31, 1  ;;  %v12057_v57 = vld [vmem:[#allocation2 + $0xbc] ss:$0 sps:$4 sm:$0x11]  }
 0x367   : > { %8999 = vmatmul.mubr.bf16.gmra.mrb[224].mxu1 %v6680_v22  ;;  %v6715_v22 = vrot.slane %v6713_v20, 1  ;;  %v7523_v21 = vor.u32 %v7522_v19, %v7518_v12  ;;  %v13424_v20 = vld [vmem:[#allocation2 + $0xc0] sm:$0xff]   ;;  %v7014_v14 = vsel %vm1679_vm10, %v7012_v51, %v7013_v52  ;;  %v6749_v51 = vshll.u32 %v12057_v57, 16 }
 0x368   : > { %9006 = vmatprep.mubr.bf16.mxu1 %v7002_v50  ;;  %v6711_v50 = vor.u32 %v6710_v39, %v6706_v17  ;;  %v7516_v10 = vsel %vm1278_vm6, %v7511_v8, %v7515_v62  ;;  %v12051_v39 = vld [vmem:[#allocation2 + $0xb4] sm:$0xfe]   ;;  %v7544_v12 = vshll.u32 %v13424_v20, 16 }
 0x369   : > { %v7528_v9 = vsel %vm1278_vm6, %v7523_v21, %v7527_v35  ;;  %v12046_v35 = vld [vmem:[#allocation2 + $0xa8] sm:$0xff]   ;;  %v7015_v24 = vrot.slane %v12051_v39, 1  ;;  %v6742_v21 = vshrl.u32 %v13428_v13, 16 }
 0x36a   : > { %v6716_v60 = vsel %vm1278_vm6, %v6711_v50, %v6715_v22  ;;  %v6730_v22 = vshrl.u32 %v13412_v53, 16  ;;  %v7546_v36 = vrot.slane %v7544_v12, 1 }
 0x36c   : > { %9160 = vmatmul.mubr.bf16.gmra.mrb[0].mxu0 %v12016_v4 }
 0x36d   : > { %9167 = vmatprep.mubr.bf16.mxu0 %v7492_v49  ;;  %v7532_v49 = vshll.u32 %v13410_v59, 16  ;;  %v6744_v59 = vshll.u32 %v13428_v13, 16  ;;  %v12063_v13 = vld [vmem:[#allocation2 + $0xc8] ss:$0 sps:$4 sm:$0x11]  }
 0x36f   : > { %9007 = vmatmul.mubr.bf16.gmra.mrb[228].mxu1 %v6692_v0  ;;  %v7534_v25 = vrot.slane %v7532_v49, 1 }
 0x370   : > { %9014 = vmatprep.mubr.bf16.mxu1 %v7005_v33  ;;  %v6732_v33 = vshll.u32 %v13412_v53, 16  ;;  %v7549_v53 = vshll.u32 %v12055_v46, 16  ;;  %v12066_v46 = vld [vmem:[#allocation2 + $0x18] sm:$0xfe]  }
 0x372   : > { %v6734_v3 = vrot.slane %v6732_v33, 1  ;;  %v12065_v33 = vld [vmem:[#allocation2 + $0xd4] ss:$0 sps:$4 sm:$0x11]   ;;  %v7551_v15 = vrot.slane %v7549_v53, 1 }
 0x374   : > { %9168 = vmatmul.mubr.bf16.gmra.mrb[4].mxu0 %v12023_v16  ;;  %v6723_v16 = vor.u32 %v6722_v54, %v6718_v27  ;;  %v6735_v27 = vor.u32 %v6734_v3, %v6730_v22 }
 0x375   : > { %9175 = vmatprep.mubr.bf16.mxu0 %v7504_v42  ;;  %v6737_v42 = vshll.u32 %v12050_v43, 16  ;;  %v12062_v43 = vld [vmem:[#allocation2 + $0xc0] sm:$0xff]  }
 0x377   : > { %9015 = vmatmul.mubr.bf16.gmra.mrb[232].mxu1 %v6704_v6  ;;  %v6739_v54 = vrot.slane %v6737_v42, 1 }
 0x378   : > { %9022 = vmatprep.mubr.bf16.mxu1 %v7008_v34  ;;  %v6728_v34 = vsel %vm1278_vm6, %v6723_v16, %v6727_v2 }
 0x379   : > { %v6740_v49 = vsel %vm1278_vm6, %v6735_v27, %v6739_v54  ;;  %v6754_v54 = vshrl.u32 %v12062_v43, 16 }
 0x37c   : > { %v10855_v4 = vpop.f32.mrb[132].mxu1  ;;  %9176 = vmatmul.mubr.bf16.gmra.mrb[8].mxu0 %v12031_v37  ;;  %v7535_v37 = vor.u32 %v7534_v25, %v7530_v48  ;;  %v12053_v25 = vld [vmem:[#allocation2 + $0xb4] sm:$0xff]  }
 0x37d   : > { %v10856_v30 = vpop.f32.mrb[133].mxu1  ;;  %9183 = vmatprep.mubr.bf16.mxu0 %v7516_v10  ;;  %v12059_v10 = vld [vmem:[#allocation2 + $0xc0] sm:$0xfe]  }
 0x37e   : > { %v10857_v29 = vadd.f32 %v10856_v30, %v10855_v4  ;;  %v10967_v63 = vpop.f32.mrb[164].mxu0  ;;  %v10858_v58 = vpop.f32.mrb[134].mxu1  ;;  %v7542_v4 = vshrl.u32 %v13424_v20, 16  ;;  %v7018_v42 = vrot.slane %v12059_v10, 1 }
 0x37f   : > { %9023 = vmatmul.mubr.bf16.gmra.mrb[236].mxu1 %v6716_v60  ;;  %v10968_v0 = vpop.f32.mrb[165].mxu0  ;;  %v10859_v61 = vpop.f32.mrb[135].mxu1  ;;  %v13437_v60 = vld [vmem:[#allocation2 + $0xcc] sm:$0xff]  }
 0x380   : > { %9030 = vmatprep.mubr.bf16.mxu1 %v7011_v44  ;;  %v8623_v1 = vadd.f32 %v10857_v29, %v13388_v26  ;;  %v10969_v47 = vadd.f32 %v10968_v0, %v10967_v63  ;;  %v10860_v38 = vadd.f32 %v10859_v61, %v10858_v58  ;;  %v10970_v40 = vpop.f32.mrb[166].mxu0  ;;  %v6746_v29 = vrot.slane %v6744_v59, 1  ;;  %v12060_v63 = vld [vmem:[#allocation2 + $0xc8] ss:$0 sps:$4 sm:$0x11]  }
 0x381   : > { %v10971_v11 = vpop.f32.mrb[167].mxu0  ;;  %v7540_v58 = vsel %vm1278_vm6, %v7535_v37, %v7539_v7  ;;  %v7017_v0 = vsel %vm1679_vm10, %v7015_v24, %v7016_v18  ;;  %v7547_v52 = vor.u32 %v7546_v36, %v7542_v4  ;;  %v12067_v24 = vld [vmem:[#allocation2 + $0x20] ss:$0 sps:$4 sm:$0x11]   ;;  %v6761_v36 = vshll.u32 %v12063_v13, 16 }
 0x382   : > { %v13421_v28 = vadd.f32 %v10969_v47, %v8623_v1  ;;  %v8626_v56 = vadd.f32 %v10860_v38, %v13388_v26  ;;  %v10972_v5 = vadd.f32 %v10971_v11, %v10970_v40  ;;  %v6747_v3 = vor.u32 %v6746_v29, %v6742_v21 }
 0x383   : > { %v7552_v22 = vsel %vm1278_vm6, %v7547_v52, %v7551_v15 }
 0x384   : > { %v13426_v6 = vadd.f32 %v10972_v5, %v8626_v56  ;;  %v10861_v62 = vpop.f32.mrb[136].mxu1  ;;  %9184 = vmatmul.mubr.bf16.gmra.mrb[12].mxu0 %v12038_v23  ;;  %v7556_v23 = vshll.u32 %v13437_v60, 16 }
 0x385   : > { %v10862_v17 = vpop.f32.mrb[137].mxu1  ;;  %9191 = vmatprep.mubr.bf16.mxu0 %v7528_v9  ;;  %v7019_v9 = vrot.slane %v12060_v63, 1 }
 0x386   : > { %v10863_v32 = vadd.f32 %v10862_v17, %v10861_v62  ;;  %v10864_v8 = vpop.f32.mrb[138].mxu1  ;;  %v6756_v62 = vshll.u32 %v12062_v43, 16  ;;  %v7554_v17 = vshrl.u32 %v13437_v60, 16  ;;  %v7558_v31 = vrot.slane %v7556_v23, 1 }
 0x387   : > { %9031 = vmatmul.mubr.bf16.gmra.mrb[240].mxu1 %v6728_v34  ;;  %v10865_v50 = vpop.f32.mrb[139].mxu1  ;;  %v6751_v34 = vrot.slane %v6749_v51, 1  ;;  %v7020_v59 = vsel %vm1679_vm10, %v7018_v42, %v7019_v9  ;;  %v12068_v51 = vld [vmem:[#allocation2 + $0xcc] sm:$0xff]  }
 0x388   : > { %9038 = vmatprep.mubr.bf16.mxu1 %v7014_v14  ;;  %v10866_v19 = vadd.f32 %v10865_v50, %v10864_v8  ;;  %v8631_v30 = vadd.f32 %v10863_v32, %v13388_v26  ;;  %v7561_v14 = vshll.u32 %v12065_v33, 16  ;;  %v6758_v50 = vrot.slane %v6756_v62, 1  ;;  %v12070_v33 = vld [vmem:[#allocation2 + $0x2c] ss:$0 sps:$4 sm:$0x11]  }
 0x389   : > { %v6752_v37 = vsel %vm1278_vm6, %v6747_v3, %v6751_v34  ;;  %v7559_v57 = vor.u32 %v7558_v31, %v7554_v17  ;;  %v7777_v52 = vrot.slane %v12070_v33, 1  ;;  %v12073_v17 = vld [vmem:[#allocation2 + $0x3c] sm:$0xfe]   ;;  %v12080_v33 = vld [vmem:[#allocation2 + $0x68] ss:$0 sps:$4 sm:$0x11]  }
 0x38a   : > { %v8634_v47 = vadd.f32 %v10866_v19, %v13388_v26  ;;  %v7563_v53 = vrot.slane %v7561_v14, 1  ;;  %v6759_v29 = vor.u32 %v6758_v50, %v6754_v54  ;;  %v7782_v54 = vrot.slane %v12073_v17, 1 }
 0x38c   : > { %v10867_v44 = vpop.f32.mrb[140].mxu1  ;;  %9192 = vmatmul.mubr.bf16.gmra.mrb[16].mxu0 %v12046_v35  ;;  %v7564_v43 = vsel %vm1278_vm6, %v7559_v57, %v7563_v53 }
 0x38d   : > { %v10973_v41 = vpop.f32.mrb[168].mxu0  ;;  %v10868_v61 = vpop.f32.mrb[141].mxu1  ;;  %9199 = vmatprep.mubr.bf16.mxu0 %v7540_v58 }
 0x38e   : > { %v10974_v48 = vpop.f32.mrb[169].mxu0  ;;  %v10869_v40 = vadd.f32 %v10868_v61, %v10867_v44  ;;  %v10870_v2 = vpop.f32.mrb[142].mxu1  ;;  %v6763_v61 = vrot.slane %v6761_v36, 1 }
 0x38f   : > { %v10975_v1 = vadd.f32 %v10974_v48, %v10973_v41  ;;  %v10976_v38 = vpop.f32.mrb[170].mxu0  ;;  %9039 = vmatmul.mubr.bf16.gmra.mrb[244].mxu1 %v6740_v49  ;;  %v10871_v16 = vpop.f32.mrb[143].mxu1  ;;  %v7773_v48 = vrot.slane %v12066_v46, 1  ;;  %v7774_v49 = vrot.slane %v12067_v24, 1 }
 0x390   : > { %v10977_v11 = vpop.f32.mrb[171].mxu0  ;;  %9046 = vmatprep.mubr.bf16.mxu1 %v7017_v0  ;;  %v10872_v20 = vadd.f32 %v10871_v16, %v10870_v2  ;;  %v8639_v32 = vadd.f32 %v10869_v40, %v13388_v26  ;;  %v12061_v0 = vld [vmem:[#allocation2 + $0xc0] sm:$0xff]   ;;  %v12072_v2 = vld [vmem:[#allocation2 + $0x38] ss:$0 sps:$4 sm:$0x11]  }
 0x391   : > { %v13446_v56 = vadd.f32 %v10975_v1, %v8631_v30  ;;  %v10978_v5 = vadd.f32 %v10977_v11, %v10976_v38  ;;  %v6764_v1 = vsel %vm1278_vm6, %v6759_v29, %v6763_v61  ;;  %v12071_v38 = vld [vmem:[#allocation2 + $0x30] sm:$0xfe]   ;;  %v7775_v40 = vsel %vm1679_vm10, %v7773_v48, %v7774_v49 }
 0x392   : > { %v8642_v19 = vadd.f32 %v10872_v20, %v13388_v26  ;;  %v7779_v42 = vrot.slane %v12071_v38, 1  ;;  %v7780_v62 = vrot.slane %v12072_v2, 1  ;;  %v12077_v29 = vld [vmem:[#allocation2 + $0x54] sm:$0xfe]   ;;  %v12079_v38 = vld [vmem:[#allocation2 + $0x60] sm:$0xfe]  }
 0x393   : > { %v13448_v39 = vadd.f32 %v10978_v5, %v8634_v47  ;;  %v12069_v47 = vld [vmem:[#allocation2 + $0x24] sm:$0xfe]  }
 0x394   : > { %9200 = vmatmul.mubr.bf16.gmra.mrb[20].mxu0 %v12053_v25  ;;  %v7776_v5 = vrot.slane %v12069_v47, 1  ;;  %v7781_v46 = vsel %vm1679_vm10, %v7779_v42, %v7780_v62 }
 0x395   : > { %v10979_v8 = vpop.f32.mrb[172].mxu0  ;;  %9207 = vmatprep.mubr.bf16.mxu0 %v7552_v22  ;;  %v12075_v22 = vld [vmem:[#allocation2 + $0x48] sm:$0xfe]  }
 0x396   : > { %v10980_v12 = vpop.f32.mrb[173].mxu0  ;;  %v7785_v53 = vrot.slane %v12075_v22, 1 }
 0x397   : > { %v10981_v7 = vadd.f32 %v10980_v12, %v10979_v8  ;;  %v10982_v27 = vpop.f32.mrb[174].mxu0  ;;  %9047 = vmatmul.mubr.bf16.gmra.mrb[248].mxu1 %v6752_v37  ;;  %v10873_v35 = vpop.f32.mrb[144].mxu1  ;;  %v12074_v8 = vld [vmem:[#allocation2 + $0x44] ss:$0 sps:$4 sm:$0x11]   ;;  %v7778_v37 = vsel %vm1679_vm10, %v7776_v5, %v7777_v52 }
 0x398   : > { %v10983_v18 = vpop.f32.mrb[175].mxu0  ;;  %9054 = vmatprep.mubr.bf16.mxu1 %v7020_v59  ;;  %v10874_v4 = vpop.f32.mrb[145].mxu1  ;;  %v7783_v24 = vrot.slane %v12074_v8, 1  ;;  %v12082_v8 = vld [vmem:[#allocation2 + $0x74] ss:$0 sps:$4 sm:$0x11]  }
 0x399   : > { %v13456_v10 = vadd.f32 %v10981_v7, %v8639_v32  ;;  %v10984_v60 = vadd.f32 %v10983_v18, %v10982_v27  ;;  %v10875_v30 = vadd.f32 %v10874_v4, %v10873_v35  ;;  %v10876_v41 = vpop.f32.mrb[146].mxu1  ;;  %v12076_v7 = vld [vmem:[#allocation2 + $0x50] ss:$0 sps:$4 sm:$0x11]  }
 0x39a   : > { %v10877_v44 = vpop.f32.mrb[147].mxu1 }
 0x39b   : > { %v13458_v63 = vadd.f32 %v10984_v60, %v8642_v19  ;;  %v10878_v58 = vadd.f32 %v10877_v44, %v10876_v41  ;;  %v8647_v21 = vadd.f32 %v10875_v30, %v13388_v26  ;;  %v7786_v60 = vrot.slane %v12076_v7, 1 }
 0x39c   : > { %9208 = vmatmul.mubr.bf16.gmra.mrb[24].mxu0 %v12061_v0  ;;  %v12078_v0 = vld [vmem:[#allocation2 + $0x5c] ss:$0 sps:$4 sm:$0x11]  }
 0x39d   : > { %9215 = vmatprep.mubr.bf16.mxu0 %v7564_v43  ;;  %v10985_v11 = vpop.f32.mrb[176].mxu0  ;;  %v8650_v25 = vadd.f32 %v10878_v58, %v13388_v26  ;;  %v7784_v43 = vsel %vm1679_vm10, %v7782_v54, %v7783_v24  ;;  %v7787_v47 = vsel %vm1679_vm10, %v7785_v53, %v7786_v60  ;;  %v7795_v54 = vrot.slane %v12082_v8, 1 }
 0x39e   : > { %v10986_v16 = vpop.f32.mrb[177].mxu0 }
 0x39f   : > { %9055 = vmatmul.mubr.bf16.gmra.mrb[252].mxu1 %v6764_v1  ;;  %v10987_v20 = vadd.f32 %v10986_v16, %v10985_v11  ;;  %v10988_v15 = vpop.f32.mrb[178].mxu0  ;;  %v7788_v16 = vrot.slane %v12077_v29, 1 }
 0x3a0   : > { %11369 = vmatprep.mubr.bf16.mxu1 %v7775_v40  ;;  %v10989_v9 = vpop.f32.mrb[179].mxu0 }
 0x3a1   : > { %v13465_v31 = vadd.f32 %v10987_v20, %v8647_v21  ;;  %v10990_v14 = vadd.f32 %v10989_v9, %v10988_v15  ;;  %v7792_v15 = vrot.slane %v12080_v33, 1 }
 0x3a2   : > { %v10879_v23 = vpop.f32.mrb[148].mxu1 }
 0x3a3   : > { %v10880_v3 = vpop.f32.mrb[149].mxu1  ;;  %v13468_v50 = vadd.f32 %v10990_v14, %v8650_v25  ;;  %v7791_v25 = vrot.slane %v12079_v38, 1  ;;  %v12087_v38 = vld [vmem:[#allocation2 + $0x90] sm:$0xfe]  }
 0x3a4   : > { %v10881_v13 = vadd.f32 %v10880_v3, %v10879_v23  ;;  %v10882_v34 = vpop.f32.mrb[150].mxu1  ;;  %9216 = vmatmul.mubr.bf16.gmra.mrb[28].mxu0 %v12068_v51  ;;  %v7789_v51 = vrot.slane %v12078_v0, 1 }
 0x3a5   : > { %v10883_v32 = vpop.f32.mrb[151].mxu1 }
 0x3a6   : > { %v10884_v12 = vadd.f32 %v10883_v32, %v10882_v34  ;;  %v8655_v19 = vadd.f32 %v10881_v13, %v13388_v26  ;;  %v7790_v14 = vsel %vm1679_vm10, %v7788_v16, %v7789_v51  ;;  %v12081_v32 = vld [vmem:[#allocation2 + $0x6c] sm:$0xfe]  }
 0x3a7   : > { %11370 = vmatmul.mubr.bf16.vlgmr.msra.gmra.mrb[0].mxu1 %v7778_v37  ;;  %v10991_v27 = vpop.f32.mrb[180].mxu0  ;;  %v12083_v37 = vld [vmem:[#allocation2 + $0x78] sm:$0xfe]  }
 0x3a8   : > { %11373 = vmatprep.mubr.bf16.mxu1 %v7781_v46  ;;  %v10992_v59 = vpop.f32.mrb[181].mxu0  ;;  %v8658_v4 = vadd.f32 %v10884_v12, %v13388_v26  ;;  %v7793_v12 = vsel %vm1679_vm10, %v7791_v25, %v7792_v15  ;;  %v12084_v46 = vld [vmem:[#allocation2 + $0x80] ss:$0 sps:$4 sm:$0x11]   ;;  %v7803_v15 = vrot.slane %v12087_v38, 1 }
 0x3a9   : > { %v10993_v18 = vadd.f32 %v10992_v59, %v10991_v27  ;;  %v10994_v36 = vpop.f32.mrb[182].mxu0  ;;  %v7798_v53 = vrot.slane %v12084_v46, 1 }
 0x3aa   : > { %v10885_v35 = vpop.f32.mrb[152].mxu1  ;;  %v10995_v30 = vpop.f32.mrb[183].mxu0 }
 0x3ab   : > { %v10886_v57 = vpop.f32.mrb[153].mxu1  ;;  %v13473_v58 = vadd.f32 %v10993_v18, %v8655_v19  ;;  %v10996_v48 = vadd.f32 %v10995_v30, %v10994_v36 }
 0x3ac   : > { %v10887_v41 = vadd.f32 %v10886_v57, %v10885_v35  ;;  %v10888_v44 = vpop.f32.mrb[154].mxu1  ;;  %v7794_v35 = vrot.slane %v12081_v32, 1  ;;  %v7797_v57 = vrot.slane %v12083_v37, 1  ;;  %v12090_v37 = vld [vmem:[#allocation2 + $0xa4] ss:$0 sps:$4 sm:$0x11]  }
 0x3ad   : > { %v10889_v49 = vpop.f32.mrb[155].mxu1  ;;  %v13476_v1 = vadd.f32 %v10996_v48, %v8658_v4 }
 0x3ae   : > { %v10890_v61 = vadd.f32 %v10889_v49, %v10888_v44  ;;  %v8663_v40 = vadd.f32 %v10887_v41, %v13388_v26  ;;  %v7796_v0 = vsel %vm1679_vm10, %v7794_v35, %v7795_v54 }
 0x3af   : > { %11374 = vmatmul.mubr.bf16.gmra.mrb[4].mxu1 %v7784_v43  ;;  %v10997_v2 = vpop.f32.mrb[184].mxu0  ;;  %v12086_v43 = vld [vmem:[#allocation2 + $0x8c] ss:$0 sps:$4 sm:$0x11]  }
 0x3b0   : > { %11377 = vmatprep.mubr.bf16.mxu1 %v7787_v47  ;;  %v10998_v21 = vpop.f32.mrb[185].mxu0  ;;  %v8666_v5 = vadd.f32 %v10890_v61, %v13388_v26  ;;  %v12085_v61 = vld [vmem:[#allocation2 + $0x84] sm:$0xfe]   ;;  %v7799_v47 = vsel %vm1679_vm10, %v7797_v57, %v7798_v53 }
 0x3b1   : > { %v10999_v23 = vadd.f32 %v10998_v21, %v10997_v2  ;;  %v11000_v52 = vpop.f32.mrb[186].mxu0  ;;  %v7800_v51 = vrot.slane %v12085_v61, 1 }
 0x3b2   : > { %v10891_v11 = vpop.f32.mrb[156].mxu1  ;;  %v11001_v3 = vpop.f32.mrb[187].mxu0 }
 0x3b3   : > { %v10892_v20 = vpop.f32.mrb[157].mxu1  ;;  %v13481_v9 = vadd.f32 %v10999_v23, %v8663_v40  ;;  %v11002_v13 = vadd.f32 %v11001_v3, %v11000_v52  ;;  %v12088_v40 = vld [vmem:[#allocation2 + $0x98] ss:$0 sps:$4 sm:$0x11]   ;;  %v7801_v23 = vrot.slane %v12086_v43, 1 }
 0x3b4   : > { %v10893_v42 = vadd.f32 %v10892_v20, %v10891_v11  ;;  %v10894_v62 = vpop.f32.mrb[158].mxu1  ;;  %v7804_v3 = vrot.slane %v12088_v40, 1  ;;  %v12093_v40 = vld [vmem:[#allocation2 + $0xb4] sm:$0xfe]  }
 0x3b5   : > { %v10895_v34 = vpop.f32.mrb[159].mxu1  ;;  %v13484_v22 = vadd.f32 %v11002_v13, %v8666_v5  ;;  %v7802_v8 = vsel %vm1679_vm10, %v7800_v51, %v7801_v23  ;;  %v12096_v51 = vld [vmem:[#allocation2 + $0xc8] ss:$0 sps:$4 sm:$0x11]  }
 0x3b6   : > { %v10896_v17 = vadd.f32 %v10895_v34, %v10894_v62  ;;  %v8671_v7 = vadd.f32 %v10893_v42, %v13388_v26 }
 0x3b7   : > { %11378 = vmatmul.mubr.bf16.gmra.mrb[8].mxu1 %v7790_v14  ;;  %v11003_v19 = vpop.f32.mrb[188].mxu0 }
 0x3b8   : > { %11381 = vmatprep.mubr.bf16.mxu1 %v7793_v12  ;;  %v11004_v27 = vpop.f32.mrb[189].mxu0  ;;  %v8674_v18 = vadd.f32 %v10896_v17, %v13388_v26  ;;  %v12089_v12 = vld [vmem:[#allocation2 + $0x9c] sm:$0xfe]  }
 0x3b9   : > { %v11005_v24 = vadd.f32 %v11004_v27, %v11003_v19  ;;  %v11006_v4 = vpop.f32.mrb[190].mxu0  ;;  %v12092_v19 = vld [vmem:[#allocation2 + $0xb0] ss:$0 sps:$4 sm:$0x11]   ;;  %v13506_v27 = vld [vmem:[%s13806_s4] ss:$0 sm:$0xff] }
 0x3ba   : > { %v10897_v59 = vpop.f32.mrb[160].mxu1  ;;  %v11007_v60 = vpop.f32.mrb[191].mxu0 }
 0x3bb   : > { %v10898_v36 = vpop.f32.mrb[161].mxu1  ;;  %v13489_v44 = vadd.f32 %v11005_v24, %v8671_v7  ;;  %v11008_v29 = vadd.f32 %v11007_v60, %v11006_v4  ;;  %v12091_v7 = vld [vmem:[#allocation2 + $0xa8] sm:$0xfe]   ;;  %v7807_v4 = vrot.slane %v12090_v37, 1 }
 0x3bc   : > { %v10899_v30 = vadd.f32 %v10898_v36, %v10897_v59  ;;  %v10900_v41 = vpop.f32.mrb[162].mxu1 }
 0x3bd   : > { %v10901_v48 = vpop.f32.mrb[163].mxu1  ;;  %v13492_v33 = vadd.f32 %v11008_v29, %v8674_v18  ;;  %v7806_v18 = vrot.slane %v12089_v12, 1 }
 0x3be   : > { %v10902_v49 = vadd.f32 %v10901_v48, %v10900_v41  ;;  %v8679_v2 = vadd.f32 %v10899_v30, %v13388_v26  ;;  %v7809_v30 = vrot.slane %v12091_v7, 1  ;;  %v7810_v41 = vrot.slane %v12092_v19, 1 }
 0x3bf   : > { %11382 = vmatmul.mubr.bf16.gmra.mrb[12].mxu1 %v7796_v0  ;;  %v11009_v21 = vpop.f32.mrb[192].mxu0  ;;  %v7808_v38 = vsel %vm1679_vm10, %v7806_v18, %v7807_v4 }
 0x3c0   : > { %11385 = vmatprep.mubr.bf16.mxu1 %v7799_v47  ;;  %v11010_v11 = vpop.f32.mrb[193].mxu0  ;;  %v8682_v52 = vadd.f32 %v10902_v49, %v13388_v26  ;;  %v7805_v26 = vsel %vm1679_vm10, %v7803_v15, %v7804_v3 }
 0x3c1   : > { %v11011_v5 = vadd.f32 %v11010_v11, %v11009_v21  ;;  %v11012_v20 = vpop.f32.mrb[194].mxu0  ;;  %v7811_v11 = vsel %vm1679_vm10, %v7809_v30, %v7810_v41 }
 0x3c2   : > { %v10903_v16 = vpop.f32.mrb[164].mxu1  ;;  %v11013_v42 = vpop.f32.mrb[195].mxu0 }
 0x3c3   : > { %v10904_v25 = vpop.f32.mrb[165].mxu1  ;;  %v13497_v34 = vadd.f32 %v11011_v5, %v8679_v2  ;;  %v11014_v17 = vadd.f32 %v11013_v42, %v11012_v20  ;;  %v12094_v2 = vld [vmem:[#allocation2 + $0xbc] ss:$0 sps:$4 sm:$0x11]  }
 0x3c4   : > { %v10905_v62 = vadd.f32 %v10904_v25, %v10903_v16  ;;  %v10906_v13 = vpop.f32.mrb[166].mxu1  ;;  %v12095_v16 = vld [vmem:[#allocation2 + $0xc0] sm:$0xfe]   ;;  %v7812_v25 = vrot.slane %v12093_v40, 1  ;;  %v7813_v15 = vrot.slane %v12094_v2, 1 }
 0x3c5   : > { %v10907_v14 = vpop.f32.mrb[167].mxu1  ;;  %v13500_v46 = vadd.f32 %v11014_v17, %v8682_v52  ;;  %v7815_v17 = vrot.slane %v12095_v16, 1 }
 0x3c6   : > { %v10908_v32 = vadd.f32 %v10907_v14, %v10906_v13  ;;  %v8687_v59 = vadd.f32 %v13506_v27, %v10905_v62  ;;  %v7816_v14 = vrot.slane %v12096_v51, 1 }
 0x3c7   : > { %11386 = vmatmul.mubr.bf16.gmra.mrb[16].mxu1 %v7802_v8  ;;  %v11015_v35 = vpop.f32.mrb[196].mxu0 }
 0x3c8   : > { %11389 = vmatprep.mubr.bf16.mxu1 %v7805_v26  ;;  %v11016_v54 = vpop.f32.mrb[197].mxu0  ;;  %v8690_v57 = vadd.f32 %v13506_v27, %v10908_v32  ;;  %v12097_v32 = vld [vmem:[#allocation2 + $0xcc] sm:$0xfe]   ;;  %v12098_v26 = vld [vmem:[#allocation2 + $0xd4] ss:$0 sps:$4 sm:$0x11]   ;;  %v7817_v18 = vsel %vm1679_vm10, %v7815_v17, %v7816_v14 }
 0x3c9   : > { %v11017_v36 = vadd.f32 %v11016_v54, %v11015_v35  ;;  %v11018_v53 = vpop.f32.mrb[198].mxu0  ;;  %v7814_v54 = vsel %vm1679_vm10, %v7812_v25, %v7813_v15  ;;  %v7818_v4 = vrot.slane %v12097_v32, 1 }
 0x3ca   : > { %v10909_v24 = vpop.f32.mrb[168].mxu1  ;;  %v11019_v29 = vpop.f32.mrb[199].mxu0 }
 0x3cb   : > { %v10910_v60 = vpop.f32.mrb[169].mxu1  ;;  %v13510_v0 = vadd.f32 %v11017_v36, %v8687_v59  ;;  %v11020_v61 = vadd.f32 %v11019_v29, %v11018_v53  ;;  %v7819_v36 = vrot.slane %v12098_v26, 1 }
 0x3cc   : > { %v10911_v48 = vadd.f32 %v10910_v60, %v10909_v24  ;;  %v10912_v49 = vpop.f32.mrb[170].mxu1 }
 0x3cd   : > { %v10913_v43 = vpop.f32.mrb[171].mxu1  ;;  %v13513_v21 = vadd.f32 %v11020_v61, %v8690_v57 }
 0x3ce   : > { %v10914_v47 = vadd.f32 %v10913_v43, %v10912_v49  ;;  %v8695_v23 = vadd.f32 %v13506_v27, %v10911_v48 }
 0x3cf   : > { %11390 = vmatmul.mubr.bf16.gmra.mrb[20].mxu1 %v7808_v38  ;;  %v11021_v5 = vpop.f32.mrb[200].mxu0  ;;  %v7820_v38 = vsel %vm1679_vm10, %v7818_v4, %v7819_v36 }
 0x3d0   : > { %11393 = vmatprep.mubr.bf16.mxu1 %v7811_v11  ;;  %v11022_v52 = vpop.f32.mrb[201].mxu0  ;;  %v8698_v42 = vadd.f32 %v13506_v27, %v10914_v47 }
 0x3d1   : > { %v11023_v3 = vadd.f32 %v11022_v52, %v11021_v5  ;;  %v11024_v62 = vpop.f32.mrb[202].mxu0 }
 0x3d2   : > { %v10915_v20 = vpop.f32.mrb[172].mxu1  ;;  %v11025_v8 = vpop.f32.mrb[203].mxu0 }
 0x3d3   : > { %v10916_v13 = vpop.f32.mrb[173].mxu1  ;;  %v13518_v7 = vadd.f32 %v11023_v3, %v8695_v23  ;;  %v11026_v19 = vadd.f32 %v11025_v8, %v11024_v62 }
 0x3d4   : > { %v10917_v12 = vadd.f32 %v10916_v13, %v10915_v20  ;;  %v10918_v37 = vpop.f32.mrb[174].mxu1 }
 0x3d5   : > { %v10919_v59 = vpop.f32.mrb[175].mxu1  ;;  %v13521_v24 = vadd.f32 %v11026_v19, %v8698_v42 }
 0x3d6   : > { %v10920_v35 = vadd.f32 %v10919_v59, %v10918_v37  ;;  %v8703_v57 = vadd.f32 %v13506_v27, %v10917_v12 }
 0x3d7   : > { %11394 = vmatmul.mubr.bf16.gmra.mrb[24].mxu1 %v7814_v54  ;;  %v11027_v53 = vpop.f32.mrb[204].mxu0 }
 0x3d8   : > { %11397 = vmatprep.mubr.bf16.mxu1 %v7817_v18  ;;  %v11028_v60 = vpop.f32.mrb[205].mxu0  ;;  %v8706_v29 = vadd.f32 %v13506_v27, %v10920_v35 }
 0x3d9   : > { %v11029_v41 = vadd.f32 %v11028_v60, %v11027_v53  ;;  %v11030_v48 = vpop.f32.mrb[206].mxu0 }
 0x3da   : > { %v10921_v30 = vpop.f32.mrb[176].mxu1  ;;  %v11031_v61 = vpop.f32.mrb[207].mxu0 }
 0x3db   : > { %v10922_v49 = vpop.f32.mrb[177].mxu1  ;;  %v13527_v40 = vadd.f32 %v11029_v41, %v8703_v57  ;;  %v11032_v2 = vadd.f32 %v11031_v61, %v11030_v48 }
 0x3dc   : > { %v10923_v43 = vadd.f32 %v10922_v49, %v10921_v30  ;;  %v10924_v47 = vpop.f32.mrb[178].mxu1 }
 0x3dd   : > { %v10925_v11 = vpop.f32.mrb[179].mxu1  ;;  %v13529_v51 = vadd.f32 %v11032_v2, %v8706_v29 }
 0x3de   : > { %v10926_v16 = vadd.f32 %v10925_v11, %v10924_v47  ;;  %v8711_v23 = vadd.f32 %v13506_v27, %v10923_v43 }
 0x3df   : > { %11398 = vmatmul.mubr.bf16.gmra.mrb[28].mxu1 %v7820_v38  ;;  %v11033_v5 = vpop.f32.mrb[208].mxu0 }
 0x3e0   : > { %v11034_v52 = vpop.f32.mrb[209].mxu0  ;;  %v8714_v15 = vadd.f32 %v13506_v27, %v10926_v16 }
 0x3e1   : > { %v11035_v25 = vadd.f32 %v11034_v52, %v11033_v5  ;;  %v11036_v3 = vpop.f32.mrb[210].mxu0 }
 0x3e2   : > { %v10927_v20 = vpop.f32.mrb[180].mxu1  ;;  %v11037_v62 = vpop.f32.mrb[211].mxu0 }
 0x3e3   : > { %v10928_v42 = vpop.f32.mrb[181].mxu1  ;;  %v13533_v14 = vadd.f32 %v11035_v25, %v8711_v23  ;;  %v11038_v32 = vadd.f32 %v11037_v62, %v11036_v3 }
 0x3e4   : > { %v10929_v13 = vadd.f32 %v10928_v42, %v10927_v20  ;;  %v10930_v17 = vpop.f32.mrb[182].mxu1 }
 0x3e5   : > { %v10931_v8 = vpop.f32.mrb[183].mxu1  ;;  %v13535_v37 = vadd.f32 %v11038_v32, %v8714_v15 }
 0x3e6   : > { %v10932_v12 = vadd.f32 %v10931_v8, %v10930_v17  ;;  %v8719_v26 = vadd.f32 %v13506_v27, %v10929_v13 }
 0x3e7   : > { %v11039_v19 = vpop.f32.mrb[212].mxu0 }
 0x3e8   : > { %v11040_v59 = vpop.f32.mrb[213].mxu0  ;;  %v8722_v18 = vadd.f32 %v13506_v27, %v10932_v12 }
 0x3e9   : > { %v11041_v54 = vadd.f32 %v11040_v59, %v11039_v19  ;;  %v11042_v4 = vpop.f32.mrb[214].mxu0 }
 0x3ea   : > { %v10933_v35 = vpop.f32.mrb[184].mxu1  ;;  %v11043_v57 = vpop.f32.mrb[215].mxu0 }
 0x3eb   : > { %v10934_v36 = vpop.f32.mrb[185].mxu1  ;;  %v13539_v30 = vadd.f32 %v11041_v54, %v8719_v26  ;;  %v11044_v41 = vadd.f32 %v11043_v57, %v11042_v4 }
 0x3ec   : > { %v10935_v53 = vadd.f32 %v10934_v36, %v10933_v35  ;;  %v10936_v60 = vpop.f32.mrb[186].mxu1 }
 0x3ed   : > { %v10937_v29 = vpop.f32.mrb[187].mxu1  ;;  %v13541_v49 = vadd.f32 %v11044_v41, %v8722_v18 }
 0x3ee   : > { %v10938_v48 = vadd.f32 %v10937_v29, %v10936_v60  ;;  %v8727_v61 = vadd.f32 %v13506_v27, %v10935_v53 }
 0x3ef   : > { %v11045_v43 = vpop.f32.mrb[216].mxu0 }
 0x3f0   : > { %v11046_v47 = vpop.f32.mrb[217].mxu0  ;;  %v8730_v11 = vadd.f32 %v13506_v27, %v10938_v48 }
 0x3f1   : > { %v11047_v2 = vadd.f32 %v11046_v47, %v11045_v43  ;;  %v11048_v16 = vpop.f32.mrb[218].mxu0 }
 0x3f2   : > { %v10939_v38 = vpop.f32.mrb[188].mxu1  ;;  %v11049_v5 = vpop.f32.mrb[219].mxu0 }
 0x3f3   : > { %v10940_v23 = vpop.f32.mrb[189].mxu1  ;;  %v13545_v25 = vadd.f32 %v11047_v2, %v8727_v61  ;;  %v11050_v15 = vadd.f32 %v11049_v5, %v11048_v16 }
 0x3f4   : > { %v10941_v52 = vadd.f32 %v10940_v23, %v10939_v38  ;;  %v10942_v20 = vpop.f32.mrb[190].mxu1 }
 0x3f5   : > { %v10943_v3 = vpop.f32.mrb[191].mxu1  ;;  %v13547_v62 = vadd.f32 %v11050_v15, %v8730_v11 }
 0x3f6   : > { %v10944_v42 = vadd.f32 %v10943_v3, %v10942_v20  ;;  %v8735_v13 = vadd.f32 %v13506_v27, %v10941_v52 }
 0x3f7   : > { %v11051_v17 = vpop.f32.mrb[220].mxu0 }
 0x3f8   : > { %v11052_v32 = vpop.f32.mrb[221].mxu0  ;;  %v8738_v26 = vadd.f32 %v13506_v27, %v10944_v42 }
 0x3f9   : > { %v11053_v12 = vadd.f32 %v11052_v32, %v11051_v17  ;;  %v11054_v19 = vpop.f32.mrb[222].mxu0 }
 0x3fa   : > { %v11073_v8 = vpop.f32.mrb[192].mxu1  ;;  %v11055_v35 = vpop.f32.mrb[223].mxu0 }
 0x3fb   : > { %v11074_v59 = vpop.f32.mrb[193].mxu1  ;;  %v13551_v4 = vadd.f32 %v11053_v12, %v8735_v13  ;;  %v11056_v36 = vadd.f32 %v11055_v35, %v11054_v19 }
 0x3fc   : > { %v11075_v54 = vadd.f32 %v11074_v59, %v11073_v8  ;;  %v11076_v18 = vpop.f32.mrb[194].mxu1 }
 0x3fd   : > { %v11077_v57 = vpop.f32.mrb[195].mxu1  ;;  %v13554_v41 = vadd.f32 %v11056_v36, %v8738_v26 }
 0x3fe   : > { %v8937_v53 = vadd.f32 %v11075_v54, %v13394_v55  ;;  %v11078_v60 = vadd.f32 %v11077_v57, %v11076_v18 }
 0x3ff   : > { %v11185_v48 = vpop.f32.mrb[224].mxu0 }
 0x400   : > { %v8940_v29 = vadd.f32 %v11078_v60, %v13398_v45  ;;  %v11186_v61 = vpop.f32.mrb[225].mxu0 }
 0x401   : > { %v11187_v27 = vadd.f32 %v11186_v61, %v11185_v48  ;;  %v11188_v47 = vpop.f32.mrb[226].mxu0 }
 0x402   : > { %v11079_v43 = vpop.f32.mrb[196].mxu1  ;;  %v11189_v2 = vpop.f32.mrb[227].mxu0 }
 0x403   : > { %v11080_v38 = vpop.f32.mrb[197].mxu1  ;;  %v11190_v23 = vadd.f32 %v11189_v2, %v11188_v47  ;;  %v13557_v52 = vadd.f32 %v11187_v27, %v8937_v53 }
 0x404   : > { %v11081_v11 = vadd.f32 %v11080_v38, %v11079_v43  ;;  %v11082_v16 = vpop.f32.mrb[198].mxu1 }
 0x405   : > { %v11083_v5 = vpop.f32.mrb[199].mxu1  ;;  %v13560_v15 = vadd.f32 %v11190_v23, %v8940_v29 }
 0x406   : > { %v8945_v55 = vadd.f32 %v11081_v11, %v13421_v28  ;;  %v11084_v20 = vadd.f32 %v11083_v5, %v11082_v16 }
 0x407   : > { %v11191_v3 = vpop.f32.mrb[228].mxu0 }
 0x408   : > { %v8948_v45 = vadd.f32 %v11084_v20, %v13426_v6  ;;  %v11192_v42 = vpop.f32.mrb[229].mxu0 }
 0x409   : > { %v11193_v17 = vadd.f32 %v11192_v42, %v11191_v3  ;;  %v11194_v32 = vpop.f32.mrb[230].mxu0 }
 0x40a   : > { %v11085_v13 = vpop.f32.mrb[200].mxu1  ;;  %v11195_v12 = vpop.f32.mrb[231].mxu0 }
 0x40b   : > { %v11086_v8 = vpop.f32.mrb[201].mxu1  ;;  %v11196_v59 = vadd.f32 %v11195_v12, %v11194_v32  ;;  %v13563_v54 = vadd.f32 %v11193_v17, %v8945_v55 }
 0x40c   : > { %v11087_v26 = vadd.f32 %v11086_v8, %v11085_v13  ;;  %v11088_v19 = vpop.f32.mrb[202].mxu1 }
 0x40d   : > { %v11089_v35 = vpop.f32.mrb[203].mxu1  ;;  %v13566_v36 = vadd.f32 %v11196_v59, %v8948_v45 }
 0x40e   : > { %v8953_v28 = vadd.f32 %v11087_v26, %v13446_v56  ;;  %v11090_v18 = vadd.f32 %v11089_v35, %v11088_v19 }
 0x40f   : > { %v11197_v57 = vpop.f32.mrb[232].mxu0 }
 0x410   : > { %v8956_v6 = vadd.f32 %v11090_v18, %v13448_v39  ;;  %v11198_v53 = vpop.f32.mrb[233].mxu0 }
 0x411   : > { %v11199_v29 = vadd.f32 %v11198_v53, %v11197_v57  ;;  %v11200_v48 = vpop.f32.mrb[234].mxu0 }
 0x412   : > { %v11091_v60 = vpop.f32.mrb[204].mxu1  ;;  %v11201_v43 = vpop.f32.mrb[235].mxu0 }
 0x413   : > { %v11092_v61 = vpop.f32.mrb[205].mxu1  ;;  %v11202_v38 = vadd.f32 %v11201_v43, %v11200_v48  ;;  %v13569_v11 = vadd.f32 %v11199_v29, %v8953_v28 }
 0x414   : > { %v11093_v27 = vadd.f32 %v11092_v61, %v11091_v60  ;;  %v11094_v47 = vpop.f32.mrb[206].mxu1 }
 0x415   : > { %v11095_v2 = vpop.f32.mrb[207].mxu1  ;;  %v13572_v23 = vadd.f32 %v11202_v38, %v8956_v6 }
 0x416   : > { %v8961_v56 = vadd.f32 %v11093_v27, %v13456_v10  ;;  %v11096_v16 = vadd.f32 %v11095_v2, %v11094_v47 }
 0x417   : > { %v11203_v5 = vpop.f32.mrb[236].mxu0 }
 0x418   : > { %v8964_v39 = vadd.f32 %v11096_v16, %v13458_v63  ;;  %v11204_v55 = vpop.f32.mrb[237].mxu0 }
 0x419   : > { %v11205_v45 = vadd.f32 %v11204_v55, %v11203_v5  ;;  %v11206_v3 = vpop.f32.mrb[238].mxu0 }
 0x41a   : > { %v11097_v20 = vpop.f32.mrb[208].mxu1  ;;  %v11207_v13 = vpop.f32.mrb[239].mxu0 }
 0x41b   : > { %v11098_v42 = vpop.f32.mrb[209].mxu1  ;;  %v11208_v8 = vadd.f32 %v11207_v13, %v11206_v3  ;;  %v13575_v26 = vadd.f32 %v11205_v45, %v8961_v56 }
 0x41c   : > { %v11099_v17 = vadd.f32 %v11098_v42, %v11097_v20  ;;  %v11100_v32 = vpop.f32.mrb[210].mxu1 }
 0x41d   : > { %v11101_v12 = vpop.f32.mrb[211].mxu1  ;;  %v13578_v59 = vadd.f32 %v11208_v8, %v8964_v39 }
 0x41e   : > { %v8969_v10 = vadd.f32 %v11099_v17, %v13465_v31  ;;  %v11102_v19 = vadd.f32 %v11101_v12, %v11100_v32 }
 0x41f   : > { %v11209_v35 = vpop.f32.mrb[240].mxu0 }
 0x420   : > { %v8972_v63 = vadd.f32 %v11102_v19, %v13468_v50  ;;  %v11210_v28 = vpop.f32.mrb[241].mxu0 }
 0x421   : > { %v11211_v6 = vadd.f32 %v11210_v28, %v11209_v35  ;;  %v11212_v57 = vpop.f32.mrb[242].mxu0 }
 0x422   : > { %v11103_v18 = vpop.f32.mrb[212].mxu1  ;;  %v11213_v60 = vpop.f32.mrb[243].mxu0 }
 0x423   : > { %v11104_v53 = vpop.f32.mrb[213].mxu1  ;;  %v11214_v61 = vadd.f32 %v11213_v60, %v11212_v57  ;;  %v13581_v27 = vadd.f32 %v11211_v6, %v8969_v10 }
 0x424   : > { %v11105_v29 = vadd.f32 %v11104_v53, %v11103_v18  ;;  %v11106_v48 = vpop.f32.mrb[214].mxu1 }
 0x425   : > { %v11107_v43 = vpop.f32.mrb[215].mxu1  ;;  %v13584_v38 = vadd.f32 %v11214_v61, %v8972_v63 }
 0x426   : > { %v8977_v31 = vadd.f32 %v11105_v29, %v13473_v58  ;;  %v11108_v47 = vadd.f32 %v11107_v43, %v11106_v48 }
 0x427   : > { %v11215_v2 = vpop.f32.mrb[244].mxu0 }
 0x428   : > { %v8980_v50 = vadd.f32 %v11108_v47, %v13476_v1  ;;  %v11216_v56 = vpop.f32.mrb[245].mxu0 }
 0x429   : > { %v11217_v39 = vadd.f32 %v11216_v56, %v11215_v2  ;;  %v11218_v5 = vpop.f32.mrb[246].mxu0 }
 0x42a   : > { %v11109_v16 = vpop.f32.mrb[216].mxu1  ;;  %v11219_v20 = vpop.f32.mrb[247].mxu0 }
 0x42b   : > { %v11110_v55 = vpop.f32.mrb[217].mxu1  ;;  %v11220_v42 = vadd.f32 %v11219_v20, %v11218_v5  ;;  %v13587_v17 = vadd.f32 %v11217_v39, %v8977_v31 }
 0x42c   : > { %v11111_v45 = vadd.f32 %v11110_v55, %v11109_v16  ;;  %v11112_v3 = vpop.f32.mrb[218].mxu1 }
 0x42d   : > { %v11113_v13 = vpop.f32.mrb[219].mxu1  ;;  %v13590_v8 = vadd.f32 %v11220_v42, %v8980_v50 }
 0x42e   : > { %v8985_v58 = vadd.f32 %v11111_v45, %v13481_v9  ;;  %v11114_v32 = vadd.f32 %v11113_v13, %v11112_v3 }
 0x42f   : > { %v11221_v12 = vpop.f32.mrb[248].mxu0 }
 0x430   : > { %v8988_v1 = vadd.f32 %v11114_v32, %v13484_v22  ;;  %v11222_v10 = vpop.f32.mrb[249].mxu0 }
 0x431   : > { %v11223_v63 = vadd.f32 %v11222_v10, %v11221_v12  ;;  %v11224_v35 = vpop.f32.mrb[250].mxu0 }
 0x432   : > { %v11115_v19 = vpop.f32.mrb[220].mxu1  ;;  %v11225_v18 = vpop.f32.mrb[251].mxu0 }
 0x433   : > { %v11116_v28 = vpop.f32.mrb[221].mxu1  ;;  %v11226_v53 = vadd.f32 %v11225_v18, %v11224_v35  ;;  %v13593_v29 = vadd.f32 %v11223_v63, %v8985_v58 }
 0x434   : > { %v11117_v6 = vadd.f32 %v11116_v28, %v11115_v19  ;;  %v11118_v57 = vpop.f32.mrb[222].mxu1 }
 0x435   : > { %v11119_v60 = vpop.f32.mrb[223].mxu1  ;;  %v13596_v61 = vadd.f32 %v11226_v53, %v8988_v1 }
 0x436   : > { %v8993_v9 = vadd.f32 %v11117_v6, %v13489_v44  ;;  %v11120_v48 = vadd.f32 %v11119_v60, %v11118_v57 }
 0x437   : > { %v11227_v43 = vpop.f32.mrb[252].mxu0 }
 0x438   : > { %v8996_v22 = vadd.f32 %v11120_v48, %v13492_v33  ;;  %v11228_v31 = vpop.f32.mrb[253].mxu0 }
 0x439   : > { %v11229_v50 = vadd.f32 %v11228_v31, %v11227_v43  ;;  %v11230_v2 = vpop.f32.mrb[254].mxu0 }
 0x43a   : > { %v11121_v47 = vpop.f32.mrb[224].mxu1  ;;  %v11231_v16 = vpop.f32.mrb[255].mxu0 }
 0x43b   : > { %v11122_v56 = vpop.f32.mrb[225].mxu1  ;;  %v11232_v55 = vadd.f32 %v11231_v16, %v11230_v2  ;;  %v13599_v45 = vadd.f32 %v11229_v50, %v8993_v9 }
 0x43c   : > { %v11123_v39 = vadd.f32 %v11122_v56, %v11121_v47  ;;  %v11124_v5 = vpop.f32.mrb[226].mxu1 }
 0x43d   : > { %v11125_v20 = vpop.f32.mrb[227].mxu1  ;;  %v13602_v42 = vadd.f32 %v11232_v55, %v8996_v22 }
 0x43e   : > { %v9001_v44 = vadd.f32 %v11123_v39, %v13497_v34  ;;  %v11126_v3 = vadd.f32 %v11125_v20, %v11124_v5 }
 0x43f   : > { %v11233_v13 = vpop.f32.mrb[0].mxu0 }
 0x440   : > { %v9004_v33 = vadd.f32 %v11126_v3, %v13500_v46  ;;  %v11234_v58 = vpop.f32.mrb[1].mxu0 }
 0x441   : > { %v11235_v1 = vadd.f32 %v11234_v58, %v11233_v13  ;;  %v11236_v12 = vpop.f32.mrb[2].mxu0 }
 0x442   : > { %v11127_v32 = vpop.f32.mrb[228].mxu1  ;;  %v11237_v19 = vpop.f32.mrb[3].mxu0 }
 0x443   : > { %v11128_v10 = vpop.f32.mrb[229].mxu1  ;;  %v11238_v28 = vadd.f32 %v11237_v19, %v11236_v12  ;;  %v13605_v6 = vadd.f32 %v11235_v1, %v9001_v44 }
 0x444   : > { %v11129_v63 = vadd.f32 %v11128_v10, %v11127_v32  ;;  %v11130_v35 = vpop.f32.mrb[230].mxu1 }
 0x445   : > { %v11131_v18 = vpop.f32.mrb[231].mxu1  ;;  %v13608_v53 = vadd.f32 %v11238_v28, %v9004_v33 }
 0x446   : > { %v9009_v34 = vadd.f32 %v11129_v63, %v13510_v0  ;;  %v11132_v57 = vadd.f32 %v11131_v18, %v11130_v35 }
 0x447   : > { %v11239_v60 = vpop.f32.mrb[4].mxu0 }
 0x448   : > { %v9012_v46 = vadd.f32 %v11132_v57, %v13513_v21  ;;  %v11240_v9 = vpop.f32.mrb[5].mxu0 }
 0x449   : > { %v11241_v22 = vadd.f32 %v11240_v9, %v11239_v60  ;;  %v11242_v43 = vpop.f32.mrb[6].mxu0 }
 0x44a   : > { %v11133_v48 = vpop.f32.mrb[232].mxu1  ;;  %v11243_v47 = vpop.f32.mrb[7].mxu0 }
 0x44b   : > { %v11134_v31 = vpop.f32.mrb[233].mxu1  ;;  %v11244_v56 = vadd.f32 %v11243_v47, %v11242_v43  ;;  %v13611_v39 = vadd.f32 %v11241_v22, %v9009_v34 }
 0x44c   : > { %v11135_v50 = vadd.f32 %v11134_v31, %v11133_v48  ;;  %v11136_v2 = vpop.f32.mrb[234].mxu1 }
 0x44d   : > { %v11137_v16 = vpop.f32.mrb[235].mxu1  ;;  %v13614_v55 = vadd.f32 %v11244_v56, %v9012_v46 }
 0x44e   : > { %v9017_v0 = vadd.f32 %v11135_v50, %v13518_v7  ;;  %v11138_v5 = vadd.f32 %v11137_v16, %v11136_v2 }
 0x44f   : > { %v11245_v20 = vpop.f32.mrb[8].mxu0 }
 0x450   : > { %v9020_v21 = vadd.f32 %v11138_v5, %v13521_v24  ;;  %v11246_v44 = vpop.f32.mrb[9].mxu0 }
 0x451   : > { %v11247_v33 = vadd.f32 %v11246_v44, %v11245_v20  ;;  %v11248_v13 = vpop.f32.mrb[10].mxu0 }
 0x452   : > { %v11139_v3 = vpop.f32.mrb[236].mxu1  ;;  %v11249_v32 = vpop.f32.mrb[11].mxu0 }
 0x453   : > { %v11140_v58 = vpop.f32.mrb[237].mxu1  ;;  %v11250_v10 = vadd.f32 %v11249_v32, %v11248_v13  ;;  %v13617_v63 = vadd.f32 %v11247_v33, %v9017_v0 }
 0x454   : > { %v11141_v1 = vadd.f32 %v11140_v58, %v11139_v3  ;;  %v11142_v12 = vpop.f32.mrb[238].mxu1 }
 0x455   : > { %v11143_v19 = vpop.f32.mrb[239].mxu1  ;;  %v13620_v28 = vadd.f32 %v11250_v10, %v9020_v21 }
 0x456   : > { %v9025_v7 = vadd.f32 %v11141_v1, %v13527_v40  ;;  %v11144_v35 = vadd.f32 %v11143_v19, %v11142_v12 }
 0x457   : > { %v11251_v18 = vpop.f32.mrb[12].mxu0 }
 0x458   : > { %v9028_v24 = vadd.f32 %v11144_v35, %v13529_v51  ;;  %v11252_v34 = vpop.f32.mrb[13].mxu0 }
 0x459   : > { %v11253_v46 = vadd.f32 %v11252_v34, %v11251_v18  ;;  %v11254_v60 = vpop.f32.mrb[14].mxu0 }
 0x45a   : > { %v11145_v57 = vpop.f32.mrb[240].mxu1  ;;  %v11255_v48 = vpop.f32.mrb[15].mxu0 }
 0x45b   : > { %v11146_v9 = vpop.f32.mrb[241].mxu1  ;;  %v11256_v31 = vadd.f32 %v11255_v48, %v11254_v60  ;;  %v13623_v50 = vadd.f32 %v11253_v46, %v9025_v7 }
 0x45c   : > { %v11147_v22 = vadd.f32 %v11146_v9, %v11145_v57  ;;  %v11148_v43 = vpop.f32.mrb[242].mxu1 }
 0x45d   : > { %v11149_v47 = vpop.f32.mrb[243].mxu1  ;;  %v13626_v56 = vadd.f32 %v11256_v31, %v9028_v24 }
 0x45e   : > { %v9033_v40 = vadd.f32 %v11147_v22, %v13533_v14  ;;  %v11150_v2 = vadd.f32 %v11149_v47, %v11148_v43 }
 0x45f   : > { %v11257_v16 = vpop.f32.mrb[16].mxu0 }
 0x460   : > { %v9036_v51 = vadd.f32 %v11150_v2, %v13535_v37  ;;  %v11258_v0 = vpop.f32.mrb[17].mxu0 }
 0x461   : > { %v11259_v21 = vadd.f32 %v11258_v0, %v11257_v16  ;;  %v11260_v20 = vpop.f32.mrb[18].mxu0 }
 0x462   : > { %v11151_v5 = vpop.f32.mrb[244].mxu1  ;;  %v11261_v3 = vpop.f32.mrb[19].mxu0 }
 0x463   : > { %v11152_v44 = vpop.f32.mrb[245].mxu1  ;;  %v11262_v58 = vadd.f32 %v11261_v3, %v11260_v20  ;;  %v13629_v1 = vadd.f32 %v11259_v21, %v9033_v40 }
 0x464   : > { %v11153_v33 = vadd.f32 %v11152_v44, %v11151_v5  ;;  %v11154_v13 = vpop.f32.mrb[246].mxu1 }
 0x465   : > { %v11155_v32 = vpop.f32.mrb[247].mxu1  ;;  %v13632_v10 = vadd.f32 %v11262_v58, %v9036_v51 }
 0x466   : > { %v9041_v14 = vadd.f32 %v11153_v33, %v13539_v30  ;;  %v11156_v12 = vadd.f32 %v11155_v32, %v11154_v13 }
 0x467   : > { %v11263_v19 = vpop.f32.mrb[20].mxu0 }
 0x468   : > { %v9044_v37 = vadd.f32 %v11156_v12, %v13541_v49  ;;  %v11264_v7 = vpop.f32.mrb[21].mxu0 }
 0x469   : > { %v11265_v24 = vadd.f32 %v11264_v7, %v11263_v19  ;;  %v11266_v18 = vpop.f32.mrb[22].mxu0 }
 0x46a   : > { %v11157_v35 = vpop.f32.mrb[248].mxu1  ;;  %v11267_v57 = vpop.f32.mrb[23].mxu0 }
 0x46b   : > { %v11158_v34 = vpop.f32.mrb[249].mxu1  ;;  %v11268_v9 = vadd.f32 %v11267_v57, %v11266_v18  ;;  %v13635_v22 = vadd.f32 %v11265_v24, %v9041_v14  ;;  %v9385_v18 = vld [vmem:[%s12478_s6] sm:$0xff] }
 0x46c   : > { %v11159_v46 = vadd.f32 %v11158_v34, %v11157_v35  ;;  %v11160_v60 = vpop.f32.mrb[250].mxu1 }
 0x46d   : > { %v11161_v48 = vpop.f32.mrb[251].mxu1  ;;  %v13638_v31 = vadd.f32 %v11268_v9, %v9044_v37  ;;  %v9387_v37 = vld [vmem:[%s12478_s6 + $0x10] sm:$0xff] }
 0x46e   : > { %v9049_v30 = vadd.f32 %v11159_v46, %v13545_v25  ;;  %v11162_v43 = vadd.f32 %v11161_v48, %v11160_v60  ;;  %v9388_v46 = vld [vmem:[%s12478_s6 + $0x18] sm:$0xff] }
 0x46f   : > { %v11269_v47 = vpop.f32.mrb[24].mxu0 }
 0x470   : > { %v9052_v49 = vadd.f32 %v11162_v43, %v13547_v62  ;;  %v11270_v40 = vpop.f32.mrb[25].mxu0 }
 0x471   : > { %v11271_v51 = vadd.f32 %v11270_v40, %v11269_v47  ;;  %v11272_v16 = vpop.f32.mrb[26].mxu0 }
 0x472   : > { %v11163_v2 = vpop.f32.mrb[252].mxu1  ;;  %v11273_v5 = vpop.f32.mrb[27].mxu0 }
 0x473   : > { %v11164_v0 = vpop.f32.mrb[253].mxu1  ;;  %v11274_v44 = vadd.f32 %v11273_v5, %v11272_v16  ;;  %v13641_v33 = vadd.f32 %v11271_v51, %v9049_v30  ;;  %v9386_v30 = vld [vmem:[%s12478_s6 + $0x8] sm:$0xff]  ;;  %v9389_v16 = vld [vmem:[%s12478_s6 + $0x20] sm:$0xff] }
 0x474   : > { %v11165_v21 = vadd.f32 %v11164_v0, %v11163_v2  ;;  %v11166_v20 = vpop.f32.mrb[254].mxu1 }
 0x475   : > { %v11167_v3 = vpop.f32.mrb[255].mxu1  ;;  %v13644_v62 = vadd.f32 %v11274_v44, %v9052_v49 }
 0x476   : > { %v9057_v25 = vadd.f32 %v11165_v21, %v13551_v4  ;;  %v11168_v13 = vadd.f32 %v11167_v3, %v11166_v20  ;;  %v9392_v21 = vld [vmem:[%s12478_s6 + $0x38] sm:$0xff] }
 0x477   : > { %v11275_v32 = vpop.f32.mrb[28].mxu0 }
 0x478   : > { %v9060_v58 = vadd.f32 %v11168_v13, %v13554_v41  ;;  %v11276_v14 = vpop.f32.mrb[29].mxu0 }
 0x479   : > { %v11277_v19 = vadd.f32 %v11276_v14, %v11275_v32  ;;  %v11278_v7 = vpop.f32.mrb[30].mxu0  ;;  %v9395_v14 = vld [vmem:[%s12478_s6 + $0x50] sm:$0xff] }
 0x47a   : > { %v11371_v12 = vpop.f32.mrb[0].mxu1  ;;  %v11279_v34 = vpop.f32.mrb[31].mxu0 }
 0x47b   : > { %v9267_v35 = vadd.f32 %v11371_v12, %v13563_v54  ;;  %v9258_v24 = vpop.f32.mrb[1].mxu1  ;;  %v11280_v60 = vadd.f32 %v11279_v34, %v11278_v7  ;;  %v13654_v43 = vadd.f32 %v11277_v19, %v9057_v25  ;;  %v9390_v25 = vld [vmem:[%s12478_s6 + $0x28] sm:$0xff]  ;;  %v9396_v7 = vld [vmem:[%s12478_s6 + $0x58] sm:$0xff] }
 0x47c   : > { %v9259_v4 = vadd.f32 %v9258_v24, %v13557_v52  ;;  %v11372_v57 = vpop.f32.mrb[2].mxu1  ;;  %v9394_v34 = vld [vmem:[%s12478_s6 + $0x48] sm:$0xff] }
 0x47d   : > { %v9419_v9 = vadd.f32 %v9387_v37, %v9267_v35  ;;  %v9270_v41 = vadd.f32 %v11372_v57, %v13566_v36  ;;  %v9261_v48 = vpop.f32.mrb[3].mxu1  ;;  %v13662_v47 = vadd.f32 %v11280_v60, %v9060_v58  ;;  %v9393_v37 = vld [vmem:[%s12478_s6 + $0x40] sm:$0xff]  ;;  %v9399_v60 = vld [vmem:[%s12478_s6 + $0x70] sm:$0xff] }
 0x47e   : > { %v9417_v49 = vadd.f32 %v9385_v18, %v9259_v4  ;;  %v9262_v54 = vadd.f32 %v9261_v48, %v13560_v15  ;;  %v9391_v15 = vld [vmem:[%s12478_s6 + $0x30] sm:$0xff] }
 0x47f   : > { %9451 = vst [vmem:[%s13659_s16 + $0x10] sm:$0xff] %v9419_v9  ;;  %v9420_v52 = vadd.f32 %v9388_v46, %v9270_v41  ;;  %v9397_v41 = vld [vmem:[%s12478_s6 + $0x60] sm:$0xff] }
 0x480   : > { %9449 = vst [vmem:[%s13659_s16] sm:$0xff] %v9417_v49  ;;  %v9418_v36 = vadd.f32 %v9386_v30, %v9262_v54  ;;  %v9400_v30 = vld [vmem:[%s12478_s6 + $0x78] sm:$0xff] }
 0x481   : > { %9452 = vst [vmem:[%s13659_s16 + $0x18] sm:$0xff] %v9420_v52 }
 0x482   : > { %9450 = vst [vmem:[%s13659_s16 + $0x8] sm:$0xff] %v9418_v36  ;;  %v11375_v40 = vpop.f32.mrb[4].mxu1  ;;  %v9398_v36 = vld [vmem:[%s12478_s6 + $0x68] sm:$0xff] }
 0x483   : > { %v9283_v2 = vadd.f32 %v11375_v40, %v13575_v26  ;;  %v9274_v51 = vpop.f32.mrb[5].mxu1 }
 0x484   : > { %v9275_v0 = vadd.f32 %v9274_v51, %v13569_v11  ;;  %v11376_v5 = vpop.f32.mrb[6].mxu1  ;;  %v9403_v51 = vld [vmem:[%s12478_s6 + $0x90] sm:$0xff] }
 0x485   : > { %v9423_v20 = vadd.f32 %v9391_v15, %v9283_v2  ;;  %v9286_v44 = vadd.f32 %v11376_v5, %v13578_v59  ;;  %v9277_v3 = vpop.f32.mrb[7].mxu1 }
 0x486   : > { %v9421_v13 = vadd.f32 %v9389_v16, %v9275_v0  ;;  %v9278_v58 = vadd.f32 %v9277_v3, %v13572_v23  ;;  %v9401_v0 = vld [vmem:[%s12478_s6 + $0x80] sm:$0xff] }
 0x487   : > { %9455 = vst [vmem:[%s13659_s16 + $0x30] sm:$0xff] %v9423_v20  ;;  %v9424_v26 = vadd.f32 %v9392_v21, %v9286_v44  ;;  %v9404_v21 = vld [vmem:[%s12478_s6 + $0x98] sm:$0xff] }
 0x488   : > { %9453 = vst [vmem:[%s13659_s16 + $0x20] sm:$0xff] %v9421_v13  ;;  %v9422_v32 = vadd.f32 %v9390_v25, %v9278_v58  ;;  %v9402_v25 = vld [vmem:[%s12478_s6 + $0x88] sm:$0xff] }
 0x489   : > { %9456 = vst [vmem:[%s13659_s16 + $0x38] sm:$0xff] %v9424_v26 }
 0x48a   : > { %9454 = vst [vmem:[%s13659_s16 + $0x28] sm:$0xff] %v9422_v32  ;;  %v11379_v11 = vpop.f32.mrb[8].mxu1  ;;  %v9407_v32 = vld [vmem:[%s12478_s6 + $0xb0] sm:$0xff] }
 0x48b   : > { %v9299_v12 = vadd.f32 %v11379_v11, %v13587_v17  ;;  %v9290_v59 = vpop.f32.mrb[9].mxu1 }
 0x48c   : > { %v9291_v19 = vadd.f32 %v9290_v59, %v13581_v27  ;;  %v11380_v23 = vpop.f32.mrb[10].mxu1  ;;  %v9408_v59 = vld [vmem:[%s12478_s6 + $0xb8] sm:$0xff] }
 0x48d   : > { %v9427_v35 = vadd.f32 %v9395_v14, %v9299_v12  ;;  %v9302_v24 = vadd.f32 %v11380_v23, %v13590_v8  ;;  %v9293_v18 = vpop.f32.mrb[11].mxu1  ;;  %v9405_v14 = vld [vmem:[%s12478_s6 + $0xa0] sm:$0xff] }
 0x48e   : > { %v9425_v4 = vadd.f32 %v9393_v37, %v9291_v19  ;;  %v9294_v57 = vadd.f32 %v9293_v18, %v13584_v38 }
 0x48f   : > { %9459 = vst [vmem:[%s13659_s16 + $0x50] sm:$0xff] %v9427_v35  ;;  %v9428_v17 = vadd.f32 %v9396_v7, %v9302_v24  ;;  %v9406_v7 = vld [vmem:[%s12478_s6 + $0xa8] sm:$0xff] }
 0x490   : > { %9457 = vst [vmem:[%s13659_s16 + $0x40] sm:$0xff] %v9425_v4  ;;  %v9426_v46 = vadd.f32 %v9394_v34, %v9294_v57  ;;  %v9411_v34 = vld [vmem:[%s12478_s6 + $0xd0] sm:$0xff]  ;;  %v9409_v57 = vld [vmem:[%s12478_s6 + $0xc0] sm:$0xff] }
 0x491   : > { %9460 = vst [vmem:[%s13659_s16 + $0x58] sm:$0xff] %v9428_v17 }
 0x492   : > { %9458 = vst [vmem:[%s13659_s16 + $0x48] sm:$0xff] %v9426_v46  ;;  %v11383_v27 = vpop.f32.mrb[12].mxu1  ;;  %v9412_v46 = vld [vmem:[%s12478_s6 + $0xd8] sm:$0xff] }
 0x493   : > { %v9315_v9 = vadd.f32 %v11383_v27, %v13599_v45  ;;  %v9306_v8 = vpop.f32.mrb[13].mxu1 }
 0x494   : > { %v9307_v48 = vadd.f32 %v9306_v8, %v13593_v29  ;;  %v11384_v38 = vpop.f32.mrb[14].mxu1  ;;  %v9410_v8 = vld [vmem:[%s12478_s6 + $0xc8] sm:$0xff] }
 0x495   : > { %v9431_v49 = vadd.f32 %v9399_v60, %v9315_v9  ;;  %v9318_v54 = vadd.f32 %v11384_v38, %v13602_v42  ;;  %v9309_v52 = vpop.f32.mrb[15].mxu1 }
 0x496   : > { %v9429_v40 = vadd.f32 %v9397_v41, %v9307_v48  ;;  %v9310_v15 = vadd.f32 %v9309_v52, %v13596_v61 }
 0x497   : > { %9463 = vst [vmem:[%s13659_s16 + $0x70] sm:$0xff] %v9431_v49  ;;  %v9432_v45 = vadd.f32 %v9400_v30, %v9318_v54  ;;  %v9415_v30 = vld [vmem:[%s12478_s6 + $0xf0] sm:$0xff]  ;;  %v9413_v54 = vld [vmem:[%s12478_s6 + $0xe0] sm:$0xff] }
 0x498   : > { %9461 = vst [vmem:[%s13659_s16 + $0x60] sm:$0xff] %v9429_v40  ;;  %v9430_v2 = vadd.f32 %v9398_v36, %v9310_v15 }
 0x499   : > { %9464 = vst [vmem:[%s13659_s16 + $0x78] sm:$0xff] %v9432_v45 }
 0x49a   : > { %9462 = vst [vmem:[%s13659_s16 + $0x68] sm:$0xff] %v9430_v2  ;;  %v11387_v29 = vpop.f32.mrb[16].mxu1  ;;  %v9414_v2 = vld [vmem:[%s12478_s6 + $0xe8] sm:$0xff] }
 0x49b   : > { %v9331_v16 = vadd.f32 %v11387_v29, %v13611_v39  ;;  %v9322_v42 = vpop.f32.mrb[17].mxu1 }
 0x49c   : > { %v9323_v5 = vadd.f32 %v9322_v42, %v13605_v6  ;;  %v11388_v61 = vpop.f32.mrb[18].mxu1 }
 0x49d   : > { %v9435_v20 = vadd.f32 %v9403_v51, %v9331_v16  ;;  %v9334_v44 = vadd.f32 %v11388_v61, %v13614_v55  ;;  %v9325_v3 = vpop.f32.mrb[19].mxu1 }
 0x49e   : > { %v9433_v13 = vadd.f32 %v9401_v0, %v9323_v5  ;;  %v9326_v58 = vadd.f32 %v9325_v3, %v13608_v53 }
 0x49f   : > { %9467 = vst [vmem:[%s13659_s16 + $0x90] sm:$0xff] %v9435_v20  ;;  %v9436_v39 = vadd.f32 %v9404_v21, %v9334_v44 }
 0x4a0   : > { %9465 = vst [vmem:[%s13659_s16 + $0x80] sm:$0xff] %v9433_v13  ;;  %v9434_v26 = vadd.f32 %v9402_v25, %v9326_v58 }
 0x4a1   : > { %9468 = vst [vmem:[%s13659_s16 + $0x98] sm:$0xff] %v9436_v39 }
 0x4a2   : > { %9466 = vst [vmem:[%s13659_s16 + $0x88] sm:$0xff] %v9434_v26  ;;  %v11391_v6 = vpop.f32.mrb[20].mxu1 }
 0x4a3   : > { %v9347_v11 = vadd.f32 %v11391_v6, %v13623_v50  ;;  %v9338_v55 = vpop.f32.mrb[21].mxu1 }
 0x4a4   : > { %v9339_v12 = vadd.f32 %v9338_v55, %v13617_v63  ;;  %v11392_v53 = vpop.f32.mrb[22].mxu1 }
 0x4a5   : > { %v9439_v37 = vadd.f32 %v9407_v32, %v9347_v11  ;;  %v9350_v19 = vadd.f32 %v11392_v53, %v13626_v56  ;;  %v9341_v23 = vpop.f32.mrb[23].mxu1 }
 0x4a6   : > { %v9437_v35 = vadd.f32 %v9405_v14, %v9339_v12  ;;  %v9342_v24 = vadd.f32 %v9341_v23, %v13620_v28 }
 0x4a7   : > { %9471 = vst [vmem:[%s13659_s16 + $0xb0] sm:$0xff] %v9439_v37  ;;  %v9440_v50 = vadd.f32 %v9408_v59, %v9350_v19 }
 0x4a8   : > { %9469 = vst [vmem:[%s13659_s16 + $0xa0] sm:$0xff] %v9437_v35  ;;  %v9438_v18 = vadd.f32 %v9406_v7, %v9342_v24 }
 0x4a9   : > { %9472 = vst [vmem:[%s13659_s16 + $0xb8] sm:$0xff] %v9440_v50 }
 0x4aa   : > { %9470 = vst [vmem:[%s13659_s16 + $0xa8] sm:$0xff] %v9438_v18  ;;  %v11395_v63 = vpop.f32.mrb[24].mxu1 }
 0x4ab   : > { %v9363_v4 = vadd.f32 %v11395_v63, %v13635_v22  ;;  %v9354_v56 = vpop.f32.mrb[25].mxu1 }
 0x4ac   : > { %v9355_v17 = vadd.f32 %v9354_v56, %v13629_v1  ;;  %v11396_v28 = vpop.f32.mrb[26].mxu1 }
 0x4ad   : > { %v9443_v27 = vadd.f32 %v9411_v34, %v9363_v4  ;;  %v9366_v60 = vadd.f32 %v11396_v28, %v13638_v31  ;;  %v9357_v9 = vpop.f32.mrb[27].mxu1 }
 0x4ae   : > { %v9441_v41 = vadd.f32 %v9409_v57, %v9355_v17  ;;  %v9358_v22 = vadd.f32 %v9357_v9, %v13632_v10  ;;  %v9416_v10 = vld [vmem:[%s12478_s6 + $0xf8] sm:$0xff]  ;;  %s12187_s6 = scalar_lea.vmem %s13755_s12, 4096 }
 0x4af   : > { %9475 = vst [vmem:[%s13659_s16 + $0xd0] sm:$0xff] %v9443_v27  ;;  %v9444_v48 = vadd.f32 %v9412_v46, %v9366_v60  ;;  %p12188_p11 = scmp.ne.s32.totalorder %s13755_s12, %s12187_s6  ;;  %p12195_p9 = scmp.lt.s32.totalorder %s12193_s8, %s12187_s6 }
 0x4b0   : > { %9473 = vst [vmem:[%s13659_s16 + $0xc0] sm:$0xff] %v9441_v41  ;;  %v9442_v38 = vadd.f32 %v9410_v8, %v9358_v22 }
 0x4b1   : > { %9476 = vst [vmem:[%s13659_s16 + $0xd8] sm:$0xff] %v9444_v48  ;;  %p12189_p1 = pnand %p12188_p11, %p13829_p0  ;;  %p12196_p12 = por %p12195_p9, %p12194_p7 }
 0x4b2   : > { %9474 = vst [vmem:[%s13659_s16 + $0xc8] sm:$0xff] %v9442_v38  ;;  %v11399_v1 = vpop.f32.mrb[28].mxu1 }
 0x4b3   : > { %v9379_v31 = vadd.f32 %v11399_v1, %v13654_v43  ;;  %v9370_v49 = vpop.f32.mrb[29].mxu1  ;;  %p12190_p3 = pneg %p12189_p1 }
 0x4b4   : > { %v9371_v52 = vadd.f32 %v9370_v49, %v13641_v33  ;;  %v11400_v36 = vpop.f32.mrb[30].mxu1 }
 0x4b5   : > { %v9447_v40 = vadd.f32 %v9415_v30, %v9379_v31  ;;  %v9382_v15 = vadd.f32 %v11400_v36, %v13662_v47  ;;  %v9373_v45 = vpop.f32.mrb[31].mxu1  ;;  %p12197_p2 = pnand %p12196_p12, %p12190_p3 }
 0x4b6   : > { %v9445_v29 = vadd.f32 %v9413_v54, %v9371_v52  ;;  %v9374_v43 = vadd.f32 %v9373_v45, %v13644_v62 }
 0x4b7   : > { %9479 = vst [vmem:[%s13659_s16 + $0xf0] sm:$0xff] %v9447_v40  ;;  %v9448_v51 = vadd.f32 %v9416_v10, %v9382_v15 }
 0x4b8   : > { %9477 = vst [vmem:[%s13659_s16 + $0xe0] sm:$0xff] %v9445_v29  ;;  %v9446_v33 = vadd.f32 %v9414_v2, %v9374_v43 }
 0x4b9   : > { %9480 = vst [vmem:[%s13659_s16 + $0xf8] sm:$0xff] %v9448_v51 }
 0x4ba   : > { %9478 = vst [vmem:[%s13659_s16 + $0xe8] sm:$0xff] %v9446_v33 }
 0x4bb   : > { %12200 = shalt.err (!%p12197_p2)
}
 0x4bc   : > { %s12201_s10 = scalar_lea.hbm %s13753_s7, 4096  ;;  %s12205_s30 = scalar_lea.hbm %s13807_s5, 8192 }
 0x4bd   : > { %p12202_p13 = scmp.ne.s32.totalorder %s13753_s7, %s12201_s10  ;;  %p12206_p4 = scmp.lt.u32.totalorder %s13753_s7, %s13807_s5 }
 0x4be   : > { %p12207_p5 = scmp.lt.u32.totalorder %s12205_s30, %s12201_s10  ;;  %p12209_p11 = scmp.lt.u32.totalorder %s12201_s10, %s13753_s7 }
 0x4bf   : > { %p12203_p6 = pnand %p12202_p13, %p13829_p0 }
 0x4c0   : > { %p12208_p8 = por %p12207_p5, %p12206_p4 }
 0x4c1   : > { %p12204_p10 = pneg %p12203_p6 }
 0x4c2   : > { %p12210_p1 = por %p12209_p11, %p12208_p8 }
 0x4c4   : > { %p12211_p3 = pnand %p12210_p1, %p12204_p10 }
 0x4c6   : > { %12214 = shalt.err (!%p12211_p3)
}
 0x4c7   : > { %s12268_s9 = smov 128   ;;  %s12269_s13 = smov 8  }
 0x4c8   : > { %11411 = dma.vmem_to_hbm [thread:$0]  (%p13829_p0), %s13755_s12, 4096, %s13753_s7, %s9482_s22, %s12268_s9, %s12268_s9, %s12269_s13  }
 0x4c9 PF: > { %s9510_s17 = sand.u32 1, %s12245_s18   ;;  %p13830_p7 = scmp.ne.s32.totalorder %s13812_s25, 0 }
 0x4ca   : > { %p13831_p9 = scmp.ge.s32.totalorder %s12257_s21, 2  ;;  %s9511_s6 = scalar_lea.sflag [#allocation6], %s9510_s17 }
 0x4cc   : > { %p11425_p12 = pnand %p13831_p9, %p13830_p7 }
 0x4ce   : > { %12240 = dma.done.wait (!%p11425_p12), %s9511_s6, 4096  }
 0x4cf   : > { %12242 = vsyncadd (!%p11425_p12), %s9511_s6, 4294963200  ;;  %p19_p2 = scmp.ge.s32.totalorder %s12410_s14, 4   ;;  %s13832_s18 = smov %s12249_s19 }
 0x4d0   : > { %s13833_s19 = smov %s12253_s20  ;;  %s13834_s20 = smov %s12426_s27 }
 0x4d1   : > { %s13835_s21 = smov %s12410_s14  ;;  %21 = sbr.rel (!%p19_p2) target bundleno = 6 (0x6), region = 96 }
 0x4d8   :  { %9516 = vsyncpa [#allocation5], 1 }
 0x4d9   :  { %9518 = vsyncpa [#allocation5 + $0x1], 1 }
 0x4da   :  { %9519 = vsyncpa [#allocation8], 1 }
 0x4db   :  { %9520 = vsyncpa [#allocation6], 1 }
 0x4dc   :  { %9522 = vsyncpa [#allocation6 + $0x1], 1 }

</bundles_post_ra>
